<compile_context>
chip_gen: v5e
topology: v5e:2x2
jax: 0.10.0
libtpu: 0.0.40
codegen_flags: <defaults>
</compile_context>

<pallas_src>
import math
import numpy as np
import jax
import jax.numpy as jnp
from jax import lax
from jax.experimental import pallas as pl
from jax.experimental.pallas import tpu as pltpu

HIDDEN = 128                 # GRU hidden size
IN_FEAT = 64                 # GRU input size
GATES = 3 * HIDDEN           # 384 (r, z, n) per direction
LN_DIM = 2 * HIDDEN          # 256, bi-directional concat / LayerNorm dim
FUSED_GATES = 2 * GATES      # 768, fused column order [r_f r_b z_f z_b n_f n_b]
T_TEMP = 0.4
BASE = 3.0
LN_EPS = 1e-5


def _hyper_kernel(xaug_ref, wih_ref, bih_ref, whh_hi_ref, whh_lo_ref, bhh_ref,
                  gamma_ref, beta_ref, mask_ref, gumbel_ref, wcat_hbm_ref,
                  out_ref,
                  xcat_ref, wcat_vmem_ref, dma_sem):
    L = xaug_ref.shape[0]
    H = HIDDEN
    H2 = 2 * H

    # ---- Prefetch the output-linear weights (not needed until after the serial
    # recurrence) so their HBM->VMEM DMA hides under the GRU loop. --------------
    wcat_cp = pltpu.make_async_copy(wcat_hbm_ref, wcat_vmem_ref, dma_sem)
    wcat_cp.start()

    # ---- Fused input projection for BOTH directions / all gates (one bf16 dot).
    # Row i holds the forward-gate projection of x[i] and the backward-gate
    # projection of x[L-1-i] (the backward half of x_aug is time-reversed on host).
    xcat_ref[...] = jnp.dot(xaug_ref[...], wih_ref[...],
                            preferred_element_type=jnp.float32) + bih_ref[...]

    def rec_matmul(h_cat):
        # Manual bf16_3x ("HIGH"-equivalent): 3 single-pass bf16 matmuls instead
        # of HIGHEST's 6 passes; the dropped lo*lo term is O(2^-18) relative.
        # Weights are read from VMEM inside the loop (not hoisted to a huge SSA
        # value that would stay live across every unrolled iteration).
        h_hi = h_cat.astype(jnp.bfloat16)
        h_lo = (h_cat - h_hi.astype(jnp.float32)).astype(jnp.bfloat16)
        acc = jnp.dot(h_hi, whh_hi_ref[...], preferred_element_type=jnp.float32)
        acc = acc + jnp.dot(h_hi, whh_lo_ref[...], preferred_element_type=jnp.float32)
        acc = acc + jnp.dot(h_lo, whh_hi_ref[...], preferred_element_type=jnp.float32)
        return acc

    # ---- Fused fwd+bwd recurrence: ONE block-diag matmul + ONE gate pass / step.
    # h_cat = [h_f(time i) | h_b(time L-1-i)]; L is a trace-time constant so the
    # loop is fully unrolled with static slice offsets.
    h_cat = jnp.zeros((1, H2), jnp.float32)
    h_hist = []
    for i in range(L):
        gi = xcat_ref[i:i + 1, :]                              # (1, 768)
        gh = rec_matmul(h_cat) + bhh_ref[...]                  # (1, 768)
        r = jax.nn.sigmoid(gi[:, 0:H2] + gh[:, 0:H2])          # [r_f | r_b]
        z = jax.nn.sigmoid(gi[:, H2:2 * H2] + gh[:, H2:2 * H2])
        n = jnp.tanh(gi[:, 2 * H2:3 * H2] + r * gh[:, 2 * H2:3 * H2])
        h_cat = (1.0 - z) * n + z * h_cat
        h_hist.append(h_cat)

    # ---- Re-assemble the (L, 256) bi-directional sequence in registers (no
    # per-row masked VMEM stores + reload): row t = [h_f(t) | h_b(t)]. ----------
    seq_f = jnp.concatenate([h_hist[t][:, 0:H] for t in range(L)], axis=0)
    seq_b = jnp.concatenate([h_hist[L - 1 - t][:, H:H2] for t in range(L)], axis=0)
    seq = jnp.concatenate([seq_f, seq_b], axis=1)              # (L, 256)

    # ---- LayerNorm([256]) + ReLU per time step -------------------------------
    mean = jnp.mean(seq, axis=-1, keepdims=True)
    var = jnp.mean((seq - mean) ** 2, axis=-1, keepdims=True)
    act = (seq - mean) * lax.rsqrt(var + LN_EPS)
    act = act * gamma_ref[...] + beta_ref[...]
    act = jnp.maximum(act, 0.0)

    # ---- Per-step Linear(256, structure[i]) + concat --------------------------
    # wcat holds all per-step linear weights concatenated along columns (zero
    # padded to a multiple of 128 lanes); mask selects row i for group i.
    wcat_cp.wait()
    full = jnp.dot(act.astype(jnp.bfloat16), wcat_vmem_ref[...],
                   preferred_element_type=jnp.float32)         # (L, total_pad)
    logits = jnp.sum(full * mask_ref[...], axis=0, keepdims=True)  # (1, total_pad)

    # ---- Gumbel-Sigmoid: sigmoid((logits + gumbel + base) / T) ----------------
    y = (logits + gumbel_ref[...] + BASE) / T_TEMP
    out_ref[...] = jax.nn.sigmoid(y)


def hyper_structure_forward(params, gumbel, *, training=True):
    L = params["x_aug"].shape[0]
    total = params["total"]
    total_pad = params["wcat"].shape[1]

    # Zero-pad gumbel noise to the lane-padded width; padded lanes are sliced off.
    g = jnp.zeros((1, total_pad), jnp.float32).at[0, :total].set(
        jnp.reshape(gumbel, (-1,)))

    # bf16 copies for the single-pass (DEFAULT-equivalent) matmuls.
    x_aug_bf16 = params["x_aug"].astype(jnp.bfloat16)
    wih_bf16 = params["wih_big"].astype(jnp.bfloat16)
    wcat_bf16 = params["wcat"].astype(jnp.bfloat16)
    # bf16 hi/lo split of the recurrent weights for the manual 3-pass recurrence.
    whh_hi = params["whh_big"].astype(jnp.bfloat16)
    whh_lo = (params["whh_big"] - whh_hi.astype(jnp.float32)).astype(jnp.bfloat16)

    vmem = pl.BlockSpec(memory_space=pltpu.MemorySpace.VMEM)
    hbm = pl.BlockSpec(memory_space=pl.ANY)      # wcat: prefetched manually

    args = (x_aug_bf16, wih_bf16, params["bih_big"],
            whh_hi, whh_lo, params["bhh_big"],
            params["gamma"], params["beta"],
            params["mask"], g, wcat_bf16)

    out = pl.pallas_call(
        _hyper_kernel,
        out_shape=jax.ShapeDtypeStruct((1, total_pad), jnp.float32),
        in_specs=[vmem] * (len(args) - 1) + [hbm],
        out_specs=vmem,
        scratch_shapes=[
            pltpu.VMEM((L, FUSED_GATES), jnp.float32),       # fused input projection
            pltpu.VMEM((LN_DIM, total_pad), jnp.bfloat16),   # prefetched wcat
            pltpu.SemaphoreType.DMA,                         # wcat DMA semaphore
        ],
    )(*args)

    out = out[0, :total]                 # drop lane padding -> (total,)
    if not training:
        # hard_concrete forward value (STE only changes the backward pass).
        # TODO(synk): straight-through gradient not implemented (forward-only kernel).
        out = jnp.where(out >= 0.5, 1.0, 0.0).astype(out.dtype)
    return out


def make_params(structure, seed=0):
    L = len(structure)
    total = int(sum(structure))
    total_pad = ((total + 127) // 128) * 128
    keys = jax.random.split(jax.random.PRNGKey(seed), 12)

    # nn.init.orthogonal_ on a (L, 1, 64) tensor == orthogonal over (L, 64).
    inputs = jax.nn.initializers.orthogonal()(keys[0], (L, IN_FEAT)).astype(jnp.float32)

    k = 1.0 / math.sqrt(HIDDEN)

    def u(key, shape):
        return jax.random.uniform(key, shape, jnp.float32, minval=-k, maxval=k)

    wih_f = u(keys[1], (IN_FEAT, GATES))
    whh_f = u(keys[2], (HIDDEN, GATES))
    bih_f = u(keys[3], (1, GATES))
    bhh_f = u(keys[4], (1, GATES))
    wih_b = u(keys[5], (IN_FEAT, GATES))
    whh_b = u(keys[6], (HIDDEN, GATES))
    bih_b = u(keys[7], (1, GATES))
    bhh_b = u(keys[8], (1, GATES))

    params = {
        "inputs": inputs,
        "wih_f": wih_f, "whh_f": whh_f, "bih_f": bih_f, "bhh_f": bhh_f,
        "wih_b": wih_b, "whh_b": whh_b, "bih_b": bih_b, "bhh_b": bhh_b,
        "gamma": jnp.ones((1, LN_DIM), jnp.float32),
        "beta": jnp.zeros((1, LN_DIM), jnp.float32),
        "total": total,
    }

    # ---- Fused (direction-interleaved) matrices for the kernel ----------------
    # Fused column order: [r_f r_b z_f z_b n_f n_b], each block 128 wide.
    H = HIDDEN
    wih_big = np.zeros((2 * IN_FEAT, FUSED_GATES), np.float32)
    whh_big = np.zeros((LN_DIM, FUSED_GATES), np.float32)
    bih_big = np.zeros((1, FUSED_GATES), np.float32)
    bhh_big = np.zeros((1, FUSED_GATES), np.float32)
    np_wih_f, np_wih_b = np.asarray(wih_f), np.asarray(wih_b)
    np_whh_f, np_whh_b = np.asarray(whh_f), np.asarray(whh_b)
    np_bih_f, np_bih_b = np.asarray(bih_f), np.asarray(bih_b)
    np_bhh_f, np_bhh_b = np.asarray(bhh_f), np.asarray(bhh_b)
    for g in range(3):                                  # gate order r, z, n
        src = slice(g * H, (g + 1) * H)
        cf = slice(2 * g * H, (2 * g + 1) * H)          # fused fwd cols for gate g
        cb = slice((2 * g + 1) * H, (2 * g + 2) * H)    # fused bwd cols for gate g
        wih_big[:IN_FEAT, cf] = np_wih_f[:, src]
        wih_big[IN_FEAT:, cb] = np_wih_b[:, src]
        whh_big[:H, cf] = np_whh_f[:, src]              # block-diagonal in h_cat
        whh_big[H:, cb] = np_whh_b[:, src]
        bih_big[0, cf] = np_bih_f[0, src]
        bih_big[0, cb] = np_bih_b[0, src]
        bhh_big[0, cf] = np_bhh_f[0, src]
        bhh_big[0, cb] = np_bhh_b[0, src]
    params["wih_big"] = jnp.asarray(wih_big)
    params["whh_big"] = jnp.asarray(whh_big)
    params["bih_big"] = jnp.asarray(bih_big)
    params["bhh_big"] = jnp.asarray(bhh_big)

    # Fused input: row i = [x[i] | x[L-1-i]] so one matmul projects both directions.
    params["x_aug"] = jnp.concatenate([inputs, inputs[::-1]], axis=1)   # (L, 128)

    # Per-step Linear(256, structure[i], bias=False) weights, concatenated along
    # the output dim and zero-padded to a multiple of 128 lanes.
    kl = 1.0 / math.sqrt(LN_DIM)
    wkeys = jax.random.split(keys[9], L)
    blocks = [jax.random.uniform(wkeys[i], (LN_DIM, structure[i]), jnp.float32,
                                 minval=-kl, maxval=kl) for i in range(L)]
    wcat = jnp.concatenate(blocks, axis=1)                       # (256, total)
    params["wcat"] = jnp.pad(wcat, ((0, 0), (0, total_pad - total)))

    mask = np.zeros((L, total_pad), np.float32)
    start = 0
    for i, s in enumerate(structure):
        mask[i, start:start + s] = 1.0
        start += s
    params["mask"] = jnp.asarray(mask)

    # Gumbel noise: -log(-log(U + eps) + eps)
    eps = 1e-20
    U = jax.random.uniform(keys[10], (1, total), jnp.float32)
    gumbel = -jnp.log(-jnp.log(U + eps) + eps)
    return params, gumbel


def reference_forward(params, gumbel, structure, *, training=True):
    """Pure-JAX ground truth (full f32 / HIGHEST precision), mirrors PyTorch."""
    x = params["inputs"]
    H = HIDDEN
    PREC = lax.Precision.HIGHEST

    def run_dir(wih, whh, bih, bhh, reverse):
        hs = [None] * x.shape[0]
        h = jnp.zeros((H,), jnp.float32)
        order = range(x.shape[0] - 1, -1, -1) if reverse else range(x.shape[0])
        for t in order:
            gi = jnp.dot(x[t], wih, precision=PREC) + bih[0]
            gh = jnp.dot(h, whh, precision=PREC) + bhh[0]
            r = jax.nn.sigmoid(gi[:H] + gh[:H])
            z = jax.nn.sigmoid(gi[H:2 * H] + gh[H:2 * H])
            n = jnp.tanh(gi[2 * H:] + r * gh[2 * H:])
            h = (1.0 - z) * n + z * h
            hs[t] = h
        return jnp.stack(hs)

    hf = run_dir(params["wih_f"], params["whh_f"], params["bih_f"], params["bhh_f"], False)
    hb = run_dir(params["wih_b"], params["whh_b"], params["bih_b"], params["bhh_b"], True)
    seq = jnp.concatenate([hf, hb], axis=1)                      # (L, 256)

    mean = seq.mean(axis=-1, keepdims=True)
    var = ((seq - mean) ** 2).mean(axis=-1, keepdims=True)
    act = (seq - mean) / jnp.sqrt(var + LN_EPS) * params["gamma"][0] + params["beta"][0]
    act = jnp.maximum(act, 0.0)

    pieces, start = [], 0
    for i, s in enumerate(structure):
        w = params["wcat"][:, start:start + s]                   # padding never reached
        pieces.append(jnp.dot(act[i], w, precision=PREC))
        start += s
    logits = jnp.concatenate(pieces)[None, :]
    out = jax.nn.sigmoid((logits + gumbel + BASE) / T_TEMP)[0]
    if not training:
        out = jnp.where(out >= 0.5, 1.0, 0.0).astype(out.dtype)
    return out


if __name__ == "__main__":
    structure = [16, 24, 32, 40, 48, 56, 64, 72]   # L=8, total=352 (lane-padded to 384)
    params, gumbel = make_params(structure, seed=0)

    out = jax.block_until_ready(hyper_structure_forward(params, gumbel, training=True))
    ref = jax.block_until_ready(reference_forward(params, gumbel, structure, training=True))

    assert out.shape == (sum(structure),), out.shape
    np.testing.assert_allclose(np.asarray(out), np.asarray(ref), atol=2e-3, rtol=2e-3)

    print("KERNEL_OK")
</pallas_src>

<mosaic_0001>
module attributes {stable_mosaic.version = 11 : i64} {
  func.func @_hyper_kernel(%arg0: memref<8x128xbf16, #tpu.memory_space<vmem>>, %arg1: memref<128x768xbf16, #tpu.memory_space<vmem>>, %arg2: memref<1x768xf32, #tpu.memory_space<vmem>>, %arg3: memref<256x768xbf16, #tpu.memory_space<vmem>>, %arg4: memref<256x768xbf16, #tpu.memory_space<vmem>>, %arg5: memref<1x768xf32, #tpu.memory_space<vmem>>, %arg6: memref<1x256xf32, #tpu.memory_space<vmem>>, %arg7: memref<1x256xf32, #tpu.memory_space<vmem>>, %arg8: memref<8x384xf32, #tpu.memory_space<vmem>>, %arg9: memref<1x384xf32, #tpu.memory_space<vmem>>, %arg10: memref<256x384xbf16, #tpu.memory_space<any>>, %arg11: memref<1x384xf32, #tpu.memory_space<vmem>>, %arg12: memref<8x768xf32, #tpu.memory_space<vmem>>, %arg13: memref<256x384xbf16, #tpu.memory_space<vmem>>, %arg14: memref<!tpu.dma_semaphore, #tpu.memory_space<semaphore_mem>>) attributes {dimension_semantics = [], scalar_prefetch = 0 : i64, scratch_operands = 3 : i64, tpu.core_type = #tpu.core_type<tc>} {
    tpu.enqueue_dma source(%arg10 : memref<256x384xbf16, #tpu.memory_space<any>>) target(%arg13 : memref<256x384xbf16, #tpu.memory_space<vmem>>) target_semaphore(%arg14 : memref<!tpu.dma_semaphore, #tpu.memory_space<semaphore_mem>>)
    %c0 = arith.constant 0 : index
    %c0_0 = arith.constant 0 : index
    %0 = vector.load %arg0[%c0, %c0_0] : memref<8x128xbf16, #tpu.memory_space<vmem>>, vector<8x128xbf16>
    %c0_1 = arith.constant 0 : index
    %c0_2 = arith.constant 0 : index
    %1 = vector.load %arg1[%c0_1, %c0_2] : memref<128x768xbf16, #tpu.memory_space<vmem>>, vector<128x768xbf16>
    %cst = arith.constant dense<0.000000e+00> : vector<8x768xf32>
    %2 = tpu.matmul %0, %1, %cst {dimension_numbers = #tpu.dot_dimension_numbers<[1], [0], [0], [1], [0, 0, 1, 1], [], []>} : vector<8x128xbf16>, vector<128x768xbf16>, vector<8x768xf32> -> vector<8x768xf32>
    %c0_3 = arith.constant 0 : index
    %c0_4 = arith.constant 0 : index
    %3 = vector.load %arg2[%c0_3, %c0_4] : memref<1x768xf32, #tpu.memory_space<vmem>>, vector<1x768xf32>
    %4 = vector.broadcast %3 : vector<1x768xf32> to vector<8x768xf32>
    %5 = arith.addf %2, %4 : vector<8x768xf32>
    %c0_5 = arith.constant 0 : index
    %c0_6 = arith.constant 0 : index
    %6 = vector.load %arg12[%c0_5, %c0_6] : memref<8x768xf32, #tpu.memory_space<vmem>>, vector<8x768xf32>
    tpu.vector_store %arg12[%c0_5, %c0_6], %5 {strides = array<i32>} : memref<8x768xf32, #tpu.memory_space<vmem>>, vector<8x768xf32>,
    %cst_7 = arith.constant 0.000000e+00 : f32
    %7 = vector.broadcast %cst_7 : f32 to vector<1x256xf32>
    %c0_8 = arith.constant 0 : index
    %c0_9 = arith.constant 0 : index
    %8 = vector.load %arg12[%c0_8, %c0_9] : memref<8x768xf32, #tpu.memory_space<vmem>>, vector<1x768xf32>
    %9 = arith.truncf %7 : vector<1x256xf32> to vector<1x256xbf16>
    %10 = arith.extf %9 : vector<1x256xbf16> to vector<1x256xf32>
    %11 = arith.subf %7, %10 : vector<1x256xf32>
    %12 = arith.truncf %11 : vector<1x256xf32> to vector<1x256xbf16>
    %c0_10 = arith.constant 0 : index
    %c0_11 = arith.constant 0 : index
    %13 = vector.load %arg3[%c0_10, %c0_11] : memref<256x768xbf16, #tpu.memory_space<vmem>>, vector<256x768xbf16>
    %cst_12 = arith.constant dense<0.000000e+00> : vector<1x768xf32>
    %14 = tpu.matmul %9, %13, %cst_12 {dimension_numbers = #tpu.dot_dimension_numbers<[1], [0], [0], [1], [0, 0, 1, 1], [], []>} : vector<1x256xbf16>, vector<256x768xbf16>, vector<1x768xf32> -> vector<1x768xf32>
    %c0_13 = arith.constant 0 : index
    %c0_14 = arith.constant 0 : index
    %15 = vector.load %arg4[%c0_13, %c0_14] : memref<256x768xbf16, #tpu.memory_space<vmem>>, vector<256x768xbf16>
    %cst_15 = arith.constant dense<0.000000e+00> : vector<1x768xf32>
    %16 = tpu.matmul %9, %15, %cst_15 {dimension_numbers = #tpu.dot_dimension_numbers<[1], [0], [0], [1], [0, 0, 1, 1], [], []>} : vector<1x256xbf16>, vector<256x768xbf16>, vector<1x768xf32> -> vector<1x768xf32>
    %17 = arith.addf %14, %16 : vector<1x768xf32>
    %c0_16 = arith.constant 0 : index
    %c0_17 = arith.constant 0 : index
    %18 = vector.load %arg3[%c0_16, %c0_17] : memref<256x768xbf16, #tpu.memory_space<vmem>>, vector<256x768xbf16>
    %cst_18 = arith.constant dense<0.000000e+00> : vector<1x768xf32>
    %19 = tpu.matmul %12, %18, %cst_18 {dimension_numbers = #tpu.dot_dimension_numbers<[1], [0], [0], [1], [0, 0, 1, 1], [], []>} : vector<1x256xbf16>, vector<256x768xbf16>, vector<1x768xf32> -> vector<1x768xf32>
    %20 = arith.addf %17, %19 : vector<1x768xf32>
    %c0_19 = arith.constant 0 : index
    %c0_20 = arith.constant 0 : index
    %21 = vector.load %arg5[%c0_19, %c0_20] : memref<1x768xf32, #tpu.memory_space<vmem>>, vector<1x768xf32>
    %22 = arith.addf %20, %21 : vector<1x768xf32>
    %23 = vector.extract_strided_slice %8 {offsets = [0, 0], sizes = [1, 256], strides = [1, 1]} : vector<1x768xf32> to vector<1x256xf32>
    %24 = vector.extract_strided_slice %22 {offsets = [0, 0], sizes = [1, 256], strides = [1, 1]} : vector<1x768xf32> to vector<1x256xf32>
    %25 = arith.addf %23, %24 : vector<1x256xf32>
    %26 = arith.negf %25 : vector<1x256xf32>
    %27 = math.exp %26 : vector<1x256xf32>
    %cst_21 = arith.constant 1.000000e+00 : f32
    %28 = vector.broadcast %cst_21 : f32 to vector<1x256xf32>
    %29 = arith.addf %28, %27 : vector<1x256xf32>
    %30 = arith.divf %28, %29 : vector<1x256xf32>
    %31 = vector.extract_strided_slice %8 {offsets = [0, 256], sizes = [1, 256], strides = [1, 1]} : vector<1x768xf32> to vector<1x256xf32>
    %32 = vector.extract_strided_slice %22 {offsets = [0, 256], sizes = [1, 256], strides = [1, 1]} : vector<1x768xf32> to vector<1x256xf32>
    %33 = arith.addf %31, %32 : vector<1x256xf32>
    %34 = arith.negf %33 : vector<1x256xf32>
    %35 = math.exp %34 : vector<1x256xf32>
    %cst_22 = arith.constant 1.000000e+00 : f32
    %36 = vector.broadcast %cst_22 : f32 to vector<1x256xf32>
    %37 = arith.addf %36, %35 : vector<1x256xf32>
    %38 = arith.divf %36, %37 : vector<1x256xf32>
    %39 = vector.extract_strided_slice %8 {offsets = [0, 512], sizes = [1, 256], strides = [1, 1]} : vector<1x768xf32> to vector<1x256xf32>
    %40 = vector.extract_strided_slice %22 {offsets = [0, 512], sizes = [1, 256], strides = [1, 1]} : vector<1x768xf32> to vector<1x256xf32>
    %41 = arith.mulf %30, %40 : vector<1x256xf32>
    %42 = arith.addf %39, %41 : vector<1x256xf32>
    %43 = math.tanh %42 : vector<1x256xf32>
    %cst_23 = arith.constant 1.000000e+00 : f32
    %44 = vector.broadcast %cst_23 : f32 to vector<1x256xf32>
    %45 = arith.subf %44, %38 : vector<1x256xf32>
    %46 = arith.mulf %45, %43 : vector<1x256xf32>
    %47 = arith.mulf %38, %7 : vector<1x256xf32>
    %48 = arith.addf %46, %47 : vector<1x256xf32>
    %c1 = arith.constant 1 : index
    %c0_24 = arith.constant 0 : index
    %49 = vector.load %arg12[%c1, %c0_24] : memref<8x768xf32, #tpu.memory_space<vmem>>, vector<1x768xf32>
    %50 = arith.truncf %48 : vector<1x256xf32> to vector<1x256xbf16>
    %51 = arith.extf %50 : vector<1x256xbf16> to vector<1x256xf32>
    %52 = arith.subf %48, %51 : vector<1x256xf32>
    %53 = arith.truncf %52 : vector<1x256xf32> to vector<1x256xbf16>
    %c0_25 = arith.constant 0 : index
    %c0_26 = arith.constant 0 : index
    %54 = vector.load %arg3[%c0_25, %c0_26] : memref<256x768xbf16, #tpu.memory_space<vmem>>, vector<256x768xbf16>
    %cst_27 = arith.constant dense<0.000000e+00> : vector<1x768xf32>
    %55 = tpu.matmul %50, %54, %cst_27 {dimension_numbers = #tpu.dot_dimension_numbers<[1], [0], [0], [1], [0, 0, 1, 1], [], []>} : vector<1x256xbf16>, vector<256x768xbf16>, vector<1x768xf32> -> vector<1x768xf32>
    %c0_28 = arith.constant 0 : index
    %c0_29 = arith.constant 0 : index
    %56 = vector.load %arg4[%c0_28, %c0_29] : memref<256x768xbf16, #tpu.memory_space<vmem>>, vector<256x768xbf16>
    %cst_30 = arith.constant dense<0.000000e+00> : vector<1x768xf32>
    %57 = tpu.matmul %50, %56, %cst_30 {dimension_numbers = #tpu.dot_dimension_numbers<[1], [0], [0], [1], [0, 0, 1, 1], [], []>} : vector<1x256xbf16>, vector<256x768xbf16>, vector<1x768xf32> -> vector<1x768xf32>
    %58 = arith.addf %55, %57 : vector<1x768xf32>
    %c0_31 = arith.constant 0 : index
    %c0_32 = arith.constant 0 : index
    %59 = vector.load %arg3[%c0_31, %c0_32] : memref<256x768xbf16, #tpu.memory_space<vmem>>, vector<256x768xbf16>
    %cst_33 = arith.constant dense<0.000000e+00> : vector<1x768xf32>
    %60 = tpu.matmul %53, %59, %cst_33 {dimension_numbers = #tpu.dot_dimension_numbers<[1], [0], [0], [1], [0, 0, 1, 1], [], []>} : vector<1x256xbf16>, vector<256x768xbf16>, vector<1x768xf32> -> vector<1x768xf32>
    %61 = arith.addf %58, %60 : vector<1x768xf32>
    %c0_34 = arith.constant 0 : index
    %c0_35 = arith.constant 0 : index
    %62 = vector.load %arg5[%c0_34, %c0_35] : memref<1x768xf32, #tpu.memory_space<vmem>>, vector<1x768xf32>
    %63 = arith.addf %61, %62 : vector<1x768xf32>
    %64 = vector.extract_strided_slice %49 {offsets = [0, 0], sizes = [1, 256], strides = [1, 1]} : vector<1x768xf32> to vector<1x256xf32>
    %65 = vector.extract_strided_slice %63 {offsets = [0, 0], sizes = [1, 256], strides = [1, 1]} : vector<1x768xf32> to vector<1x256xf32>
    %66 = arith.addf %64, %65 : vector<1x256xf32>
    %67 = arith.negf %66 : vector<1x256xf32>
    %68 = math.exp %67 : vector<1x256xf32>
    %cst_36 = arith.constant 1.000000e+00 : f32
    %69 = vector.broadcast %cst_36 : f32 to vector<1x256xf32>
    %70 = arith.addf %69, %68 : vector<1x256xf32>
    %71 = arith.divf %69, %70 : vector<1x256xf32>
    %72 = vector.extract_strided_slice %49 {offsets = [0, 256], sizes = [1, 256], strides = [1, 1]} : vector<1x768xf32> to vector<1x256xf32>
    %73 = vector.extract_strided_slice %63 {offsets = [0, 256], sizes = [1, 256], strides = [1, 1]} : vector<1x768xf32> to vector<1x256xf32>
    %74 = arith.addf %72, %73 : vector<1x256xf32>
    %75 = arith.negf %74 : vector<1x256xf32>
    %76 = math.exp %75 : vector<1x256xf32>
    %cst_37 = arith.constant 1.000000e+00 : f32
    %77 = vector.broadcast %cst_37 : f32 to vector<1x256xf32>
    %78 = arith.addf %77, %76 : vector<1x256xf32>
    %79 = arith.divf %77, %78 : vector<1x256xf32>
    %80 = vector.extract_strided_slice %49 {offsets = [0, 512], sizes = [1, 256], strides = [1, 1]} : vector<1x768xf32> to vector<1x256xf32>
    %81 = vector.extract_strided_slice %63 {offsets = [0, 512], sizes = [1, 256], strides = [1, 1]} : vector<1x768xf32> to vector<1x256xf32>
    %82 = arith.mulf %71, %81 : vector<1x256xf32>
    %83 = arith.addf %80, %82 : vector<1x256xf32>
    %84 = math.tanh %83 : vector<1x256xf32>
    %cst_38 = arith.constant 1.000000e+00 : f32
    %85 = vector.broadcast %cst_38 : f32 to vector<1x256xf32>
    %86 = arith.subf %85, %79 : vector<1x256xf32>
    %87 = arith.mulf %86, %84 : vector<1x256xf32>
    %88 = arith.mulf %79, %48 : vector<1x256xf32>
    %89 = arith.addf %87, %88 : vector<1x256xf32>
    %c2 = arith.constant 2 : index
    %c0_39 = arith.constant 0 : index
    %90 = vector.load %arg12[%c2, %c0_39] : memref<8x768xf32, #tpu.memory_space<vmem>>, vector<1x768xf32>
    %91 = arith.truncf %89 : vector<1x256xf32> to vector<1x256xbf16>
    %92 = arith.extf %91 : vector<1x256xbf16> to vector<1x256xf32>
    %93 = arith.subf %89, %92 : vector<1x256xf32>
    %94 = arith.truncf %93 : vector<1x256xf32> to vector<1x256xbf16>
    %c0_40 = arith.constant 0 : index
    %c0_41 = arith.constant 0 : index
    %95 = vector.load %arg3[%c0_40, %c0_41] : memref<256x768xbf16, #tpu.memory_space<vmem>>, vector<256x768xbf16>
    %cst_42 = arith.constant dense<0.000000e+00> : vector<1x768xf32>
    %96 = tpu.matmul %91, %95, %cst_42 {dimension_numbers = #tpu.dot_dimension_numbers<[1], [0], [0], [1], [0, 0, 1, 1], [], []>} : vector<1x256xbf16>, vector<256x768xbf16>, vector<1x768xf32> -> vector<1x768xf32>
    %c0_43 = arith.constant 0 : index
    %c0_44 = arith.constant 0 : index
    %97 = vector.load %arg4[%c0_43, %c0_44] : memref<256x768xbf16, #tpu.memory_space<vmem>>, vector<256x768xbf16>
    %cst_45 = arith.constant dense<0.000000e+00> : vector<1x768xf32>
    %98 = tpu.matmul %91, %97, %cst_45 {dimension_numbers = #tpu.dot_dimension_numbers<[1], [0], [0], [1], [0, 0, 1, 1], [], []>} : vector<1x256xbf16>, vector<256x768xbf16>, vector<1x768xf32> -> vector<1x768xf32>
    %99 = arith.addf %96, %98 : vector<1x768xf32>
    %c0_46 = arith.constant 0 : index
    %c0_47 = arith.constant 0 : index
    %100 = vector.load %arg3[%c0_46, %c0_47] : memref<256x768xbf16, #tpu.memory_space<vmem>>, vector<256x768xbf16>
    %cst_48 = arith.constant dense<0.000000e+00> : vector<1x768xf32>
    %101 = tpu.matmul %94, %100, %cst_48 {dimension_numbers = #tpu.dot_dimension_numbers<[1], [0], [0], [1], [0, 0, 1, 1], [], []>} : vector<1x256xbf16>, vector<256x768xbf16>, vector<1x768xf32> -> vector<1x768xf32>
    %102 = arith.addf %99, %101 : vector<1x768xf32>
    %c0_49 = arith.constant 0 : index
    %c0_50 = arith.constant 0 : index
    %103 = vector.load %arg5[%c0_49, %c0_50] : memref<1x768xf32, #tpu.memory_space<vmem>>, vector<1x768xf32>
    %104 = arith.addf %102, %103 : vector<1x768xf32>
    %105 = vector.extract_strided_slice %90 {offsets = [0, 0], sizes = [1, 256], strides = [1, 1]} : vector<1x768xf32> to vector<1x256xf32>
    %106 = vector.extract_strided_slice %104 {offsets = [0, 0], sizes = [1, 256], strides = [1, 1]} : vector<1x768xf32> to vector<1x256xf32>
    %107 = arith.addf %105, %106 : vector<1x256xf32>
    %108 = arith.negf %107 : vector<1x256xf32>
    %109 = math.exp %108 : vector<1x256xf32>
    %cst_51 = arith.constant 1.000000e+00 : f32
    %110 = vector.broadcast %cst_51 : f32 to vector<1x256xf32>
    %111 = arith.addf %110, %109 : vector<1x256xf32>
    %112 = arith.divf %110, %111 : vector<1x256xf32>
    %113 = vector.extract_strided_slice %90 {offsets = [0, 256], sizes = [1, 256], strides = [1, 1]} : vector<1x768xf32> to vector<1x256xf32>
    %114 = vector.extract_strided_slice %104 {offsets = [0, 256], sizes = [1, 256], strides = [1, 1]} : vector<1x768xf32> to vector<1x256xf32>
    %115 = arith.addf %113, %114 : vector<1x256xf32>
    %116 = arith.negf %115 : vector<1x256xf32>
    %117 = math.exp %116 : vector<1x256xf32>
    %cst_52 = arith.constant 1.000000e+00 : f32
    %118 = vector.broadcast %cst_52 : f32 to vector<1x256xf32>
    %119 = arith.addf %118, %117 : vector<1x256xf32>
    %120 = arith.divf %118, %119 : vector<1x256xf32>
    %121 = vector.extract_strided_slice %90 {offsets = [0, 512], sizes = [1, 256], strides = [1, 1]} : vector<1x768xf32> to vector<1x256xf32>
    %122 = vector.extract_strided_slice %104 {offsets = [0, 512], sizes = [1, 256], strides = [1, 1]} : vector<1x768xf32> to vector<1x256xf32>
    %123 = arith.mulf %112, %122 : vector<1x256xf32>
    %124 = arith.addf %121, %123 : vector<1x256xf32>
    %125 = math.tanh %124 : vector<1x256xf32>
    %cst_53 = arith.constant 1.000000e+00 : f32
    %126 = vector.broadcast %cst_53 : f32 to vector<1x256xf32>
    %127 = arith.subf %126, %120 : vector<1x256xf32>
    %128 = arith.mulf %127, %125 : vector<1x256xf32>
    %129 = arith.mulf %120, %89 : vector<1x256xf32>
    %130 = arith.addf %128, %129 : vector<1x256xf32>
    %c3 = arith.constant 3 : index
    %c0_54 = arith.constant 0 : index
    %131 = vector.load %arg12[%c3, %c0_54] : memref<8x768xf32, #tpu.memory_space<vmem>>, vector<1x768xf32>
    %132 = arith.truncf %130 : vector<1x256xf32> to vector<1x256xbf16>
    %133 = arith.extf %132 : vector<1x256xbf16> to vector<1x256xf32>
    %134 = arith.subf %130, %133 : vector<1x256xf32>
    %135 = arith.truncf %134 : vector<1x256xf32> to vector<1x256xbf16>
    %c0_55 = arith.constant 0 : index
    %c0_56 = arith.constant 0 : index
    %136 = vector.load %arg3[%c0_55, %c0_56] : memref<256x768xbf16, #tpu.memory_space<vmem>>, vector<256x768xbf16>
    %cst_57 = arith.constant dense<0.000000e+00> : vector<1x768xf32>
    %137 = tpu.matmul %132, %136, %cst_57 {dimension_numbers = #tpu.dot_dimension_numbers<[1], [0], [0], [1], [0, 0, 1, 1], [], []>} : vector<1x256xbf16>, vector<256x768xbf16>, vector<1x768xf32> -> vector<1x768xf32>
    %c0_58 = arith.constant 0 : index
    %c0_59 = arith.constant 0 : index
    %138 = vector.load %arg4[%c0_58, %c0_59] : memref<256x768xbf16, #tpu.memory_space<vmem>>, vector<256x768xbf16>
    %cst_60 = arith.constant dense<0.000000e+00> : vector<1x768xf32>
    %139 = tpu.matmul %132, %138, %cst_60 {dimension_numbers = #tpu.dot_dimension_numbers<[1], [0], [0], [1], [0, 0, 1, 1], [], []>} : vector<1x256xbf16>, vector<256x768xbf16>, vector<1x768xf32> -> vector<1x768xf32>
    %140 = arith.addf %137, %139 : vector<1x768xf32>
    %c0_61 = arith.constant 0 : index
    %c0_62 = arith.constant 0 : index
    %141 = vector.load %arg3[%c0_61, %c0_62] : memref<256x768xbf16, #tpu.memory_space<vmem>>, vector<256x768xbf16>
    %cst_63 = arith.constant dense<0.000000e+00> : vector<1x768xf32>
    %142 = tpu.matmul %135, %141, %cst_63 {dimension_numbers = #tpu.dot_dimension_numbers<[1], [0], [0], [1], [0, 0, 1, 1], [], []>} : vector<1x256xbf16>, vector<256x768xbf16>, vector<1x768xf32> -> vector<1x768xf32>
    %143 = arith.addf %140, %142 : vector<1x768xf32>
    %c0_64 = arith.constant 0 : index
    %c0_65 = arith.constant 0 : index
    %144 = vector.load %arg5[%c0_64, %c0_65] : memref<1x768xf32, #tpu.memory_space<vmem>>, vector<1x768xf32>
    %145 = arith.addf %143, %144 : vector<1x768xf32>
    %146 = vector.extract_strided_slice %131 {offsets = [0, 0], sizes = [1, 256], strides = [1, 1]} : vector<1x768xf32> to vector<1x256xf32>
    %147 = vector.extract_strided_slice %145 {offsets = [0, 0], sizes = [1, 256], strides = [1, 1]} : vector<1x768xf32> to vector<1x256xf32>
    %148 = arith.addf %146, %147 : vector<1x256xf32>
    %149 = arith.negf %148 : vector<1x256xf32>
    %150 = math.exp %149 : vector<1x256xf32>
    %cst_66 = arith.constant 1.000000e+00 : f32
    %151 = vector.broadcast %cst_66 : f32 to vector<1x256xf32>
    %152 = arith.addf %151, %150 : vector<1x256xf32>
    %153 = arith.divf %151, %152 : vector<1x256xf32>
    %154 = vector.extract_strided_slice %131 {offsets = [0, 256], sizes = [1, 256], strides = [1, 1]} : vector<1x768xf32> to vector<1x256xf32>
    %155 = vector.extract_strided_slice %145 {offsets = [0, 256], sizes = [1, 256], strides = [1, 1]} : vector<1x768xf32> to vector<1x256xf32>
    %156 = arith.addf %154, %155 : vector<1x256xf32>
    %157 = arith.negf %156 : vector<1x256xf32>
    %158 = math.exp %157 : vector<1x256xf32>
    %cst_67 = arith.constant 1.000000e+00 : f32
    %159 = vector.broadcast %cst_67 : f32 to vector<1x256xf32>
    %160 = arith.addf %159, %158 : vector<1x256xf32>
    %161 = arith.divf %159, %160 : vector<1x256xf32>
    %162 = vector.extract_strided_slice %131 {offsets = [0, 512], sizes = [1, 256], strides = [1, 1]} : vector<1x768xf32> to vector<1x256xf32>
    %163 = vector.extract_strided_slice %145 {offsets = [0, 512], sizes = [1, 256], strides = [1, 1]} : vector<1x768xf32> to vector<1x256xf32>
    %164 = arith.mulf %153, %163 : vector<1x256xf32>
    %165 = arith.addf %162, %164 : vector<1x256xf32>
    %166 = math.tanh %165 : vector<1x256xf32>
    %cst_68 = arith.constant 1.000000e+00 : f32
    %167 = vector.broadcast %cst_68 : f32 to vector<1x256xf32>
    %168 = arith.subf %167, %161 : vector<1x256xf32>
    %169 = arith.mulf %168, %166 : vector<1x256xf32>
    %170 = arith.mulf %161, %130 : vector<1x256xf32>
    %171 = arith.addf %169, %170 : vector<1x256xf32>
    %c4 = arith.constant 4 : index
    %c0_69 = arith.constant 0 : index
    %172 = vector.load %arg12[%c4, %c0_69] : memref<8x768xf32, #tpu.memory_space<vmem>>, vector<1x768xf32>
    %173 = arith.truncf %171 : vector<1x256xf32> to vector<1x256xbf16>
    %174 = arith.extf %173 : vector<1x256xbf16> to vector<1x256xf32>
    %175 = arith.subf %171, %174 : vector<1x256xf32>
    %176 = arith.truncf %175 : vector<1x256xf32> to vector<1x256xbf16>
    %c0_70 = arith.constant 0 : index
    %c0_71 = arith.constant 0 : index
    %177 = vector.load %arg3[%c0_70, %c0_71] : memref<256x768xbf16, #tpu.memory_space<vmem>>, vector<256x768xbf16>
    %cst_72 = arith.constant dense<0.000000e+00> : vector<1x768xf32>
    %178 = tpu.matmul %173, %177, %cst_72 {dimension_numbers = #tpu.dot_dimension_numbers<[1], [0], [0], [1], [0, 0, 1, 1], [], []>} : vector<1x256xbf16>, vector<256x768xbf16>, vector<1x768xf32> -> vector<1x768xf32>
    %c0_73 = arith.constant 0 : index
    %c0_74 = arith.constant 0 : index
    %179 = vector.load %arg4[%c0_73, %c0_74] : memref<256x768xbf16, #tpu.memory_space<vmem>>, vector<256x768xbf16>
    %cst_75 = arith.constant dense<0.000000e+00> : vector<1x768xf32>
    %180 = tpu.matmul %173, %179, %cst_75 {dimension_numbers = #tpu.dot_dimension_numbers<[1], [0], [0], [1], [0, 0, 1, 1], [], []>} : vector<1x256xbf16>, vector<256x768xbf16>, vector<1x768xf32> -> vector<1x768xf32>
    %181 = arith.addf %178, %180 : vector<1x768xf32>
    %c0_76 = arith.constant 0 : index
    %c0_77 = arith.constant 0 : index
    %182 = vector.load %arg3[%c0_76, %c0_77] : memref<256x768xbf16, #tpu.memory_space<vmem>>, vector<256x768xbf16>
    %cst_78 = arith.constant dense<0.000000e+00> : vector<1x768xf32>
    %183 = tpu.matmul %176, %182, %cst_78 {dimension_numbers = #tpu.dot_dimension_numbers<[1], [0], [0], [1], [0, 0, 1, 1], [], []>} : vector<1x256xbf16>, vector<256x768xbf16>, vector<1x768xf32> -> vector<1x768xf32>
    %184 = arith.addf %181, %183 : vector<1x768xf32>
    %c0_79 = arith.constant 0 : index
    %c0_80 = arith.constant 0 : index
    %185 = vector.load %arg5[%c0_79, %c0_80] : memref<1x768xf32, #tpu.memory_space<vmem>>, vector<1x768xf32>
    %186 = arith.addf %184, %185 : vector<1x768xf32>
    %187 = vector.extract_strided_slice %172 {offsets = [0, 0], sizes = [1, 256], strides = [1, 1]} : vector<1x768xf32> to vector<1x256xf32>
    %188 = vector.extract_strided_slice %186 {offsets = [0, 0], sizes = [1, 256], strides = [1, 1]} : vector<1x768xf32> to vector<1x256xf32>
    %189 = arith.addf %187, %188 : vector<1x256xf32>
    %190 = arith.negf %189 : vector<1x256xf32>
    %191 = math.exp %190 : vector<1x256xf32>
    %cst_81 = arith.constant 1.000000e+00 : f32
    %192 = vector.broadcast %cst_81 : f32 to vector<1x256xf32>
    %193 = arith.addf %192, %191 : vector<1x256xf32>
    %194 = arith.divf %192, %193 : vector<1x256xf32>
    %195 = vector.extract_strided_slice %172 {offsets = [0, 256], sizes = [1, 256], strides = [1, 1]} : vector<1x768xf32> to vector<1x256xf32>
    %196 = vector.extract_strided_slice %186 {offsets = [0, 256], sizes = [1, 256], strides = [1, 1]} : vector<1x768xf32> to vector<1x256xf32>
    %197 = arith.addf %195, %196 : vector<1x256xf32>
    %198 = arith.negf %197 : vector<1x256xf32>
    %199 = math.exp %198 : vector<1x256xf32>
    %cst_82 = arith.constant 1.000000e+00 : f32
    %200 = vector.broadcast %cst_82 : f32 to vector<1x256xf32>
    %201 = arith.addf %200, %199 : vector<1x256xf32>
    %202 = arith.divf %200, %201 : vector<1x256xf32>
    %203 = vector.extract_strided_slice %172 {offsets = [0, 512], sizes = [1, 256], strides = [1, 1]} : vector<1x768xf32> to vector<1x256xf32>
    %204 = vector.extract_strided_slice %186 {offsets = [0, 512], sizes = [1, 256], strides = [1, 1]} : vector<1x768xf32> to vector<1x256xf32>
    %205 = arith.mulf %194, %204 : vector<1x256xf32>
    %206 = arith.addf %203, %205 : vector<1x256xf32>
    %207 = math.tanh %206 : vector<1x256xf32>
    %cst_83 = arith.constant 1.000000e+00 : f32
    %208 = vector.broadcast %cst_83 : f32 to vector<1x256xf32>
    %209 = arith.subf %208, %202 : vector<1x256xf32>
    %210 = arith.mulf %209, %207 : vector<1x256xf32>
    %211 = arith.mulf %202, %171 : vector<1x256xf32>
    %212 = arith.addf %210, %211 : vector<1x256xf32>
    %c5 = arith.constant 5 : index
    %c0_84 = arith.constant 0 : index
    %213 = vector.load %arg12[%c5, %c0_84] : memref<8x768xf32, #tpu.memory_space<vmem>>, vector<1x768xf32>
    %214 = arith.truncf %212 : vector<1x256xf32> to vector<1x256xbf16>
    %215 = arith.extf %214 : vector<1x256xbf16> to vector<1x256xf32>
    %216 = arith.subf %212, %215 : vector<1x256xf32>
    %217 = arith.truncf %216 : vector<1x256xf32> to vector<1x256xbf16>
    %c0_85 = arith.constant 0 : index
    %c0_86 = arith.constant 0 : index
    %218 = vector.load %arg3[%c0_85, %c0_86] : memref<256x768xbf16, #tpu.memory_space<vmem>>, vector<256x768xbf16>
    %cst_87 = arith.constant dense<0.000000e+00> : vector<1x768xf32>
    %219 = tpu.matmul %214, %218, %cst_87 {dimension_numbers = #tpu.dot_dimension_numbers<[1], [0], [0], [1], [0, 0, 1, 1], [], []>} : vector<1x256xbf16>, vector<256x768xbf16>, vector<1x768xf32> -> vector<1x768xf32>
    %c0_88 = arith.constant 0 : index
    %c0_89 = arith.constant 0 : index
    %220 = vector.load %arg4[%c0_88, %c0_89] : memref<256x768xbf16, #tpu.memory_space<vmem>>, vector<256x768xbf16>
    %cst_90 = arith.constant dense<0.000000e+00> : vector<1x768xf32>
    %221 = tpu.matmul %214, %220, %cst_90 {dimension_numbers = #tpu.dot_dimension_numbers<[1], [0], [0], [1], [0, 0, 1, 1], [], []>} : vector<1x256xbf16>, vector<256x768xbf16>, vector<1x768xf32> -> vector<1x768xf32>
    %222 = arith.addf %219, %221 : vector<1x768xf32>
    %c0_91 = arith.constant 0 : index
    %c0_92 = arith.constant 0 : index
    %223 = vector.load %arg3[%c0_91, %c0_92] : memref<256x768xbf16, #tpu.memory_space<vmem>>, vector<256x768xbf16>
    %cst_93 = arith.constant dense<0.000000e+00> : vector<1x768xf32>
    %224 = tpu.matmul %217, %223, %cst_93 {dimension_numbers = #tpu.dot_dimension_numbers<[1], [0], [0], [1], [0, 0, 1, 1], [], []>} : vector<1x256xbf16>, vector<256x768xbf16>, vector<1x768xf32> -> vector<1x768xf32>
    %225 = arith.addf %222, %224 : vector<1x768xf32>
    %c0_94 = arith.constant 0 : index
    %c0_95 = arith.constant 0 : index
    %226 = vector.load %arg5[%c0_94, %c0_95] : memref<1x768xf32, #tpu.memory_space<vmem>>, vector<1x768xf32>
    %227 = arith.addf %225, %226 : vector<1x768xf32>
    %228 = vector.extract_strided_slice %213 {offsets = [0, 0], sizes = [1, 256], strides = [1, 1]} : vector<1x768xf32> to vector<1x256xf32>
    %229 = vector.extract_strided_slice %227 {offsets = [0, 0], sizes = [1, 256], strides = [1, 1]} : vector<1x768xf32> to vector<1x256xf32>
    %230 = arith.addf %228, %229 : vector<1x256xf32>
    %231 = arith.negf %230 : vector<1x256xf32>
    %232 = math.exp %231 : vector<1x256xf32>
    %cst_96 = arith.constant 1.000000e+00 : f32
    %233 = vector.broadcast %cst_96 : f32 to vector<1x256xf32>
    %234 = arith.addf %233, %232 : vector<1x256xf32>
    %235 = arith.divf %233, %234 : vector<1x256xf32>
    %236 = vector.extract_strided_slice %213 {offsets = [0, 256], sizes = [1, 256], strides = [1, 1]} : vector<1x768xf32> to vector<1x256xf32>
    %237 = vector.extract_strided_slice %227 {offsets = [0, 256], sizes = [1, 256], strides = [1, 1]} : vector<1x768xf32> to vector<1x256xf32>
    %238 = arith.addf %236, %237 : vector<1x256xf32>
    %239 = arith.negf %238 : vector<1x256xf32>
    %240 = math.exp %239 : vector<1x256xf32>
    %cst_97 = arith.constant 1.000000e+00 : f32
    %241 = vector.broadcast %cst_97 : f32 to vector<1x256xf32>
    %242 = arith.addf %241, %240 : vector<1x256xf32>
    %243 = arith.divf %241, %242 : vector<1x256xf32>
    %244 = vector.extract_strided_slice %213 {offsets = [0, 512], sizes = [1, 256], strides = [1, 1]} : vector<1x768xf32> to vector<1x256xf32>
    %245 = vector.extract_strided_slice %227 {offsets = [0, 512], sizes = [1, 256], strides = [1, 1]} : vector<1x768xf32> to vector<1x256xf32>
    %246 = arith.mulf %235, %245 : vector<1x256xf32>
    %247 = arith.addf %244, %246 : vector<1x256xf32>
    %248 = math.tanh %247 : vector<1x256xf32>
    %cst_98 = arith.constant 1.000000e+00 : f32
    %249 = vector.broadcast %cst_98 : f32 to vector<1x256xf32>
    %250 = arith.subf %249, %243 : vector<1x256xf32>
    %251 = arith.mulf %250, %248 : vector<1x256xf32>
    %252 = arith.mulf %243, %212 : vector<1x256xf32>
    %253 = arith.addf %251, %252 : vector<1x256xf32>
    %c6 = arith.constant 6 : index
    %c0_99 = arith.constant 0 : index
    %254 = vector.load %arg12[%c6, %c0_99] : memref<8x768xf32, #tpu.memory_space<vmem>>, vector<1x768xf32>
    %255 = arith.truncf %253 : vector<1x256xf32> to vector<1x256xbf16>
    %256 = arith.extf %255 : vector<1x256xbf16> to vector<1x256xf32>
    %257 = arith.subf %253, %256 : vector<1x256xf32>
    %258 = arith.truncf %257 : vector<1x256xf32> to vector<1x256xbf16>
    %c0_100 = arith.constant 0 : index
    %c0_101 = arith.constant 0 : index
    %259 = vector.load %arg3[%c0_100, %c0_101] : memref<256x768xbf16, #tpu.memory_space<vmem>>, vector<256x768xbf16>
    %cst_102 = arith.constant dense<0.000000e+00> : vector<1x768xf32>
    %260 = tpu.matmul %255, %259, %cst_102 {dimension_numbers = #tpu.dot_dimension_numbers<[1], [0], [0], [1], [0, 0, 1, 1], [], []>} : vector<1x256xbf16>, vector<256x768xbf16>, vector<1x768xf32> -> vector<1x768xf32>
    %c0_103 = arith.constant 0 : index
    %c0_104 = arith.constant 0 : index
    %261 = vector.load %arg4[%c0_103, %c0_104] : memref<256x768xbf16, #tpu.memory_space<vmem>>, vector<256x768xbf16>
    %cst_105 = arith.constant dense<0.000000e+00> : vector<1x768xf32>
    %262 = tpu.matmul %255, %261, %cst_105 {dimension_numbers = #tpu.dot_dimension_numbers<[1], [0], [0], [1], [0, 0, 1, 1], [], []>} : vector<1x256xbf16>, vector<256x768xbf16>, vector<1x768xf32> -> vector<1x768xf32>
    %263 = arith.addf %260, %262 : vector<1x768xf32>
    %c0_106 = arith.constant 0 : index
    %c0_107 = arith.constant 0 : index
    %264 = vector.load %arg3[%c0_106, %c0_107] : memref<256x768xbf16, #tpu.memory_space<vmem>>, vector<256x768xbf16>
    %cst_108 = arith.constant dense<0.000000e+00> : vector<1x768xf32>
    %265 = tpu.matmul %258, %264, %cst_108 {dimension_numbers = #tpu.dot_dimension_numbers<[1], [0], [0], [1], [0, 0, 1, 1], [], []>} : vector<1x256xbf16>, vector<256x768xbf16>, vector<1x768xf32> -> vector<1x768xf32>
    %266 = arith.addf %263, %265 : vector<1x768xf32>
    %c0_109 = arith.constant 0 : index
    %c0_110 = arith.constant 0 : index
    %267 = vector.load %arg5[%c0_109, %c0_110] : memref<1x768xf32, #tpu.memory_space<vmem>>, vector<1x768xf32>
    %268 = arith.addf %266, %267 : vector<1x768xf32>
    %269 = vector.extract_strided_slice %254 {offsets = [0, 0], sizes = [1, 256], strides = [1, 1]} : vector<1x768xf32> to vector<1x256xf32>
    %270 = vector.extract_strided_slice %268 {offsets = [0, 0], sizes = [1, 256], strides = [1, 1]} : vector<1x768xf32> to vector<1x256xf32>
    %271 = arith.addf %269, %270 : vector<1x256xf32>
    %272 = arith.negf %271 : vector<1x256xf32>
    %273 = math.exp %272 : vector<1x256xf32>
    %cst_111 = arith.constant 1.000000e+00 : f32
    %274 = vector.broadcast %cst_111 : f32 to vector<1x256xf32>
    %275 = arith.addf %274, %273 : vector<1x256xf32>
    %276 = arith.divf %274, %275 : vector<1x256xf32>
    %277 = vector.extract_strided_slice %254 {offsets = [0, 256], sizes = [1, 256], strides = [1, 1]} : vector<1x768xf32> to vector<1x256xf32>
    %278 = vector.extract_strided_slice %268 {offsets = [0, 256], sizes = [1, 256], strides = [1, 1]} : vector<1x768xf32> to vector<1x256xf32>
    %279 = arith.addf %277, %278 : vector<1x256xf32>
    %280 = arith.negf %279 : vector<1x256xf32>
    %281 = math.exp %280 : vector<1x256xf32>
    %cst_112 = arith.constant 1.000000e+00 : f32
    %282 = vector.broadcast %cst_112 : f32 to vector<1x256xf32>
    %283 = arith.addf %282, %281 : vector<1x256xf32>
    %284 = arith.divf %282, %283 : vector<1x256xf32>
    %285 = vector.extract_strided_slice %254 {offsets = [0, 512], sizes = [1, 256], strides = [1, 1]} : vector<1x768xf32> to vector<1x256xf32>
    %286 = vector.extract_strided_slice %268 {offsets = [0, 512], sizes = [1, 256], strides = [1, 1]} : vector<1x768xf32> to vector<1x256xf32>
    %287 = arith.mulf %276, %286 : vector<1x256xf32>
    %288 = arith.addf %285, %287 : vector<1x256xf32>
    %289 = math.tanh %288 : vector<1x256xf32>
    %cst_113 = arith.constant 1.000000e+00 : f32
    %290 = vector.broadcast %cst_113 : f32 to vector<1x256xf32>
    %291 = arith.subf %290, %284 : vector<1x256xf32>
    %292 = arith.mulf %291, %289 : vector<1x256xf32>
    %293 = arith.mulf %284, %253 : vector<1x256xf32>
    %294 = arith.addf %292, %293 : vector<1x256xf32>
    %c7 = arith.constant 7 : index
    %c0_114 = arith.constant 0 : index
    %295 = vector.load %arg12[%c7, %c0_114] : memref<8x768xf32, #tpu.memory_space<vmem>>, vector<1x768xf32>
    %296 = arith.truncf %294 : vector<1x256xf32> to vector<1x256xbf16>
    %297 = arith.extf %296 : vector<1x256xbf16> to vector<1x256xf32>
    %298 = arith.subf %294, %297 : vector<1x256xf32>
    %299 = arith.truncf %298 : vector<1x256xf32> to vector<1x256xbf16>
    %c0_115 = arith.constant 0 : index
    %c0_116 = arith.constant 0 : index
    %300 = vector.load %arg3[%c0_115, %c0_116] : memref<256x768xbf16, #tpu.memory_space<vmem>>, vector<256x768xbf16>
    %cst_117 = arith.constant dense<0.000000e+00> : vector<1x768xf32>
    %301 = tpu.matmul %296, %300, %cst_117 {dimension_numbers = #tpu.dot_dimension_numbers<[1], [0], [0], [1], [0, 0, 1, 1], [], []>} : vector<1x256xbf16>, vector<256x768xbf16>, vector<1x768xf32> -> vector<1x768xf32>
    %c0_118 = arith.constant 0 : index
    %c0_119 = arith.constant 0 : index
    %302 = vector.load %arg4[%c0_118, %c0_119] : memref<256x768xbf16, #tpu.memory_space<vmem>>, vector<256x768xbf16>
    %cst_120 = arith.constant dense<0.000000e+00> : vector<1x768xf32>
    %303 = tpu.matmul %296, %302, %cst_120 {dimension_numbers = #tpu.dot_dimension_numbers<[1], [0], [0], [1], [0, 0, 1, 1], [], []>} : vector<1x256xbf16>, vector<256x768xbf16>, vector<1x768xf32> -> vector<1x768xf32>
    %304 = arith.addf %301, %303 : vector<1x768xf32>
    %c0_121 = arith.constant 0 : index
    %c0_122 = arith.constant 0 : index
    %305 = vector.load %arg3[%c0_121, %c0_122] : memref<256x768xbf16, #tpu.memory_space<vmem>>, vector<256x768xbf16>
    %cst_123 = arith.constant dense<0.000000e+00> : vector<1x768xf32>
    %306 = tpu.matmul %299, %305, %cst_123 {dimension_numbers = #tpu.dot_dimension_numbers<[1], [0], [0], [1], [0, 0, 1, 1], [], []>} : vector<1x256xbf16>, vector<256x768xbf16>, vector<1x768xf32> -> vector<1x768xf32>
    %307 = arith.addf %304, %306 : vector<1x768xf32>
    %c0_124 = arith.constant 0 : index
    %c0_125 = arith.constant 0 : index
    %308 = vector.load %arg5[%c0_124, %c0_125] : memref<1x768xf32, #tpu.memory_space<vmem>>, vector<1x768xf32>
    %309 = arith.addf %307, %308 : vector<1x768xf32>
    %310 = vector.extract_strided_slice %295 {offsets = [0, 0], sizes = [1, 256], strides = [1, 1]} : vector<1x768xf32> to vector<1x256xf32>
    %311 = vector.extract_strided_slice %309 {offsets = [0, 0], sizes = [1, 256], strides = [1, 1]} : vector<1x768xf32> to vector<1x256xf32>
    %312 = arith.addf %310, %311 : vector<1x256xf32>
    %313 = arith.negf %312 : vector<1x256xf32>
    %314 = math.exp %313 : vector<1x256xf32>
    %cst_126 = arith.constant 1.000000e+00 : f32
    %315 = vector.broadcast %cst_126 : f32 to vector<1x256xf32>
    %316 = arith.addf %315, %314 : vector<1x256xf32>
    %317 = arith.divf %315, %316 : vector<1x256xf32>
    %318 = vector.extract_strided_slice %295 {offsets = [0, 256], sizes = [1, 256], strides = [1, 1]} : vector<1x768xf32> to vector<1x256xf32>
    %319 = vector.extract_strided_slice %309 {offsets = [0, 256], sizes = [1, 256], strides = [1, 1]} : vector<1x768xf32> to vector<1x256xf32>
    %320 = arith.addf %318, %319 : vector<1x256xf32>
    %321 = arith.negf %320 : vector<1x256xf32>
    %322 = math.exp %321 : vector<1x256xf32>
    %cst_127 = arith.constant 1.000000e+00 : f32
    %323 = vector.broadcast %cst_127 : f32 to vector<1x256xf32>
    %324 = arith.addf %323, %322 : vector<1x256xf32>
    %325 = arith.divf %323, %324 : vector<1x256xf32>
    %326 = vector.extract_strided_slice %295 {offsets = [0, 512], sizes = [1, 256], strides = [1, 1]} : vector<1x768xf32> to vector<1x256xf32>
    %327 = vector.extract_strided_slice %309 {offsets = [0, 512], sizes = [1, 256], strides = [1, 1]} : vector<1x768xf32> to vector<1x256xf32>
    %328 = arith.mulf %317, %327 : vector<1x256xf32>
    %329 = arith.addf %326, %328 : vector<1x256xf32>
    %330 = math.tanh %329 : vector<1x256xf32>
    %cst_128 = arith.constant 1.000000e+00 : f32
    %331 = vector.broadcast %cst_128 : f32 to vector<1x256xf32>
    %332 = arith.subf %331, %325 : vector<1x256xf32>
    %333 = arith.mulf %332, %330 : vector<1x256xf32>
    %334 = arith.mulf %325, %294 : vector<1x256xf32>
    %335 = arith.addf %333, %334 : vector<1x256xf32>
    %336 = vector.extract_strided_slice %48 {offsets = [0, 0], sizes = [1, 128], strides = [1, 1]} : vector<1x256xf32> to vector<1x128xf32>
    %337 = vector.extract_strided_slice %89 {offsets = [0, 0], sizes = [1, 128], strides = [1, 1]} : vector<1x256xf32> to vector<1x128xf32>
    %338 = vector.extract_strided_slice %130 {offsets = [0, 0], sizes = [1, 128], strides = [1, 1]} : vector<1x256xf32> to vector<1x128xf32>
    %339 = vector.extract_strided_slice %171 {offsets = [0, 0], sizes = [1, 128], strides = [1, 1]} : vector<1x256xf32> to vector<1x128xf32>
    %340 = vector.extract_strided_slice %212 {offsets = [0, 0], sizes = [1, 128], strides = [1, 1]} : vector<1x256xf32> to vector<1x128xf32>
    %341 = vector.extract_strided_slice %253 {offsets = [0, 0], sizes = [1, 128], strides = [1, 1]} : vector<1x256xf32> to vector<1x128xf32>
    %342 = vector.extract_strided_slice %294 {offsets = [0, 0], sizes = [1, 128], strides = [1, 1]} : vector<1x256xf32> to vector<1x128xf32>
    %343 = vector.extract_strided_slice %335 {offsets = [0, 0], sizes = [1, 128], strides = [1, 1]} : vector<1x256xf32> to vector<1x128xf32>
    %344 = tpu.concatenate %336, %337, %338, %339, %340, %341, %342, %343 in 0 : vector<1x128xf32>, vector<1x128xf32>, vector<1x128xf32>, vector<1x128xf32>, vector<1x128xf32>, vector<1x128xf32>, vector<1x128xf32>, vector<1x128xf32> -> vector<8x128xf32>
    %345 = vector.extract_strided_slice %335 {offsets = [0, 128], sizes = [1, 128], strides = [1, 1]} : vector<1x256xf32> to vector<1x128xf32>
    %346 = vector.extract_strided_slice %294 {offsets = [0, 128], sizes = [1, 128], strides = [1, 1]} : vector<1x256xf32> to vector<1x128xf32>
    %347 = vector.extract_strided_slice %253 {offsets = [0, 128], sizes = [1, 128], strides = [1, 1]} : vector<1x256xf32> to vector<1x128xf32>
    %348 = vector.extract_strided_slice %212 {offsets = [0, 128], sizes = [1, 128], strides = [1, 1]} : vector<1x256xf32> to vector<1x128xf32>
    %349 = vector.extract_strided_slice %171 {offsets = [0, 128], sizes = [1, 128], strides = [1, 1]} : vector<1x256xf32> to vector<1x128xf32>
    %350 = vector.extract_strided_slice %130 {offsets = [0, 128], sizes = [1, 128], strides = [1, 1]} : vector<1x256xf32> to vector<1x128xf32>
    %351 = vector.extract_strided_slice %89 {offsets = [0, 128], sizes = [1, 128], strides = [1, 1]} : vector<1x256xf32> to vector<1x128xf32>
    %352 = vector.extract_strided_slice %48 {offsets = [0, 128], sizes = [1, 128], strides = [1, 1]} : vector<1x256xf32> to vector<1x128xf32>
    %353 = tpu.concatenate %345, %346, %347, %348, %349, %350, %351, %352 in 0 : vector<1x128xf32>, vector<1x128xf32>, vector<1x128xf32>, vector<1x128xf32>, vector<1x128xf32>, vector<1x128xf32>, vector<1x128xf32>, vector<1x128xf32> -> vector<8x128xf32>
    %354 = tpu.concatenate %344, %353 in 1 : vector<8x128xf32>, vector<8x128xf32> -> vector<8x256xf32>
    %cst_129 = arith.constant dense<0.000000e+00> : vector<8xf32>
    %355 = vector.multi_reduction <add>, %354, %cst_129 [1] : vector<8x256xf32> to vector<8xf32>
    %356 = vector.shape_cast %355 : vector<8xf32> to vector<8x1xf32>
    %cst_130 = arith.constant 2.560000e+02 : f32
    %357 = vector.broadcast %cst_130 : f32 to vector<8x1xf32>
    %358 = arith.divf %356, %357 : vector<8x1xf32>
    %359 = vector.broadcast %358 : vector<8x1xf32> to vector<8x256xf32>
    %360 = arith.subf %354, %359 : vector<8x256xf32>
    %361 = arith.mulf %360, %360 : vector<8x256xf32>
    %cst_131 = arith.constant dense<0.000000e+00> : vector<8xf32>
    %362 = vector.multi_reduction <add>, %361, %cst_131 [1] : vector<8x256xf32> to vector<8xf32>
    %363 = vector.shape_cast %362 : vector<8xf32> to vector<8x1xf32>
    %cst_132 = arith.constant 2.560000e+02 : f32
    %364 = vector.broadcast %cst_132 : f32 to vector<8x1xf32>
    %365 = arith.divf %363, %364 : vector<8x1xf32>
    %366 = vector.broadcast %358 : vector<8x1xf32> to vector<8x256xf32>
    %367 = arith.subf %354, %366 : vector<8x256xf32>
    %cst_133 = arith.constant 9.99999974E-6 : f32
    %368 = vector.broadcast %cst_133 : f32 to vector<8x1xf32>
    %369 = arith.addf %365, %368 : vector<8x1xf32>
    %370 = math.rsqrt %369 : vector<8x1xf32>
    %371 = vector.broadcast %370 : vector<8x1xf32> to vector<8x256xf32>
    %372 = arith.mulf %367, %371 : vector<8x256xf32>
    %c0_134 = arith.constant 0 : index
    %c0_135 = arith.constant 0 : index
    %373 = vector.load %arg6[%c0_134, %c0_135] : memref<1x256xf32, #tpu.memory_space<vmem>>, vector<1x256xf32>
    %374 = vector.broadcast %373 : vector<1x256xf32> to vector<8x256xf32>
    %375 = arith.mulf %372, %374 : vector<8x256xf32>
    %c0_136 = arith.constant 0 : index
    %c0_137 = arith.constant 0 : index
    %376 = vector.load %arg7[%c0_136, %c0_137] : memref<1x256xf32, #tpu.memory_space<vmem>>, vector<1x256xf32>
    %377 = vector.broadcast %376 : vector<1x256xf32> to vector<8x256xf32>
    %378 = arith.addf %375, %377 : vector<8x256xf32>
    %cst_138 = arith.constant 0.000000e+00 : f32
    %379 = vector.broadcast %cst_138 : f32 to vector<8x256xf32>
    %380 = arith.maximumf %378, %379 : vector<8x256xf32>
    tpu.wait_dma2 semaphore(%arg14 : memref<!tpu.dma_semaphore, #tpu.memory_space<semaphore_mem>>) src(%arg10 : memref<256x384xbf16, #tpu.memory_space<any>>) dst(%arg13 : memref<256x384xbf16, #tpu.memory_space<vmem>>)
    %381 = arith.truncf %380 : vector<8x256xf32> to vector<8x256xbf16>
    %c0_139 = arith.constant 0 : index
    %c0_140 = arith.constant 0 : index
    %382 = vector.load %arg13[%c0_139, %c0_140] : memref<256x384xbf16, #tpu.memory_space<vmem>>, vector<256x384xbf16>
    %cst_141 = arith.constant dense<0.000000e+00> : vector<8x384xf32>
    %383 = tpu.matmul %381, %382, %cst_141 {dimension_numbers = #tpu.dot_dimension_numbers<[1], [0], [0], [1], [0, 0, 1, 1], [], []>} : vector<8x256xbf16>, vector<256x384xbf16>, vector<8x384xf32> -> vector<8x384xf32>
    %c0_142 = arith.constant 0 : index
    %c0_143 = arith.constant 0 : index
    %384 = vector.load %arg8[%c0_142, %c0_143] : memref<8x384xf32, #tpu.memory_space<vmem>>, vector<8x384xf32>
    %385 = arith.mulf %383, %384 : vector<8x384xf32>
    %cst_144 = arith.constant dense<0.000000e+00> : vector<384xf32>
    %386 = vector.multi_reduction <add>, %385, %cst_144 [0] : vector<8x384xf32> to vector<384xf32>
    %387 = vector.shape_cast %386 : vector<384xf32> to vector<1x384xf32>
    %c0_145 = arith.constant 0 : index
    %c0_146 = arith.constant 0 : index
    %388 = vector.load %arg9[%c0_145, %c0_146] : memref<1x384xf32, #tpu.memory_space<vmem>>, vector<1x384xf32>
    %389 = arith.addf %387, %388 : vector<1x384xf32>
    %cst_147 = arith.constant 3.000000e+00 : f32
    %390 = vector.broadcast %cst_147 : f32 to vector<1x384xf32>
    %391 = arith.addf %389, %390 : vector<1x384xf32>
    %cst_148 = arith.constant 4.000000e-01 : f32
    %392 = vector.broadcast %cst_148 : f32 to vector<1x384xf32>
    %393 = arith.divf %391, %392 : vector<1x384xf32>
    %394 = arith.negf %393 : vector<1x384xf32>
    %395 = math.exp %394 : vector<1x384xf32>
    %cst_149 = arith.constant 1.000000e+00 : f32
    %396 = vector.broadcast %cst_149 : f32 to vector<1x384xf32>
    %397 = arith.addf %396, %395 : vector<1x384xf32>
    %398 = arith.divf %396, %397 : vector<1x384xf32>
    %c0_150 = arith.constant 0 : index
    %c0_151 = arith.constant 0 : index
    %399 = vector.load %arg11[%c0_150, %c0_151] : memref<1x384xf32, #tpu.memory_space<vmem>>, vector<1x384xf32>
    tpu.vector_store %arg11[%c0_150, %c0_151], %398 {strides = array<i32>} : memref<1x384xf32, #tpu.memory_space<vmem>>, vector<1x384xf32>,
    return
  }
}

</mosaic_0001>

<bundles_post_ra>
// kernel: tpu_custom_call.1
= control target key start
LH: loop header
LB: loop body
LE: loop exit
PB: predicated region body
PF: predicated region fallthrough
CT: control target
= control target key end

     0   :  { %16 = vsyncpa [#allocation6], 0  ;;  %s12525_s0 = inlined_call_operand.hbm [shape: bf16[8,128], index: 0, kind: input, shape index: {}]   ;;  %s12526_s1 = inlined_call_operand.hbm [shape: bf16[128,768], index: 1, kind: input, shape index: {}]   ;;  %s12527_s2 = inlined_call_operand.hbm [shape: f32[1,768], index: 2, kind: input, shape index: {}]   ;;  %s12528_s3 = inlined_call_operand.hbm [shape: bf16[256,768], index: 3, kind: input, shape index: {}]   ;;  %s12529_s4 = inlined_call_operand.hbm [shape: bf16[256,768], index: 4, kind: input, shape index: {}]   ;;  %s12530_s5 = inlined_call_operand.hbm [shape: f32[1,768], index: 5, kind: input, shape index: {}]   ;;  %s12531_s6 = inlined_call_operand.vmem [shape: f32[1,256], index: 6, kind: input, shape index: {}]   ;;  %s12532_s7 = inlined_call_operand.hbm [shape: f32[1,256], index: 7, kind: input, shape index: {}]   ;;  %s12533_s8 = inlined_call_operand.hbm [shape: f32[8,384], index: 8, kind: input, shape index: {}]   ;;  %s12534_s9 = inlined_call_operand.vmem [shape: f32[1,384], index: 9, kind: input, shape index: {}]   ;;  %s12535_s10 = inlined_call_operand.hbm [shape: bf16[256,384], index: 10, kind: input, shape index: {}]   ;;  %s12536_s11 = inlined_call_operand.hbm [shape: f32[1,384], index: 11, kind: output, shape index: {}]  }
   0x1   :  { %17 = vsyncpa [#allocation9], 0 }
   0x2   :  { %18 = vsyncpa [#allocation12], 0 }
   0x3   :  { %19 = vsyncpa [#allocation15], 0 }
   0x4   :  { %20 = vsyncpa [#allocation18], 0  ;;  %s37_s19 = sshll.u32 %s12526_s1, 4  ;;  %s38_s19 = int_to_ptr.hbm [resolvable:$true] %s37_s19 }
   0x5   :  { %21 = vsyncpa [#allocation7], 0  ;;  %s8774_s20 = smov [#allocation8]   ;;  %s61_s24 = sshll.u32 %s12528_s3, 4  ;;  %s62_s24 = int_to_ptr.hbm [resolvable:$true] %s61_s24 }
   0x6   :  { %s39_s21 = sshll.u32 %s8774_s20, 4  ;;  %s8775_s25 = smov 384   ;;  %s40_s21 = int_to_ptr.vmem [resolvable:$true] %s39_s21 }
   0x7   :  { %s8776_s26 = smov 24   ;;  %s8777_s27 = smov [#allocation11]  }
   0x8   :  { %45 = dma.hbm_to_vmem [thread:$0]  %s38_s19, 6144, %s40_s21, [#allocation9], %s8775_s25, %s8775_s25, %s8776_s26  }
   0x9   :  { %s63_s28 = sshll.u32 %s8777_s27, 4  ;;  %s88_s30 = sshll.u32 %s12530_s5, 4  ;;  %s64_s28 = int_to_ptr.vmem [resolvable:$true] %s63_s28  ;;  %s89_s30 = int_to_ptr.hbm [resolvable:$true] %s88_s30 }
   0xa   :  { %69 = dma.hbm_to_vmem [thread:$0]  %s62_s24, 12288, %s64_s28, [#allocation12], %s8775_s25, %s8775_s25, %s8776_s26  }
   0xb   :  { %s27_s13 = sshll.u32 %s12525_s0, 4  ;;  %s8778_s14 = smov [#allocation14]   ;;  %s28_s13 = int_to_ptr.hbm [resolvable:$true] %s27_s13 }
   0xc   :  { %s90_s15 = sshll.u32 %s8778_s14, 4  ;;  %s8779_s16 = smov [#allocation5]   ;;  %s91_s15 = int_to_ptr.vmem [resolvable:$true] %s90_s15 }
   0xd   :  { %93 = dma.hbm_to_vmem [thread:$0]  %s89_s30, 96, %s91_s15, [#allocation15]  }
   0xe   :  { %s29_s17 = sshll.u32 %s8779_s16, 4  ;;  %s51_s5 = sshll.u32 %s12527_s2, 4  ;;  %s30_s17 = int_to_ptr.vmem [resolvable:$true] %s29_s17  ;;  %s52_s5 = int_to_ptr.hbm [resolvable:$true] %s51_s5 }
   0xf   :  { %32 = dma.hbm_to_vmem [thread:$0]  %s28_s13, 64, %s30_s17, [#allocation6]  }
  0x10   :  { %s74_s22 = sshll.u32 %s12529_s4, 4  ;;  %s8780_s23 = smov [#allocation10]   ;;  %s75_s22 = int_to_ptr.hbm [resolvable:$true] %s74_s22 }
  0x11   :  { %s53_s0 = sshll.u32 %s8780_s23, 4  ;;  %s8781_s24 = smov [#allocation13]   ;;  %s54_s0 = int_to_ptr.vmem [resolvable:$true] %s53_s0 }
  0x12   :  { %56 = dma.hbm_to_vmem [thread:$0]  %s52_s5, 96, %s54_s0, [#allocation9]  }
  0x13   :  { %s76_s27 = sshll.u32 %s8781_s24, 4  ;;  %s101_s1 = sshll.u32 %s12532_s7, 4  ;;  %s77_s27 = int_to_ptr.vmem [resolvable:$true] %s76_s27  ;;  %s102_s1 = int_to_ptr.hbm [resolvable:$true] %s101_s1 }
  0x14   :  { %82 = dma.hbm_to_vmem [thread:$0]  %s75_s22, 12288, %s77_s27, [#allocation12], %s8775_s25, %s8775_s25, %s8776_s26  }
  0x15   :  { %s112_s4 = sshll.u32 %s12533_s8, 4  ;;  %s8782_s3 = smov [#allocation16]   ;;  %s113_s4 = int_to_ptr.hbm [resolvable:$true] %s112_s4 }
  0x16   :  { %s103_s12 = sshll.u32 %s8782_s3, 4  ;;  %s8783_s13 = smov [#allocation17]   ;;  %s104_s12 = int_to_ptr.vmem [resolvable:$true] %s103_s12 }
  0x17   :  { %106 = dma.hbm_to_vmem [thread:$0]  %s102_s1, 32, %s104_s12, [#allocation15]  }
  0x18   :  { %s114_s14 = sshll.u32 %s8783_s13, 4  ;;  %s115_s14 = int_to_ptr.vmem [resolvable:$true] %s114_s14 }
  0x19   :  { %117 = dma.hbm_to_vmem [thread:$0]  %s113_s4, 384, %s115_s14, [#allocation18]  }
  0x1a   :  { %8760 = dma.done.wait [#allocation6], 64  }
  0x1b   :  { %8761 = vsyncadd [#allocation6], 4294967232 }
  0x1c   :  { %8762 = dma.done.wait [#allocation9], 6240  }
  0x1d   :  { %8763 = vsyncadd [#allocation9], 4294961056 }
  0x1e   :  { %8764 = dma.done.wait [#allocation12], 24576  }
  0x1f   :  { %8765 = vsyncadd [#allocation12], 4294942720 }
  0x20   :  { %8766 = dma.done.wait [#allocation15], 128  }
  0x21   :  { %8767 = vsyncadd [#allocation15], 4294967168 }
  0x22   :  { %8768 = dma.done.wait [#allocation18], 384  }
  0x23   :  { %8769 = vsyncadd [#allocation18], 4294966912  ;;  %v7117_v0 = vld [vmem:[#allocation8 + $0x150] sm:$0xf]  ;;  %v8164_v1 = vld [vmem:[#allocation8 + $0x164] sm:$0xf0] }
  0x24   :  { %v8161_v2 = vld [vmem:[#allocation8 + $0x154] sm:$0xf]  ;;  %v7118_v3 = vor.u32 %v8164_v1, %v7117_v0  ;;  %v7119_v4 = vld [vmem:[#allocation8 + $0x168] sm:$0xf0]  ;;  %v7125_v5 = vld [vmem:[#allocation8 + $0x158] sm:$0xf] }
  0x25   :  { %v8165_v6 = vld [vmem:[#allocation8 + $0x16c] sm:$0xf0]  ;;  %v7122_v7 = vor.u32 %v8161_v2, %v7119_v4  ;;  %v8162_v9 = vld [vmem:[#allocation8 + $0x15c] sm:$0xf]  ;;  %v7127_v10 = vld [vmem:[#allocation8 + $0x170] sm:$0xf0] }
  0x26   :  { %v7126_v8 = vor.u32 %v8165_v6, %v7125_v5  ;;  %v7093_v11 = vld [vmem:[#allocation8 + $0x120] sm:$0xf]  ;;  %469 = vmatpush.bf16.msra.mxu0 %v7118_v3  ;;  %v7130_v12 = vor.u32 %v8162_v9, %v7127_v10  ;;  %v8158_v13 = vld [vmem:[#allocation8 + $0x134] sm:$0xf0]  ;;  %v8155_v14 = vld [vmem:[#allocation8 + $0x124] sm:$0xf] }
  0x27   :  { %v7095_v15 = vld [vmem:[#allocation8 + $0x138] sm:$0xf0]  ;;  %482 = vmatpush.bf16.msra.mxu1 %v7122_v7  ;;  %v7094_v16 = vor.u32 %v8158_v13, %v7093_v11  ;;  %v7101_v18 = vld [vmem:[#allocation8 + $0x128] sm:$0xf]  ;;  %v8159_v19 = vld [vmem:[#allocation8 + $0x13c] sm:$0xf0] }
  0x28   :  { %495 = vmatpush.bf16.msra.mxu2 %v7126_v8  ;;  %v7098_v17 = vor.u32 %v8155_v14, %v7095_v15  ;;  %v8156_v20 = vld [vmem:[#allocation8 + $0x12c] sm:$0xf]  ;;  %508 = vmatpush.bf16.msra.mxu3 %v7130_v12  ;;  %v7102_v21 = vor.u32 %v8159_v19, %v7101_v18  ;;  %v7103_v22 = vld [vmem:[#allocation8 + $0x140] sm:$0xf0]  ;;  %v7069_v23 = vld [vmem:[#allocation8 + $0xf0] sm:$0xf] }
  0x29   :  { %v8152_v24 = vld [vmem:[#allocation8 + $0x104] sm:$0xf0]  ;;  %v7106_v25 = vor.u32 %v8156_v20, %v7103_v22  ;;  %v8149_v26 = vld [vmem:[#allocation8 + $0xf4] sm:$0xf]  ;;  %v7071_v27 = vld [vmem:[#allocation8 + $0x108] sm:$0xf0] }
  0x2a   :  { %v7077_v28 = vld [vmem:[#allocation8 + $0xf8] sm:$0xf]  ;;  %470 = vmatpush.bf16.msra.mxu0 %v7094_v16  ;;  %v7070_v29 = vor.u32 %v8152_v24, %v7069_v23  ;;  %v8153_v30 = vld [vmem:[#allocation8 + $0x10c] sm:$0xf0]  ;;  %v8150_v31 = vld [vmem:[#allocation8 + $0xfc] sm:$0xf]  ;;  %v7074_v33 = vor.u32 %v8149_v26, %v7071_v27 }
  0x2b   :  { %v7079_v32 = vld [vmem:[#allocation8 + $0x110] sm:$0xf0]  ;;  %483 = vmatpush.bf16.msra.mxu1 %v7098_v17  ;;  %v7078_v34 = vor.u32 %v8153_v30, %v7077_v28  ;;  %v7045_v35 = vld [vmem:[#allocation8 + $0xc0] sm:$0xf]  ;;  %v8146_v36 = vld [vmem:[#allocation8 + $0xd4] sm:$0xf0] }
  0x2c   :  { %496 = vmatpush.bf16.msra.mxu2 %v7102_v21  ;;  %v8143_v37 = vld [vmem:[#allocation8 + $0xc4] sm:$0xf]  ;;  %509 = vmatpush.bf16.msra.mxu3 %v7106_v25  ;;  %v7082_v38 = vor.u32 %v8150_v31, %v7079_v32  ;;  %v7047_v39 = vld [vmem:[#allocation8 + $0xd8] sm:$0xf0]  ;;  %v7053_v40 = vld [vmem:[#allocation8 + $0xc8] sm:$0xf]  ;;  %v7046_v44 = vor.u32 %v8146_v36, %v7045_v35 }
  0x2d   :  { %v8147_v41 = vld [vmem:[#allocation8 + $0xdc] sm:$0xf0]  ;;  %v8144_v42 = vld [vmem:[#allocation8 + $0xcc] sm:$0xf]  ;;  %v7055_v43 = vld [vmem:[#allocation8 + $0xe0] sm:$0xf0]  ;;  %v7050_v45 = vor.u32 %v8143_v37, %v7047_v39 }
  0x2e   :  { %471 = vmatpush.bf16.msra.mxu0 %v7070_v29  ;;  %v7054_v46 = vor.u32 %v8147_v41, %v7053_v40  ;;  %v7021_v47 = vld [vmem:[#allocation8 + $0x90] sm:$0xf]  ;;  %v8140_v48 = vld [vmem:[#allocation8 + $0xa4] sm:$0xf0]  ;;  %v8137_v49 = vld [vmem:[#allocation8 + $0x94] sm:$0xf]  ;;  %v7058_v50 = vor.u32 %v8144_v42, %v7055_v43 }
  0x2f   :  { %484 = vmatpush.bf16.msra.mxu1 %v7074_v33  ;;  %v7023_v51 = vld [vmem:[#allocation8 + $0xa8] sm:$0xf0]  ;;  %v7029_v52 = vld [vmem:[#allocation8 + $0x98] sm:$0xf]  ;;  %v8141_v53 = vld [vmem:[#allocation8 + $0xac] sm:$0xf0]  ;;  %v7022_v56 = vor.u32 %v8140_v48, %v7021_v47 }
  0x30   :  { %497 = vmatpush.bf16.msra.mxu2 %v7078_v34  ;;  %510 = vmatpush.bf16.msra.mxu3 %v7082_v38  ;;  %v8138_v54 = vld [vmem:[#allocation8 + $0x9c] sm:$0xf]  ;;  %v7031_v55 = vld [vmem:[#allocation8 + $0xb0] sm:$0xf0]  ;;  %v7026_v57 = vor.u32 %v8137_v49, %v7023_v51  ;;  %v7030_v58 = vor.u32 %v8141_v53, %v7029_v52  ;;  %v6997_v59 = vld [vmem:[#allocation8 + $0x60] sm:$0xf] }
  0x31   :  { %v8134_v60 = vld [vmem:[#allocation8 + $0x74] sm:$0xf0]  ;;  %v8131_v61 = vld [vmem:[#allocation8 + $0x64] sm:$0xf]  ;;  %v7034_v62 = vor.u32 %v8138_v54, %v7031_v55  ;;  %v6999_v63 = vld [vmem:[#allocation8 + $0x78] sm:$0xf0] }
  0x32   :  { %472 = vmatpush.bf16.msra.mxu0 %v7046_v44  ;;  %v7005_v0 = vld [vmem:[#allocation8 + $0x68] sm:$0xf]  ;;  %v8135_v1 = vld [vmem:[#allocation8 + $0x7c] sm:$0xf0]  ;;  %v8132_v2 = vld [vmem:[#allocation8 + $0x6c] sm:$0xf]  ;;  %v6998_v4 = vor.u32 %v8134_v60, %v6997_v59  ;;  %v7002_v5 = vor.u32 %v8131_v61, %v6999_v63 }
  0x33   :  { %485 = vmatpush.bf16.msra.mxu1 %v7050_v45  ;;  %v7007_v3 = vld [vmem:[#allocation8 + $0x80] sm:$0xf0]  ;;  %v7006_v6 = vor.u32 %v8135_v1, %v7005_v0  ;;  %v6973_v7 = vld [vmem:[#allocation8 + $0x30] sm:$0xf]  ;;  %v8128_v8 = vld [vmem:[#allocation8 + $0x44] sm:$0xf0] }
  0x34   :  { %498 = vmatpush.bf16.msra.mxu2 %v7054_v46  ;;  %511 = vmatpush.bf16.msra.mxu3 %v7058_v50  ;;  %v8125_v9 = vld [vmem:[#allocation8 + $0x34] sm:$0xf]  ;;  %v7010_v10 = vor.u32 %v8132_v2, %v7007_v3  ;;  %v6975_v11 = vld [vmem:[#allocation8 + $0x48] sm:$0xf0]  ;;  %v6981_v12 = vld [vmem:[#allocation8 + $0x38] sm:$0xf]  ;;  %v6974_v16 = vor.u32 %v8128_v8, %v6973_v7 }
  0x35   :  { %v8129_v13 = vld [vmem:[#allocation8 + $0x4c] sm:$0xf0]  ;;  %v8126_v14 = vld [vmem:[#allocation8 + $0x3c] sm:$0xf]  ;;  %v6983_v15 = vld [vmem:[#allocation8 + $0x50] sm:$0xf0]  ;;  %v6978_v19 = vor.u32 %v8125_v9, %v6975_v11 }
  0x36   :  { %473 = vmatpush.bf16.msra.mxu0 %v7022_v56  ;;  %v6949_v17 = vld [vmem:[#allocation8] sm:$0xf]  ;;  %v8122_v18 = vld [vmem:[#allocation8 + $0x14] sm:$0xf0]  ;;  %v6982_v20 = vor.u32 %v8129_v13, %v6981_v12  ;;  %v8119_v21 = vld [vmem:[#allocation8 + $0x4] sm:$0xf]  ;;  %v6986_v24 = vor.u32 %v8126_v14, %v6983_v15 }
  0x37   :  { %486 = vmatpush.bf16.msra.mxu1 %v7026_v57  ;;  %v6951_v22 = vld [vmem:[#allocation8 + $0x18] sm:$0xf0]  ;;  %v6957_v23 = vld [vmem:[#allocation8 + $0x8] sm:$0xf]  ;;  %v8123_v25 = vld [vmem:[#allocation8 + $0x1c] sm:$0xf0]  ;;  %v6950_v31 = vor.u32 %v8122_v18, %v6949_v17 }
  0x38   :  { %499 = vmatpush.bf16.msra.mxu2 %v7030_v58  ;;  %512 = vmatpush.bf16.msra.mxu3 %v7034_v62  ;;  %v8120_v26 = vld [vmem:[#allocation8 + $0xc] sm:$0xf]  ;;  %v6959_v27 = vld [vmem:[#allocation8 + $0x20] sm:$0xf0]  ;;  %v7133_v28 = vld [vmem:[#allocation8 + $0x160] sm:$0xf]  ;;  %v6954_v35 = vor.u32 %v8119_v21, %v6951_v22  ;;  %v6958_v36 = vor.u32 %v8123_v25, %v6957_v23 }
  0x39   :  { %v8166_v29 = vld [vmem:[#allocation8 + $0x174] sm:$0xf0]  ;;  %v8163_v30 = vld [vmem:[#allocation8 + $0x164] sm:$0xf]  ;;  %v7135_v32 = vld [vmem:[#allocation8 + $0x178] sm:$0xf0]  ;;  %v6962_v39 = vor.u32 %v8120_v26, %v6959_v27 }
  0x3a   :  { %474 = vmatpush.bf16.msra.mxu0 %v6998_v4  ;;  %v7309_v33 = vld [vmem:[#allocation13 + $0x150] sm:$0xf]  ;;  %v8308_v34 = vld [vmem:[#allocation13 + $0x164] sm:$0xf0]  ;;  %v7134_v40 = vor.u32 %v8166_v29, %v7133_v28  ;;  %v7138_v41 = vor.u32 %v8163_v30, %v7135_v32  ;;  %v8160_v44 = vld [vmem:[#allocation8 + $0x144] sm:$0xf0] }
  0x3b   :  { %487 = vmatpush.bf16.msra.mxu1 %v7002_v5  ;;  %v7501_v37 = vld [vmem:[#allocation13 + $0x2d0] sm:$0xf]  ;;  %v8356_v38 = vld [vmem:[#allocation13 + $0x2e4] sm:$0xf0]  ;;  %v8882_v42 = vor.u32 %v8308_v34, %v7309_v33  ;;  %v7285_v48 = vld [vmem:[#allocation13 + $0x120] sm:$0xf] }
  0x3c   :  { %500 = vmatpush.bf16.msra.mxu2 %v7006_v6  ;;  %513 = vmatpush.bf16.msra.mxu3 %v7010_v10  ;;  %v7109_v43 = vld [vmem:[#allocation8 + $0x130] sm:$0xf]  ;;  %v8157_v45 = vld [vmem:[#allocation8 + $0x134] sm:$0xf]  ;;  %v8884_v46 = vor.u32 %v8356_v38, %v7501_v37  ;;  %v7111_v47 = vld [vmem:[#allocation8 + $0x148] sm:$0xf0] }
  0x3d   :  { %13167 = vst [vmem:[#allocation31_spill] sm:$0xff] %v8882_v42  ;;  %v8302_v49 = vld [vmem:[#allocation13 + $0x134] sm:$0xf0]  ;;  %v7477_v50 = vld [vmem:[#allocation13 + $0x2a0] sm:$0xf]  ;;  %v7110_v53 = vor.u32 %v8160_v44, %v7109_v43  ;;  %v7114_v54 = vor.u32 %v8157_v45, %v7111_v47  ;;  %vm2205_vm0 = vcmask 1040384  }
  0x3e   :  { %475 = vmatpush.bf16.msra.mxu0 %v6974_v16  ;;  %13168 = vst [vmem:[#allocation32_spill] sm:$0xff] %v8884_v46  ;;  %v8350_v51 = vld [vmem:[#allocation13 + $0x2b4] sm:$0xf0]  ;;  %v8889_v55 = vor.u32 %v8302_v49, %v7285_v48  ;;  %v8154_v57 = vld [vmem:[#allocation8 + $0x114] sm:$0xf0]  ;;  %s160_s25 = sshll.u32 %s12535_s10, 4  ;;  %s161_s25 = int_to_ptr.hbm [resolvable:$true] %s160_s25 }
  0x3f   :  { %488 = vmatpush.bf16.msra.mxu1 %v6978_v19  ;;  %v8886_v52 = vld [vmem:[#allocation5] sm:$0xf]  ;;  %v7085_v56 = vld [vmem:[#allocation8 + $0x100] sm:$0xf]  ;;  %v8151_v58 = vld [vmem:[#allocation8 + $0x104] sm:$0xf]  ;;  %v8892_v59 = vor.u32 %v8350_v51, %v7477_v50 }
  0x40   :  { %501 = vmatpush.bf16.msra.mxu2 %v6982_v20  ;;  %514 = vmatpush.bf16.msra.mxu3 %v6986_v24  ;;  %13169 = vst [vmem:[#allocation33_spill] sm:$0xff] %v8889_v55  ;;  %v7087_v60 = vld [vmem:[#allocation8 + $0x118] sm:$0xf0]  ;;  %v7261_v61 = vld [vmem:[#allocation13 + $0xf0] sm:$0xf]  ;;  %v7086_v1 = vor.u32 %v8154_v57, %v7085_v56  ;;  %s8786_s26 = smov [#allocation3]  }
  0x41   :  { %13170 = vst [vmem:[#allocation34_spill] sm:$0xff] %v8892_v59  ;;  %v8296_v62 = vld [vmem:[#allocation13 + $0x104] sm:$0xf0]  ;;  %v7453_v63 = vld [vmem:[#allocation13 + $0x270] sm:$0xf]  ;;  %v7090_v2 = vor.u32 %v8151_v58, %v7087_v60  ;;  %s162_s15 = sshll.u32 %s8786_s26, 4  ;;  %s163_s15 = int_to_ptr.vmem [resolvable:$true] %s162_s15 }
  0x42   :  { %476 = vmatpush.bf16.msra.mxu0 %v6950_v31  ;;  %v8344_v0 = vld [vmem:[#allocation13 + $0x284] sm:$0xf0]  ;;  %v8899_v3 = vor.u32 %v8296_v62, %v7261_v61  ;;  %v8148_v5 = vld [vmem:[#allocation8 + $0xe4] sm:$0xf0]  ;;  %v8145_v6 = vld [vmem:[#allocation8 + $0xd4] sm:$0xf] }
  0x43   :  { %489 = vmatpush.bf16.msra.mxu1 %v6954_v35  ;;  %v7061_v4 = vld [vmem:[#allocation8 + $0xd0] sm:$0xf]  ;;  %v8902_v7 = vor.u32 %v8344_v0, %v7453_v63  ;;  %v7063_v8 = vld [vmem:[#allocation8 + $0xe8] sm:$0xf0]  ;;  %v7237_v9 = vld [vmem:[#allocation13 + $0xc0] sm:$0xf] }
  0x44   :  { %502 = vmatpush.bf16.msra.mxu2 %v6958_v36  ;;  %515 = vmatpush.bf16.msra.mxu3 %v6962_v39  ;;  %13171 = vst [vmem:[#allocation35_spill] sm:$0xff] %v8899_v3  ;;  %v8290_v10 = vld [vmem:[#allocation13 + $0xd4] sm:$0xf0]  ;;  %v7429_v11 = vld [vmem:[#allocation13 + $0x240] sm:$0xf]  ;;  %v7062_v13 = vor.u32 %v8148_v5, %v7061_v4  ;;  %v7066_v14 = vor.u32 %v8145_v6, %v7063_v8 }
  0x45   :  { %477 = vmatmul.bf16.vlgmr.msra.gmra.mxu0 %v8886_v52  ;;  %13172 = vst [vmem:[#allocation36_spill] sm:$0xff] %v8902_v7  ;;  %v8338_v12 = vld [vmem:[#allocation13 + $0x254] sm:$0xf0]  ;;  %v8905_v15 = vor.u32 %v8290_v10, %v7237_v9  ;;  %v8142_v17 = vld [vmem:[#allocation8 + $0xb4] sm:$0xf0] }
  0x46   :  { %521 = vmatpush.bf16.msrb.mxu0 %v7134_v40  ;;  %490 = vmatmul.bf16.vlgmr.msra.gmra.mxu1 %v8886_v52  ;;  %v7037_v16 = vld [vmem:[#allocation8 + $0xa0] sm:$0xf]  ;;  %v8139_v18 = vld [vmem:[#allocation8 + $0xa4] sm:$0xf]  ;;  %v8908_v19 = vor.u32 %v8338_v12, %v7429_v11  ;;  %v7039_v20 = vld [vmem:[#allocation8 + $0xb8] sm:$0xf0] }
  0x47   :  { %534 = vmatpush.bf16.msrb.mxu1 %v7138_v41  ;;  %503 = vmatmul.bf16.vlgmr.msra.gmra.mxu2 %v8886_v52  ;;  %13173 = vst [vmem:[#allocation37_spill] sm:$0xff] %v8905_v15  ;;  %v7213_v21 = vld [vmem:[#allocation13 + $0x90] sm:$0xf]  ;;  %v8284_v22 = vld [vmem:[#allocation13 + $0xa4] sm:$0xf0]  ;;  %v7038_v25 = vor.u32 %v8142_v17, %v7037_v16  ;;  %v7042_v26 = vor.u32 %v8139_v18, %v7039_v20 }
  0x48   :  { %1228 = vmatpush.bf16.msrb.mxu2 %v8882_v42  ;;  %1241 = vmatpush.bf16.msrb.mxu3 %v8884_v46  ;;  %13174 = vst [vmem:[#allocation38_spill] sm:$0xff] %v8908_v19  ;;  %v7405_v23 = vld [vmem:[#allocation13 + $0x210] sm:$0xf]  ;;  %v8332_v24 = vld [vmem:[#allocation13 + $0x224] sm:$0xf0]  ;;  %v8911_v27 = vor.u32 %v8284_v22, %v7213_v21 }
  0x49   :  { %516 = vmatmul.bf16.vlgmr.msra.gmra.mxu3 %v8886_v52  ;;  %v7013_v28 = vld [vmem:[#allocation8 + $0x70] sm:$0xf]  ;;  %v8136_v29 = vld [vmem:[#allocation8 + $0x84] sm:$0xf0]  ;;  %v8133_v30 = vld [vmem:[#allocation8 + $0x74] sm:$0xf]  ;;  %v8914_v31 = vor.u32 %v8332_v24, %v7405_v23 }
  0x4a   :  { %522 = vmatpush.bf16.msrb.mxu0 %v7110_v53  ;;  %13175 = vst [vmem:[#allocation39_spill] sm:$0xff] %v8911_v27  ;;  %v7015_v32 = vld [vmem:[#allocation8 + $0x88] sm:$0xf0]  ;;  %v7189_v33 = vld [vmem:[#allocation13 + $0x60] sm:$0xf]  ;;  %v7014_v37 = vor.u32 %v8136_v29, %v7013_v28 }
  0x4b   :  { %535 = vmatpush.bf16.msrb.mxu1 %v7114_v54  ;;  %13176 = vst [vmem:[#allocation40_spill] sm:$0xff] %v8914_v31  ;;  %v8278_v34 = vld [vmem:[#allocation13 + $0x74] sm:$0xf0]  ;;  %v7381_v35 = vld [vmem:[#allocation13 + $0x1e0] sm:$0xf]  ;;  %v7018_v38 = vor.u32 %v8133_v30, %v7015_v32 }
  0x4c   :  { %1229 = vmatpush.bf16.msrb.mxu2 %v8889_v55  ;;  %1242 = vmatpush.bf16.msrb.mxu3 %v8892_v59  ;;  %v8326_v36 = vld [vmem:[#allocation13 + $0x1f4] sm:$0xf0]  ;;  %v8917_v39 = vor.u32 %v8278_v34, %v7189_v33  ;;  %v8130_v41 = vld [vmem:[#allocation8 + $0x54] sm:$0xf0]  ;;  %v8127_v43 = vld [vmem:[#allocation8 + $0x44] sm:$0xf] }
  0x4d   :  { %v6989_v40 = vld [vmem:[#allocation8 + $0x40] sm:$0xf]  ;;  %v8920_v44 = vor.u32 %v8326_v36, %v7381_v35  ;;  %v6991_v45 = vld [vmem:[#allocation8 + $0x58] sm:$0xf0]  ;;  %v7165_v47 = vld [vmem:[#allocation13 + $0x30] sm:$0xf] }
  0x4e   :  { %523 = vmatpush.bf16.msrb.mxu0 %v7086_v1  ;;  %13177 = vst [vmem:[#allocation41_spill] sm:$0xff] %v8917_v39  ;;  %v8272_v48 = vld [vmem:[#allocation13 + $0x44] sm:$0xf0]  ;;  %v7357_v49 = vld [vmem:[#allocation13 + $0x1b0] sm:$0xf]  ;;  %v6990_v51 = vor.u32 %v8130_v41, %v6989_v40  ;;  %v6994_v56 = vor.u32 %v8127_v43, %v6991_v45 }
  0x4f   :  { %536 = vmatpush.bf16.msrb.mxu1 %v7090_v2  ;;  %13178 = vst [vmem:[#allocation42_spill] sm:$0xff] %v8920_v44  ;;  %v8320_v50 = vld [vmem:[#allocation13 + $0x1c4] sm:$0xf0]  ;;  %v8124_v54 = vld [vmem:[#allocation8 + $0x24] sm:$0xf0]  ;;  %v8923_v57 = vor.u32 %v8272_v48, %v7165_v47  ;;  %v12537_v48 = vmov 0  }
  0x50   :  { %1230 = vmatpush.bf16.msrb.mxu2 %v8899_v3  ;;  %1243 = vmatpush.bf16.msrb.mxu3 %v8902_v7  ;;  %v6965_v53 = vld [vmem:[#allocation8 + $0x10] sm:$0xf]  ;;  %v8121_v58 = vld [vmem:[#allocation8 + $0x14] sm:$0xf]  ;;  %v6967_v60 = vld [vmem:[#allocation8 + $0x28] sm:$0xf0]  ;;  %v8926_v62 = vor.u32 %v8320_v50, %v7357_v49 }
  0x51   :  { %13179 = vst [vmem:[#allocation43_spill] sm:$0xff] %v8923_v57  ;;  %v7141_v61 = vld [vmem:[#allocation13] sm:$0xf]  ;;  %v8266_v63 = vld [vmem:[#allocation13 + $0x14] sm:$0xf0]  ;;  %v6966_v6 = vor.u32 %v8124_v54, %v6965_v53  ;;  %v6970_v11 = vor.u32 %v8121_v58, %v6967_v60 }
  0x52   :  { %524 = vmatpush.bf16.msrb.mxu0 %v7062_v13  ;;  %13180 = vst [vmem:[#allocation44_spill] sm:$0xff] %v8926_v62  ;;  %v7333_v0 = vld [vmem:[#allocation13 + $0x180] sm:$0xf]  ;;  %v8314_v1 = vld [vmem:[#allocation13 + $0x194] sm:$0xf0]  ;;  %v8929_v12 = vor.u32 %v8266_v63, %v7141_v61 }
  0x53   :  { %537 = vmatpush.bf16.msrb.mxu1 %v7066_v14  ;;  %v8305_v2 = vld [vmem:[#allocation13 + $0x154] sm:$0xf]  ;;  %v7311_v4 = vld [vmem:[#allocation13 + $0x168] sm:$0xf0]  ;;  %v7317_v9 = vld [vmem:[#allocation13 + $0x158] sm:$0xf]  ;;  %v8932_v16 = vor.u32 %v8314_v1, %v7333_v0 }
  0x54   :  { %1231 = vmatpush.bf16.msrb.mxu2 %v8905_v15  ;;  %1244 = vmatpush.bf16.msrb.mxu3 %v8908_v19  ;;  %v8353_v5 = vld [vmem:[#allocation13 + $0x2d4] sm:$0xf]  ;;  %v7503_v8 = vld [vmem:[#allocation13 + $0x2e8] sm:$0xf0]  ;;  %v8309_v10 = vld [vmem:[#allocation13 + $0x16c] sm:$0xf0]  ;;  %v8934_v17 = vor.u32 %v8305_v2, %v7311_v4 }
  0x55   :  { %13181 = vst [vmem:[#allocation45_spill] sm:$0xff] %v8929_v12  ;;  %v7509_v13 = vld [vmem:[#allocation13 + $0x2d8] sm:$0xf]  ;;  %v8357_v14 = vld [vmem:[#allocation13 + $0x2ec] sm:$0xf0]  ;;  %v8936_v18 = vor.u32 %v8353_v5, %v7503_v8  ;;  %v8938_v20 = vor.u32 %v8309_v10, %v7317_v9 }
  0x56   :  { %525 = vmatpush.bf16.msrb.mxu0 %v7038_v25  ;;  %13182 = vst [vmem:[#allocation46_spill] sm:$0xff] %v8932_v16  ;;  %v8299_v21 = vld [vmem:[#allocation13 + $0x124] sm:$0xf]  ;;  %v7287_v22 = vld [vmem:[#allocation13 + $0x138] sm:$0xf0]  ;;  %v8940_v24 = vor.u32 %v8357_v14, %v7509_v13 }
  0x57   :  { %538 = vmatpush.bf16.msrb.mxu1 %v7042_v26  ;;  %13183 = vst [vmem:[#allocation47_spill] sm:$0xff] %v8934_v17  ;;  %v8347_v23 = vld [vmem:[#allocation13 + $0x2a4] sm:$0xf]  ;;  %v7479_v25 = vld [vmem:[#allocation13 + $0x2b8] sm:$0xf0]  ;;  %v8945_v32 = vor.u32 %v8299_v21, %v7287_v22 }
  0x58   :  { %1232 = vmatpush.bf16.msrb.mxu2 %v8911_v27  ;;  %1245 = vmatpush.bf16.msrb.mxu3 %v8914_v31  ;;  %13184 = vst [vmem:[#allocation48_spill] sm:$0xff] %v8936_v18  ;;  %v7293_v26 = vld [vmem:[#allocation13 + $0x128] sm:$0xf]  ;;  %v8303_v28 = vld [vmem:[#allocation13 + $0x13c] sm:$0xf0]  ;;  %v8949_v34 = vor.u32 %v8347_v23, %v7479_v25 }
  0x59   :  { %13185 = vst [vmem:[#allocation49_spill] sm:$0xff] %v8938_v20  ;;  %v7485_v29 = vld [vmem:[#allocation13 + $0x2a8] sm:$0xf]  ;;  %v8351_v30 = vld [vmem:[#allocation13 + $0x2bc] sm:$0xf0]  ;;  %v8951_v35 = vor.u32 %v8303_v28, %v7293_v26 }
  0x5a   :  { %526 = vmatpush.bf16.msrb.mxu0 %v7014_v37  ;;  %13186 = vst [vmem:[#allocation50_spill] sm:$0xff] %v8940_v24  ;;  %v8293_v33 = vld [vmem:[#allocation13 + $0xf4] sm:$0xf]  ;;  %v7263_v36 = vld [vmem:[#allocation13 + $0x108] sm:$0xf0] }
  0x5b   :  { %539 = vmatpush.bf16.msrb.mxu1 %v7018_v38  ;;  %13187 = vst [vmem:[#allocation51_spill] sm:$0xff] %v8945_v32  ;;  %v8341_v37 = vld [vmem:[#allocation13 + $0x274] sm:$0xf]  ;;  %v8955_v38 = vor.u32 %v8351_v30, %v7485_v29  ;;  %v7455_v40 = vld [vmem:[#allocation13 + $0x288] sm:$0xf0]  ;;  %v8960_v49 = vor.u32 %v8293_v33, %v7263_v36 }
  0x5c   :  { %1233 = vmatpush.bf16.msrb.mxu2 %v8917_v39  ;;  %1246 = vmatpush.bf16.msrb.mxu3 %v8920_v44  ;;  %13188 = vst [vmem:[#allocation52_spill] sm:$0xff] %v8949_v34  ;;  %v7269_v41 = vld [vmem:[#allocation13 + $0xf8] sm:$0xf]  ;;  %v8297_v43 = vld [vmem:[#allocation13 + $0x10c] sm:$0xf0]  ;;  %v8965_v50 = vor.u32 %v8341_v37, %v7455_v40 }
  0x5d   :  { %13189 = vst [vmem:[#allocation53_spill] sm:$0xff] %v8951_v35  ;;  %v7461_v45 = vld [vmem:[#allocation13 + $0x278] sm:$0xf]  ;;  %v8345_v47 = vld [vmem:[#allocation13 + $0x28c] sm:$0xf0] }
  0x5e   :  { %527 = vmatpush.bf16.msrb.mxu0 %v6990_v51  ;;  %13190 = vst [vmem:[#allocation54_spill] sm:$0xff] %v8955_v38  ;;  %v8967_v51 = vor.u32 %v8297_v43, %v7269_v41  ;;  %v7239_v53 = vld [vmem:[#allocation13 + $0xd8] sm:$0xf0]  ;;  %v8335_v54 = vld [vmem:[#allocation13 + $0x244] sm:$0xf] }
  0x5f   :  { %540 = vmatpush.bf16.msrb.mxu1 %v6994_v56  ;;  %13191 = vst [vmem:[#allocation55_spill] sm:$0xff] %v8960_v49  ;;  %v8970_v56 = vor.u32 %v8345_v47, %v7461_v45  ;;  %v7431_v58 = vld [vmem:[#allocation13 + $0x258] sm:$0xf0]  ;;  %v7245_v60 = vld [vmem:[#allocation13 + $0xc8] sm:$0xf] }
  0x60   :  { %1234 = vmatpush.bf16.msrb.mxu2 %v8923_v57  ;;  %1247 = vmatpush.bf16.msrb.mxu3 %v8926_v62  ;;  %13192 = vst [vmem:[#allocation56_spill] sm:$0xff] %v8965_v50  ;;  %v8291_v61 = vld [vmem:[#allocation13 + $0xdc] sm:$0xf0]  ;;  %v7437_v63 = vld [vmem:[#allocation13 + $0x248] sm:$0xf]  ;;  %v8977_v2 = vor.u32 %v8335_v54, %v7431_v58 }
  0x61   :  { %13193 = vst [vmem:[#allocation57_spill] sm:$0xff] %v8967_v51  ;;  %v8339_v0 = vld [vmem:[#allocation13 + $0x25c] sm:$0xf0]  ;;  %v8979_v4 = vor.u32 %v8291_v61, %v7245_v60  ;;  %v8281_v5 = vld [vmem:[#allocation13 + $0x94] sm:$0xf] }
  0x62   :  { %528 = vmatpush.bf16.msrb.mxu0 %v6966_v6  ;;  %13194 = vst [vmem:[#allocation58_spill] sm:$0xff] %v8970_v56  ;;  %v7215_v6 = vld [vmem:[#allocation13 + $0xa8] sm:$0xf0]  ;;  %v8329_v8 = vld [vmem:[#allocation13 + $0x214] sm:$0xf]  ;;  %v8982_v9 = vor.u32 %v8339_v0, %v7437_v63 }
  0x63   :  { %541 = vmatpush.bf16.msrb.mxu1 %v6970_v11  ;;  %13196 = vst [vmem:[#allocation60_spill] sm:$0xff] %v8977_v2  ;;  %v7407_v10 = vld [vmem:[#allocation13 + $0x228] sm:$0xf0]  ;;  %v7221_v11 = vld [vmem:[#allocation13 + $0x98] sm:$0xf]  ;;  %v8985_v22 = vor.u32 %v8281_v5, %v7215_v6 }
  0x64   :  { %1235 = vmatpush.bf16.msrb.mxu2 %v8929_v12  ;;  %1248 = vmatpush.bf16.msrb.mxu3 %v8932_v16  ;;  %13197 = vst [vmem:[#allocation61_spill] sm:$0xff] %v8979_v4  ;;  %v8285_v13 = vld [vmem:[#allocation13 + $0xac] sm:$0xf0]  ;;  %v7413_v14 = vld [vmem:[#allocation13 + $0x218] sm:$0xf]  ;;  %v8989_v23 = vor.u32 %v8329_v8, %v7407_v10 }
  0x65   :  { %529 = vmatmul.bf16.vlgmr.msrb.gmra.mxu0 %v8886_v52  ;;  %13198 = vst [vmem:[#allocation62_spill] sm:$0xff] %v8982_v9  ;;  %v8333_v21 = vld [vmem:[#allocation13 + $0x22c] sm:$0xf0]  ;;  %v8991_v25 = vor.u32 %v8285_v13, %v7221_v11  ;;  %v8275_v26 = vld [vmem:[#allocation13 + $0x64] sm:$0xf] }
  0x66   :  { %1254 = vmatpush.bf16.msra.mxu0 %v8934_v17  ;;  %542 = vmatmul.bf16.vlgmr.msrb.gmra.mxu1 %v8886_v52  ;;  %v8287_v52 = vld [vmem:[#allocation13 + $0xc4] sm:$0xf]  ;;  %13199 = vst [vmem:[#allocation63_spill] sm:$0xff] %v8985_v22  ;;  %v7191_v28 = vld [vmem:[#allocation13 + $0x78] sm:$0xf0]  ;;  %v8994_v30 = vor.u32 %v8333_v21, %v7413_v14 }
  0x67   :  { %1267 = vmatpush.bf16.msra.mxu1 %v8936_v18  ;;  %1236 = vmatmul.bf16.vlgmr.msrb.gmra.mxu2 %v12537_v48  ;;  %v8973_v1 = vor.u32 %v8287_v52, %v7239_v53  ;;  %13200 = vst [vmem:[#allocation64_spill] sm:$0xff] %v8989_v23  ;;  %v8323_v29 = vld [vmem:[#allocation13 + $0x1e4] sm:$0xf]  ;;  %v7383_v33 = vld [vmem:[#allocation13 + $0x1f8] sm:$0xf0]  ;;  %v8997_v43 = vor.u32 %v8275_v26, %v7191_v28 }
  0x68   :  { %1280 = vmatpush.bf16.msra.mxu2 %v8938_v20  ;;  %1293 = vmatpush.bf16.msra.mxu3 %v8940_v24  ;;  %13201 = vst [vmem:[#allocation65_spill] sm:$0xff] %v8991_v25  ;;  %v7197_v36 = vld [vmem:[#allocation13 + $0x68] sm:$0xf]  ;;  %v8279_v37 = vld [vmem:[#allocation13 + $0x7c] sm:$0xf0]  ;;  %v9001_v45 = vor.u32 %v8323_v29, %v7383_v33 }
  0x69   :  { %1249 = vmatmul.bf16.vlgmr.msrb.gmra.mxu3 %v12537_v48  ;;  %13195 = vst [vmem:[#allocation59_spill] sm:$0xff] %v8973_v1  ;;  %v7389_v40 = vld [vmem:[#allocation13 + $0x1e8] sm:$0xf]  ;;  %v8327_v41 = vld [vmem:[#allocation13 + $0x1fc] sm:$0xf0]  ;;  %v9003_v47 = vor.u32 %v8279_v37, %v7197_v36 }
  0x6a   :  { %1255 = vmatpush.bf16.msra.mxu0 %v8945_v32  ;;  %13202 = vst [vmem:[#allocation66_spill] sm:$0xff] %v8994_v30  ;;  %v8269_v52 = vld [vmem:[#allocation13 + $0x34] sm:$0xf]  ;;  %v7167_v53 = vld [vmem:[#allocation13 + $0x48] sm:$0xf0]  ;;  %v9006_v58 = vor.u32 %v8327_v41, %v7389_v40 }
  0x6b   :  { %1268 = vmatpush.bf16.msra.mxu1 %v8949_v34  ;;  %13203 = vst [vmem:[#allocation67_spill] sm:$0xff] %v8997_v43  ;;  %v8317_v54 = vld [vmem:[#allocation13 + $0x1b4] sm:$0xf]  ;;  %v7359_v60 = vld [vmem:[#allocation13 + $0x1c8] sm:$0xf0]  ;;  %v9009_v6 = vor.u32 %v8269_v52, %v7167_v53 }
  0x6c   :  { %1281 = vmatpush.bf16.msra.mxu2 %v8951_v35  ;;  %1294 = vmatpush.bf16.msra.mxu3 %v8955_v38  ;;  %13204 = vst [vmem:[#allocation68_spill] sm:$0xff] %v9001_v45  ;;  %v7173_v61 = vld [vmem:[#allocation13 + $0x38] sm:$0xf]  ;;  %v8273_v63 = vld [vmem:[#allocation13 + $0x4c] sm:$0xf0]  ;;  %v9013_v11 = vor.u32 %v8317_v54, %v7359_v60 }
  0x6d   :  { %13205 = vst [vmem:[#allocation69_spill] sm:$0xff] %v9003_v47  ;;  %v7365_v0 = vld [vmem:[#allocation13 + $0x1b8] sm:$0xf]  ;;  %v8321_v5 = vld [vmem:[#allocation13 + $0x1cc] sm:$0xf0]  ;;  %v9015_v13 = vor.u32 %v8273_v63, %v7173_v61 }
  0x6e   :  { %1256 = vmatpush.bf16.msra.mxu0 %v8960_v49  ;;  %13206 = vst [vmem:[#allocation70_spill] sm:$0xff] %v9006_v58  ;;  %v8263_v8 = vld [vmem:[#allocation13 + $0x4] sm:$0xf]  ;;  %v7143_v10 = vld [vmem:[#allocation13 + $0x18] sm:$0xf0]  ;;  %v9018_v28 = vor.u32 %v8321_v5, %v7365_v0 }
  0x6f   :  { %1269 = vmatpush.bf16.msra.mxu1 %v8965_v50  ;;  %13207 = vst [vmem:[#allocation71_spill] sm:$0xff] %v9009_v6  ;;  %v8311_v14 = vld [vmem:[#allocation13 + $0x184] sm:$0xf]  ;;  %v7335_v21 = vld [vmem:[#allocation13 + $0x198] sm:$0xf0]  ;;  %v9021_v52 = vor.u32 %v8263_v8, %v7143_v10 }
  0x70   :  { %1282 = vmatpush.bf16.msra.mxu2 %v8967_v51  ;;  %1295 = vmatpush.bf16.msra.mxu3 %v8970_v56  ;;  %13208 = vst [vmem:[#allocation72_spill] sm:$0xff] %v9013_v11  ;;  %v7149_v26 = vld [vmem:[#allocation13 + $0x8] sm:$0xf]  ;;  %v8267_v29 = vld [vmem:[#allocation13 + $0x1c] sm:$0xf0]  ;;  %v9025_v61 = vor.u32 %v8311_v14, %v7335_v21 }
  0x71   :  { %13209 = vst [vmem:[#allocation73_spill] sm:$0xff] %v9015_v13  ;;  %v7341_v33 = vld [vmem:[#allocation13 + $0x188] sm:$0xf]  ;;  %v8315_v36 = vld [vmem:[#allocation13 + $0x19c] sm:$0xf0]  ;;  %v9027_v63 = vor.u32 %v8267_v29, %v7149_v26 }
  0x72   :  { %1257 = vmatpush.bf16.msra.mxu0 %v8973_v1  ;;  %13210 = vst [vmem:[#allocation74_spill] sm:$0xff] %v9018_v28  ;;  %v8306_v37 = vld [vmem:[#allocation13 + $0x15c] sm:$0xf]  ;;  %v7319_v40 = vld [vmem:[#allocation13 + $0x170] sm:$0xf0]  ;;  %v9030_v48 = vor.u32 %v8315_v36, %v7341_v33 }
  0x73   :  { %1270 = vmatpush.bf16.msra.mxu1 %v8977_v2  ;;  %v8354_v41 = vld [vmem:[#allocation13 + $0x2dc] sm:$0xf]  ;;  %13211 = vst [vmem:[#allocation75_spill] sm:$0xff] %v9021_v52  ;;  %v7511_v53 = vld [vmem:[#allocation13 + $0x2f0] sm:$0xf0] }
  0x74   :  { %1283 = vmatpush.bf16.msra.mxu2 %v8979_v4  ;;  %1296 = vmatpush.bf16.msra.mxu3 %v8982_v9  ;;  %v7325_v54 = vld [vmem:[#allocation13 + $0x160] sm:$0xf]  ;;  %v8310_v60 = vld [vmem:[#allocation13 + $0x174] sm:$0xf0]  ;;  %13212 = vst [vmem:[#allocation76_spill] sm:$0xff] %v9025_v61  ;;  %v9034_v8 = vor.u32 %v8354_v41, %v7511_v53 }
  0x75   :  { %13213 = vst [vmem:[#allocation77_spill] sm:$0xff] %v9027_v63  ;;  %v7517_v0 = vld [vmem:[#allocation13 + $0x2e0] sm:$0xf]  ;;  %v8358_v5 = vld [vmem:[#allocation13 + $0x2f4] sm:$0xf0]  ;;  %v9036_v10 = vor.u32 %v8310_v60, %v7325_v54 }
  0x76   :  { %1258 = vmatpush.bf16.msra.mxu0 %v8985_v22  ;;  %13214 = vst [vmem:[#allocation78_spill] sm:$0xff] %v9030_v48  ;;  %v9039_v14 = vor.u32 %v8358_v5, %v7517_v0  ;;  %v7487_v21 = vld [vmem:[#allocation13 + $0x2c0] sm:$0xf0]  ;;  %v7301_v26 = vld [vmem:[#allocation13 + $0x130] sm:$0xf] }
  0x77   :  { %1271 = vmatpush.bf16.msra.mxu1 %v8989_v23  ;;  %13216 = vst [vmem:[#allocation80_spill] sm:$0xff] %v9034_v8  ;;  %v8304_v29 = vld [vmem:[#allocation13 + $0x144] sm:$0xf0]  ;;  %v7493_v33 = vld [vmem:[#allocation13 + $0x2b0] sm:$0xf] }
  0x78   :  { %1284 = vmatpush.bf16.msra.mxu2 %v8991_v25  ;;  %1297 = vmatpush.bf16.msra.mxu3 %v8994_v30  ;;  %13217 = vst [vmem:[#allocation81_spill] sm:$0xff] %v9036_v10  ;;  %v8352_v36 = vld [vmem:[#allocation13 + $0x2c4] sm:$0xf0]  ;;  %v9051_v41 = vor.u32 %v8304_v29, %v7301_v26  ;;  %v8294_v53 = vld [vmem:[#allocation13 + $0xfc] sm:$0xf] }
  0x79   :  { %13218 = vst [vmem:[#allocation82_spill] sm:$0xff] %v9039_v14  ;;  %v7271_v54 = vld [vmem:[#allocation13 + $0x110] sm:$0xf0]  ;;  %v8342_v60 = vld [vmem:[#allocation13 + $0x27c] sm:$0xf]  ;;  %v9054_v0 = vor.u32 %v8352_v36, %v7493_v33 }
  0x7a   :  { %1259 = vmatpush.bf16.msra.mxu0 %v8997_v43  ;;  %13221 = vst [vmem:[#allocation85_spill] sm:$0xff] %v9051_v41  ;;  %v7463_v5 = vld [vmem:[#allocation13 + $0x290] sm:$0xf0]  ;;  %v8288_v29 = vld [vmem:[#allocation13 + $0xcc] sm:$0xf] }
  0x7b   :  { %1272 = vmatpush.bf16.msra.mxu1 %v9001_v45  ;;  %13222 = vst [vmem:[#allocation86_spill] sm:$0xff] %v9054_v0  ;;  %v7247_v33 = vld [vmem:[#allocation13 + $0xe0] sm:$0xf0]  ;;  %v8336_v36 = vld [vmem:[#allocation13 + $0x24c] sm:$0xf] }
  0x7c   :  { %1285 = vmatpush.bf16.msra.mxu2 %v9003_v47  ;;  %1298 = vmatpush.bf16.msra.mxu3 %v9006_v58  ;;  %v9032_v58 = vor.u32 %v8306_v37, %v7319_v40  ;;  %v8300_v47 = vld [vmem:[#allocation13 + $0x12c] sm:$0xf]  ;;  %v8349_v30 = vld [vmem:[#allocation13 + $0x2b4] sm:$0xf]  ;;  %v7573_v45 = vld [vmem:[#allocation11 + $0x60] sm:$0xf] }
  0x7d   :  { %v7375_v25 = vld [vmem:[#allocation13 + $0x1d8] sm:$0xf0]  ;;  %v7549_v43 = vld [vmem:[#allocation11 + $0x30] sm:$0xf]  ;;  %v7525_v9 = vld [vmem:[#allocation11] sm:$0xf] }
  0x7e   :  { %1260 = vmatpush.bf16.msra.mxu0 %v9009_v6  ;;  %13215 = vst [vmem:[#allocation79_spill] sm:$0xff] %v9032_v58  ;;  %v8348_v6 = vld [vmem:[#allocation13 + $0x2ac] sm:$0xf]  ;;  %v8209_v4 = vld [vmem:[#allocation11 + $0x154] sm:$0xf] }
  0x7f   :  { %1273 = vmatpush.bf16.msra.mxu1 %v9013_v11  ;;  %v7295_v11 = vld [vmem:[#allocation13 + $0x140] sm:$0xf0]  ;;  %v9049_v40 = vor.u32 %v8348_v6, %v7487_v21  ;;  %v9060_v6 = vor.u32 %v8294_v53, %v7271_v54  ;;  %v9065_v21 = vor.u32 %v8342_v60, %v7463_v5  ;;  %v7253_v53 = vld [vmem:[#allocation13 + $0xd0] sm:$0xf]  ;;  %v8292_v54 = vld [vmem:[#allocation13 + $0xe4] sm:$0xf0] }
  0x80   :  { %1286 = vmatpush.bf16.msra.mxu2 %v9015_v13  ;;  %1299 = vmatpush.bf16.msra.mxu3 %v9018_v28  ;;  %v9045_v37 = vor.u32 %v8300_v47, %v7295_v11  ;;  %v13223_v47 = vmov 0   ;;  %v7469_v11 = vld [vmem:[#allocation13 + $0x280] sm:$0xf]  ;;  %v8346_v28 = vld [vmem:[#allocation13 + $0x294] sm:$0xf0] }
  0x81   :  { %13220 = vst [vmem:[#allocation84_spill] sm:$0xff] %v9049_v40  ;;  %v8282_v60 = vld [vmem:[#allocation13 + $0x9c] sm:$0xf]  ;;  %v8355_v13 = vld [vmem:[#allocation13 + $0x2e4] sm:$0xf] }
  0x82   :  { %1261 = vmatpush.bf16.msra.mxu0 %v9021_v52  ;;  %13219 = vst [vmem:[#allocation83_spill] sm:$0xff] %v9045_v37  ;;  %v8330_v5 = vld [vmem:[#allocation13 + $0x21c] sm:$0xf]  ;;  %v8301_v52 = vld [vmem:[#allocation13 + $0x134] sm:$0xf] }
  0x83   :  { %1274 = vmatpush.bf16.msra.mxu1 %v9025_v61  ;;  %13224 = vst [vmem:[#allocation87_spill] sm:$0xff] %v9060_v6  ;;  %v7327_v61 = vld [vmem:[#allocation13 + $0x178] sm:$0xf0]  ;;  %v7695_v22 = vld [vmem:[#allocation11 + $0x168] sm:$0xf0] }
  0x84   :  { %1287 = vmatpush.bf16.msra.mxu2 %v9027_v63  ;;  %1300 = vmatpush.bf16.msra.mxu3 %v9030_v48  ;;  %v7277_v48 = vld [vmem:[#allocation13 + $0x100] sm:$0xf]  ;;  %v8298_v63 = vld [vmem:[#allocation13 + $0x114] sm:$0xf0]  ;;  %13225 = vst [vmem:[#allocation88_spill] sm:$0xff] %v9065_v21 }
  0x85   :  { %1262 = vmatmul.bf16.vlgmr.msra.gmra.mxu0 %v13223_v47  ;;  %v9067_v26 = vor.u32 %v8298_v63, %v7277_v48  ;;  %v9079_v63 = vor.u32 %v8292_v54, %v7253_v53  ;;  %v8276_v53 = vld [vmem:[#allocation13 + $0x6c] sm:$0xf]  ;;  %v8257_v56 = vld [vmem:[#allocation11 + $0x2d4] sm:$0xf]  ;;  %v8261_v2 = vld [vmem:[#allocation11 + $0x2ec] sm:$0xf0] }
  0x86   :  { %1306 = vmatpush.bf16.msrb.mxu0 %v9032_v58  ;;  %1275 = vmatmul.bf16.vlgmr.msra.gmra.mxu1 %v13223_v47  ;;  %v8307_v58 = vld [vmem:[#allocation13 + $0x164] sm:$0xf]  ;;  %v7623_v50 = vld [vmem:[#allocation11 + $0xd8] sm:$0xf0]  ;;  %v7629_v24 = vld [vmem:[#allocation11 + $0xc8] sm:$0xf] }
  0x87   :  { %1319 = vmatpush.bf16.msrb.mxu1 %v9034_v8  ;;  %1288 = vmatmul.bf16.vlgmr.msra.gmra.mxu2 %v13223_v47  ;;  %13226 = vst [vmem:[#allocation89_spill] sm:$0xff] %v9067_v26  ;;  %v8340_v8 = vld [vmem:[#allocation13 + $0x264] sm:$0xf0]  ;;  %v8203_v1 = vld [vmem:[#allocation11 + $0x124] sm:$0xf] }
  0x88   :  { %1332 = vmatpush.bf16.msrb.mxu2 %v9036_v10  ;;  %1345 = vmatpush.bf16.msrb.mxu3 %v9039_v14  ;;  %v9070_v14 = vor.u32 %v8346_v28, %v7469_v11  ;;  %v7439_v10 = vld [vmem:[#allocation13 + $0x260] sm:$0xf0]  ;;  %13230 = vst [vmem:[#allocation93_spill] sm:$0xff] %v9079_v63  ;;  %v7223_v28 = vld [vmem:[#allocation13 + $0xb0] sm:$0xf0] }
  0x89   :  { %1301 = vmatmul.bf16.vlgmr.msra.gmra.mxu3 %v13223_v47  ;;  %v9077_v48 = vor.u32 %v8336_v36, %v7439_v10  ;;  %v8251_v38 = vld [vmem:[#allocation11 + $0x2a4] sm:$0xf]  ;;  %v8195_v34 = vld [vmem:[#allocation11 + $0xdc] sm:$0xf0]  ;;  %v7821_v20 = vld [vmem:[#allocation11 + $0x248] sm:$0xf] }
  0x8a   :  { %1307 = vmatpush.bf16.msrb.mxu0 %v9045_v37  ;;  %13227 = vst [vmem:[#allocation90_spill] sm:$0xff] %v9070_v14  ;;  %v7445_v37 = vld [vmem:[#allocation13 + $0x250] sm:$0xf]  ;;  %v8239_v35 = vld [vmem:[#allocation11 + $0x244] sm:$0xf] }
  0x8b   :  { %1320 = vmatpush.bf16.msrb.mxu1 %v9049_v40  ;;  %v9073_v40 = vor.u32 %v8288_v29, %v7247_v33  ;;  %13229 = vst [vmem:[#allocation92_spill] sm:$0xff] %v9077_v48  ;;  %v9082_v11 = vor.u32 %v8340_v8, %v7445_v37  ;;  %v7421_v29 = vld [vmem:[#allocation13 + $0x220] sm:$0xf]  ;;  %v8334_v33 = vld [vmem:[#allocation13 + $0x234] sm:$0xf0] }
  0x8c   :  { %1333 = vmatpush.bf16.msrb.mxu2 %v9051_v41  ;;  %1346 = vmatpush.bf16.msrb.mxu3 %v9054_v0  ;;  %v7415_v0 = vld [vmem:[#allocation13 + $0x230] sm:$0xf0]  ;;  %v7229_v41 = vld [vmem:[#allocation13 + $0xa0] sm:$0xf]  ;;  %v7199_v8 = vld [vmem:[#allocation13 + $0x80] sm:$0xf0]  ;;  %v9094_v54 = vor.u32 %v8334_v33, %v7421_v29 }
  0x8d   :  { %13228 = vst [vmem:[#allocation91_spill] sm:$0xff] %v9073_v40  ;;  %v9089_v10 = vor.u32 %v8330_v5, %v7415_v0  ;;  %v8324_v37 = vld [vmem:[#allocation13 + $0x1ec] sm:$0xf]  ;;  %v7175_v5 = vld [vmem:[#allocation13 + $0x50] sm:$0xf0] }
  0x8e   :  { %1308 = vmatpush.bf16.msrb.mxu0 %v9060_v6  ;;  %13231 = vst [vmem:[#allocation94_spill] sm:$0xff] %v9082_v11  ;;  %v8286_v6 = vld [vmem:[#allocation13 + $0xb4] sm:$0xf0]  ;;  %v8318_v29 = vld [vmem:[#allocation13 + $0x1bc] sm:$0xf] }
  0x8f   :  { %1321 = vmatpush.bf16.msrb.mxu1 %v9065_v21  ;;  %v9085_v21 = vor.u32 %v8282_v60, %v7223_v28  ;;  %13233 = vst [vmem:[#allocation96_spill] sm:$0xff] %v9089_v10  ;;  %v9091_v36 = vor.u32 %v8286_v6, %v7229_v41  ;;  %v7397_v60 = vld [vmem:[#allocation13 + $0x1f0] sm:$0xf]  ;;  %v8328_v28 = vld [vmem:[#allocation13 + $0x204] sm:$0xf0] }
  0x90   :  { %1334 = vmatpush.bf16.msrb.mxu2 %v9067_v26  ;;  %1347 = vmatpush.bf16.msrb.mxu3 %v9070_v14  ;;  %13235 = vst [vmem:[#allocation98_spill] sm:$0xff] %v9094_v54  ;;  %v7391_v14 = vld [vmem:[#allocation13 + $0x200] sm:$0xf0]  ;;  %v7205_v26 = vld [vmem:[#allocation13 + $0x70] sm:$0xf]  ;;  %v9106_v33 = vor.u32 %v8328_v28, %v7397_v60 }
  0x91   :  { %13232 = vst [vmem:[#allocation95_spill] sm:$0xff] %v9085_v21  ;;  %v9101_v41 = vor.u32 %v8324_v37, %v7391_v14  ;;  %v8270_v6 = vld [vmem:[#allocation13 + $0x3c] sm:$0xf]  ;;  %v8264_v14 = vld [vmem:[#allocation13 + $0xc] sm:$0xf] }
  0x92   :  { %1309 = vmatpush.bf16.msrb.mxu0 %v9073_v40  ;;  %13234 = vst [vmem:[#allocation97_spill] sm:$0xff] %v9091_v36  ;;  %v8280_v40 = vld [vmem:[#allocation13 + $0x84] sm:$0xf0]  ;;  %v7151_v37 = vld [vmem:[#allocation13 + $0x20] sm:$0xf0] }
  0x93   :  { %1322 = vmatpush.bf16.msrb.mxu1 %v9077_v48  ;;  %v9097_v48 = vor.u32 %v8276_v53, %v7199_v8  ;;  %13237 = vst [vmem:[#allocation100_spill] sm:$0xff] %v9101_v41  ;;  %v9103_v0 = vor.u32 %v8280_v40, %v7205_v26  ;;  %v7373_v53 = vld [vmem:[#allocation13 + $0x1c0] sm:$0xf]  ;;  %v8322_v8 = vld [vmem:[#allocation13 + $0x1d4] sm:$0xf0] }
  0x94   :  { %1335 = vmatpush.bf16.msrb.mxu2 %v9079_v63  ;;  %1348 = vmatpush.bf16.msrb.mxu3 %v9082_v11  ;;  %13239 = vst [vmem:[#allocation102_spill] sm:$0xff] %v9106_v33  ;;  %v7367_v11 = vld [vmem:[#allocation13 + $0x1d0] sm:$0xf0]  ;;  %v7181_v63 = vld [vmem:[#allocation13 + $0x40] sm:$0xf] }
  0x95   :  { %13236 = vst [vmem:[#allocation99_spill] sm:$0xff] %v9097_v48  ;;  %v9113_v40 = vor.u32 %v8318_v29, %v7367_v11  ;;  %v8312_v60 = vld [vmem:[#allocation13 + $0x18c] sm:$0xf]  ;;  %v7343_v28 = vld [vmem:[#allocation13 + $0x1a0] sm:$0xf0] }
  0x96   :  { %1310 = vmatpush.bf16.msrb.mxu0 %v9085_v21  ;;  %13238 = vst [vmem:[#allocation101_spill] sm:$0xff] %v9103_v0  ;;  %v8274_v21 = vld [vmem:[#allocation13 + $0x54] sm:$0xf0]  ;;  %v7519_v11 = vld [vmem:[#allocation13 + $0x2f8] sm:$0xf0]  ;;  %v9125_v29 = vor.u32 %v8312_v60, %v7343_v28 }
  0x97   :  { %1323 = vmatpush.bf16.msrb.mxu1 %v9089_v10  ;;  %v9109_v10 = vor.u32 %v8270_v6, %v7175_v5  ;;  %13241 = vst [vmem:[#allocation104_spill] sm:$0xff] %v9113_v40  ;;  %v9115_v26 = vor.u32 %v8274_v21, %v7181_v63  ;;  %v7349_v6 = vld [vmem:[#allocation13 + $0x190] sm:$0xf]  ;;  %v8316_v5 = vld [vmem:[#allocation13 + $0x1a4] sm:$0xf0] }
  0x98   :  { %1336 = vmatpush.bf16.msrb.mxu2 %v9091_v36  ;;  %1349 = vmatpush.bf16.msrb.mxu3 %v9094_v54  ;;  %v7157_v54 = vld [vmem:[#allocation13 + $0x10] sm:$0xf]  ;;  %v9118_v36 = vor.u32 %v8322_v8, %v7373_v53  ;;  %v8212_v63 = vld [vmem:[#allocation11 + $0x164] sm:$0xf0]  ;;  %13245 = vst [vmem:[#allocation108_spill] sm:$0xff] %v9125_v29 }
  0x99   :  { %13240 = vst [vmem:[#allocation103_spill] sm:$0xff] %v9109_v10  ;;  %v7693_v21 = vld [vmem:[#allocation11 + $0x150] sm:$0xf]  ;;  %v8206_v28 = vld [vmem:[#allocation11 + $0x134] sm:$0xf0] }
  0x9a   :  { %1311 = vmatpush.bf16.msrb.mxu0 %v9097_v48  ;;  %13242 = vst [vmem:[#allocation105_spill] sm:$0xff] %v9115_v26  ;;  %v8268_v48 = vld [vmem:[#allocation13 + $0x24] sm:$0xf0]  ;;  %v7885_v8 = vld [vmem:[#allocation11 + $0x2d0] sm:$0xf] }
  0x9b   :  { %1324 = vmatpush.bf16.msrb.mxu1 %v9101_v41  ;;  %13243 = vst [vmem:[#allocation106_spill] sm:$0xff] %v9118_v36  ;;  %v9127_v53 = vor.u32 %v8268_v48, %v7157_v54  ;;  %v9130_v41 = vor.u32 %v8316_v5, %v7349_v6  ;;  %v7495_v48 = vld [vmem:[#allocation13 + $0x2c8] sm:$0xf0]  ;;  %v7669_v54 = vld [vmem:[#allocation11 + $0x120] sm:$0xf] }
  0x9c   :  { %1337 = vmatpush.bf16.msrb.mxu2 %v9103_v0  ;;  %1350 = vmatpush.bf16.msrb.mxu3 %v9106_v33  ;;  %v9121_v0 = vor.u32 %v8264_v14, %v7151_v37  ;;  %v8260_v33 = vld [vmem:[#allocation11 + $0x2e4] sm:$0xf0]  ;;  %v9134_v14 = vor.u32 %v8355_v13, %v7519_v11  ;;  %v9136_v37 = vor.u32 %v8212_v63, %v7693_v21  ;;  %v8295_v5 = vld [vmem:[#allocation13 + $0x104] sm:$0xf]  ;;  %v7279_v11 = vld [vmem:[#allocation13 + $0x118] sm:$0xf0] }
  0x9d   :  { %13246 = vst [vmem:[#allocation109_spill] sm:$0xff] %v9127_v53  ;;  %v9139_v60 = vor.u32 %v8260_v33, %v7885_v8  ;;  %v9149_v33 = vor.u32 %v8349_v30, %v7495_v48  ;;  %v9151_v6 = vor.u32 %v8206_v28, %v7669_v54  ;;  %v8343_v21 = vld [vmem:[#allocation13 + $0x284] sm:$0xf]  ;;  %v7471_v8 = vld [vmem:[#allocation13 + $0x298] sm:$0xf0]  ;;  %v9160_v30 = vor.u32 %v8295_v5, %v7279_v11 }
  0x9e   :  { %1312 = vmatpush.bf16.msrb.mxu0 %v9109_v10  ;;  %13244 = vst [vmem:[#allocation107_spill] sm:$0xff] %v9121_v0  ;;  %v9132_v10 = vor.u32 %v8307_v58, %v7327_v61  ;;  %v7861_v58 = vld [vmem:[#allocation11 + $0x2a0] sm:$0xf]  ;;  %v8254_v61 = vld [vmem:[#allocation11 + $0x2b4] sm:$0xf0]  ;;  %v9165_v48 = vor.u32 %v8343_v21, %v7471_v8 }
  0x9f   :  { %1325 = vmatpush.bf16.msrb.mxu1 %v9113_v40  ;;  %13247 = vst [vmem:[#allocation110_spill] sm:$0xff] %v9130_v41  ;;  %v7303_v40 = vld [vmem:[#allocation13 + $0x148] sm:$0xf0]  ;;  %v9154_v63 = vor.u32 %v8254_v61, %v7861_v58  ;;  %v8289_v28 = vld [vmem:[#allocation13 + $0xd4] sm:$0xf] }
  0xa0   :  { %1338 = vmatpush.bf16.msrb.mxu2 %v9115_v26  ;;  %1351 = vmatpush.bf16.msrb.mxu3 %v9118_v36  ;;  %13248 = vst [vmem:[#allocation111_spill] sm:$0xff] %v9132_v10  ;;  %v9145_v13 = vor.u32 %v8301_v52, %v7303_v40  ;;  %v7837_v52 = vld [vmem:[#allocation11 + $0x270] sm:$0xf]  ;;  %v8248_v40 = vld [vmem:[#allocation11 + $0x284] sm:$0xf0] }
  0xa1   :  { %13249 = vst [vmem:[#allocation112_spill] sm:$0xff] %v9134_v14  ;;  %v7255_v58 = vld [vmem:[#allocation13 + $0xe8] sm:$0xf0]  ;;  %v8337_v61 = vld [vmem:[#allocation13 + $0x254] sm:$0xf]  ;;  %v9170_v36 = vor.u32 %v8248_v40, %v7837_v52 }
  0xa2   :  { %13250 = vst [vmem:[#allocation113_spill] sm:$0xff] %v9136_v37  ;;  %1313 = vmatpush.bf16.msrb.mxu0 %v9121_v0  ;;  %v7447_v26 = vld [vmem:[#allocation13 + $0x268] sm:$0xf0]  ;;  %v7621_v5 = vld [vmem:[#allocation11 + $0xc0] sm:$0xf] }
  0xa3   :  { %13251 = vst [vmem:[#allocation114_spill] sm:$0xff] %v9139_v60  ;;  %1326 = vmatpush.bf16.msrb.mxu1 %v9125_v29  ;;  %v8194_v11 = vld [vmem:[#allocation11 + $0xd4] sm:$0xf0]  ;;  %v8283_v21 = vld [vmem:[#allocation13 + $0xa4] sm:$0xf] }
  0xa4   :  { %1339 = vmatpush.bf16.msrb.mxu2 %v9127_v53  ;;  %1352 = vmatpush.bf16.msrb.mxu3 %v9130_v41  ;;  %13252 = vst [vmem:[#allocation115_spill] sm:$0xff] %v9145_v13  ;;  %v7645_v41 = vld [vmem:[#allocation11 + $0xf0] sm:$0xf]  ;;  %v8200_v53 = vld [vmem:[#allocation11 + $0x104] sm:$0xf0] }
  0xa5   :  { %13253 = vst [vmem:[#allocation116_spill] sm:$0xff] %v9149_v33  ;;  %1314 = vmatmul.bf16.vlgmr.msrb.gmra.mxu0 %v13223_v47  ;;  %v9167_v54 = vor.u32 %v8200_v53, %v7645_v41  ;;  %v9177_v41 = vor.u32 %v8337_v61, %v7447_v26  ;;  %v9179_v53 = vor.u32 %v8194_v11, %v7621_v5  ;;  %v7231_v8 = vld [vmem:[#allocation13 + $0xb8] sm:$0xf0]  ;;  %v8331_v52 = vld [vmem:[#allocation13 + $0x224] sm:$0xf] }
  0xa6   :  { %1358 = vmatpush.bf16.msra.mxu0 %v9132_v10  ;;  %13254 = vst [vmem:[#allocation117_spill] sm:$0xff] %v9151_v6  ;;  %1327 = vmatmul.bf16.vlgmr.msrb.gmra.mxu1 %v13223_v47  ;;  %v7423_v10 = vld [vmem:[#allocation13 + $0x238] sm:$0xf0]  ;;  %v7597_v29 = vld [vmem:[#allocation11 + $0x90] sm:$0xf] }
  0xa7   :  { %1371 = vmatpush.bf16.msra.mxu1 %v9134_v14  ;;  %13255 = vst [vmem:[#allocation118_spill] sm:$0xff] %v9154_v63  ;;  %1340 = vmatmul.bf16.vlgmr.msrb.gmra.mxu2 %v13223_v47  ;;  %v8242_v14 = vld [vmem:[#allocation11 + $0x254] sm:$0xf0]  ;;  %v9189_v26 = vor.u32 %v8331_v52, %v7423_v10  ;;  %v8277_v5 = vld [vmem:[#allocation13 + $0x74] sm:$0xf] }
  0xa8   :  { %1864 = vmatpush.bf16.msra.mxu2 %v9136_v37  ;;  %1877 = vmatpush.bf16.msra.mxu3 %v9139_v60  ;;  %13256 = vst [vmem:[#allocation119_spill] sm:$0xff] %v9160_v30  ;;  %v7399_v0 = vld [vmem:[#allocation13 + $0x208] sm:$0xf0]  ;;  %v7183_v52 = vld [vmem:[#allocation13 + $0x58] sm:$0xf0] }
  0xa9   :  { %1353 = vmatmul.bf16.vlgmr.msrb.gmra.mxu3 %v13223_v47  ;;  %13257 = vst [vmem:[#allocation120_spill] sm:$0xff] %v9165_v48  ;;  %v8243_v32 = vld [vmem:[#allocation11 + $0x25c] sm:$0xf0]  ;;  %v8233_v18 = vld [vmem:[#allocation11 + $0x214] sm:$0xf] }
  0xaa   :  { %1359 = vmatpush.bf16.msra.mxu0 %v9145_v13  ;;  %13258 = vst [vmem:[#allocation121_spill] sm:$0xff] %v9167_v54  ;;  %v7813_v13 = vld [vmem:[#allocation11 + $0x240] sm:$0xf]  ;;  %v7791_v17 = vld [vmem:[#allocation11 + $0x228] sm:$0xf0]  ;;  %v9286_v57 = vor.u32 %v8243_v32, %v7821_v20 }
  0xab   :  { %1372 = vmatpush.bf16.msra.mxu1 %v9149_v33  ;;  %13259 = vst [vmem:[#allocation122_spill] sm:$0xff] %v9170_v36  ;;  %v9173_v33 = vor.u32 %v8289_v28, %v7255_v58  ;;  %v9182_v40 = vor.u32 %v8242_v14, %v7813_v13  ;;  %v7789_v28 = vld [vmem:[#allocation11 + $0x210] sm:$0xf]  ;;  %v8236_v58 = vld [vmem:[#allocation11 + $0x224] sm:$0xf0]  ;;  %v9295_v20 = vor.u32 %v8233_v18, %v7791_v17 }
  0xac   :  { %1865 = vmatpush.bf16.msra.mxu2 %v9151_v6  ;;  %1878 = vmatpush.bf16.msra.mxu3 %v9154_v63  ;;  %13261 = vst [vmem:[#allocation124_spill] sm:$0xff] %v9177_v41  ;;  %v7207_v14 = vld [vmem:[#allocation13 + $0x88] sm:$0xf0]  ;;  %v8325_v13 = vld [vmem:[#allocation13 + $0x1f4] sm:$0xf]  ;;  %v9194_v11 = vor.u32 %v8236_v58, %v7789_v28 }
  0xad   :  { %13260 = vst [vmem:[#allocation123_spill] sm:$0xff] %v9173_v33  ;;  %v9201_v10 = vor.u32 %v8325_v13, %v7399_v0  ;;  %v8319_v28 = vld [vmem:[#allocation13 + $0x1c4] sm:$0xf]  ;;  %v8265_v0 = vld [vmem:[#allocation13 + $0x14] sm:$0xf] }
  0xae   :  { %1360 = vmatpush.bf16.msra.mxu0 %v9160_v30  ;;  %13262 = vst [vmem:[#allocation125_spill] sm:$0xff] %v9179_v53  ;;  %v8188_v30 = vld [vmem:[#allocation11 + $0xa4] sm:$0xf0]  ;;  %v7159_v13 = vld [vmem:[#allocation13 + $0x28] sm:$0xf0] }
  0xaf   :  { %1373 = vmatpush.bf16.msra.mxu1 %v9165_v48  ;;  %13263 = vst [vmem:[#allocation126_spill] sm:$0xff] %v9182_v40  ;;  %v9185_v48 = vor.u32 %v8283_v21, %v7231_v8  ;;  %v9191_v61 = vor.u32 %v8188_v30, %v7597_v29  ;;  %v7765_v21 = vld [vmem:[#allocation11 + $0x1e0] sm:$0xf]  ;;  %v8230_v8 = vld [vmem:[#allocation11 + $0x1f4] sm:$0xf0] }
  0xb0   :  { %1866 = vmatpush.bf16.msra.mxu2 %v9167_v54  ;;  %1879 = vmatpush.bf16.msra.mxu3 %v9170_v36  ;;  %13265 = vst [vmem:[#allocation128_spill] sm:$0xff] %v9189_v26  ;;  %v8271_v30 = vld [vmem:[#allocation13 + $0x44] sm:$0xf]  ;;  %v9206_v58 = vor.u32 %v8230_v8, %v7765_v21  ;;  %v8313_v21 = vld [vmem:[#allocation13 + $0x194] sm:$0xf] }
  0xb1   :  { %13264 = vst [vmem:[#allocation127_spill] sm:$0xff] %v9185_v48  ;;  %v7351_v8 = vld [vmem:[#allocation13 + $0x1a8] sm:$0xf0]  ;;  %v7773_v39 = vld [vmem:[#allocation11 + $0x1e8] sm:$0xf] }
  0xb2   :  { %1361 = vmatpush.bf16.msra.mxu0 %v9173_v33  ;;  %13266 = vst [vmem:[#allocation129_spill] sm:$0xff] %v9194_v11  ;;  %v8182_v33 = vld [vmem:[#allocation11 + $0x74] sm:$0xf0]  ;;  %v8231_v31 = vld [vmem:[#allocation11 + $0x1fc] sm:$0xf0] }
  0xb3   :  { %1374 = vmatpush.bf16.msra.mxu1 %v9177_v41  ;;  %v9197_v41 = vor.u32 %v8277_v5, %v7207_v14  ;;  %13268 = vst [vmem:[#allocation131_spill] sm:$0xff] %v9201_v10  ;;  %v9203_v29 = vor.u32 %v8182_v33, %v7573_v45  ;;  %v7741_v5 = vld [vmem:[#allocation11 + $0x1b0] sm:$0xf]  ;;  %v8224_v14 = vld [vmem:[#allocation11 + $0x1c4] sm:$0xf0]  ;;  %v9213_v45 = vor.u32 %v8319_v28, %v7375_v25 }
  0xb4   :  { %1867 = vmatpush.bf16.msra.mxu2 %v9179_v53  ;;  %1880 = vmatpush.bf16.msra.mxu3 %v9182_v40  ;;  %v9218_v23 = vor.u32 %v8224_v14, %v7741_v5  ;;  %v7887_v25 = vld [vmem:[#allocation11 + $0x2e8] sm:$0xf0]  ;;  %v9225_v28 = vor.u32 %v8313_v21, %v7351_v8  ;;  %v7893_v14 = vld [vmem:[#allocation11 + $0x2d8] sm:$0xf]  ;;  %v8207_v8 = vld [vmem:[#allocation11 + $0x13c] sm:$0xf0] }
  0xb5   :  { %13267 = vst [vmem:[#allocation130_spill] sm:$0xff] %v9197_v41  ;;  %v9239_v21 = vor.u32 %v8261_v2, %v7893_v14  ;;  %v8173_v18 = vld [vmem:[#allocation11 + $0x34] sm:$0xf]  ;;  %v8210_v55 = vld [vmem:[#allocation11 + $0x15c] sm:$0xf] }
  0xb6   :  { %1362 = vmatpush.bf16.msra.mxu0 %v9185_v48  ;;  %v8176_v48 = vld [vmem:[#allocation11 + $0x44] sm:$0xf0]  ;;  %13270 = vst [vmem:[#allocation133_spill] sm:$0xff] %v9213_v45  ;;  %v8221_v3 = vld [vmem:[#allocation11 + $0x1b4] sm:$0xf] }
  0xb7   :  { %1375 = vmatpush.bf16.msra.mxu1 %v9189_v26  ;;  %v9209_v26 = vor.u32 %v8271_v30, %v7183_v52  ;;  %v9215_v33 = vor.u32 %v8176_v48, %v7549_v43  ;;  %v7717_v30 = vld [vmem:[#allocation11 + $0x180] sm:$0xf]  ;;  %v8218_v52 = vld [vmem:[#allocation11 + $0x194] sm:$0xf0]  ;;  %v8213_v48 = vld [vmem:[#allocation11 + $0x16c] sm:$0xf0] }
  0xb8   :  { %1868 = vmatpush.bf16.msra.mxu2 %v9191_v61  ;;  %1881 = vmatpush.bf16.msra.mxu3 %v9194_v11  ;;  %v7701_v43 = vld [vmem:[#allocation11 + $0x158] sm:$0xf]  ;;  %13272 = vst [vmem:[#allocation135_spill] sm:$0xff] %v9225_v28  ;;  %v9230_v51 = vor.u32 %v8218_v52, %v7717_v30  ;;  %v8197_v30 = vld [vmem:[#allocation11 + $0xf4] sm:$0xf] }
  0xb9   :  { %13269 = vst [vmem:[#allocation132_spill] sm:$0xff] %v9209_v26  ;;  %v7703_v46 = vld [vmem:[#allocation11 + $0x170] sm:$0xf0]  ;;  %v8258_v42 = vld [vmem:[#allocation11 + $0x2dc] sm:$0xf] }
  0xba   :  { %1363 = vmatpush.bf16.msra.mxu0 %v9197_v41  ;;  %v8170_v41 = vld [vmem:[#allocation11 + $0x14] sm:$0xf0]  ;;  %13275 = vst [vmem:[#allocation138_spill] sm:$0xff] %v9239_v21  ;;  %165 = dma.hbm_to_vmem [thread:$0]  %s161_s25, 6144, %s163_s15, [#allocation4] }
  0xbb   :  { %1376 = vmatpush.bf16.msra.mxu1 %v9201_v10  ;;  %v9221_v10 = vor.u32 %v8265_v0, %v7159_v13  ;;  %v9227_v5 = vor.u32 %v8170_v41, %v7525_v9  ;;  %v9234_v0 = vor.u32 %v8257_v56, %v7887_v25  ;;  %v9236_v13 = vor.u32 %v8213_v48, %v7701_v43  ;;  %v7863_v9 = vld [vmem:[#allocation11 + $0x2b8] sm:$0xf0]  ;;  %v7677_v41 = vld [vmem:[#allocation11 + $0x128] sm:$0xf]  ;;  %v7647_v25 = vld [vmem:[#allocation11 + $0x108] sm:$0xf0] }
  0xbc   :  { %1869 = vmatpush.bf16.msra.mxu2 %v9203_v29  ;;  %1882 = vmatpush.bf16.msra.mxu3 %v9206_v58  ;;  %v9249_v2 = vor.u32 %v8251_v38, %v7863_v9  ;;  %v9251_v52 = vor.u32 %v8207_v8, %v7677_v41  ;;  %v8245_v43 = vld [vmem:[#allocation11 + $0x274] sm:$0xf]  ;;  %v9253_v48 = vld [vmem:[#allocation10] sm:$0x3f]  ;;  %v8249_v38 = vld [vmem:[#allocation11 + $0x28c] sm:$0xf0]  ;;  %v9262_v9 = vor.u32 %v8197_v30, %v7647_v25 }
  0xbd   :  { %13271 = vst [vmem:[#allocation134_spill] sm:$0xff] %v9221_v10  ;;  %v8191_v41 = vld [vmem:[#allocation11 + $0xc4] sm:$0xf]  ;;  %v217_v8 = vperm.slane %v9253_v48, 0  ;;  %v218_v49 = vperm.slane %v9253_v48, 1  ;;  %v219_v44 = vperm.slane %v9253_v48, 2 }
  0xbe   :  { %1364 = vmatpush.bf16.msra.mxu0 %v9209_v26  ;;  %v9232_v26 = vor.u32 %v8209_v4, %v7695_v22  ;;  %13274 = vst [vmem:[#allocation137_spill] sm:$0xff] %v9236_v13  ;;  %v7869_v4 = vld [vmem:[#allocation11 + $0x2a8] sm:$0xf]  ;;  %v8255_v22 = vld [vmem:[#allocation11 + $0x2bc] sm:$0xf0] }
  0xbf   :  { %1377 = vmatpush.bf16.msra.mxu1 %v9213_v45  ;;  %v7671_v45 = vld [vmem:[#allocation11 + $0x138] sm:$0xf0]  ;;  %13276 = vst [vmem:[#allocation139_spill] sm:$0xff] %v9251_v52  ;;  %v9257_v14 = vor.u32 %v8255_v22, %v7869_v4 }
  0xc0   :  { %1870 = vmatpush.bf16.msra.mxu2 %v9215_v33  ;;  %1883 = vmatpush.bf16.msra.mxu3 %v9218_v23  ;;  %13273 = vst [vmem:[#allocation136_spill] sm:$0xff] %v9232_v26  ;;  %v9245_v56 = vor.u32 %v8203_v1, %v7671_v45  ;;  %v7839_v1 = vld [vmem:[#allocation11 + $0x288] sm:$0xf0]  ;;  %v7653_v45 = vld [vmem:[#allocation11 + $0xf8] sm:$0xf] }
  0xc1   :  { %13277 = vst [vmem:[#allocation140_spill] sm:$0xff] %v9257_v14  ;;  %v9268_v4 = vor.u32 %v8245_v43, %v7839_v1  ;;  %v7815_v25 = vld [vmem:[#allocation11 + $0x258] sm:$0xf0]  ;;  %v9277_v43 = vor.u32 %v8191_v41, %v7623_v50  ;;  %v7605_v50 = vld [vmem:[#allocation11 + $0x98] sm:$0xf] }
  0xc2   :  { %1365 = vmatpush.bf16.msra.mxu0 %v9221_v10  ;;  %v7845_v10 = vld [vmem:[#allocation11 + $0x278] sm:$0xf]  ;;  %v478_v16 = vpop.f32.mrf.mxu0  ;;  %v9281_v12 = vor.u32 %v8239_v35, %v7815_v25  ;;  %13281 = vst [vmem:[#allocation144_spill] sm:$0xff] %v9286_v57  ;;  %v8189_v41 = vld [vmem:[#allocation11 + $0xac] sm:$0xf0] }
  0xc3   :  { %1378 = vmatpush.bf16.msra.mxu1 %v9225_v28  ;;  %v8201_v28 = vld [vmem:[#allocation11 + $0x10c] sm:$0xf0]  ;;  %v9274_v30 = vor.u32 %v8249_v38, %v7845_v10  ;;  %v479_v1 = vadd.f32 %v478_v16, %v217_v8  ;;  %v9283_v10 = vor.u32 %v8195_v34, %v7629_v24  ;;  %v7599_v38 = vld [vmem:[#allocation11 + $0xa8] sm:$0xf0]  ;;  %v7797_v16 = vld [vmem:[#allocation11 + $0x218] sm:$0xf]  ;;  %v9297_v32 = vor.u32 %v8189_v41, %v7605_v50 }
  0xc4   :  { %1871 = vmatpush.bf16.msra.mxu2 %v9227_v5  ;;  %1884 = vmatpush.bf16.msra.mxu3 %v9230_v51  ;;  %v9270_v22 = vor.u32 %v8201_v28, %v7653_v45  ;;  %v8185_v28 = vld [vmem:[#allocation11 + $0x94] sm:$0xf]  ;;  %v491_v45 = vpop.f32.mrf.mxu1  ;;  %v8237_v8 = vld [vmem:[#allocation11 + $0x22c] sm:$0xf0]  ;;  %v220_v34 = vperm.slane %v9253_v48, 3  ;;  %13282 = vst [vmem:[#allocation145_spill] sm:$0xff] %v9295_v20 }
  0xc5   :  { %1366 = vmatmul.bf16.vlgmr.msra.gmra.mxu0 %v13223_v47  ;;  %13279 = vst [vmem:[#allocation142_spill] sm:$0xff] %v9274_v30  ;;  %v492_v62 = vadd.f32 %v491_v45, %v218_v49  ;;  %v9290_v24 = vor.u32 %v8185_v28, %v7599_v38  ;;  %v8179_v35 = vld [vmem:[#allocation11 + $0x64] sm:$0xf]  ;;  %v7575_v49 = vld [vmem:[#allocation11 + $0x78] sm:$0xf0] }
  0xc6   :  { %1890 = vmatpush.bf16.msrb.mxu0 %v9232_v26  ;;  %1379 = vmatmul.bf16.vlgmr.msra.gmra.mxu1 %v13223_v47  ;;  %13278 = vst [vmem:[#allocation141_spill] sm:$0xff] %v9270_v22  ;;  %v8227_v25 = vld [vmem:[#allocation11 + $0x1e4] sm:$0xf]  ;;  %v7581_v28 = vld [vmem:[#allocation11 + $0x68] sm:$0xf]  ;;  %v9303_v17 = vor.u32 %v8179_v35, %v7575_v49 }
  0xc7   :  { %1903 = vmatpush.bf16.msrb.mxu1 %v9234_v0  ;;  %1872 = vmatmul.bf16.vlgmr.msra.gmra.mxu2 %v13223_v47  ;;  %13280 = vst [vmem:[#allocation143_spill] sm:$0xff] %v9283_v10  ;;  %v8183_v45 = vld [vmem:[#allocation11 + $0x7c] sm:$0xf0]  ;;  %v7551_v50 = vld [vmem:[#allocation11 + $0x48] sm:$0xf0] }
  0xc8   :  { %1916 = vmatpush.bf16.msrb.mxu2 %v9236_v13  ;;  %1929 = vmatpush.bf16.msrb.mxu3 %v9239_v21  ;;  %547 = vst [vmem:[#allocation2] sm:$0xff] %v479_v1  ;;  %v7767_v1 = vld [vmem:[#allocation11 + $0x1f8] sm:$0xf0]  ;;  %v7557_v35 = vld [vmem:[#allocation11 + $0x38] sm:$0xf] }
  0xc9   :  { %1885 = vmatmul.bf16.vlgmr.msra.gmra.mxu3 %v13223_v47  ;;  %548 = vst [vmem:[#allocation2 + $0x8] sm:$0xff] %v492_v62  ;;  %v9300_v62 = vor.u32 %v8237_v8, %v7797_v16  ;;  %v9307_v16 = vor.u32 %v8227_v25, %v7767_v1  ;;  %v9309_v8 = vor.u32 %v8183_v45, %v7581_v28  ;;  %v8177_v49 = vld [vmem:[#allocation11 + $0x4c] sm:$0xf0]  ;;  %v8167_v25 = vld [vmem:[#allocation11 + $0x4] sm:$0xf] }
  0xca   :  { %1891 = vmatpush.bf16.msrb.mxu0 %v9245_v56  ;;  %13283 = vst [vmem:[#allocation146_spill] sm:$0xff] %v9297_v32  ;;  %v504_v38 = vpop.f32.mrf.mxu2  ;;  %v480_v27 = vpop.f32.mrf.mxu0  ;;  %v7527_v1 = vld [vmem:[#allocation11 + $0x18] sm:$0xf0]  ;;  %v9321_v28 = vor.u32 %v8177_v49, %v7557_v35  ;;  %v7533_v45 = vld [vmem:[#allocation11 + $0x8] sm:$0xf] }
  0xcb   :  { %1904 = vmatpush.bf16.msrb.mxu1 %v9249_v2  ;;  %13284 = vst [vmem:[#allocation147_spill] sm:$0xff] %v9300_v62  ;;  %v505_v19 = vadd.f32 %v504_v38, %v219_v44  ;;  %v7743_v27 = vld [vmem:[#allocation11 + $0x1c8] sm:$0xf0]  ;;  %v9312_v44 = vor.u32 %v8231_v31, %v7773_v39  ;;  %v7749_v38 = vld [vmem:[#allocation11 + $0x1b8] sm:$0xf] }
  0xcc   :  { %1917 = vmatpush.bf16.msrb.mxu2 %v9251_v52  ;;  %1930 = vmatpush.bf16.msrb.mxu3 %v9257_v14  ;;  %v517_v15 = vpop.f32.mrf.mxu3  ;;  %13285 = vst [vmem:[#allocation148_spill] sm:$0xff] %v9303_v17  ;;  %v493_v41 = vpop.f32.mrf.mxu1  ;;  %v8215_v31 = vld [vmem:[#allocation11 + $0x184] sm:$0xf]  ;;  %v7719_v39 = vld [vmem:[#allocation11 + $0x198] sm:$0xf0] }
  0xcd   :  { %v518_v7 = vadd.f32 %v517_v15, %v220_v34  ;;  %13286 = vst [vmem:[#allocation149_spill] sm:$0xff] %v9307_v16  ;;  %v8225_v15 = vld [vmem:[#allocation11 + $0x1cc] sm:$0xf0]  ;;  %v9315_v34 = vor.u32 %v8173_v18, %v7551_v50  ;;  %v8171_v41 = vld [vmem:[#allocation11 + $0x1c] sm:$0xf0] }
  0xce   :  { %1892 = vmatpush.bf16.msrb.mxu0 %v9262_v9  ;;  %13287 = vst [vmem:[#allocation150_spill] sm:$0xff] %v9309_v8  ;;  %v7725_v18 = vld [vmem:[#allocation11 + $0x188] sm:$0xf]  ;;  %v8219_v50 = vld [vmem:[#allocation11 + $0x19c] sm:$0xf0] }
  0xcf   :  { %1905 = vmatpush.bf16.msrb.mxu1 %v9268_v4  ;;  %549 = vst [vmem:[#allocation2 + $0x10] sm:$0xff] %v505_v19  ;;  %v9319_v19 = vor.u32 %v8221_v3, %v7743_v27  ;;  %v9327_v3 = vor.u32 %v8167_v25, %v7527_v1  ;;  %v7895_v27 = vld [vmem:[#allocation11 + $0x2f0] sm:$0xf0]  ;;  %v7709_v35 = vld [vmem:[#allocation11 + $0x160] sm:$0xf] }
  0xd0   :  { %1918 = vmatpush.bf16.msrb.mxu2 %v9270_v22  ;;  %1931 = vmatpush.bf16.msrb.mxu3 %v9274_v30  ;;  %13288 = vst [vmem:[#allocation151_spill] sm:$0xff] %v9312_v44  ;;  %v8214_v49 = vld [vmem:[#allocation11 + $0x174] sm:$0xf0]  ;;  %v9340_v25 = vor.u32 %v8258_v42, %v7895_v27  ;;  %v7655_v27 = vld [vmem:[#allocation11 + $0x110] sm:$0xf0] }
  0xd1   :  { %550 = vst [vmem:[#allocation2 + $0x18] sm:$0xff] %v518_v7  ;;  %v9324_v7 = vor.u32 %v8225_v15, %v7749_v38  ;;  %v9331_v38 = vor.u32 %v8215_v31, %v7719_v39  ;;  %v9333_v15 = vor.u32 %v8171_v41, %v7533_v45  ;;  %v9342_v1 = vor.u32 %v8214_v49, %v7709_v35  ;;  %v7871_v39 = vld [vmem:[#allocation11 + $0x2c0] sm:$0xf0]  ;;  %v7685_v45 = vld [vmem:[#allocation11 + $0x130] sm:$0xf] }
  0xd2   :  { %1893 = vmatpush.bf16.msrb.mxu0 %v9277_v43  ;;  %13289 = vst [vmem:[#allocation152_spill] sm:$0xff] %v9315_v34  ;;  %v506_v59 = vpop.f32.mrf.mxu2  ;;  %v8208_v41 = vld [vmem:[#allocation11 + $0x144] sm:$0xf0]  ;;  %v8246_v35 = vld [vmem:[#allocation11 + $0x27c] sm:$0xf] }
  0xd3   :  { %1906 = vmatpush.bf16.msrb.mxu1 %v9281_v12  ;;  %13290 = vst [vmem:[#allocation153_spill] sm:$0xff] %v9319_v19  ;;  %v7901_v59 = vld [vmem:[#allocation11 + $0x2e0] sm:$0xf] }
  0xd4   :  { %1919 = vmatpush.bf16.msrb.mxu2 %v9283_v10  ;;  %1932 = vmatpush.bf16.msrb.mxu3 %v9286_v57  ;;  %13291 = vst [vmem:[#allocation154_spill] sm:$0xff] %v9321_v28 }
  0xd5   :  { %13292 = vst [vmem:[#allocation155_spill] sm:$0xff] %v9324_v7 }
  0xd6   :  { %1894 = vmatpush.bf16.msrb.mxu0 %v9290_v24  ;;  %13293 = vst [vmem:[#allocation156_spill] sm:$0xff] %v9327_v3 }
  0xd7   :  { %1907 = vmatpush.bf16.msrb.mxu1 %v9295_v20  ;;  %13294 = vst [vmem:[#allocation157_spill] sm:$0xff] %v9331_v38 }
  0xd8   :  { %1920 = vmatpush.bf16.msrb.mxu2 %v9297_v32  ;;  %1933 = vmatpush.bf16.msrb.mxu3 %v9300_v62  ;;  %13295 = vst [vmem:[#allocation158_spill] sm:$0xff] %v9333_v15 }
  0xd9   :  { %13298 = vst [vmem:[#allocation161_spill] sm:$0xff] %v9340_v25 }
  0xda   :  { %1895 = vmatpush.bf16.msrb.mxu0 %v9303_v17  ;;  %13299 = vst [vmem:[#allocation162_spill] sm:$0xff] %v9342_v1  ;;  %v8252_v17 = vld [vmem:[#allocation11 + $0x2ac] sm:$0xf] }
  0xdb   :  { %1908 = vmatpush.bf16.msrb.mxu1 %v9307_v16  ;;  %v519_v16 = vpop.f32.mrf.mxu3 }
  0xdc   :  { %1921 = vmatpush.bf16.msrb.mxu2 %v9309_v8  ;;  %1934 = vmatpush.bf16.msrb.mxu3 %v9312_v44  ;;  %v8262_v44 = vld [vmem:[#allocation11 + $0x2f4] sm:$0xf0]  ;;  %v9336_v16 = vor.u32 %v8219_v50, %v7725_v18  ;;  %v8204_v8 = vld [vmem:[#allocation11 + $0x12c] sm:$0xf]  ;;  %v9357_v18 = vor.u32 %v8208_v41, %v7685_v45  ;;  %v8198_v50 = vld [vmem:[#allocation11 + $0xfc] sm:$0xf] }
  0xdd   :  { %v9345_v31 = vor.u32 %v8262_v44, %v7901_v59  ;;  %v9355_v44 = vor.u32 %v8252_v17, %v7871_v39  ;;  %v7847_v59 = vld [vmem:[#allocation11 + $0x290] sm:$0xf0]  ;;  %v7853_v17 = vld [vmem:[#allocation11 + $0x280] sm:$0xf]  ;;  %v8250_v39 = vld [vmem:[#allocation11 + $0x294] sm:$0xf0]  ;;  %v9367_v45 = vor.u32 %v8198_v50, %v7655_v27 }
  0xde   :  { %1896 = vmatpush.bf16.msrb.mxu0 %v9315_v34  ;;  %13296 = vst [vmem:[#allocation159_spill] sm:$0xff] %v9336_v16  ;;  %v9338_v34 = vor.u32 %v8210_v55, %v7703_v46  ;;  %v7877_v46 = vld [vmem:[#allocation11 + $0x2b0] sm:$0xf]  ;;  %v8256_v55 = vld [vmem:[#allocation11 + $0x2c4] sm:$0xf0]  ;;  %v221_v41 = vperm.slane %v9253_v48, 4 }
  0xdf   :  { %1909 = vmatpush.bf16.msrb.mxu1 %v9319_v19  ;;  %v7679_v19 = vld [vmem:[#allocation11 + $0x140] sm:$0xf0]  ;;  %13300 = vst [vmem:[#allocation163_spill] sm:$0xff] %v9345_v31  ;;  %v9361_v49 = vor.u32 %v8256_v55, %v7877_v46  ;;  %v222_v46 = vperm.slane %v9253_v48, 5  ;;  %v9373_v55 = vor.u32 %v8246_v35, %v7847_v59  ;;  %v7637_v27 = vld [vmem:[#allocation11 + $0xd0] sm:$0xf] }
  0xe0   :  { %1922 = vmatpush.bf16.msrb.mxu2 %v9321_v28  ;;  %1935 = vmatpush.bf16.msrb.mxu3 %v9324_v7  ;;  %13297 = vst [vmem:[#allocation160_spill] sm:$0xff] %v9338_v34  ;;  %v9351_v42 = vor.u32 %v8204_v8, %v7679_v19  ;;  %v7661_v8 = vld [vmem:[#allocation11 + $0x100] sm:$0xf]  ;;  %v8202_v19 = vld [vmem:[#allocation11 + $0x114] sm:$0xf0] }
  0xe1   :  { %13302 = vst [vmem:[#allocation165_spill] sm:$0xff] %v9355_v44  ;;  %v7823_v50 = vld [vmem:[#allocation11 + $0x260] sm:$0xf0]  ;;  %v7829_v48 = vld [vmem:[#allocation11 + $0x250] sm:$0xf] }
  0xe2   :  { %1897 = vmatpush.bf16.msrb.mxu0 %v9327_v3  ;;  %13301 = vst [vmem:[#allocation164_spill] sm:$0xff] %v9351_v42  ;;  %v7799_v3 = vld [vmem:[#allocation11 + $0x230] sm:$0xf0] }
  0xe3   :  { %1910 = vmatpush.bf16.msrb.mxu1 %v9331_v38  ;;  %13303 = vst [vmem:[#allocation166_spill] sm:$0xff] %v9357_v18  ;;  %v8244_v38 = vld [vmem:[#allocation11 + $0x264] sm:$0xf0]  ;;  %v543_v35 = vpop.f32.mrf.mxu1 }
  0xe4   :  { %1923 = vmatpush.bf16.msrb.mxu2 %v9333_v15  ;;  %1936 = vmatpush.bf16.msrb.mxu3 %v9336_v16  ;;  %13304 = vst [vmem:[#allocation167_spill] sm:$0xff] %v9361_v49  ;;  %v8196_v16 = vld [vmem:[#allocation11 + $0xe4] sm:$0xf0]  ;;  %v530_v15 = vpop.f32.mrf.mxu0 }
  0xe5   :  { %1898 = vmatmul.bf16.vlgmr.msrb.gmra.mxu0 %v13223_v47  ;;  %13305 = vst [vmem:[#allocation168_spill] sm:$0xff] %v9367_v45 }
  0xe6   :  { %1942 = vmatpush.bf16.msra.mxu0 %v9338_v34  ;;  %1911 = vmatmul.bf16.vlgmr.msrb.gmra.mxu1 %v13223_v47  ;;  %13306 = vst [vmem:[#allocation169_spill] sm:$0xff] %v9373_v55  ;;  %v8240_v34 = vld [vmem:[#allocation11 + $0x24c] sm:$0xf] }
  0xe7   :  { %1955 = vmatpush.bf16.msra.mxu1 %v9340_v25  ;;  %1924 = vmatmul.bf16.vlgmr.msrb.gmra.mxu2 %v13223_v47  ;;  %v7631_v25 = vld [vmem:[#allocation11 + $0xe0] sm:$0xf0] }
  0xe8   :  { %1968 = vmatpush.bf16.msra.mxu2 %v9342_v1  ;;  %1981 = vmatpush.bf16.msra.mxu3 %v9345_v31  ;;  %v9375_v31 = vor.u32 %v8202_v19, %v7661_v8  ;;  %v8192_v1 = vld [vmem:[#allocation11 + $0xcc] sm:$0xf]  ;;  %v8186_v8 = vld [vmem:[#allocation11 + $0x9c] sm:$0xf]  ;;  %v544_v19 = vadd.f32 %v543_v35, %v222_v46  ;;  %v7589_v35 = vld [vmem:[#allocation11 + $0x70] sm:$0xf] }
  0xe9   :  { %1937 = vmatmul.bf16.vlgmr.msrb.gmra.mxu3 %v13223_v47  ;;  %v9381_v59 = vor.u32 %v8192_v1, %v7631_v25  ;;  %v7613_v25 = vld [vmem:[#allocation11 + $0xa0] sm:$0xf]  ;;  %v8190_v1 = vld [vmem:[#allocation11 + $0xb4] sm:$0xf0] }
  0xea   :  { %1943 = vmatpush.bf16.msra.mxu0 %v9351_v42  ;;  %13307 = vst [vmem:[#allocation170_spill] sm:$0xff] %v9375_v31  ;;  %v9378_v42 = vor.u32 %v8250_v39, %v7853_v17  ;;  %v9385_v17 = vor.u32 %v8240_v34, %v7823_v50  ;;  %v9387_v39 = vor.u32 %v8196_v16, %v7637_v27  ;;  %v8228_v50 = vld [vmem:[#allocation11 + $0x1ec] sm:$0xf] }
  0xeb   :  { %1956 = vmatpush.bf16.msra.mxu1 %v9355_v44  ;;  %13309 = vst [vmem:[#allocation172_spill] sm:$0xff] %v9381_v59  ;;  %v8234_v44 = vld [vmem:[#allocation11 + $0x21c] sm:$0xf]  ;;  %v9399_v16 = vor.u32 %v8190_v1, %v7613_v25  ;;  %v7559_v1 = vld [vmem:[#allocation11 + $0x50] sm:$0xf0] }
  0xec   :  { %1969 = vmatpush.bf16.msra.mxu2 %v9357_v18  ;;  %1982 = vmatpush.bf16.msra.mxu3 %v9361_v49  ;;  %13308 = vst [vmem:[#allocation171_spill] sm:$0xff] %v9378_v42  ;;  %v531_v18 = vadd.f32 %v530_v15, %v221_v41  ;;  %v7607_v49 = vld [vmem:[#allocation11 + $0xb0] sm:$0xf0]  ;;  %v9390_v15 = vor.u32 %v8244_v38, %v7829_v48  ;;  %v7805_v41 = vld [vmem:[#allocation11 + $0x220] sm:$0xf] }
  0xed   :  { %13310 = vst [vmem:[#allocation173_spill] sm:$0xff] %v9385_v17  ;;  %v9393_v46 = vor.u32 %v8186_v8, %v7607_v49  ;;  %v9397_v34 = vor.u32 %v8234_v44, %v7799_v3  ;;  %v7583_v38 = vld [vmem:[#allocation11 + $0x80] sm:$0xf0]  ;;  %v7781_v49 = vld [vmem:[#allocation11 + $0x1f0] sm:$0xf]  ;;  %v545_v3 = vpop.f32.mrf.mxu1 }
  0xee   :  { %1944 = vmatpush.bf16.msra.mxu0 %v9367_v45  ;;  %13311 = vst [vmem:[#allocation174_spill] sm:$0xff] %v9387_v39  ;;  %v7775_v48 = vld [vmem:[#allocation11 + $0x200] sm:$0xf0]  ;;  %v8232_v8 = vld [vmem:[#allocation11 + $0x204] sm:$0xf0] }
  0xef   :  { %1957 = vmatpush.bf16.msra.mxu1 %v9373_v55  ;;  %551 = vst [vmem:[#allocation2 + $0x20] sm:$0xff] %v531_v18  ;;  %v8238_v55 = vld [vmem:[#allocation11 + $0x234] sm:$0xf0]  ;;  %v8180_v18 = vld [vmem:[#allocation11 + $0x6c] sm:$0xf]  ;;  %v9409_v44 = vor.u32 %v8228_v50, %v7775_v48 }
  0xf0   :  { %1970 = vmatpush.bf16.msra.mxu2 %v9375_v31  ;;  %1983 = vmatpush.bf16.msra.mxu3 %v9378_v42  ;;  %13312 = vst [vmem:[#allocation175_spill] sm:$0xff] %v9390_v15  ;;  %v9402_v27 = vor.u32 %v8238_v55, %v7805_v41  ;;  %v8174_v55 = vld [vmem:[#allocation11 + $0x3c] sm:$0xf]  ;;  %v8226_v3 = vld [vmem:[#allocation11 + $0x1d4] sm:$0xf0]  ;;  %v1250_v31 = vpop.f32.mrf.mxu3 }
  0xf1   :  { %552 = vst [vmem:[#allocation2 + $0x28] sm:$0xff] %v544_v19  ;;  %v8184_v19 = vld [vmem:[#allocation11 + $0x84] sm:$0xf0]  ;;  %v8222_v41 = vld [vmem:[#allocation11 + $0x1bc] sm:$0xf] }
  0xf2   :  { %1945 = vmatpush.bf16.msra.mxu0 %v9381_v59  ;;  %13313 = vst [vmem:[#allocation176_spill] sm:$0xff] %v9393_v46  ;;  %v532_v59 = vpop.f32.mrf.mxu0  ;;  %v9411_v25 = vor.u32 %v8184_v19, %v7589_v35  ;;  %v8168_v50 = vld [vmem:[#allocation11 + $0xc] sm:$0xf]  ;;  %v7535_v19 = vld [vmem:[#allocation11 + $0x20] sm:$0xf0] }
  0xf3   :  { %1958 = vmatpush.bf16.msra.mxu1 %v9385_v17  ;;  %13314 = vst [vmem:[#allocation177_spill] sm:$0xff] %v9397_v34  ;;  %v7751_v59 = vld [vmem:[#allocation11 + $0x1d0] sm:$0xf0]  ;;  %v8211_v17 = vld [vmem:[#allocation11 + $0x164] sm:$0xf] }
  0xf4   :  { %1971 = vmatpush.bf16.msra.mxu2 %v9387_v39  ;;  %13315 = vst [vmem:[#allocation178_spill] sm:$0xff] %v9399_v16  ;;  %1984 = vmatpush.bf16.msra.mxu3 %v9390_v15  ;;  %v9405_v39 = vor.u32 %v8180_v18, %v7583_v38  ;;  %v9414_v15 = vor.u32 %v8232_v8, %v7781_v49  ;;  %v8178_v18 = vld [vmem:[#allocation11 + $0x54] sm:$0xf0]  ;;  %v7757_v38 = vld [vmem:[#allocation11 + $0x1c0] sm:$0xf] }
  0xf5   :  { %13316 = vst [vmem:[#allocation179_spill] sm:$0xff] %v9402_v27  ;;  %v9421_v48 = vor.u32 %v8222_v41, %v7751_v59  ;;  %v8216_v49 = vld [vmem:[#allocation11 + $0x18c] sm:$0xf]  ;;  %v7727_v8 = vld [vmem:[#allocation11 + $0x1a0] sm:$0xf0]  ;;  %v1237_v59 = vpop.f32.mrf.mxu2 }
  0xf6   :  { %1946 = vmatpush.bf16.msra.mxu0 %v9393_v46  ;;  %13317 = vst [vmem:[#allocation180_spill] sm:$0xff] %v9405_v39  ;;  %v7565_v46 = vld [vmem:[#allocation11 + $0x40] sm:$0xf]  ;;  %v7711_v42 = vld [vmem:[#allocation11 + $0x178] sm:$0xf0] }
  0xf7   :  { %1959 = vmatpush.bf16.msra.mxu1 %v9397_v34  ;;  %13318 = vst [vmem:[#allocation181_spill] sm:$0xff] %v9409_v44  ;;  %v9417_v34 = vor.u32 %v8174_v55, %v7559_v1  ;;  %v9423_v35 = vor.u32 %v8178_v18, %v7565_v46  ;;  %v7733_v55 = vld [vmem:[#allocation11 + $0x190] sm:$0xf]  ;;  %v8220_v1 = vld [vmem:[#allocation11 + $0x1a4] sm:$0xf0]  ;;  %v9433_v18 = vor.u32 %v8216_v49, %v7727_v8 }
  0xf8   :  { %1972 = vmatpush.bf16.msra.mxu2 %v9399_v16  ;;  %13319 = vst [vmem:[#allocation182_spill] sm:$0xff] %v9411_v25  ;;  %1985 = vmatpush.bf16.msra.mxu3 %v9402_v27  ;;  %v9426_v27 = vor.u32 %v8226_v3, %v7757_v38  ;;  %v7541_v16 = vld [vmem:[#allocation11 + $0x10] sm:$0xf]  ;;  %v8259_v41 = vld [vmem:[#allocation11 + $0x2e4] sm:$0xf]  ;;  %v9438_v3 = vor.u32 %v8220_v1, %v7733_v55 }
  0xf9   :  { %13320 = vst [vmem:[#allocation183_spill] sm:$0xff] %v9414_v15  ;;  %v7903_v46 = vld [vmem:[#allocation11 + $0x2f8] sm:$0xf0] }
  0xfa   :  { %1947 = vmatpush.bf16.msra.mxu0 %v9405_v39  ;;  %13321 = vst [vmem:[#allocation184_spill] sm:$0xff] %v9417_v34  ;;  %v8172_v39 = vld [vmem:[#allocation11 + $0x24] sm:$0xf0]  ;;  %v7663_v49 = vld [vmem:[#allocation11 + $0x118] sm:$0xf0] }
  0xfb   :  { %1960 = vmatpush.bf16.msra.mxu1 %v9409_v44  ;;  %13322 = vst [vmem:[#allocation185_spill] sm:$0xff] %v9421_v48  ;;  %v9435_v38 = vor.u32 %v8172_v39, %v7541_v16  ;;  %v8253_v44 = vld [vmem:[#allocation11 + $0x2b4] sm:$0xf]  ;;  %v9447_v39 = vadd.f32 %v1250_v31, %v1237_v59  ;;  %v8199_v16 = vld [vmem:[#allocation11 + $0x104] sm:$0xf] }
  0xfc   :  { %1973 = vmatpush.bf16.msra.mxu2 %v9411_v25  ;;  %13323 = vst [vmem:[#allocation186_spill] sm:$0xff] %v9423_v35  ;;  %1986 = vmatpush.bf16.msra.mxu3 %v9414_v15  ;;  %v9429_v25 = vor.u32 %v8168_v50, %v7535_v19  ;;  %v9440_v15 = vor.u32 %v8211_v17, %v7711_v42  ;;  %v8205_v50 = vld [vmem:[#allocation11 + $0x134] sm:$0xf]  ;;  %v7687_v19 = vld [vmem:[#allocation11 + $0x148] sm:$0xf0] }
  0xfd   :  { %13324 = vst [vmem:[#allocation187_spill] sm:$0xff] %v9426_v27  ;;  %v9451_v42 = vor.u32 %v8205_v50, %v7687_v19  ;;  %v8247_v31 = vld [vmem:[#allocation11 + $0x284] sm:$0xf]  ;;  %v7855_v8 = vld [vmem:[#allocation11 + $0x298] sm:$0xf0]  ;;  %v1239_v55 = vpop.f32.mrf.mxu2  ;;  %v9463_v1 = vor.u32 %v8199_v16, %v7663_v49  ;;  %v1252_v50 = vpop.f32.mrf.mxu3 }
  0xfe   :  { %1948 = vmatpush.bf16.msra.mxu0 %v9417_v34  ;;  %13325 = vst [vmem:[#allocation188_spill] sm:$0xff] %v9429_v25  ;;  %v9442_v34 = vor.u32 %v8259_v41, %v7903_v46  ;;  %v7639_v41 = vld [vmem:[#allocation11 + $0xe8] sm:$0xf0]  ;;  %v8241_v46 = vld [vmem:[#allocation11 + $0x254] sm:$0xf] }
  0xff   :  { %1961 = vmatpush.bf16.msra.mxu1 %v9421_v48  ;;  %13326 = vst [vmem:[#allocation189_spill] sm:$0xff] %v9433_v18  ;;  %v7879_v48 = vld [vmem:[#allocation11 + $0x2c8] sm:$0xf0]  ;;  %v7807_v50 = vld [vmem:[#allocation11 + $0x238] sm:$0xf0] }
 0x100   :  { %1974 = vmatpush.bf16.msra.mxu2 %v9423_v35  ;;  %13327 = vst [vmem:[#allocation190_spill] sm:$0xff] %v9435_v38  ;;  %1987 = vmatpush.bf16.msra.mxu3 %v9426_v27  ;;  %v9455_v17 = vor.u32 %v8253_v44, %v7879_v48  ;;  %v9467_v44 = vor.u32 %v8247_v31, %v7855_v8  ;;  %v8193_v48 = vld [vmem:[#allocation11 + $0xd4] sm:$0xf]  ;;  %v7831_v59 = vld [vmem:[#allocation11 + $0x268] sm:$0xf0] }
 0x101   :  { %13328 = vst [vmem:[#allocation191_spill] sm:$0xff] %v9438_v3  ;;  %v9471_v55 = vor.u32 %v8193_v48, %v7639_v41  ;;  %v9475_v49 = vor.u32 %v8241_v46, %v7831_v59  ;;  %v8187_v31 = vld [vmem:[#allocation11 + $0xa4] sm:$0xf]  ;;  %v7615_v8 = vld [vmem:[#allocation11 + $0xb8] sm:$0xf0] }
 0x102   :  { %13329 = vst [vmem:[#allocation192_spill] sm:$0xff] %v9440_v15  ;;  %1949 = vmatpush.bf16.msra.mxu0 %v9429_v25  ;;  %v1263_v19 = vpop.f32.mrf.mxu0  ;;  %v8181_v41 = vld [vmem:[#allocation11 + $0x74] sm:$0xf]  ;;  %v7591_v46 = vld [vmem:[#allocation11 + $0x88] sm:$0xf0] }
 0x103   :  { %13330 = vst [vmem:[#allocation193_spill] sm:$0xff] %v9442_v34  ;;  %1962 = vmatpush.bf16.msra.mxu1 %v9433_v18  ;;  %v1276_v16 = vpop.f32.mrf.mxu1  ;;  %v8229_v59 = vld [vmem:[#allocation11 + $0x1f4] sm:$0xf] }
 0x104   :  { %1975 = vmatpush.bf16.msra.mxu2 %v9435_v38  ;;  %1988 = vmatpush.bf16.msra.mxu3 %v9438_v3  ;;  %13331 = vst [vmem:[#allocation194_spill] sm:$0xff] %v9451_v42 }
 0x105   :  { %13332 = vst [vmem:[#allocation195_spill] sm:$0xff] %v9455_v17  ;;  %1950 = vmatmul.bf16.vlgmr.msra.gmra.mxu0 %v13223_v47 }
 0x106   :  { %1994 = vmatpush.bf16.msrb.mxu0 %v9440_v15  ;;  %1963 = vmatmul.bf16.vlgmr.msra.gmra.mxu1 %v13223_v47  ;;  %13333 = vst [vmem:[#allocation196_spill] sm:$0xff] %v9463_v1 }
 0x107   :  { %2007 = vmatpush.bf16.msrb.mxu1 %v9442_v34  ;;  %1976 = vmatmul.bf16.vlgmr.msra.gmra.mxu2 %v13223_v47  ;;  %13334 = vst [vmem:[#allocation197_spill] sm:$0xff] %v9467_v44 }
 0x108   :  { %2020 = vmatpush.bf16.msrb.mxu2 %v9136_v37  ;;  %2033 = vmatpush.bf16.msrb.mxu3 %v9139_v60  ;;  %13335 = vst [vmem:[#allocation198_spill] sm:$0xff] %v9471_v55  ;;  %v9481_v60 = vor.u32 %v8187_v31, %v7615_v8  ;;  %v9489_v37 = vor.u32 %v8181_v41, %v7591_v46  ;;  %v8169_v41 = vld [vmem:[#allocation11 + $0x14] sm:$0xf]  ;;  %v7543_v46 = vld [vmem:[#allocation11 + $0x28] sm:$0xf0] }
 0x109   :  { %1989 = vmatmul.bf16.vlgmr.msra.gmra.mxu3 %v13223_v47  ;;  %13336 = vst [vmem:[#allocation199_spill] sm:$0xff] %v9475_v49 }
 0x10a   :  { %1995 = vmatpush.bf16.msrb.mxu0 %v9451_v42  ;;  %13337 = vst [vmem:[#allocation200_spill] sm:$0xff] %v9481_v60 }
 0x10b   :  { %2008 = vmatpush.bf16.msrb.mxu1 %v9455_v17  ;;  %13339 = vst [vmem:[#allocation202_spill] sm:$0xff] %v9489_v37  ;;  %v1278_v31 = vpop.f32.mrf.mxu1 }
 0x10c   :  { %2021 = vmatpush.bf16.msrb.mxu2 %v9151_v6  ;;  %2034 = vmatpush.bf16.msrb.mxu3 %v9154_v63  ;;  %v9477_v6 = vadd.f32 %v1276_v16, %v1263_v19  ;;  %v8235_v63 = vld [vmem:[#allocation11 + $0x224] sm:$0xf]  ;;  %v7783_v19 = vld [vmem:[#allocation11 + $0x208] sm:$0xf0]  ;;  %v1289_v16 = vpop.f32.mrf.mxu2 }
 0x10d   :  { %v9485_v48 = vor.u32 %v8235_v63, %v7807_v50  ;;  %v9495_v63 = vor.u32 %v8229_v59, %v7783_v19  ;;  %v8175_v50 = vld [vmem:[#allocation11 + $0x44] sm:$0xf]  ;;  %v8217_v59 = vld [vmem:[#allocation11 + $0x194] sm:$0xf]  ;;  %v7735_v19 = vld [vmem:[#allocation11 + $0x1a8] sm:$0xf0] }
 0x10e   :  { %1996 = vmatpush.bf16.msrb.mxu0 %v9463_v1 }
 0x10f   :  { %2009 = vmatpush.bf16.msrb.mxu1 %v9467_v44  ;;  %13338 = vst [vmem:[#allocation201_spill] sm:$0xff] %v9485_v48 }
 0x110   :  { %2022 = vmatpush.bf16.msrb.mxu2 %v9167_v54  ;;  %2035 = vmatpush.bf16.msrb.mxu3 %v9170_v36  ;;  %v1265_v36 = vpop.f32.mrf.mxu0  ;;  %v1302_v54 = vpop.f32.mrf.mxu3  ;;  %13340 = vst [vmem:[#allocation203_spill] sm:$0xff] %v9495_v63 }
 0x111   :  { %v9491_v8 = vadd.f32 %v1302_v54, %v1289_v16  ;;  %v7759_v36 = vld [vmem:[#allocation11 + $0x1d8] sm:$0xf0] }
 0x112   :  { %1997 = vmatpush.bf16.msrb.mxu0 %v9471_v55 }
 0x113   :  { %2010 = vmatpush.bf16.msrb.mxu1 %v9475_v49 }
 0x114   :  { %2023 = vmatpush.bf16.msrb.mxu2 %v9179_v53  ;;  %2036 = vmatpush.bf16.msrb.mxu3 %v9182_v40  ;;  %v7567_v40 = vld [vmem:[#allocation11 + $0x58] sm:$0xf0]  ;;  %v8223_v53 = vld [vmem:[#allocation11 + $0x1c4] sm:$0xf]  ;;  %v1291_v16 = vpop.f32.mrf.mxu2 }
 0x115   :  { %v9503_v54 = vor.u32 %v8223_v53, %v7759_v36 }
 0x116   :  { %1998 = vmatpush.bf16.msrb.mxu0 %v9481_v60  ;;  %v9499_v60 = vor.u32 %v8175_v50, %v7567_v40  ;;  %v9511_v40 = vor.u32 %v8217_v59, %v7735_v19 }
 0x117   :  { %2011 = vmatpush.bf16.msrb.mxu1 %v9485_v48  ;;  %13342 = vst [vmem:[#allocation205_spill] sm:$0xff] %v9503_v54 }
 0x118   :  { %2024 = vmatpush.bf16.msrb.mxu2 %v9191_v61  ;;  %2037 = vmatpush.bf16.msrb.mxu3 %v9194_v11  ;;  %13341 = vst [vmem:[#allocation204_spill] sm:$0xff] %v9499_v60  ;;  %v1304_v31 = vpop.f32.mrf.mxu3  ;;  %v9507_v11 = vor.u32 %v8169_v41, %v7543_v46 }
 0x119   :  { %13344 = vst [vmem:[#allocation207_spill] sm:$0xff] %v9511_v40  ;;  %v13345_v31 = vld [vmem:[#allocation148_spill] sm:$0xff] }
 0x11a   :  { %1999 = vmatpush.bf16.msrb.mxu0 %v9489_v37  ;;  %13343 = vst [vmem:[#allocation206_spill] sm:$0xff] %v9507_v11 }
 0x11b   :  { %2012 = vmatpush.bf16.msrb.mxu1 %v9495_v63 }
 0x11c   :  { %2025 = vmatpush.bf16.msrb.mxu2 %v9203_v29  ;;  %2038 = vmatpush.bf16.msrb.mxu3 %v9206_v58 }
 0x11e   :  { %2000 = vmatpush.bf16.msrb.mxu0 %v9499_v60 }
 0x11f   :  { %2013 = vmatpush.bf16.msrb.mxu1 %v9503_v54 }
 0x120   :  { %2026 = vmatpush.bf16.msrb.mxu2 %v9215_v33  ;;  %2039 = vmatpush.bf16.msrb.mxu3 %v9218_v23 }
 0x122   :  { %2001 = vmatpush.bf16.msrb.mxu0 %v9507_v11  ;;  %v1315_v53 = vpop.f32.mrf.mxu0 }
 0x123   :  { %2014 = vmatpush.bf16.msrb.mxu1 %v9511_v40  ;;  %v1328_v50 = vpop.f32.mrf.mxu1 }
 0x124   :  { %2027 = vmatpush.bf16.msrb.mxu2 %v9227_v5  ;;  %2040 = vmatpush.bf16.msrb.mxu3 %v9230_v51  ;;  %v9534_v36 = vadd.f32 %v1328_v50, %v1315_v53  ;;  %v13346_v53 = vld [vmem:[#allocation149_spill] sm:$0xff]  ;;  %v13347_v50 = vld [vmem:[#allocation150_spill] sm:$0xff] }
 0x125   :  { %2002 = vmatmul.bf16.vlgmr.msrb.gmra.mxu0 %v13223_v47 }
 0x126   :  { %2046 = vmatpush.bf16.msra.mxu0 %v9232_v26  ;;  %2015 = vmatmul.bf16.vlgmr.msrb.gmra.mxu1 %v13223_v47 }
 0x127   :  { %2059 = vmatpush.bf16.msra.mxu1 %v9234_v0  ;;  %2028 = vmatmul.bf16.vlgmr.msrb.gmra.mxu2 %v13223_v47 }
 0x128   :  { %2072 = vmatpush.bf16.msra.mxu2 %v9236_v13  ;;  %2085 = vmatpush.bf16.msra.mxu3 %v9239_v21 }
 0x129   :  { %2041 = vmatmul.bf16.vlgmr.msrb.gmra.mxu3 %v13223_v47 }
 0x12a   :  { %2047 = vmatpush.bf16.msra.mxu0 %v9245_v56  ;;  %v1341_v41 = vpop.f32.mrf.mxu2  ;;  %v1317_v19 = vpop.f32.mrf.mxu0 }
 0x12b   :  { %2060 = vmatpush.bf16.msra.mxu1 %v9249_v2  ;;  %v1330_v16 = vpop.f32.mrf.mxu1  ;;  %v13350_v19 = vld [vmem:[#allocation153_spill] sm:$0xff] }
 0x12c   :  { %2073 = vmatpush.bf16.msra.mxu2 %v9251_v52  ;;  %2086 = vmatpush.bf16.msra.mxu3 %v9257_v14  ;;  %v1354_v46 = vpop.f32.mrf.mxu3  ;;  %v13351_v16 = vld [vmem:[#allocation156_spill] sm:$0xff]  ;;  %v13365_v52 = vld [vmem:[#allocation171_spill] sm:$0xff] }
 0x12d   :  { %v9540_v59 = vadd.f32 %v1354_v46, %v1341_v41  ;;  %v13349_v46 = vld [vmem:[#allocation152_spill] sm:$0xff] }
 0x12e   :  { %2048 = vmatpush.bf16.msra.mxu0 %v9262_v9 }
 0x12f   :  { %2061 = vmatpush.bf16.msra.mxu1 %v9268_v4 }
 0x130   :  { %2074 = vmatpush.bf16.msra.mxu2 %v9270_v22  ;;  %2087 = vmatpush.bf16.msra.mxu3 %v9274_v30  ;;  %v13354_v30 = vld [vmem:[#allocation159_spill] sm:$0xff]  ;;  %v13364_v22 = vld [vmem:[#allocation170_spill] sm:$0xff] }
 0x132   :  { %2049 = vmatpush.bf16.msra.mxu0 %v9277_v43 }
 0x133   :  { %2062 = vmatpush.bf16.msra.mxu1 %v9281_v12 }
 0x134   :  { %2075 = vmatpush.bf16.msra.mxu2 %v9283_v10  ;;  %2088 = vmatpush.bf16.msra.mxu3 %v9286_v57  ;;  %v1343_v57 = vpop.f32.mrf.mxu2  ;;  %v13348_v10 = vld [vmem:[#allocation151_spill] sm:$0xff]  ;;  %v1356_v41 = vpop.f32.mrf.mxu3 }
 0x135   :  { %v13355_v57 = vld [vmem:[#allocation160_spill] sm:$0xff]  ;;  %v13357_v41 = vld [vmem:[#allocation162_spill] sm:$0xff] }
 0x136   :  { %2050 = vmatpush.bf16.msra.mxu0 %v9290_v24 }
 0x137   :  { %2063 = vmatpush.bf16.msra.mxu1 %v9295_v20 }
 0x138   :  { %2076 = vmatpush.bf16.msra.mxu2 %v9297_v32  ;;  %2089 = vmatpush.bf16.msra.mxu3 %v9300_v62  ;;  %v13352_v62 = vld [vmem:[#allocation157_spill] sm:$0xff]  ;;  %v13353_v32 = vld [vmem:[#allocation158_spill] sm:$0xff] }
 0x13a   :  { %2051 = vmatpush.bf16.msra.mxu0 %v13345_v31 }
 0x13b   :  { %2064 = vmatpush.bf16.msra.mxu1 %v13346_v53 }
 0x13c   :  { %2077 = vmatpush.bf16.msra.mxu2 %v13347_v50  ;;  %2090 = vmatpush.bf16.msra.mxu3 %v13348_v10  ;;  %v13356_v10 = vld [vmem:[#allocation161_spill] sm:$0xff]  ;;  %v13358_v50 = vld [vmem:[#allocation163_spill] sm:$0xff] }
 0x13e   :  { %2052 = vmatpush.bf16.msra.mxu0 %v13349_v46 }
 0x13f   :  { %2065 = vmatpush.bf16.msra.mxu1 %v13350_v19 }
 0x140   :  { %2078 = vmatpush.bf16.msra.mxu2 %v9321_v28  ;;  %2091 = vmatpush.bf16.msra.mxu3 %v9324_v7  ;;  %v13359_v7 = vld [vmem:[#allocation164_spill] sm:$0xff]  ;;  %v13362_v28 = vld [vmem:[#allocation167_spill] sm:$0xff] }
 0x142   :  { %2053 = vmatpush.bf16.msra.mxu0 %v13351_v16 }
 0x143   :  { %2066 = vmatpush.bf16.msra.mxu1 %v13352_v62  ;;  %v1380_v14 = vpop.f32.mrf.mxu1 }
 0x144   :  { %2079 = vmatpush.bf16.msra.mxu2 %v13353_v32  ;;  %2092 = vmatpush.bf16.msra.mxu3 %v13354_v30  ;;  %v13360_v32 = vld [vmem:[#allocation165_spill] sm:$0xff]  ;;  %v13361_v30 = vld [vmem:[#allocation166_spill] sm:$0xff] }
 0x145   :  { %2054 = vmatmul.bf16.vlgmr.msra.gmra.mxu0 %v13223_v47 }
 0x146   :  { %2098 = vmatpush.bf16.msrb.mxu0 %v13355_v57  ;;  %2067 = vmatmul.bf16.vlgmr.msra.gmra.mxu1 %v13223_v47  ;;  %v13366_v57 = vld [vmem:[#allocation172_spill] sm:$0xff] }
 0x147   :  { %2111 = vmatpush.bf16.msrb.mxu1 %v13356_v10  ;;  %2080 = vmatmul.bf16.vlgmr.msra.gmra.mxu2 %v13223_v47 }
 0x148   :  { %2124 = vmatpush.bf16.msrb.mxu2 %v13357_v41  ;;  %2137 = vmatpush.bf16.msrb.mxu3 %v13358_v50  ;;  %v1367_v41 = vpop.f32.mrf.mxu0  ;;  %v13363_v50 = vld [vmem:[#allocation169_spill] sm:$0xff] }
 0x149   :  { %2093 = vmatmul.bf16.vlgmr.msra.gmra.mxu3 %v13223_v47  ;;  %v9574_v10 = vadd.f32 %v1380_v14, %v1367_v41  ;;  %v13372_v14 = vld [vmem:[#allocation178_spill] sm:$0xff] }
 0x14a   :  { %2099 = vmatpush.bf16.msrb.mxu0 %v13359_v7  ;;  %v13367_v7 = vld [vmem:[#allocation173_spill] sm:$0xff] }
 0x14b   :  { %2112 = vmatpush.bf16.msrb.mxu1 %v13360_v32  ;;  %v13368_v32 = vld [vmem:[#allocation174_spill] sm:$0xff]  ;;  %v1382_v41 = vpop.f32.mrf.mxu1 }
 0x14c   :  { %2125 = vmatpush.bf16.msrb.mxu2 %v13361_v30  ;;  %2138 = vmatpush.bf16.msrb.mxu3 %v13362_v28  ;;  %v1873_v30 = vpop.f32.mrf.mxu2  ;;  %v13369_v28 = vld [vmem:[#allocation175_spill] sm:$0xff]  ;;  %v1886_v21 = vpop.f32.mrf.mxu3 }
 0x14e   :  { %2100 = vmatpush.bf16.msrb.mxu0 %v9367_v45  ;;  %v1874_v45 = vadd.f32 %v1873_v30, %v9447_v39  ;;  %v13377_v39 = vld [vmem:[#allocation183_spill] sm:$0xff] }
 0x14f   :  { %2113 = vmatpush.bf16.msrb.mxu1 %v13363_v50  ;;  %v13370_v50 = vld [vmem:[#allocation176_spill] sm:$0xff] }
 0x150   :  { %2126 = vmatpush.bf16.msrb.mxu2 %v13364_v22  ;;  %2139 = vmatpush.bf16.msrb.mxu3 %v13365_v52  ;;  %v9582_v22 = vadd.f32 %v1886_v21, %v1874_v45  ;;  %v1369_v13 = vpop.f32.mrf.mxu0  ;;  %v13371_v52 = vld [vmem:[#allocation177_spill] sm:$0xff]  ;;  %v13378_v21 = vld [vmem:[#allocation184_spill] sm:$0xff]  ;;  %v13380_v45 = vld [vmem:[#allocation31_spill] sm:$0xff] }
 0x151   :  { %v13379_v13 = vld [vmem:[#allocation185_spill] sm:$0xff] }
 0x152   :  { %2101 = vmatpush.bf16.msrb.mxu0 %v13366_v57  ;;  %v13373_v57 = vld [vmem:[#allocation179_spill] sm:$0xff] }
 0x153   :  { %2114 = vmatpush.bf16.msrb.mxu1 %v13367_v7  ;;  %v13374_v7 = vld [vmem:[#allocation180_spill] sm:$0xff] }
 0x154   :  { %2127 = vmatpush.bf16.msrb.mxu2 %v13368_v32  ;;  %2140 = vmatpush.bf16.msrb.mxu3 %v13369_v28  ;;  %v13375_v32 = vld [vmem:[#allocation181_spill] sm:$0xff]  ;;  %v13376_v28 = vld [vmem:[#allocation182_spill] sm:$0xff]  ;;  %v1875_v30 = vpop.f32.mrf.mxu2 }
 0x155   :  { %v13382_v30 = vld [vmem:[#allocation33_spill] sm:$0xff] }
 0x156   :  { %2102 = vmatpush.bf16.msrb.mxu0 %v13370_v50  ;;  %v1888_v50 = vpop.f32.mrf.mxu3 }
 0x157   :  { %2115 = vmatpush.bf16.msrb.mxu1 %v13371_v52  ;;  %v13381_v50 = vld [vmem:[#allocation32_spill] sm:$0xff] }
 0x158   :  { %2128 = vmatpush.bf16.msrb.mxu2 %v13372_v14  ;;  %2141 = vmatpush.bf16.msrb.mxu3 %v13373_v57 }
 0x15a   :  { %2103 = vmatpush.bf16.msrb.mxu0 %v13374_v7 }
 0x15b   :  { %2116 = vmatpush.bf16.msrb.mxu1 %v13375_v32 }
 0x15c   :  { %2129 = vmatpush.bf16.msrb.mxu2 %v13376_v28  ;;  %2142 = vmatpush.bf16.msrb.mxu3 %v13377_v39 }
 0x15e   :  { %2104 = vmatpush.bf16.msrb.mxu0 %v13378_v21 }
 0x15f   :  { %2117 = vmatpush.bf16.msrb.mxu1 %v13379_v13 }
 0x160   :  { %2130 = vmatpush.bf16.msrb.mxu2 %v9423_v35  ;;  %2143 = vmatpush.bf16.msrb.mxu3 %v9426_v27  ;;  %v13383_v27 = vld [vmem:[#allocation34_spill] sm:$0xff] }
 0x162   :  { %2105 = vmatpush.bf16.msrb.mxu0 %v9429_v25  ;;  %v1899_v41 = vpop.f32.mrf.mxu0 }
 0x163   :  { %2118 = vmatpush.bf16.msrb.mxu1 %v9433_v18 }
 0x164   :  { %2131 = vmatpush.bf16.msrb.mxu2 %v9435_v38  ;;  %2144 = vmatpush.bf16.msrb.mxu3 %v9438_v3  ;;  %v1900_v3 = vadd.f32 %v1899_v41, %v9477_v6  ;;  %v1912_v38 = vpop.f32.mrf.mxu1  ;;  %v13386_v41 = vld [vmem:[#allocation37_spill] sm:$0xff] }
 0x165   :  { %2106 = vmatmul.bf16.vlgmr.msrb.gmra.mxu0 %v13223_v47 }
 0x166   :  { %2150 = vmatpush.bf16.msra.mxu0 %v9440_v15  ;;  %2119 = vmatmul.bf16.vlgmr.msrb.gmra.mxu1 %v13223_v47  ;;  %v9614_v35 = vadd.f32 %v1912_v38, %v1900_v3  ;;  %v13388_v38 = vld [vmem:[#allocation38_spill] sm:$0xff] }
 0x167   :  { %2163 = vmatpush.bf16.msra.mxu1 %v9442_v34  ;;  %2132 = vmatmul.bf16.vlgmr.msrb.gmra.mxu2 %v13223_v47 }
 0x168   :  { %2145 = vmatmul.bf16.vlgmr.msrb.gmra.mxu3 %v13223_v47  ;;  %2302 = vmatpush.bf16.msra.mxu2 %v13380_v45  ;;  %v13384_v45 = vld [vmem:[#allocation35_spill] sm:$0xff] }
 0x169   :  { %2315 = vmatpush.bf16.msra.mxu3 %v13381_v50  ;;  %v13385_v50 = vld [vmem:[#allocation36_spill] sm:$0xff] }
 0x16a   :  { %2151 = vmatpush.bf16.msra.mxu0 %v9451_v42  ;;  %v1901_v6 = vpop.f32.mrf.mxu0 }
 0x16b   :  { %2164 = vmatpush.bf16.msra.mxu1 %v9455_v17  ;;  %v13391_v6 = vld [vmem:[#allocation41_spill] sm:$0xff] }
 0x16c   :  { %2303 = vmatpush.bf16.msra.mxu2 %v13382_v30  ;;  %v1925_v30 = vpop.f32.mrf.mxu2  ;;  %v1938_v28 = vpop.f32.mrf.mxu3 }
 0x16d   :  { %2316 = vmatpush.bf16.msra.mxu3 %v13383_v27  ;;  %v1926_v39 = vadd.f32 %v1925_v30, %v9491_v8  ;;  %v13387_v27 = vld [vmem:[#allocation200_spill] sm:$0xff]  ;;  %v1914_v57 = vpop.f32.mrf.mxu1 }
 0x16e   :  { %2152 = vmatpush.bf16.msra.mxu0 %v9463_v1  ;;  %v13392_v57 = vld [vmem:[#allocation42_spill] sm:$0xff] }
 0x16f   :  { %2165 = vmatpush.bf16.msra.mxu1 %v9467_v44  ;;  %v9625_v3 = vadd.f32 %v1938_v28, %v1926_v39  ;;  %v13393_v28 = vld [vmem:[#allocation43_spill] sm:$0xff]  ;;  %v13394_v39 = vld [vmem:[#allocation44_spill] sm:$0xff] }
 0x170   :  { %2304 = vmatpush.bf16.msra.mxu2 %v13384_v45  ;;  %v13389_v45 = vld [vmem:[#allocation39_spill] sm:$0xff] }
 0x171   :  { %2317 = vmatpush.bf16.msra.mxu3 %v13385_v50  ;;  %v13390_v50 = vld [vmem:[#allocation40_spill] sm:$0xff] }
 0x172   :  { %2153 = vmatpush.bf16.msra.mxu0 %v9471_v55 }
 0x173   :  { %2166 = vmatpush.bf16.msra.mxu1 %v9475_v49 }
 0x174   :  { %2305 = vmatpush.bf16.msra.mxu2 %v13386_v41  ;;  %v1927_v8 = vpop.f32.mrf.mxu2  ;;  %v1940_v30 = vpop.f32.mrf.mxu3  ;;  %v13403_v41 = vld [vmem:[#allocation55_spill] sm:$0xff] }
 0x175   :  { %2318 = vmatpush.bf16.msra.mxu3 %v13388_v38  ;;  %v13396_v8 = vld [vmem:[#allocation48_spill] sm:$0xff]  ;;  %v13397_v30 = vld [vmem:[#allocation45_spill] sm:$0xff] }
 0x176   :  { %2154 = vmatpush.bf16.msra.mxu0 %v13387_v27 }
 0x177   :  { %2167 = vmatpush.bf16.msra.mxu1 %v9485_v48 }
 0x178   :  { %2306 = vmatpush.bf16.msra.mxu2 %v13389_v45  ;;  %v13401_v45 = vld [vmem:[#allocation52_spill] sm:$0xff] }
 0x179   :  { %2319 = vmatpush.bf16.msra.mxu3 %v13390_v50  ;;  %v13395_v50 = vld [vmem:[#allocation47_spill] sm:$0xff] }
 0x17a   :  { %2155 = vmatpush.bf16.msra.mxu0 %v9489_v37 }
 0x17b   :  { %2168 = vmatpush.bf16.msra.mxu1 %v9495_v63  ;;  %v554_v63 = vld [vmem:[#allocation2] ss:$8 sm:$0x30] }
 0x17c   :  { %2307 = vmatpush.bf16.msra.mxu2 %v13391_v6  ;;  %v13399_v6 = vld [vmem:[#allocation51_spill] sm:$0xff] }
 0x17d   :  { %2320 = vmatpush.bf16.msra.mxu3 %v13392_v57  ;;  %v13398_v57 = vld [vmem:[#allocation46_spill] sm:$0xff] }
 0x17e   :  { %2156 = vmatpush.bf16.msra.mxu0 %v9499_v60 }
 0x17f   :  { %2169 = vmatpush.bf16.msra.mxu1 %v9503_v54  ;;  %v13439_v54 = vld [vmem:[#allocation99_spill] sm:$0xff] }
 0x180   :  { %2308 = vmatpush.bf16.msra.mxu2 %v13393_v28  ;;  %v13400_v28 = vld [vmem:[#allocation49_spill] sm:$0xff] }
 0x181   :  { %2321 = vmatpush.bf16.msra.mxu3 %v13394_v39  ;;  %v13402_v39 = vld [vmem:[#allocation50_spill] sm:$0xff] }
 0x182   :  { %2157 = vmatpush.bf16.msra.mxu0 %v9507_v11  ;;  %v1951_v38 = vpop.f32.mrf.mxu0 }
 0x183   :  { %2170 = vmatpush.bf16.msra.mxu1 %v9511_v40  ;;  %v13405_v40 = vld [vmem:[#allocation56_spill] sm:$0xff] }
 0x184   :  { %2309 = vmatpush.bf16.msra.mxu2 %v13397_v30  ;;  %v1964_v30 = vpop.f32.mrf.mxu1 }
 0x185   :  { %2158 = vmatmul.bf16.vlgmr.msra.gmra.mxu0 %v13223_v47  ;;  %2322 = vmatpush.bf16.msra.mxu3 %v13398_v57 }
 0x186   :  { %2328 = vmatpush.bf16.msrb.mxu0 %v13395_v50  ;;  %2171 = vmatmul.bf16.vlgmr.msra.gmra.mxu1 %v13223_v47  ;;  %v1952_v50 = vadd.f32 %v1951_v38, %v9534_v36  ;;  %v13406_v47 = vld [vmem:[#allocation54_spill] sm:$0xff]  ;;  %v13411_v38 = vld [vmem:[#allocation63_spill] sm:$0xff] }
 0x187   :  { %2341 = vmatpush.bf16.msrb.mxu1 %v13396_v8  ;;  %v13404_v8 = vld [vmem:[#allocation53_spill] sm:$0xff] }
 0x188   :  { %2354 = vmatpush.bf16.msrb.mxu2 %v13400_v28  ;;  %v9654_v57 = vadd.f32 %v1964_v30, %v1952_v50  ;;  %v13408_v28 = vld [vmem:[#allocation57_spill] sm:$0xff]  ;;  %v13413_v50 = vld [vmem:[#allocation64_spill] sm:$0xff]  ;;  %v13414_v30 = vld [vmem:[#allocation62_spill] sm:$0xff] }
 0x189   :  { %2367 = vmatpush.bf16.msrb.mxu3 %v13402_v39  ;;  %v13410_v39 = vld [vmem:[#allocation58_spill] sm:$0xff] }
 0x18a   :  { %2329 = vmatpush.bf16.msrb.mxu0 %v13399_v6  ;;  %v13407_v6 = vld [vmem:[#allocation59_spill] sm:$0xff]  ;;  %v1953_v36 = vpop.f32.mrf.mxu0 }
 0x18b   :  { %2342 = vmatpush.bf16.msrb.mxu1 %v13401_v45  ;;  %v13409_v45 = vld [vmem:[#allocation60_spill] sm:$0xff] }
 0x18c   :  { %2355 = vmatpush.bf16.msrb.mxu2 %v13404_v8  ;;  %v1990_v11 = vpop.f32.mrf.mxu3 }
 0x18d   :  { %2368 = vmatpush.bf16.msrb.mxu3 %v13406_v47  ;;  %v1966_v47 = vpop.f32.mrf.mxu1 }
 0x18e   :  { %2330 = vmatpush.bf16.msrb.mxu0 %v13403_v41  ;;  %v1977_v41 = vpop.f32.mrf.mxu2  ;;  %v13421_v47 = vld [vmem:[#allocation72_spill] sm:$0xff] }
 0x18f   :  { %2343 = vmatpush.bf16.msrb.mxu1 %v13405_v40  ;;  %v1978_v8 = vadd.f32 %v1977_v41, %v9540_v59  ;;  %v13412_v40 = vld [vmem:[#allocation61_spill] sm:$0xff]  ;;  %v13418_v59 = vld [vmem:[#allocation66_spill] sm:$0xff] }
 0x190   :  { %2356 = vmatpush.bf16.msrb.mxu2 %v13408_v28  ;;  %v13415_v28 = vld [vmem:[#allocation67_spill] sm:$0xff] }
 0x191   :  { %2369 = vmatpush.bf16.msrb.mxu3 %v13410_v39  ;;  %v13417_v39 = vld [vmem:[#allocation68_spill] sm:$0xff] }
 0x192   :  { %2331 = vmatpush.bf16.msrb.mxu0 %v13407_v6  ;;  %v9665_v6 = vadd.f32 %v1990_v11, %v1978_v8  ;;  %v13423_v11 = vld [vmem:[#allocation75_spill] sm:$0xff]  ;;  %v13424_v8 = vld [vmem:[#allocation73_spill] sm:$0xff] }
 0x193   :  { %2344 = vmatpush.bf16.msrb.mxu1 %v13409_v45  ;;  %v13416_v45 = vld [vmem:[#allocation65_spill] sm:$0xff] }
 0x194   :  { %2357 = vmatpush.bf16.msrb.mxu2 %v13412_v40  ;;  %v1992_v36 = vpop.f32.mrf.mxu3  ;;  %v13420_v40 = vld [vmem:[#allocation69_spill] sm:$0xff] }
 0x195   :  { %2370 = vmatpush.bf16.msrb.mxu3 %v13414_v30  ;;  %v13425_v30 = vld [vmem:[#allocation76_spill] sm:$0xff]  ;;  %v13429_v36 = vld [vmem:[#allocation77_spill] sm:$0xff] }
 0x196   :  { %2332 = vmatpush.bf16.msrb.mxu0 %v13411_v38  ;;  %v1979_v41 = vpop.f32.mrf.mxu2  ;;  %v13419_v38 = vld [vmem:[#allocation71_spill] sm:$0xff] }
 0x197   :  { %2345 = vmatpush.bf16.msrb.mxu1 %v13413_v50  ;;  %v13422_v50 = vld [vmem:[#allocation70_spill] sm:$0xff] }
 0x198   :  { %2358 = vmatpush.bf16.msrb.mxu2 %v13416_v45  ;;  %v13426_v45 = vld [vmem:[#allocation79_spill] sm:$0xff]  ;;  %v13428_v41 = vld [vmem:[#allocation74_spill] sm:$0xff] }
 0x199   :  { %2371 = vmatpush.bf16.msrb.mxu3 %v13418_v59  ;;  %v13430_v59 = vld [vmem:[#allocation83_spill] sm:$0xff] }
 0x19a   :  { %2333 = vmatpush.bf16.msrb.mxu0 %v13415_v28  ;;  %v13437_v28 = vld [vmem:[#allocation95_spill] sm:$0xff] }
 0x19b   :  { %2346 = vmatpush.bf16.msrb.mxu1 %v13417_v39  ;;  %v13427_v39 = vld [vmem:[#allocation80_spill] sm:$0xff] }
 0x19c   :  { %2359 = vmatpush.bf16.msrb.mxu2 %v13420_v40  ;;  %v13431_v40 = vld [vmem:[#allocation84_spill] sm:$0xff] }
 0x19d   :  { %2372 = vmatpush.bf16.msrb.mxu3 %v13422_v50  ;;  %v13433_v50 = vld [vmem:[#allocation87_spill] sm:$0xff] }
 0x19e   :  { %2334 = vmatpush.bf16.msrb.mxu0 %v13419_v38 }
 0x19f   :  { %2347 = vmatpush.bf16.msrb.mxu1 %v13421_v47  ;;  %v13432_v47 = vld [vmem:[#allocation78_spill] sm:$0xff] }
 0x1a0   :  { %2360 = vmatpush.bf16.msrb.mxu2 %v13424_v8  ;;  %v13434_v8 = vld [vmem:[#allocation88_spill] sm:$0xff] }
 0x1a1   :  { %2373 = vmatpush.bf16.msrb.mxu3 %v13428_v41  ;;  %v13436_v41 = vld [vmem:[#allocation92_spill] sm:$0xff] }
 0x1a2   :  { %2335 = vmatpush.bf16.msrb.mxu0 %v13423_v11  ;;  %v2003_v11 = vpop.f32.mrf.mxu0 }
 0x1a3   :  { %2348 = vmatpush.bf16.msrb.mxu1 %v13425_v30  ;;  %v2004_v30 = vadd.f32 %v2003_v11, %v9574_v10 }
 0x1a4   :  { %2361 = vmatpush.bf16.msrb.mxu2 %v13429_v36 }
 0x1a5   :  { %2374 = vmatpush.bf16.msrb.mxu3 %v13432_v47  ;;  %v13438_v47 = vld [vmem:[#allocation96_spill] sm:$0xff] }
 0x1a6   :  { %2380 = vmatpush.bf16.msra.mxu0 %v13426_v45  ;;  %v2016_v45 = vpop.f32.mrf.mxu1 }
 0x1a7   :  { %2393 = vmatpush.bf16.msra.mxu1 %v13427_v39  ;;  %v9688_v38 = vadd.f32 %v2016_v45, %v2004_v30  ;;  %v13435_v39 = vld [vmem:[#allocation91_spill] sm:$0xff]  ;;  %v13442_v30 = vld [vmem:[#allocation104_spill] sm:$0xff] }
 0x1a8   :  { %v13441_v45 = vld [vmem:[#allocation103_spill] sm:$0xff] }
 0x1aa   :  { %2381 = vmatpush.bf16.msra.mxu0 %v13430_v59  ;;  %v2029_v36 = vpop.f32.mrf.mxu2 }
 0x1ab   :  { %2394 = vmatpush.bf16.msra.mxu1 %v13431_v40  ;;  %v2005_v40 = vpop.f32.mrf.mxu0 }
 0x1ac   :  { %v2042_v59 = vpop.f32.mrf.mxu3  ;;  %v9700_v40 = vld [vmem:[#allocation14] sm:$0x3f] }
 0x1ad   :  { %v2043_v60 = vadd.f32 %v2042_v59, %v2029_v36 }
 0x1ae   :  { %2382 = vmatpush.bf16.msra.mxu0 %v13433_v50  ;;  %v2018_v50 = vpop.f32.mrf.mxu1 }
 0x1af   :  { %2395 = vmatpush.bf16.msra.mxu1 %v13434_v8  ;;  %v13440_v8 = vld [vmem:[#allocation100_spill] sm:$0xff] }
 0x1b2   :  { %2383 = vmatpush.bf16.msra.mxu0 %v13435_v39  ;;  %v2031_v10 = vpop.f32.mrf.mxu2  ;;  %v13443_v39 = vld [vmem:[#allocation107_spill] sm:$0xff] }
 0x1b3   :  { %2396 = vmatpush.bf16.msra.mxu1 %v13436_v41  ;;  %v13444_v41 = vld [vmem:[#allocation108_spill] sm:$0xff]  ;;  %v2176_v10 = vadd.f32 %v2043_v60, %v9582_v22 }
 0x1b4   :  { %v2044_v11 = vpop.f32.mrf.mxu3  ;;  %v553_v22 = vld [vmem:[#allocation2] ss:$8 sm:$0xf] }
 0x1b5   :  { %v9707_v11 = vperm.slane %v9700_v40, 0  ;;  %v9713_v48 = vor.u32 %v554_v63, %v553_v22 }
 0x1b6   :  { %2384 = vmatpush.bf16.msra.mxu0 %v13437_v28 }
 0x1b7   :  { %2397 = vmatpush.bf16.msra.mxu1 %v13438_v47  ;;  %13446 = vst [vmem:[#allocation149_spill] sm:$0xff] %v9707_v11  ;;  %v2196_v59 = vadd.f32 %v9707_v11, %v2176_v10 }
 0x1ba   :  { %2385 = vmatpush.bf16.msra.mxu0 %v13439_v54  ;;  %v9703_v54 = vperm.slane %v9700_v40, 1 }
 0x1bb   :  { %2398 = vmatpush.bf16.msra.mxu1 %v13440_v8 }
 0x1bc   :  { %13445 = vst [vmem:[#allocation148_spill] sm:$0xff] %v9703_v54 }
 0x1be   :  { %2386 = vmatpush.bf16.msra.mxu0 %v13441_v45 }
 0x1bf   :  { %2399 = vmatpush.bf16.msra.mxu1 %v13442_v30 }
 0x1c2   :  { %2387 = vmatpush.bf16.msra.mxu0 %v13443_v39  ;;  %v2055_v28 = vpop.f32.mrf.mxu0 }
 0x1c3   :  { %2400 = vmatpush.bf16.msra.mxu1 %v13444_v41  ;;  %v2068_v47 = vpop.f32.mrf.mxu1 }
 0x1c4   :  { %v2069_v50 = vadd.f32 %v2068_v47, %v2055_v28 }
 0x1c6   :  { %v2177_v30 = vadd.f32 %v2069_v50, %v9614_v35 }
 0x1c8   :  { %v2197_v39 = vadd.f32 %v9703_v54, %v2177_v30 }
 0x1ca   :  { %v2081_v41 = vpop.f32.mrf.mxu2  ;;  %v2204_v36 = vrot.slane %v2197_v39, 7  ;;  %v2057_v8 = vpop.f32.mrf.mxu0  ;;  %v9717_v39 = vperm.slane %v9700_v40, 3 }
 0x1cb   :  { %v2070_v28 = vpop.f32.mrf.mxu1 }
 0x1cc   :  { %v2094_v45 = vpop.f32.mrf.mxu3  ;;  %v2206_v47 = vsel %vm2205_vm0, %v2196_v59, %v2204_v36  ;;  %13447 = vst [vmem:[#allocation152_spill] sm:$0xff] %v9717_v39  ;;  %v9721_v59 = vperm.slane %v9700_v40, 2 }
 0x1cd   :  { %v2208_v35 = vadd.f32 %v2206_v47, %v9713_v48  ;;  %v2095_v30 = vadd.f32 %v2094_v45, %v2081_v41 }
 0x1ce   :  { %13448 = vst [vmem:[#allocation153_spill] sm:$0xff] %v9721_v59 }
 0x1cf   :  { %v7907_v50 = vmul.f32 -1.442695, %v2208_v35  ;;  %v2178_v8 = vadd.f32 %v2095_v30, %v9625_v3 }
 0x1d1   :  { %8422 = vpow2.f32 %v7907_v50  ;;  %v2198_v41 = vadd.f32 %v9721_v59, %v2178_v8 }
 0x1d2   :  { %v2083_v37 = vpop.f32.mrf.mxu2 }
 0x1d4   :  { %v2096_v60 = vpop.f32.mrf.mxu3 }
 0x1d7   :  { %v8423_v63 = vpop.eup %8422 }
 0x1d8   :  { %v2212_v47 = vadd.f32 1.0, %v8423_v63 }
 0x1da   :  { %8424 = vrcp.f32 %v2212_v47  ;;  %vm2218_vm2 = vweird.f32 %v2212_v47 }
 0x1e2   :  { %v2107_v54 = vpop.f32.mrf.mxu0 }
 0x1e3   :  { %v2120_v27 = vpop.f32.mrf.mxu1 }
 0x1e4   :  { %v2121_v10 = vadd.f32 %v2120_v27, %v2107_v54  ;;  %v2229_v54 = vrot.slane %v9713_v48, 2 }
 0x1e6   :  { %v2179_v37 = vadd.f32 %v2121_v10, %v9654_v57  ;;  %v8425_v10 = vpop.eup %8424 }
 0x1e7   :  { %vm2219_vm1 = vweird.f32 %v8425_v10 }
 0x1e8   :  { %v2199_v36 = vadd.f32 %v9717_v39, %v2179_v37  ;;  %v2214_v39 = vmul.f32 %v8425_v10, %v2212_v47  ;;  %vm2220_vm3 = vmor %vm2218_vm2, %vm2219_vm1 }
 0x1ea   :  { %v2133_v28 = vpop.f32.mrf.mxu2  ;;  %v2233_v45 = vrot.slane %v2199_v36, 7  ;;  %v2109_v27 = vpop.f32.mrf.mxu0  ;;  %v2215_v8 = vsub.f32 1.0, %v2214_v39 }
 0x1eb   :  { %v2146_v60 = vpop.f32.mrf.mxu3  ;;  %v2122_v22 = vpop.f32.mrf.mxu1 }
 0x1ec   :  { %v2234_v3 = vsel %vm2205_vm0, %v2198_v41, %v2233_v45  ;;  %v2216_v36 = vmul.f32 %v8425_v10, %v2215_v8  ;;  %v2147_v27 = vadd.f32 %v2146_v60, %v2133_v28  ;;  %v9729_v41 = vperm.slane %v9700_v40, 5 }
 0x1ed   :  { %v2236_v35 = vadd.f32 %v2234_v3, %v2229_v54  ;;  %v2222_v28 = vand.u32 2147483647, %v2212_v47 }
 0x1ee   :  { %13449 = vst [vmem:[#allocation156_spill] sm:$0xff] %v9729_v41  ;;  %v2217_v54 = vadd.f32 %v8425_v10, %v2216_v36  ;;  %v2180_v3 = vadd.f32 %v2147_v27, %v9665_v6 }
 0x1ef   :  { %v7908_v50 = vmul.f32 -1.442695, %v2236_v35  ;;  %v9733_v35 = vperm.slane %v9700_v40, 4  ;;  %vm2223_vm4 = vcmp.eq.f32.partialorder %v2222_v28, 8.507059e+37 }
 0x1f1   :  { %8426 = vpow2.f32 %v7908_v50  ;;  %13450 = vst [vmem:[#allocation208_spill] sm:$0xff] %v9733_v35  ;;  %v2224_v50 = vand.u32 2147483648, %v2212_v47  ;;  %v2262_v47 = vrot.slane %v9713_v48, 4 }
 0x1f2   :  { %v2135_v57 = vpop.f32.mrf.mxu2 }
 0x1f3   :  { %v2148_v30 = vpop.f32.mrf.mxu3 }
 0x1f4   :  { %v2200_v30 = vadd.f32 %v9733_v35, %v2180_v3  ;;  %v13505_v35 = vld [vmem:[#allocation143_spill] sm:$0xff] }
 0x1f7   :  { %v8427_v37 = vpop.eup %8426 }
 0x1f8   :  { %v2240_v63 = vadd.f32 1.0, %v8427_v37 }
 0x1fa   :  { %8428 = vrcp.f32 %v2240_v63  ;;  %vm2246_vm6 = vweird.f32 %v2240_v63 }
 0x200   :  { %v8429_v59 = vpop.eup %8428 }
 0x201   :  { %v2242_v14 = vmul.f32 %v8429_v59, %v2240_v63  ;;  %vm2247_vm5 = vweird.f32 %v8429_v59 }
 0x202   :  { %v2159_v11 = vpop.f32.mrf.mxu0  ;;  %vm2248_vm7 = vmor %vm2246_vm6, %vm2247_vm5 }
 0x203   :  { %v2172_v22 = vpop.f32.mrf.mxu1  ;;  %v2243_v45 = vsub.f32 1.0, %v2242_v14  ;;  %v2225_v14 = vor.u32 1.1754944e-38, %v2224_v50 }
 0x204   :  { %v2173_v49 = vadd.f32 %v2172_v22, %v2159_v11  ;;  %v2221_v11 = vsel %vm2220_vm3, %v8425_v10, %v2217_v54  ;;  %v2250_v22 = vand.u32 2147483647, %v2240_v63 }
 0x205   :  { %v2244_v60 = vmul.f32 %v8429_v59, %v2243_v45  ;;  %v2226_v40 = vsel %vm2223_vm4, %v2225_v14, %v2221_v11 }
 0x206   :  { %v2181_v39 = vadd.f32 %v2173_v49, %v9688_v38  ;;  %v2252_v38 = vand.u32 2147483648, %v2240_v63  ;;  %vm2251_vm8 = vcmp.eq.f32.partialorder %v2250_v22, 8.507059e+37  ;;  %v13460_v22 = vld [vmem:[#allocation89_spill] sm:$0xff] }
 0x207   :  { %v2245_v36 = vadd.f32 %v8429_v59, %v2244_v60 }
 0x208   :  { %v2201_v57 = vadd.f32 %v9729_v41, %v2181_v39  ;;  %v2253_v54 = vor.u32 1.1754944e-38, %v2252_v38  ;;  %v13457_v38 = vld [vmem:[#allocation86_spill] sm:$0xff]  ;;  %v13506_v41 = vld [vmem:[#allocation144_spill] sm:$0xff] }
 0x209   :  { %v2249_v45 = vsel %vm2248_vm7, %v8429_v59, %v2245_v36  ;;  %v13455_v36 = vld [vmem:[#allocation112_spill] sm:$0xff] }
 0x20a   :  { %v2258_v37 = vrot.slane %v2201_v57, 7  ;;  %v2161_v8 = vpop.f32.mrf.mxu0  ;;  %v2254_v3 = vsel %vm2251_vm8, %v2253_v54, %v2249_v45  ;;  %v13462_v45 = vld [vmem:[#allocation119_spill] sm:$0xff]  ;;  %v13463_v54 = vld [vmem:[#allocation120_spill] sm:$0xff] }
 0x20b   :  { %v2174_v6 = vpop.f32.mrf.mxu1  ;;  %v2266_v39 = vsub.f32 1.0, %v2254_v3  ;;  %v2268_v57 = vmul.f32 0.0, %v2254_v3  ;;  %v13452_v8 = vld [vmem:[#allocation81_spill] sm:$0xff] }
 0x20c   :  { %v2259_v49 = vsel %vm2205_vm0, %v2200_v30, %v2258_v37  ;;  %v13453_v6 = vld [vmem:[#allocation82_spill] sm:$0xff]  ;;  %v13464_v3 = vld [vmem:[#allocation93_spill] sm:$0xff] }
 0x20d   :  { %v2261_v27 = vmul.f32 %v2259_v49, %v2226_v40  ;;  %v13454_v40 = vld [vmem:[#allocation111_spill] sm:$0xff]  ;;  %v13456_v49 = vld [vmem:[#allocation85_spill] sm:$0xff] }
 0x20f   :  { %v2264_v10 = vadd.f32 %v2262_v47, %v2261_v27  ;;  %v13458_v27 = vld [vmem:[#allocation115_spill] sm:$0xff]  ;;  %v13459_v47 = vld [vmem:[#allocation116_spill] sm:$0xff] }
 0x211   :  { %8430 = vtanh.f32 %v2264_v10  ;;  %v13461_v10 = vld [vmem:[#allocation90_spill] sm:$0xff] }
 0x217   :  { %v8431_v50 = vpop.eup %8430 }
 0x218   :  { %v2267_v28 = vmul.f32 %v8431_v50, %v2266_v39  ;;  %v13465_v39 = vld [vmem:[#allocation94_spill] sm:$0xff]  ;;  %v13466_v50 = vld [vmem:[#allocation123_spill] sm:$0xff] }
 0x21a   :  { %v9740_v60 = vadd.f32 %v2268_v57, %v2267_v28  ;;  %v13467_v28 = vld [vmem:[#allocation124_spill] sm:$0xff]  ;;  %v13468_v57 = vld [vmem:[#allocation97_spill] sm:$0xff] }
 0x21c   :  { %13451 = vst [vmem:[#allocation209_spill] sm:$0xff] %v9740_v60  ;;  %v2275_v11 = vperm.slane %v9740_v60, 0  ;;  %v12879_v30 = vperm.slane %v9740_v60, 1 }
 0x21e   :  { %v9746_v48 = vpack.c.bf16 %v12879_v30, %v2275_v11  ;;  %v13469_v11 = vld [vmem:[#allocation98_spill] sm:$0xff]  ;;  %v13472_v30 = vld [vmem:[#allocation101_spill] sm:$0xff] }
 0x220   :  { %v2296_v59 = vunpack.c.l.b16 %v9746_v48  ;;  %v2297_v63 = vunpack.c.h.b16 %v9746_v48 }
 0x222   :  { %v9750_v14 = vpack.c.b16 %v2296_v59, %v2296_v59  ;;  %v9752_v37 = vpack.c.b16 %v2297_v63, %v2297_v63  ;;  %v13470_v59 = vld [vmem:[#allocation127_spill] sm:$0xff]  ;;  %v13471_v63 = vld [vmem:[#allocation128_spill] sm:$0xff] }
 0x224   :  { %2310 = vmatmul.bf16.vlgmr.msra.gmra.mxu2 %v9750_v14  ;;  %2323 = vmatmul.bf16.vlgmr.msra.gmra.mxu3 %v9752_v37 }
 0x225   :  { %2336 = vmatmul.bf16.vlgmr.msrb.gmra.mxu0 %v9750_v14  ;;  %2349 = vmatmul.bf16.vlgmr.msrb.gmra.mxu1 %v9752_v37 }
 0x226   :  { %2406 = vmatpush.bf16.msra.mxu2 %v13452_v8  ;;  %2419 = vmatpush.bf16.msra.mxu3 %v13453_v6  ;;  %v13503_v6 = vld [vmem:[#allocation168_spill] sm:$0xff]  ;;  %v13504_v8 = vld [vmem:[#allocation169_spill] sm:$0xff] }
 0x227   :  { %2432 = vmatpush.bf16.msrb.mxu0 %v13454_v40  ;;  %2445 = vmatpush.bf16.msrb.mxu1 %v13455_v36  ;;  %v13501_v36 = vld [vmem:[#allocation141_spill] sm:$0xff]  ;;  %v13502_v40 = vld [vmem:[#allocation142_spill] sm:$0xff] }
 0x22a   :  { %2407 = vmatpush.bf16.msra.mxu2 %v13456_v49  ;;  %2420 = vmatpush.bf16.msra.mxu3 %v13457_v38  ;;  %v13499_v38 = vld [vmem:[#allocation164_spill] sm:$0xff]  ;;  %v13500_v49 = vld [vmem:[#allocation165_spill] sm:$0xff] }
 0x22b   :  { %2433 = vmatpush.bf16.msrb.mxu0 %v13458_v27  ;;  %2446 = vmatpush.bf16.msrb.mxu1 %v13459_v47  ;;  %v13497_v47 = vld [vmem:[#allocation139_spill] sm:$0xff]  ;;  %v13498_v27 = vld [vmem:[#allocation140_spill] sm:$0xff] }
 0x22e   :  { %2408 = vmatpush.bf16.msra.mxu2 %v13460_v22  ;;  %2421 = vmatpush.bf16.msra.mxu3 %v13461_v10  ;;  %v13495_v10 = vld [vmem:[#allocation160_spill] sm:$0xff]  ;;  %v13496_v22 = vld [vmem:[#allocation161_spill] sm:$0xff] }
 0x22f   :  { %2434 = vmatpush.bf16.msrb.mxu0 %v13462_v45  ;;  %2447 = vmatpush.bf16.msrb.mxu1 %v13463_v54  ;;  %v13477_v54 = vld [vmem:[#allocation106_spill] sm:$0xff]  ;;  %v13478_v45 = vld [vmem:[#allocation132_spill] sm:$0xff] }
 0x232   :  { %2409 = vmatpush.bf16.msra.mxu2 %v13464_v3  ;;  %2422 = vmatpush.bf16.msra.mxu3 %v13465_v39  ;;  %v13475_v39 = vld [vmem:[#allocation131_spill] sm:$0xff]  ;;  %v13476_v3 = vld [vmem:[#allocation105_spill] sm:$0xff] }
 0x233   :  { %2435 = vmatpush.bf16.msrb.mxu0 %v13466_v50  ;;  %2448 = vmatpush.bf16.msrb.mxu1 %v13467_v28  ;;  %v13473_v50 = vld [vmem:[#allocation102_spill] sm:$0xff] }
 0x234   :  { %2362 = vmatmul.bf16.vlgmr.msrb.gmra.mxu2 %v9750_v14  ;;  %2375 = vmatmul.bf16.vlgmr.msrb.gmra.mxu3 %v9752_v37  ;;  %v13474_v28 = vld [vmem:[#allocation130_spill] sm:$0xff] }
 0x235   :  { %2388 = vmatmul.bf16.vlgmr.msra.gmra.mxu0 %v9750_v14  ;;  %2401 = vmatmul.bf16.vlgmr.msra.gmra.mxu1 %v9752_v37 }
 0x236   :  { %2410 = vmatpush.bf16.msra.mxu2 %v13468_v57  ;;  %2423 = vmatpush.bf16.msra.mxu3 %v13469_v11  ;;  %v13479_v57 = vld [vmem:[#allocation133_spill] sm:$0xff] }
 0x237   :  { %2436 = vmatpush.bf16.msrb.mxu0 %v13470_v59  ;;  %2449 = vmatpush.bf16.msrb.mxu1 %v13471_v63  ;;  %v13480_v11 = vld [vmem:[#allocation109_spill] sm:$0xff]  ;;  %v13481_v59 = vld [vmem:[#allocation110_spill] sm:$0xff] }
 0x238   :  { %v13482_v63 = vld [vmem:[#allocation134_spill] sm:$0xff] }
 0x23a   :  { %2411 = vmatpush.bf16.msra.mxu2 %v13472_v30  ;;  %2424 = vmatpush.bf16.msra.mxu3 %v13473_v50  ;;  %v13483_v30 = vld [vmem:[#allocation135_spill] sm:$0xff]  ;;  %v13484_v50 = vld [vmem:[#allocation113_spill] sm:$0xff] }
 0x23b   :  { %2437 = vmatpush.bf16.msrb.mxu0 %v13474_v28  ;;  %2450 = vmatpush.bf16.msrb.mxu1 %v13475_v39  ;;  %v13485_v28 = vld [vmem:[#allocation114_spill] sm:$0xff] }
 0x23c   :  { %v13494_v39 = vld [vmem:[#allocation138_spill] sm:$0xff] }
 0x23e   :  { %2412 = vmatpush.bf16.msra.mxu2 %v13476_v3  ;;  %2425 = vmatpush.bf16.msra.mxu3 %v13477_v54  ;;  %v13492_v54 = vld [vmem:[#allocation129_spill] sm:$0xff] }
 0x23f   :  { %2438 = vmatpush.bf16.msrb.mxu0 %v13478_v45  ;;  %2451 = vmatpush.bf16.msrb.mxu1 %v13479_v57  ;;  %v13490_v57 = vld [vmem:[#allocation125_spill] sm:$0xff]  ;;  %v13491_v45 = vld [vmem:[#allocation126_spill] sm:$0xff] }
 0x240   :  { %v13493_v3 = vld [vmem:[#allocation137_spill] sm:$0xff] }
 0x242   :  { %2413 = vmatpush.bf16.msra.mxu2 %v13480_v11  ;;  %2426 = vmatpush.bf16.msra.mxu3 %v13481_v59  ;;  %v13486_v59 = vld [vmem:[#allocation117_spill] sm:$0xff]  ;;  %v13489_v11 = vld [vmem:[#allocation122_spill] sm:$0xff] }
 0x243   :  { %2439 = vmatpush.bf16.msrb.mxu0 %v13482_v63  ;;  %2452 = vmatpush.bf16.msrb.mxu1 %v13483_v30  ;;  %v13487_v63 = vld [vmem:[#allocation118_spill] sm:$0xff]  ;;  %v13488_v30 = vld [vmem:[#allocation121_spill] sm:$0xff] }
 0x245   :  { %2414 = vmatmul.bf16.vlgmr.msra.gmra.mxu2 %v9750_v14  ;;  %2427 = vmatmul.bf16.vlgmr.msra.gmra.mxu3 %v9752_v37 }
 0x246   :  { %2458 = vmatpush.bf16.msrb.mxu2 %v13484_v50  ;;  %2471 = vmatpush.bf16.msrb.mxu3 %v13485_v28 }
 0x247   :  { %2484 = vmatpush.bf16.msra.mxu0 %v9232_v26  ;;  %2497 = vmatpush.bf16.msra.mxu1 %v9234_v0 }
 0x248   :  { %2440 = vmatmul.bf16.vlgmr.msrb.gmra.mxu0 %v9750_v14  ;;  %2453 = vmatmul.bf16.vlgmr.msrb.gmra.mxu1 %v9752_v37 }
 0x24a   :  { %2459 = vmatpush.bf16.msrb.mxu2 %v13486_v59  ;;  %2472 = vmatpush.bf16.msrb.mxu3 %v13487_v63 }
 0x24b   :  { %2485 = vmatpush.bf16.msra.mxu0 %v9245_v56  ;;  %2498 = vmatpush.bf16.msra.mxu1 %v9249_v2 }
 0x24e   :  { %2460 = vmatpush.bf16.msrb.mxu2 %v13488_v30  ;;  %2473 = vmatpush.bf16.msrb.mxu3 %v13489_v11 }
 0x24f   :  { %2486 = vmatpush.bf16.msra.mxu0 %v9262_v9  ;;  %2499 = vmatpush.bf16.msra.mxu1 %v9268_v4 }
 0x252   :  { %2461 = vmatpush.bf16.msrb.mxu2 %v13490_v57  ;;  %2474 = vmatpush.bf16.msrb.mxu3 %v13491_v45 }
 0x253   :  { %2487 = vmatpush.bf16.msra.mxu0 %v9277_v43  ;;  %2500 = vmatpush.bf16.msra.mxu1 %v9281_v12 }
 0x256   :  { %2462 = vmatpush.bf16.msrb.mxu2 %v9191_v61  ;;  %2475 = vmatpush.bf16.msrb.mxu3 %v13492_v54 }
 0x257   :  { %2488 = vmatpush.bf16.msra.mxu0 %v9290_v24  ;;  %2501 = vmatpush.bf16.msra.mxu1 %v9295_v20 }
 0x25a   :  { %2463 = vmatpush.bf16.msrb.mxu2 %v9203_v29  ;;  %2476 = vmatpush.bf16.msrb.mxu3 %v9206_v58 }
 0x25b   :  { %2489 = vmatpush.bf16.msra.mxu0 %v13345_v31  ;;  %2502 = vmatpush.bf16.msra.mxu1 %v13346_v53 }
 0x25e   :  { %2464 = vmatpush.bf16.msrb.mxu2 %v9215_v33  ;;  %2477 = vmatpush.bf16.msrb.mxu3 %v9218_v23 }
 0x25f   :  { %2490 = vmatpush.bf16.msra.mxu0 %v13349_v46  ;;  %2503 = vmatpush.bf16.msra.mxu1 %v13350_v19 }
 0x262   :  { %2465 = vmatpush.bf16.msrb.mxu2 %v9227_v5  ;;  %2478 = vmatpush.bf16.msrb.mxu3 %v9230_v51 }
 0x263   :  { %2491 = vmatpush.bf16.msra.mxu0 %v13351_v16  ;;  %2504 = vmatpush.bf16.msra.mxu1 %v13352_v62 }
 0x265   :  { %2466 = vmatmul.bf16.vlgmr.msrb.gmra.mxu2 %v9750_v14  ;;  %2479 = vmatmul.bf16.vlgmr.msrb.gmra.mxu3 %v9752_v37 }
 0x266   :  { %2510 = vmatpush.bf16.msra.mxu2 %v13493_v3  ;;  %2523 = vmatpush.bf16.msra.mxu3 %v13494_v39 }
 0x267   :  { %2536 = vmatpush.bf16.msrb.mxu0 %v13495_v10  ;;  %2549 = vmatpush.bf16.msrb.mxu1 %v13496_v22  ;;  %v13507_v22 = vld [vmem:[#allocation172_spill] sm:$0xff] }
 0x268   :  { %2492 = vmatmul.bf16.vlgmr.msra.gmra.mxu0 %v9750_v14  ;;  %2505 = vmatmul.bf16.vlgmr.msra.gmra.mxu1 %v9752_v37 }
 0x26a   :  { %2511 = vmatpush.bf16.msra.mxu2 %v13497_v47  ;;  %2524 = vmatpush.bf16.msra.mxu3 %v13498_v27  ;;  %v13508_v47 = vld [vmem:[#allocation173_spill] sm:$0xff]  ;;  %v13509_v27 = vld [vmem:[#allocation146_spill] sm:$0xff] }
 0x26b   :  { %2537 = vmatpush.bf16.msrb.mxu0 %v13499_v38  ;;  %2550 = vmatpush.bf16.msrb.mxu1 %v13500_v49  ;;  %v13510_v38 = vld [vmem:[#allocation147_spill] sm:$0xff]  ;;  %v13511_v49 = vld [vmem:[#allocation176_spill] sm:$0xff] }
 0x26e   :  { %2512 = vmatpush.bf16.msra.mxu2 %v13501_v36  ;;  %2525 = vmatpush.bf16.msra.mxu3 %v13502_v40  ;;  %v13512_v40 = vld [vmem:[#allocation150_spill] sm:$0xff] }
 0x26f   :  { %2538 = vmatpush.bf16.msrb.mxu0 %v13503_v6  ;;  %2551 = vmatpush.bf16.msrb.mxu1 %v13504_v8  ;;  %v13513_v6 = vld [vmem:[#allocation151_spill] sm:$0xff] }
 0x272   :  { %2513 = vmatpush.bf16.msra.mxu2 %v13505_v35  ;;  %2526 = vmatpush.bf16.msra.mxu3 %v13506_v41  ;;  %v13514_v41 = vld [vmem:[#allocation154_spill] sm:$0xff] }
 0x273   :  { %2539 = vmatpush.bf16.msrb.mxu0 %v13507_v22  ;;  %2552 = vmatpush.bf16.msrb.mxu1 %v13508_v47  ;;  %v13515_v22 = vld [vmem:[#allocation155_spill] sm:$0xff] }
 0x276   :  { %2514 = vmatpush.bf16.msra.mxu2 %v13509_v27  ;;  %2527 = vmatpush.bf16.msra.mxu3 %v13510_v38  ;;  %v13516_v38 = vld [vmem:[#allocation158_spill] sm:$0xff] }
 0x277   :  { %2540 = vmatpush.bf16.msrb.mxu0 %v13511_v49  ;;  %2553 = vmatpush.bf16.msrb.mxu1 %v13371_v52  ;;  %v13517_v49 = vld [vmem:[#allocation159_spill] sm:$0xff] }
 0x27a   :  { %2515 = vmatpush.bf16.msra.mxu2 %v13512_v40  ;;  %2528 = vmatpush.bf16.msra.mxu3 %v13513_v6  ;;  %v13518_v6 = vld [vmem:[#allocation162_spill] sm:$0xff] }
 0x27b   :  { %2541 = vmatpush.bf16.msrb.mxu0 %v13374_v7  ;;  %2554 = vmatpush.bf16.msrb.mxu1 %v13375_v32  ;;  %v13519_v7 = vld [vmem:[#allocation163_spill] sm:$0xff] }
 0x27e   :  { %2516 = vmatpush.bf16.msra.mxu2 %v13514_v41  ;;  %2529 = vmatpush.bf16.msra.mxu3 %v13515_v22 }
 0x27f   :  { %2542 = vmatpush.bf16.msrb.mxu0 %v13378_v21  ;;  %2555 = vmatpush.bf16.msrb.mxu1 %v13379_v13 }
 0x282   :  { %2517 = vmatpush.bf16.msra.mxu2 %v13516_v38  ;;  %2530 = vmatpush.bf16.msra.mxu3 %v13517_v49  ;;  %v13520_v49 = vld [vmem:[#allocation166_spill] sm:$0xff] }
 0x283   :  { %2543 = vmatpush.bf16.msrb.mxu0 %v9429_v25  ;;  %2556 = vmatpush.bf16.msrb.mxu1 %v9433_v18  ;;  %v13521_v25 = vld [vmem:[#allocation167_spill] sm:$0xff] }
 0x285   :  { %2518 = vmatmul.bf16.vlgmr.msra.gmra.mxu2 %v9750_v14  ;;  %2531 = vmatmul.bf16.vlgmr.msra.gmra.mxu3 %v9752_v37 }
 0x286   :  { %2562 = vmatpush.bf16.msrb.mxu2 %v13518_v6  ;;  %2575 = vmatpush.bf16.msrb.mxu3 %v13519_v7  ;;  %v13522_v7 = vld [vmem:[#allocation170_spill] sm:$0xff]  ;;  %v13525_v6 = vld [vmem:[#allocation175_spill] sm:$0xff] }
 0x287   :  { %2588 = vmatpush.bf16.msra.mxu0 %v9440_v15  ;;  %2601 = vmatpush.bf16.msra.mxu1 %v9442_v34  ;;  %v13523_v15 = vld [vmem:[#allocation171_spill] sm:$0xff]  ;;  %v13524_v34 = vld [vmem:[#allocation174_spill] sm:$0xff] }
 0x288   :  { %2544 = vmatmul.bf16.vlgmr.msrb.gmra.mxu0 %v9750_v14  ;;  %2557 = vmatmul.bf16.vlgmr.msrb.gmra.mxu1 %v9752_v37 }
 0x28a   :  { %2563 = vmatpush.bf16.msrb.mxu2 %v13520_v49  ;;  %2576 = vmatpush.bf16.msrb.mxu3 %v13521_v25  ;;  %v13526_v49 = vld [vmem:[#allocation199_spill] sm:$0xff]  ;;  %v13527_v25 = vld [vmem:[#allocation178_spill] sm:$0xff] }
 0x28b   :  { %2589 = vmatpush.bf16.msra.mxu0 %v9451_v42  ;;  %2602 = vmatpush.bf16.msra.mxu1 %v9455_v17  ;;  %v13528_v42 = vld [vmem:[#allocation179_spill] sm:$0xff]  ;;  %v13529_v17 = vld [vmem:[#allocation200_spill] sm:$0xff] }
 0x28e   :  { %2564 = vmatpush.bf16.msrb.mxu2 %v13522_v7  ;;  %2577 = vmatpush.bf16.msrb.mxu3 %v13523_v15  ;;  %v13530_v7 = vld [vmem:[#allocation201_spill] sm:$0xff]  ;;  %v13531_v15 = vld [vmem:[#allocation182_spill] sm:$0xff] }
 0x28f   :  { %2590 = vmatpush.bf16.msra.mxu0 %v9463_v1  ;;  %2603 = vmatpush.bf16.msra.mxu1 %v9467_v44  ;;  %v13532_v1 = vld [vmem:[#allocation183_spill] sm:$0xff]  ;;  %v13533_v44 = vld [vmem:[#allocation202_spill] sm:$0xff] }
 0x292   :  { %2565 = vmatpush.bf16.msrb.mxu2 %v13524_v34  ;;  %2578 = vmatpush.bf16.msrb.mxu3 %v13525_v6  ;;  %v13534_v34 = vld [vmem:[#allocation203_spill] sm:$0xff]  ;;  %v13535_v6 = vld [vmem:[#allocation186_spill] sm:$0xff] }
 0x293   :  { %2591 = vmatpush.bf16.msra.mxu0 %v9471_v55  ;;  %2604 = vmatpush.bf16.msra.mxu1 %v13526_v49  ;;  %v13536_v55 = vld [vmem:[#allocation187_spill] sm:$0xff]  ;;  %v13537_v49 = vld [vmem:[#allocation204_spill] sm:$0xff] }
 0x296   :  { %2566 = vmatpush.bf16.msrb.mxu2 %v13527_v25  ;;  %2579 = vmatpush.bf16.msrb.mxu3 %v13528_v42  ;;  %v13538_v25 = vld [vmem:[#allocation205_spill] sm:$0xff]  ;;  %v13539_v42 = vld [vmem:[#allocation190_spill] sm:$0xff] }
 0x297   :  { %2592 = vmatpush.bf16.msra.mxu0 %v13529_v17  ;;  %2605 = vmatpush.bf16.msra.mxu1 %v13530_v7  ;;  %v13540_v17 = vld [vmem:[#allocation191_spill] sm:$0xff]  ;;  %v13541_v7 = vld [vmem:[#allocation206_spill] sm:$0xff] }
 0x29a   :  { %2567 = vmatpush.bf16.msrb.mxu2 %v13531_v15  ;;  %2580 = vmatpush.bf16.msrb.mxu3 %v13532_v1  ;;  %v13542_v15 = vld [vmem:[#allocation207_spill] sm:$0xff] }
 0x29b   :  { %2593 = vmatpush.bf16.msra.mxu0 %v13533_v44  ;;  %2606 = vmatpush.bf16.msra.mxu1 %v13534_v34 }
 0x29e   :  { %2568 = vmatpush.bf16.msrb.mxu2 %v13535_v6  ;;  %2581 = vmatpush.bf16.msrb.mxu3 %v13536_v55 }
 0x29f   :  { %2594 = vmatpush.bf16.msra.mxu0 %v13537_v49  ;;  %2607 = vmatpush.bf16.msra.mxu1 %v13538_v25 }
 0x2a2   :  { %2569 = vmatpush.bf16.msrb.mxu2 %v13539_v42  ;;  %2582 = vmatpush.bf16.msrb.mxu3 %v13540_v17 }
 0x2a3   :  { %2595 = vmatpush.bf16.msra.mxu0 %v13541_v7  ;;  %2608 = vmatpush.bf16.msra.mxu1 %v13542_v15  ;;  %v2337_v15 = vpop.f32.mrf.mxu0 }
 0x2a5   :  { %2570 = vmatmul.bf16.vlgmr.msrb.gmra.mxu2 %v9750_v14  ;;  %2583 = vmatmul.bf16.vlgmr.msrb.gmra.mxu3 %v9752_v37 }
 0x2a6   :  { %2614 = vmatpush.bf16.msra.mxu2 %v13484_v50  ;;  %2627 = vmatpush.bf16.msra.mxu3 %v13485_v28  ;;  %v2350_v50 = vpop.f32.mrf.mxu1 }
 0x2a7   :  { %2640 = vmatpush.bf16.msrb.mxu0 %v9232_v26  ;;  %2653 = vmatpush.bf16.msrb.mxu1 %v9234_v0  ;;  %v9914_v26 = vadd.f32 %v2350_v50, %v2337_v15 }
 0x2a8   :  { %2596 = vmatmul.bf16.vlgmr.msra.gmra.mxu0 %v9750_v14  ;;  %2609 = vmatmul.bf16.vlgmr.msra.gmra.mxu1 %v9752_v37  ;;  %v2311_v14 = vpop.f32.mrf.mxu2  ;;  %v2324_v37 = vpop.f32.mrf.mxu3 }
 0x2aa   :  { %2615 = vmatpush.bf16.msra.mxu2 %v13486_v59  ;;  %2628 = vmatpush.bf16.msra.mxu3 %v13487_v63  ;;  %v9920_v59 = vadd.f32 %v2324_v37, %v2311_v14  ;;  %v2281_v63 = vunpack.c.h.bf16 %v9746_v48 }
 0x2ab   :  { %2641 = vmatpush.bf16.msrb.mxu0 %v9245_v56  ;;  %2654 = vmatpush.bf16.msrb.mxu1 %v9249_v2  ;;  %v2339_v15 = vpop.f32.mrf.mxu0 }
 0x2ae   :  { %2616 = vmatpush.bf16.msra.mxu2 %v13488_v30  ;;  %2629 = vmatpush.bf16.msra.mxu3 %v13489_v11  ;;  %v2352_v50 = vpop.f32.mrf.mxu1  ;;  %v2284_v11 = vrot.slane %v2281_v63, 7 }
 0x2af   :  { %2642 = vmatpush.bf16.msrb.mxu0 %v9262_v9  ;;  %2655 = vmatpush.bf16.msrb.mxu1 %v9268_v4 }
 0x2b0   :  { %v2313_v14 = vpop.f32.mrf.mxu2  ;;  %v2326_v37 = vpop.f32.mrf.mxu3 }
 0x2b2   :  { %2617 = vmatpush.bf16.msra.mxu2 %v13490_v57  ;;  %2630 = vmatpush.bf16.msra.mxu3 %v13491_v45  ;;  %v2280_v57 = vunpack.c.l.bf16 %v9746_v48 }
 0x2b3   :  { %2643 = vmatpush.bf16.msrb.mxu0 %v9277_v43  ;;  %2656 = vmatpush.bf16.msrb.mxu1 %v9281_v12  ;;  %v2389_v50 = vpop.f32.mrf.mxu0 }
 0x2b4   :  { %v2285_v15 = vsel %vm2205_vm0, %v2280_v57, %v2284_v11 }
 0x2b6   :  { %2618 = vmatpush.bf16.msra.mxu2 %v9191_v61  ;;  %2631 = vmatpush.bf16.msra.mxu3 %v13492_v54  ;;  %v2402_v63 = vpop.f32.mrf.mxu1 }
 0x2b7   :  { %2644 = vmatpush.bf16.msrb.mxu0 %v9290_v24  ;;  %2657 = vmatpush.bf16.msrb.mxu1 %v9295_v20  ;;  %v9937_v54 = vadd.f32 %v2402_v63, %v2389_v50  ;;  %v2287_v20 = vsub.f32 %v9740_v60, %v2285_v15 }
 0x2b8   :  { %v2363_v48 = vpop.f32.mrf.mxu2  ;;  %v2376_v57 = vpop.f32.mrf.mxu3 }
 0x2b9   :  { %v9944_v11 = vadd.f32 %v2376_v57, %v2363_v48  ;;  %v2289_v14 = vperm.slane %v2287_v20, 0  ;;  %v2290_v37 = vperm.slane %v2287_v20, 1  ;;  %v13543_v20 = vld [vmem:[#allocation161_spill] sm:$0xff] }
 0x2ba   :  { %2619 = vmatpush.bf16.msra.mxu2 %v9203_v29  ;;  %2632 = vmatpush.bf16.msra.mxu3 %v9206_v58 }
 0x2bb   :  { %2645 = vmatpush.bf16.msrb.mxu0 %v13345_v31  ;;  %2658 = vmatpush.bf16.msrb.mxu1 %v13346_v53  ;;  %v2391_v50 = vpop.f32.mrf.mxu0  ;;  %v9952_v63 = vpack.c.bf16 %v2289_v14, %v2289_v14  ;;  %v9954_v48 = vpack.c.bf16 %v2290_v37, %v2290_v37  ;;  %v13545_v14 = vld [vmem:[#allocation140_spill] sm:$0xff] }
 0x2bc   :  { %v13546_v37 = vld [vmem:[#allocation164_spill] sm:$0xff] }
 0x2be   :  { %2620 = vmatpush.bf16.msra.mxu2 %v9215_v33  ;;  %2633 = vmatpush.bf16.msra.mxu3 %v9218_v23  ;;  %v2404_v15 = vpop.f32.mrf.mxu1 }
 0x2bf   :  { %2646 = vmatpush.bf16.msrb.mxu0 %v13349_v46  ;;  %2659 = vmatpush.bf16.msrb.mxu1 %v13350_v19  ;;  %v13544_v15 = vld [vmem:[#allocation139_spill] sm:$0xff] }
 0x2c0   :  { %v2365_v57 = vpop.f32.mrf.mxu2  ;;  %v2378_v50 = vpop.f32.mrf.mxu3 }
 0x2c1   :  { %v13550_v50 = vld [vmem:[#allocation144_spill] sm:$0xff] }
 0x2c2   :  { %2621 = vmatpush.bf16.msra.mxu2 %v9227_v5  ;;  %2634 = vmatpush.bf16.msra.mxu3 %v9230_v51 }
 0x2c3   :  { %2647 = vmatpush.bf16.msrb.mxu0 %v13351_v16  ;;  %2660 = vmatpush.bf16.msrb.mxu1 %v13352_v62  ;;  %v13549_v62 = vld [vmem:[#allocation168_spill] sm:$0xff] }
 0x2c5   :  { %2622 = vmatmul.bf16.vlgmr.msra.gmra.mxu2 %v9952_v63  ;;  %2635 = vmatmul.bf16.vlgmr.msra.gmra.mxu3 %v9954_v48 }
 0x2c6   :  { %2666 = vmatpush.bf16.msrb.mxu2 %v13493_v3  ;;  %2679 = vmatpush.bf16.msrb.mxu3 %v13494_v39  ;;  %v13547_v39 = vld [vmem:[#allocation165_spill] sm:$0xff]  ;;  %v2454_v3 = vpop.f32.mrf.mxu1 }
 0x2c7   :  { %2692 = vmatpush.bf16.msra.mxu0 %v13495_v10  ;;  %2705 = vmatpush.bf16.msra.mxu1 %v13543_v20  ;;  %v13548_v20 = vld [vmem:[#allocation142_spill] sm:$0xff]  ;;  %v2441_v10 = vpop.f32.mrf.mxu0 }
 0x2c8   :  { %2648 = vmatmul.bf16.vlgmr.msrb.gmra.mxu0 %v9952_v63  ;;  %2661 = vmatmul.bf16.vlgmr.msrb.gmra.mxu1 %v9954_v48  ;;  %v9970_v57 = vadd.f32 %v2454_v3, %v2441_v10  ;;  %v13553_v10 = vld [vmem:[#allocation176_spill] sm:$0xff]  ;;  %v13554_v3 = vld [vmem:[#allocation151_spill] sm:$0xff] }
 0x2ca   :  { %2667 = vmatpush.bf16.msrb.mxu2 %v13544_v15  ;;  %2680 = vmatpush.bf16.msrb.mxu3 %v13545_v14  ;;  %v13551_v14 = vld [vmem:[#allocation172_spill] sm:$0xff] }
 0x2cb   :  { %2693 = vmatpush.bf16.msra.mxu0 %v13546_v37  ;;  %2706 = vmatpush.bf16.msra.mxu1 %v13547_v39  ;;  %v2415_v39 = vpop.f32.mrf.mxu2 }
 0x2ce   :  { %2668 = vmatpush.bf16.msrb.mxu2 %v13501_v36  ;;  %2681 = vmatpush.bf16.msrb.mxu3 %v13548_v20  ;;  %v2428_v36 = vpop.f32.mrf.mxu3  ;;  %v13552_v20 = vld [vmem:[#allocation147_spill] sm:$0xff] }
 0x2cf   :  { %2694 = vmatpush.bf16.msra.mxu0 %v13549_v62  ;;  %2707 = vmatpush.bf16.msra.mxu1 %v13504_v8  ;;  %v9976_v37 = vadd.f32 %v2428_v36, %v2415_v39  ;;  %v2443_v62 = vpop.f32.mrf.mxu0  ;;  %v2456_v8 = vpop.f32.mrf.mxu1 }
 0x2d0   :  { %v13556_v62 = vld [vmem:[#allocation159_spill] sm:$0xff]  ;;  %v13557_v8 = vld [vmem:[#allocation188_spill] sm:$0xff] }
 0x2d2   :  { %2669 = vmatpush.bf16.msrb.mxu2 %v13505_v35  ;;  %2682 = vmatpush.bf16.msrb.mxu3 %v13550_v50 }
 0x2d3   :  { %2695 = vmatpush.bf16.msra.mxu0 %v13551_v14  ;;  %2708 = vmatpush.bf16.msra.mxu1 %v13508_v47  ;;  %v13555_v14 = vld [vmem:[#allocation180_spill] sm:$0xff]  ;;  %v2417_v36 = vpop.f32.mrf.mxu2 }
 0x2d4   :  { %v13559_v36 = vld [vmem:[#allocation163_spill] sm:$0xff] }
 0x2d6   :  { %2670 = vmatpush.bf16.msrb.mxu2 %v13509_v27  ;;  %2683 = vmatpush.bf16.msrb.mxu3 %v13552_v20  ;;  %v2430_v39 = vpop.f32.mrf.mxu3 }
 0x2d7   :  { %2696 = vmatpush.bf16.msra.mxu0 %v13553_v10  ;;  %2709 = vmatpush.bf16.msra.mxu1 %v13371_v52  ;;  %v13560_v39 = vld [vmem:[#allocation192_spill] sm:$0xff] }
 0x2da   :  { %2671 = vmatpush.bf16.msrb.mxu2 %v13512_v40  ;;  %2684 = vmatpush.bf16.msrb.mxu3 %v13554_v3  ;;  %v13574_v40 = vld [vmem:[#allocation178_spill] sm:$0xff] }
 0x2db   :  { %2697 = vmatpush.bf16.msra.mxu0 %v13555_v14  ;;  %2710 = vmatpush.bf16.msra.mxu1 %v13375_v32  ;;  %v13558_v14 = vld [vmem:[#allocation162_spill] sm:$0xff] }
 0x2de   :  { %2672 = vmatpush.bf16.msrb.mxu2 %v13514_v41  ;;  %2685 = vmatpush.bf16.msrb.mxu3 %v13515_v22  ;;  %v13561_v41 = vld [vmem:[#allocation193_spill] sm:$0xff] }
 0x2df   :  { %2698 = vmatpush.bf16.msra.mxu0 %v13378_v21  ;;  %2711 = vmatpush.bf16.msra.mxu1 %v13379_v13  ;;  %v13568_v13 = vld [vmem:[#allocation196_spill] sm:$0xff]  ;;  %v13569_v21 = vld [vmem:[#allocation197_spill] sm:$0xff] }
 0x2e2   :  { %2673 = vmatpush.bf16.msrb.mxu2 %v13516_v38  ;;  %2686 = vmatpush.bf16.msrb.mxu3 %v13556_v62  ;;  %v13562_v62 = vld [vmem:[#allocation166_spill] sm:$0xff] }
 0x2e3   :  { %2699 = vmatpush.bf16.msra.mxu0 %v13557_v8  ;;  %2712 = vmatpush.bf16.msra.mxu1 %v9433_v18  ;;  %v13563_v8 = vld [vmem:[#allocation167_spill] sm:$0xff]  ;;  %v13564_v18 = vld [vmem:[#allocation194_spill] sm:$0xff] }
 0x2e5   :  { %2674 = vmatmul.bf16.vlgmr.msrb.gmra.mxu2 %v9952_v63  ;;  %2687 = vmatmul.bf16.vlgmr.msrb.gmra.mxu3 %v9954_v48  ;;  %v2506_v38 = vpop.f32.mrf.mxu1 }
 0x2e6   :  { %2718 = vmatpush.bf16.msra.mxu2 %v13558_v14  ;;  %2731 = vmatpush.bf16.msra.mxu3 %v13559_v36  ;;  %v13565_v14 = vld [vmem:[#allocation195_spill] sm:$0xff]  ;;  %v13566_v36 = vld [vmem:[#allocation170_spill] sm:$0xff] }
 0x2e7   :  { %2744 = vmatpush.bf16.msrb.mxu0 %v13560_v39  ;;  %2757 = vmatpush.bf16.msrb.mxu1 %v13561_v41  ;;  %v13567_v39 = vld [vmem:[#allocation171_spill] sm:$0xff]  ;;  %v2493_v41 = vpop.f32.mrf.mxu0 }
 0x2e8   :  { %2700 = vmatmul.bf16.vlgmr.msra.gmra.mxu0 %v9952_v63  ;;  %2713 = vmatmul.bf16.vlgmr.msra.gmra.mxu1 %v9954_v48  ;;  %v2494_v22 = vadd.f32 %v2493_v41, %v9914_v26 }
 0x2ea   :  { %2719 = vmatpush.bf16.msra.mxu2 %v13562_v62  ;;  %2732 = vmatpush.bf16.msra.mxu3 %v13563_v8  ;;  %v10011_v32 = vadd.f32 %v2506_v38, %v2494_v22  ;;  %v13570_v62 = vld [vmem:[#allocation174_spill] sm:$0xff]  ;;  %v13571_v8 = vld [vmem:[#allocation175_spill] sm:$0xff]  ;;  %v13576_v38 = vld [vmem:[#allocation200_spill] sm:$0xff] }
 0x2eb   :  { %2745 = vmatpush.bf16.msrb.mxu0 %v13564_v18  ;;  %2758 = vmatpush.bf16.msrb.mxu1 %v13565_v14  ;;  %v13572_v18 = vld [vmem:[#allocation198_spill] sm:$0xff]  ;;  %v13573_v14 = vld [vmem:[#allocation199_spill] sm:$0xff]  ;;  %v13577_v22 = vld [vmem:[#allocation201_spill] sm:$0xff] }
 0x2ed   :  { %v2508_v41 = vpop.f32.mrf.mxu1 }
 0x2ee   :  { %2720 = vmatpush.bf16.msra.mxu2 %v13566_v36  ;;  %2733 = vmatpush.bf16.msra.mxu3 %v13567_v39  ;;  %v2467_v36 = vpop.f32.mrf.mxu2  ;;  %v2480_v39 = vpop.f32.mrf.mxu3  ;;  %v13582_v41 = vld [vmem:[#allocation47_spill] sm:$0xff] }
 0x2ef   :  { %2746 = vmatpush.bf16.msrb.mxu0 %v13568_v13  ;;  %2759 = vmatpush.bf16.msrb.mxu1 %v13569_v21  ;;  %v2468_v3 = vadd.f32 %v2467_v36, %v9920_v59  ;;  %v13575_v13 = vld [vmem:[#allocation179_spill] sm:$0xff]  ;;  %v2495_v26 = vpop.f32.mrf.mxu0 }
 0x2f0   :  { %v13581_v26 = vld [vmem:[#allocation32_spill] sm:$0xff] }
 0x2f1   :  { %v10020_v21 = vadd.f32 %v2480_v39, %v2468_v3  ;;  %v13579_v3 = vld [vmem:[#allocation207_spill] sm:$0xff] }
 0x2f2   :  { %2721 = vmatpush.bf16.msra.mxu2 %v13570_v62  ;;  %2734 = vmatpush.bf16.msra.mxu3 %v13571_v8  ;;  %v13578_v8 = vld [vmem:[#allocation182_spill] sm:$0xff]  ;;  %v13580_v39 = vld [vmem:[#allocation31_spill] sm:$0xff] }
 0x2f3   :  { %2747 = vmatpush.bf16.msrb.mxu0 %v13572_v18  ;;  %2760 = vmatpush.bf16.msrb.mxu1 %v13573_v14 }
 0x2f6   :  { %2722 = vmatpush.bf16.msra.mxu2 %v13574_v40  ;;  %2735 = vmatpush.bf16.msra.mxu3 %v13575_v13  ;;  %v2469_v59 = vpop.f32.mrf.mxu2  ;;  %v2482_v36 = vpop.f32.mrf.mxu3 }
 0x2f7   :  { %2748 = vmatpush.bf16.msrb.mxu0 %v13576_v38  ;;  %2761 = vmatpush.bf16.msrb.mxu1 %v13577_v22  ;;  %v13583_v59 = vld [vmem:[#allocation48_spill] sm:$0xff]  ;;  %v13584_v36 = vld [vmem:[#allocation33_spill] sm:$0xff] }
 0x2fa   :  { %2723 = vmatpush.bf16.msra.mxu2 %v13578_v8  ;;  %2736 = vmatpush.bf16.msra.mxu3 %v13532_v1  ;;  %v2272_v8 = vld [vmem:[#allocation2 + $0x1] ss:$8 sm:$0x30] }
 0x2fb   :  { %2749 = vmatpush.bf16.msrb.mxu0 %v13533_v44  ;;  %2762 = vmatpush.bf16.msrb.mxu1 %v13534_v34 }
 0x2fe   :  { %2724 = vmatpush.bf16.msra.mxu2 %v13535_v6  ;;  %2737 = vmatpush.bf16.msra.mxu3 %v13536_v55  ;;  %v13594_v55 = vld [vmem:[#allocation59_spill] sm:$0xff] }
 0x2ff   :  { %2750 = vmatpush.bf16.msrb.mxu0 %v13537_v49  ;;  %2763 = vmatpush.bf16.msrb.mxu1 %v13538_v25  ;;  %v13589_v25 = vld [vmem:[#allocation36_spill] sm:$0xff] }
 0x302   :  { %2725 = vmatpush.bf16.msra.mxu2 %v13539_v42  ;;  %2738 = vmatpush.bf16.msra.mxu3 %v13540_v17  ;;  %v13588_v42 = vld [vmem:[#allocation35_spill] sm:$0xff] }
 0x303   :  { %2751 = vmatpush.bf16.msrb.mxu0 %v13541_v7  ;;  %2764 = vmatpush.bf16.msrb.mxu1 %v13579_v3  ;;  %v13585_v7 = vld [vmem:[#allocation34_spill] sm:$0xff]  ;;  %v13586_v3 = vld [vmem:[#allocation51_spill] sm:$0xff] }
 0x305   :  { %2726 = vmatmul.bf16.vlgmr.msra.gmra.mxu2 %v9952_v63  ;;  %2739 = vmatmul.bf16.vlgmr.msra.gmra.mxu3 %v9954_v48  ;;  %v2558_v17 = vpop.f32.mrf.mxu1 }
 0x306   :  { %2881 = vmatpush.bf16.msrb.mxu2 %v13580_v39  ;;  %2894 = vmatpush.bf16.msrb.mxu3 %v13581_v26  ;;  %v13587_v39 = vld [vmem:[#allocation52_spill] sm:$0xff]  ;;  %v2545_v26 = vpop.f32.mrf.mxu0 }
 0x307   :  { %2752 = vmatmul.bf16.vlgmr.msrb.gmra.mxu0 %v9952_v63  ;;  %2765 = vmatmul.bf16.vlgmr.msrb.gmra.mxu1 %v9954_v48  ;;  %v2546_v63 = vadd.f32 %v2545_v26, %v9937_v54  ;;  %v13596_v26 = vld [vmem:[#allocation39_spill] sm:$0xff] }
 0x308   :  { %2907 = vmatpush.bf16.msra.mxu0 %v13582_v41  ;;  %2920 = vmatpush.bf16.msra.mxu1 %v13583_v59  ;;  %v13590_v41 = vld [vmem:[#allocation55_spill] sm:$0xff]  ;;  %v13591_v59 = vld [vmem:[#allocation56_spill] sm:$0xff] }
 0x309   :  { %v10051_v48 = vadd.f32 %v2558_v17, %v2546_v63  ;;  %v13597_v63 = vld [vmem:[#allocation40_spill] sm:$0xff] }
 0x30a   :  { %2882 = vmatpush.bf16.msrb.mxu2 %v13584_v36  ;;  %2895 = vmatpush.bf16.msrb.mxu3 %v13585_v7  ;;  %v13592_v36 = vld [vmem:[#allocation37_spill] sm:$0xff]  ;;  %v13593_v7 = vld [vmem:[#allocation38_spill] sm:$0xff] }
 0x30c   :  { %2908 = vmatpush.bf16.msra.mxu0 %v13586_v3  ;;  %2921 = vmatpush.bf16.msra.mxu1 %v13587_v39  ;;  %v2519_v3 = vpop.f32.mrf.mxu2  ;;  %v2532_v39 = vpop.f32.mrf.mxu3 }
 0x30d   :  { %v2520_v49 = vadd.f32 %v2519_v3, %v9944_v11  ;;  %v2560_v54 = vpop.f32.mrf.mxu1 }
 0x30e   :  { %2883 = vmatpush.bf16.msrb.mxu2 %v13588_v42  ;;  %2896 = vmatpush.bf16.msrb.mxu3 %v13589_v25  ;;  %v13595_v42 = vld [vmem:[#allocation60_spill] sm:$0xff]  ;;  %v2547_v17 = vpop.f32.mrf.mxu0  ;;  %v13606_v54 = vld [vmem:[#allocation71_spill] sm:$0xff] }
 0x30f   :  { %v10060_v25 = vadd.f32 %v2532_v39, %v2520_v49  ;;  %v13603_v49 = vld [vmem:[#allocation68_spill] sm:$0xff]  ;;  %v13604_v39 = vld [vmem:[#allocation43_spill] sm:$0xff] }
 0x310   :  { %2909 = vmatpush.bf16.msra.mxu0 %v13590_v41  ;;  %2922 = vmatpush.bf16.msra.mxu1 %v13591_v59  ;;  %v13598_v59 = vld [vmem:[#allocation63_spill] sm:$0xff]  ;;  %v13601_v41 = vld [vmem:[#allocation42_spill] sm:$0xff]  ;;  %v13605_v17 = vld [vmem:[#allocation44_spill] sm:$0xff] }
 0x312   :  { %2884 = vmatpush.bf16.msrb.mxu2 %v13592_v36  ;;  %2897 = vmatpush.bf16.msrb.mxu3 %v13593_v7  ;;  %v13599_v36 = vld [vmem:[#allocation64_spill] sm:$0xff]  ;;  %v13600_v7 = vld [vmem:[#allocation41_spill] sm:$0xff] }
 0x314   :  { %2910 = vmatpush.bf16.msra.mxu0 %v13594_v55  ;;  %2923 = vmatpush.bf16.msra.mxu1 %v13595_v42  ;;  %v2521_v11 = vpop.f32.mrf.mxu2  ;;  %v2534_v3 = vpop.f32.mrf.mxu3  ;;  %v13602_v55 = vld [vmem:[#allocation67_spill] sm:$0xff]  ;;  %v13628_v42 = vld [vmem:[#allocation65_spill] sm:$0xff] }
 0x315   :  { %v13611_v11 = vld [vmem:[#allocation50_spill] sm:$0xff]  ;;  %v13612_v3 = vld [vmem:[#allocation75_spill] sm:$0xff] }
 0x316   :  { %2885 = vmatpush.bf16.msrb.mxu2 %v13596_v26  ;;  %2898 = vmatpush.bf16.msrb.mxu3 %v13597_v63  ;;  %v13607_v63 = vld [vmem:[#allocation72_spill] sm:$0xff]  ;;  %v13626_v26 = vld [vmem:[#allocation91_spill] sm:$0xff] }
 0x318   :  { %2911 = vmatpush.bf16.msra.mxu0 %v13598_v59  ;;  %2924 = vmatpush.bf16.msra.mxu1 %v13599_v36  ;;  %v13608_v59 = vld [vmem:[#allocation45_spill] sm:$0xff]  ;;  %v13609_v36 = vld [vmem:[#allocation46_spill] sm:$0xff] }
 0x31a   :  { %2886 = vmatpush.bf16.msrb.mxu2 %v13600_v7  ;;  %2899 = vmatpush.bf16.msrb.mxu3 %v13601_v41  ;;  %v13610_v7 = vld [vmem:[#allocation49_spill] sm:$0xff]  ;;  %v13622_v41 = vld [vmem:[#allocation87_spill] sm:$0xff] }
 0x31c   :  { %2912 = vmatpush.bf16.msra.mxu0 %v13602_v55  ;;  %2925 = vmatpush.bf16.msra.mxu1 %v13603_v49  ;;  %v13613_v55 = vld [vmem:[#allocation76_spill] sm:$0xff]  ;;  %v13614_v49 = vld [vmem:[#allocation79_spill] sm:$0xff] }
 0x31e   :  { %2887 = vmatpush.bf16.msrb.mxu2 %v13604_v39  ;;  %2900 = vmatpush.bf16.msrb.mxu3 %v13605_v17  ;;  %v13615_v39 = vld [vmem:[#allocation80_spill] sm:$0xff]  ;;  %v13616_v17 = vld [vmem:[#allocation53_spill] sm:$0xff] }
 0x320   :  { %2913 = vmatpush.bf16.msra.mxu0 %v13606_v54  ;;  %2926 = vmatpush.bf16.msra.mxu1 %v13607_v63  ;;  %v13617_v54 = vld [vmem:[#allocation54_spill] sm:$0xff]  ;;  %v13618_v63 = vld [vmem:[#allocation83_spill] sm:$0xff] }
 0x322   :  { %2888 = vmatpush.bf16.msrb.mxu2 %v13608_v59  ;;  %2901 = vmatpush.bf16.msrb.mxu3 %v13609_v36  ;;  %v13619_v59 = vld [vmem:[#allocation84_spill] sm:$0xff]  ;;  %v13620_v36 = vld [vmem:[#allocation57_spill] sm:$0xff] }
 0x324   :  { %2914 = vmatpush.bf16.msra.mxu0 %v13612_v3  ;;  %2927 = vmatpush.bf16.msra.mxu1 %v13613_v55 }
 0x325   :  { %v2610_v3 = vpop.f32.mrf.mxu1 }
 0x326   :  { %2933 = vmatpush.bf16.msra.mxu2 %v13610_v7  ;;  %2946 = vmatpush.bf16.msra.mxu3 %v13611_v11  ;;  %v13621_v7 = vld [vmem:[#allocation58_spill] sm:$0xff]  ;;  %v2597_v11 = vpop.f32.mrf.mxu0 }
 0x327   :  { %v2598_v55 = vadd.f32 %v2597_v11, %v9970_v57  ;;  %v13629_v57 = vld [vmem:[#allocation66_spill] sm:$0xff] }
 0x328   :  { %2959 = vmatpush.bf16.msrb.mxu0 %v13614_v49  ;;  %2972 = vmatpush.bf16.msrb.mxu1 %v13615_v39  ;;  %v13623_v49 = vld [vmem:[#allocation88_spill] sm:$0xff] }
 0x329   :  { %v10091_v39 = vadd.f32 %v2610_v3, %v2598_v55 }
 0x32a   :  { %2934 = vmatpush.bf16.msra.mxu2 %v13616_v17  ;;  %2947 = vmatpush.bf16.msra.mxu3 %v13617_v54  ;;  %v13624_v17 = vld [vmem:[#allocation61_spill] sm:$0xff]  ;;  %v13625_v54 = vld [vmem:[#allocation62_spill] sm:$0xff] }
 0x32c   :  { %2960 = vmatpush.bf16.msrb.mxu0 %v13618_v63  ;;  %2973 = vmatpush.bf16.msrb.mxu1 %v13619_v59  ;;  %v2571_v63 = vpop.f32.mrf.mxu2  ;;  %v2584_v59 = vpop.f32.mrf.mxu3 }
 0x32d   :  { %v2612_v3 = vpop.f32.mrf.mxu1 }
 0x32e   :  { %2935 = vmatpush.bf16.msra.mxu2 %v13620_v36  ;;  %2948 = vmatpush.bf16.msra.mxu3 %v13621_v7  ;;  %v2572_v36 = vadd.f32 %v2571_v63, %v9976_v37  ;;  %v13627_v7 = vld [vmem:[#allocation92_spill] sm:$0xff]  ;;  %v2599_v55 = vpop.f32.mrf.mxu0  ;;  %v13640_v3 = vld [vmem:[#allocation77_spill] sm:$0xff] }
 0x32f   :  { %v13639_v55 = vld [vmem:[#allocation104_spill] sm:$0xff] }
 0x330   :  { %2961 = vmatpush.bf16.msrb.mxu0 %v13622_v41  ;;  %2974 = vmatpush.bf16.msrb.mxu1 %v13623_v49  ;;  %v10100_v11 = vadd.f32 %v2584_v59, %v2572_v36  ;;  %v13630_v49 = vld [vmem:[#allocation95_spill] sm:$0xff]  ;;  %v13633_v41 = vld [vmem:[#allocation70_spill] sm:$0xff] }
 0x331   :  { %v13637_v59 = vld [vmem:[#allocation74_spill] sm:$0xff]  ;;  %v13638_v36 = vld [vmem:[#allocation103_spill] sm:$0xff] }
 0x332   :  { %2936 = vmatpush.bf16.msra.mxu2 %v13624_v17  ;;  %2949 = vmatpush.bf16.msra.mxu3 %v13625_v54  ;;  %v13631_v17 = vld [vmem:[#allocation96_spill] sm:$0xff]  ;;  %v13632_v54 = vld [vmem:[#allocation69_spill] sm:$0xff] }
 0x334   :  { %2962 = vmatpush.bf16.msrb.mxu0 %v13626_v26  ;;  %2975 = vmatpush.bf16.msrb.mxu1 %v13627_v7  ;;  %v2573_v37 = vpop.f32.mrf.mxu2  ;;  %v2586_v63 = vpop.f32.mrf.mxu3  ;;  %v13634_v26 = vld [vmem:[#allocation99_spill] sm:$0xff]  ;;  %v13635_v7 = vld [vmem:[#allocation100_spill] sm:$0xff] }
 0x335   :  { %v13643_v37 = vld [vmem:[#allocation108_spill] sm:$0xff] }
 0x336   :  { %2937 = vmatpush.bf16.msra.mxu2 %v13628_v42  ;;  %2950 = vmatpush.bf16.msra.mxu3 %v13629_v57  ;;  %v13636_v42 = vld [vmem:[#allocation73_spill] sm:$0xff] }
 0x338   :  { %2963 = vmatpush.bf16.msrb.mxu0 %v13630_v49  ;;  %2976 = vmatpush.bf16.msrb.mxu1 %v13631_v17  ;;  %v13641_v17 = vld [vmem:[#allocation78_spill] sm:$0xff] }
 0x33a   :  { %2938 = vmatpush.bf16.msra.mxu2 %v13632_v54  ;;  %2951 = vmatpush.bf16.msra.mxu3 %v13633_v41  ;;  %v13642_v54 = vld [vmem:[#allocation107_spill] sm:$0xff] }
 0x33c   :  { %2964 = vmatpush.bf16.msrb.mxu0 %v13634_v26  ;;  %2977 = vmatpush.bf16.msrb.mxu1 %v13635_v7 }
 0x33e   :  { %2939 = vmatpush.bf16.msra.mxu2 %v13636_v42  ;;  %2952 = vmatpush.bf16.msra.mxu3 %v13637_v59  ;;  %v13644_v59 = vld [vmem:[#allocation148_spill] sm:$0xff] }
 0x340   :  { %2965 = vmatpush.bf16.msrb.mxu0 %v13638_v36  ;;  %2978 = vmatpush.bf16.msrb.mxu1 %v13639_v55 }
 0x342   :  { %2940 = vmatpush.bf16.msra.mxu2 %v13640_v3  ;;  %2953 = vmatpush.bf16.msra.mxu3 %v13641_v17  ;;  %v13645_v17 = vld [vmem:[#allocation149_spill] sm:$0xff] }
 0x344   :  { %2966 = vmatpush.bf16.msrb.mxu0 %v13642_v54  ;;  %2979 = vmatpush.bf16.msrb.mxu1 %v13643_v37 }
 0x345   :  { %v2649_v63 = vpop.f32.mrf.mxu0  ;;  %v2662_v26 = vpop.f32.mrf.mxu1 }
 0x346   :  { %v2663_v41 = vadd.f32 %v2662_v26, %v2649_v63  ;;  %v2271_v26 = vld [vmem:[#allocation2 + $0x1] ss:$8 sm:$0xf] }
 0x347   :  { %v10121_v63 = vor.u32 %v2272_v8, %v2271_v26 }
 0x348   :  { %v2771_v7 = vadd.f32 %v2663_v41, %v10011_v32  ;;  %v2623_v42 = vpop.f32.mrf.mxu2  ;;  %v2636_v49 = vpop.f32.mrf.mxu3 }
 0x349   :  { %v2637_v36 = vadd.f32 %v2636_v49, %v2623_v42 }
 0x34a   :  { %v2777_v57 = vadd.f32 %v2771_v7, %v13644_v59 }
 0x34b   :  { %v2770_v55 = vadd.f32 %v2637_v36, %v10020_v21 }
 0x34c   :  { %v2784_v34 = vrot.slane %v2777_v57, 7 }
 0x34d   :  { %v2651_v6 = vpop.f32.mrf.mxu0  ;;  %v2664_v3 = vpop.f32.mrf.mxu1  ;;  %v2776_v44 = vadd.f32 %v2770_v55, %v13645_v17  ;;  %v13646_v55 = vld [vmem:[#allocation152_spill] sm:$0xff] }
 0x34f   :  { %v2785_v54 = vsel %vm2205_vm0, %v2776_v44, %v2784_v34 }
 0x350   :  { %v2625_v37 = vpop.f32.mrf.mxu2  ;;  %v2638_v1 = vpop.f32.mrf.mxu3  ;;  %v2787_v32 = vadd.f32 %v2785_v54, %v10121_v63  ;;  %v13647_v54 = vld [vmem:[#allocation153_spill] sm:$0xff] }
 0x352   :  { %v7909_v41 = vmul.f32 -1.442695, %v2787_v32 }
 0x354   :  { %8432 = vpow2.f32 %v7909_v41  ;;  %v2808_v41 = vrot.slane %v10121_v63, 2 }
 0x35a   :  { %v8433_v36 = vpop.eup %8432 }
 0x35b   :  { %v2791_v37 = vadd.f32 1.0, %v8433_v36 }
 0x35d   :  { %8434 = vrcp.f32 %v2791_v37  ;;  %vm2797_vm10 = vweird.f32 %v2791_v37 }
 0x365   :  { %v2701_v7 = vpop.f32.mrf.mxu0  ;;  %v2714_v42 = vpop.f32.mrf.mxu1 }
 0x366   :  { %v2715_v21 = vadd.f32 %v2714_v42, %v2701_v7 }
 0x368   :  { %v2773_v6 = vadd.f32 %v2715_v21, %v10051_v48  ;;  %v2675_v49 = vpop.f32.mrf.mxu2  ;;  %v2688_v57 = vpop.f32.mrf.mxu3 }
 0x369   :  { %v2689_v44 = vadd.f32 %v2688_v57, %v2675_v49 }
 0x36a   :  { %v2779_v34 = vadd.f32 %v2773_v6, %v13646_v55  ;;  %v8435_v6 = vpop.eup %8434  ;;  %v2803_v55 = vand.u32 2147483648, %v2791_v37 }
 0x36b   :  { %v2772_v1 = vadd.f32 %v2689_v44, %v10060_v25  ;;  %v2793_v49 = vmul.f32 %v8435_v6, %v2791_v37  ;;  %vm2798_vm9 = vweird.f32 %v8435_v6 }
 0x36c   :  { %v2812_v26 = vrot.slane %v2779_v34, 7  ;;  %vm2799_vm11 = vmor %vm2797_vm10, %vm2798_vm9  ;;  %v2804_v38 = vor.u32 1.1754944e-38, %v2803_v55  ;;  %vm6327_vm10 = vcmask 1041408  }
 0x36d   :  { %v2703_v3 = vpop.f32.mrf.mxu0  ;;  %v2716_v8 = vpop.f32.mrf.mxu1  ;;  %v2778_v32 = vadd.f32 %v2772_v1, %v13647_v54  ;;  %v2794_v44 = vsub.f32 1.0, %v2793_v49 }
 0x36f   :  { %v2813_v7 = vsel %vm2205_vm0, %v2778_v32, %v2812_v26  ;;  %v2795_v1 = vmul.f32 %v8435_v6, %v2794_v44 }
 0x370   :  { %v2815_v48 = vadd.f32 %v2813_v7, %v2808_v41  ;;  %v2677_v42 = vpop.f32.mrf.mxu2  ;;  %v2690_v21 = vpop.f32.mrf.mxu3 }
 0x371   :  { %v2796_v7 = vadd.f32 %v8435_v6, %v2795_v1 }
 0x372   :  { %v7910_v17 = vmul.f32 -1.442695, %v2815_v48 }
 0x374   :  { %8436 = vpow2.f32 %v7910_v17  ;;  %v13648_v17 = vld [vmem:[#allocation156_spill] sm:$0xff] }
 0x37a   :  { %v8437_v57 = vpop.eup %8436 }
 0x37b   :  { %v2819_v25 = vadd.f32 1.0, %v8437_v57  ;;  %v2801_v57 = vand.u32 2147483647, %v2791_v37  ;;  %v2841_v37 = vrot.slane %v10121_v63, 4 }
 0x37d   :  { %8438 = vrcp.f32 %v2819_v25  ;;  %vm2802_vm12 = vcmp.eq.f32.partialorder %v2801_v57, 8.507059e+37  ;;  %vm2825_vm14 = vweird.f32 %v2819_v25 }
 0x383   :  { %v8439_v8 = vpop.eup %8438 }
 0x384   :  { %v2753_v36 = vpop.f32.mrf.mxu0  ;;  %v2766_v34 = vpop.f32.mrf.mxu1  ;;  %v2821_v26 = vmul.f32 %v8439_v8, %v2819_v25  ;;  %vm2826_vm13 = vweird.f32 %v8439_v8 }
 0x385   :  { %v2767_v3 = vadd.f32 %v2766_v34, %v2753_v36  ;;  %v2800_v34 = vsel %vm2799_vm11, %v8435_v6, %v2796_v7  ;;  %vm2827_vm15 = vmor %vm2825_vm14, %vm2826_vm13 }
 0x386   :  { %v2822_v48 = vsub.f32 1.0, %v2821_v26  ;;  %v2805_v1 = vsel %vm2802_vm12, %v2804_v38, %v2800_v34 }
 0x387   :  { %v2775_v54 = vadd.f32 %v2767_v3, %v10091_v39  ;;  %v13649_v3 = vld [vmem:[#allocation208_spill] sm:$0xff] }
 0x388   :  { %v2727_v32 = vpop.f32.mrf.mxu2  ;;  %v2740_v41 = vpop.f32.mrf.mxu3  ;;  %v2823_v49 = vmul.f32 %v8439_v8, %v2822_v48 }
 0x389   :  { %v2781_v42 = vadd.f32 %v2775_v54, %v13648_v17  ;;  %v2741_v21 = vadd.f32 %v2740_v41, %v2727_v32  ;;  %v2831_v32 = vand.u32 2147483648, %v2819_v25  ;;  %v13706_v17 = vld [vmem:[#allocation180_spill] sm:$0xff] }
 0x38a   :  { %v2824_v26 = vadd.f32 %v8439_v8, %v2823_v49 }
 0x38b   :  { %v2774_v59 = vadd.f32 %v2741_v21, %v10100_v11  ;;  %v2837_v39 = vrot.slane %v2781_v42, 7  ;;  %v2829_v21 = vand.u32 2147483647, %v2819_v25  ;;  %v2832_v42 = vor.u32 1.1754944e-38, %v2831_v32  ;;  %v13654_v32 = vld [vmem:[#allocation112_spill] sm:$0xff] }
 0x38c   :  { %v2755_v44 = vpop.f32.mrf.mxu0  ;;  %v2768_v36 = vpop.f32.mrf.mxu1  ;;  %v2828_v7 = vsel %vm2827_vm15, %v8439_v8, %v2824_v26  ;;  %v13652_v26 = vld [vmem:[#allocation82_spill] sm:$0xff] }
 0x38d   :  { %v2780_v22 = vadd.f32 %v2774_v59, %v13649_v3  ;;  %vm2830_vm1 = vcmp.eq.f32.partialorder %v2829_v21, 8.507059e+37  ;;  %v13659_v21 = vld [vmem:[#allocation89_spill] sm:$0xff]  ;;  %v13705_v3 = vld [vmem:[#allocation151_spill] sm:$0xff] }
 0x38e   :  { %v2833_v59 = vsel %vm2830_vm1, %v2832_v42, %v2828_v7  ;;  %v13661_v7 = vld [vmem:[#allocation119_spill] sm:$0xff]  ;;  %v13662_v42 = vld [vmem:[#allocation120_spill] sm:$0xff] }
 0x38f   :  { %v2838_v54 = vsel %vm2205_vm0, %v2780_v22, %v2837_v39  ;;  %v2845_v55 = vsub.f32 1.0, %v2833_v59  ;;  %v2847_v22 = vmul.f32 %v2833_v59, %v9740_v60  ;;  %v13663_v59 = vld [vmem:[#allocation93_spill] sm:$0xff] }
 0x390   :  { %v2840_v41 = vmul.f32 %v2838_v54, %v2805_v1  ;;  %v2729_v48 = vpop.f32.mrf.mxu2  ;;  %v2742_v11 = vpop.f32.mrf.mxu3  ;;  %v13651_v1 = vld [vmem:[#allocation81_spill] sm:$0xff]  ;;  %v13653_v54 = vld [vmem:[#allocation111_spill] sm:$0xff] }
 0x391   :  { %v13657_v48 = vld [vmem:[#allocation115_spill] sm:$0xff]  ;;  %v13658_v11 = vld [vmem:[#allocation116_spill] sm:$0xff]  ;;  %v13702_v60 = vld [vmem:[#allocation169_spill] sm:$0xff] }
 0x392   :  { %v2843_v6 = vadd.f32 %v2841_v37, %v2840_v41  ;;  %v13655_v41 = vld [vmem:[#allocation85_spill] sm:$0xff]  ;;  %v13656_v37 = vld [vmem:[#allocation86_spill] sm:$0xff] }
 0x394   :  { %8440 = vtanh.f32 %v2843_v6  ;;  %v13660_v6 = vld [vmem:[#allocation90_spill] sm:$0xff] }
 0x39a   :  { %v8441_v38 = vpop.eup %8440 }
 0x39b   :  { %v2846_v57 = vmul.f32 %v8441_v38, %v2845_v55  ;;  %v13664_v55 = vld [vmem:[#allocation94_spill] sm:$0xff]  ;;  %v13665_v38 = vld [vmem:[#allocation123_spill] sm:$0xff] }
 0x39d   :  { %v10137_v49 = vadd.f32 %v2847_v22, %v2846_v57  ;;  %v13666_v57 = vld [vmem:[#allocation124_spill] sm:$0xff]  ;;  %v13667_v22 = vld [vmem:[#allocation97_spill] sm:$0xff] }
 0x39f   :  { %13650 = vst [vmem:[#allocation114_spill] sm:$0xff] %v10137_v49  ;;  %v12937_v63 = vperm.slane %v10137_v49, 0  ;;  %v12936_v44 = vperm.slane %v10137_v49, 1 }
 0x3a1   :  { %v10145_v25 = vpack.c.bf16 %v12936_v44, %v12937_v63  ;;  %v13670_v44 = vld [vmem:[#allocation128_spill] sm:$0xff]  ;;  %v13671_v63 = vld [vmem:[#allocation101_spill] sm:$0xff] }
 0x3a3   :  { %v2875_v8 = vunpack.c.l.b16 %v10145_v25  ;;  %v2876_v36 = vunpack.c.h.b16 %v10145_v25 }
 0x3a5   :  { %v10149_v34 = vpack.c.b16 %v2875_v8, %v2875_v8  ;;  %v10151_v39 = vpack.c.b16 %v2876_v36, %v2876_v36  ;;  %v13668_v8 = vld [vmem:[#allocation98_spill] sm:$0xff]  ;;  %v13669_v36 = vld [vmem:[#allocation127_spill] sm:$0xff] }
 0x3a7   :  { %2889 = vmatmul.bf16.vlgmr.msrb.gmra.mxu2 %v10149_v34  ;;  %2902 = vmatmul.bf16.vlgmr.msrb.gmra.mxu3 %v10151_v39 }
 0x3a8   :  { %2915 = vmatmul.bf16.vlgmr.msra.gmra.mxu0 %v10149_v34  ;;  %2928 = vmatmul.bf16.vlgmr.msra.gmra.mxu1 %v10151_v39 }
 0x3a9   :  { %2985 = vmatpush.bf16.msrb.mxu2 %v13651_v1  ;;  %2998 = vmatpush.bf16.msrb.mxu3 %v13652_v26  ;;  %v13703_v26 = vld [vmem:[#allocation172_spill] sm:$0xff]  ;;  %v13704_v1 = vld [vmem:[#allocation150_spill] sm:$0xff] }
 0x3aa   :  { %3011 = vmatpush.bf16.msra.mxu0 %v13653_v54  ;;  %3024 = vmatpush.bf16.msra.mxu1 %v13654_v32  ;;  %v13700_v32 = vld [vmem:[#allocation142_spill] sm:$0xff]  ;;  %v13701_v54 = vld [vmem:[#allocation168_spill] sm:$0xff] }
 0x3ad   :  { %2986 = vmatpush.bf16.msrb.mxu2 %v13655_v41  ;;  %2999 = vmatpush.bf16.msrb.mxu3 %v13656_v37  ;;  %v13698_v37 = vld [vmem:[#allocation165_spill] sm:$0xff] }
 0x3ae   :  { %3012 = vmatpush.bf16.msra.mxu0 %v13657_v48  ;;  %3025 = vmatpush.bf16.msra.mxu1 %v13658_v11  ;;  %v13696_v11 = vld [vmem:[#allocation140_spill] sm:$0xff]  ;;  %v13699_v41 = vld [vmem:[#allocation141_spill] sm:$0xff] }
 0x3af   :  { %v13697_v48 = vld [vmem:[#allocation164_spill] sm:$0xff] }
 0x3b1   :  { %2987 = vmatpush.bf16.msrb.mxu2 %v13659_v21  ;;  %3000 = vmatpush.bf16.msrb.mxu3 %v13660_v6  ;;  %v13694_v6 = vld [vmem:[#allocation160_spill] sm:$0xff]  ;;  %v13695_v21 = vld [vmem:[#allocation161_spill] sm:$0xff] }
 0x3b2   :  { %3013 = vmatpush.bf16.msra.mxu0 %v13661_v7  ;;  %3026 = vmatpush.bf16.msra.mxu1 %v13662_v42  ;;  %v13676_v42 = vld [vmem:[#allocation106_spill] sm:$0xff]  ;;  %v13677_v7 = vld [vmem:[#allocation132_spill] sm:$0xff] }
 0x3b5   :  { %2988 = vmatpush.bf16.msrb.mxu2 %v13663_v59  ;;  %3001 = vmatpush.bf16.msrb.mxu3 %v13664_v55  ;;  %v13674_v55 = vld [vmem:[#allocation131_spill] sm:$0xff]  ;;  %v13675_v59 = vld [vmem:[#allocation105_spill] sm:$0xff] }
 0x3b6   :  { %3014 = vmatpush.bf16.msra.mxu0 %v13665_v38  ;;  %3027 = vmatpush.bf16.msra.mxu1 %v13666_v57  ;;  %v13672_v38 = vld [vmem:[#allocation102_spill] sm:$0xff] }
 0x3b7   :  { %2941 = vmatmul.bf16.vlgmr.msra.gmra.mxu2 %v10149_v34  ;;  %2954 = vmatmul.bf16.vlgmr.msra.gmra.mxu3 %v10151_v39  ;;  %v13673_v57 = vld [vmem:[#allocation130_spill] sm:$0xff] }
 0x3b8   :  { %2967 = vmatmul.bf16.vlgmr.msrb.gmra.mxu0 %v10149_v34  ;;  %2980 = vmatmul.bf16.vlgmr.msrb.gmra.mxu1 %v10151_v39 }
 0x3b9   :  { %2989 = vmatpush.bf16.msrb.mxu2 %v13667_v22  ;;  %3002 = vmatpush.bf16.msrb.mxu3 %v13668_v8  ;;  %v13678_v22 = vld [vmem:[#allocation133_spill] sm:$0xff] }
 0x3ba   :  { %3015 = vmatpush.bf16.msra.mxu0 %v13669_v36  ;;  %3028 = vmatpush.bf16.msra.mxu1 %v13670_v44  ;;  %v13679_v8 = vld [vmem:[#allocation109_spill] sm:$0xff]  ;;  %v13680_v36 = vld [vmem:[#allocation110_spill] sm:$0xff] }
 0x3bb   :  { %v13681_v44 = vld [vmem:[#allocation134_spill] sm:$0xff] }
 0x3bd   :  { %2990 = vmatpush.bf16.msrb.mxu2 %v13671_v63  ;;  %3003 = vmatpush.bf16.msrb.mxu3 %v13672_v38  ;;  %v13682_v63 = vld [vmem:[#allocation135_spill] sm:$0xff]  ;;  %v13683_v38 = vld [vmem:[#allocation113_spill] sm:$0xff] }
 0x3be   :  { %3016 = vmatpush.bf16.msra.mxu0 %v13673_v57  ;;  %3029 = vmatpush.bf16.msra.mxu1 %v13674_v55  ;;  %v13684_v55 = vld [vmem:[#allocation136_spill] sm:$0xff]  ;;  %v13693_v57 = vld [vmem:[#allocation138_spill] sm:$0xff] }
 0x3c1   :  { %2991 = vmatpush.bf16.msrb.mxu2 %v13675_v59  ;;  %3004 = vmatpush.bf16.msrb.mxu3 %v13676_v42  ;;  %v13691_v42 = vld [vmem:[#allocation157_spill] sm:$0xff] }
 0x3c2   :  { %3017 = vmatpush.bf16.msra.mxu0 %v13677_v7  ;;  %3030 = vmatpush.bf16.msra.mxu1 %v13678_v22  ;;  %v13689_v22 = vld [vmem:[#allocation129_spill] sm:$0xff] }
 0x3c3   :  { %v13690_v7 = vld [vmem:[#allocation145_spill] sm:$0xff] }
 0x3c4   :  { %v13692_v59 = vld [vmem:[#allocation137_spill] sm:$0xff] }
 0x3c5   :  { %2992 = vmatpush.bf16.msrb.mxu2 %v13679_v8  ;;  %3005 = vmatpush.bf16.msrb.mxu3 %v13680_v36  ;;  %v13685_v36 = vld [vmem:[#allocation117_spill] sm:$0xff] }
 0x3c6   :  { %3018 = vmatpush.bf16.msra.mxu0 %v13681_v44  ;;  %3031 = vmatpush.bf16.msra.mxu1 %v13682_v63  ;;  %v13686_v44 = vld [vmem:[#allocation118_spill] sm:$0xff]  ;;  %v13688_v8 = vld [vmem:[#allocation125_spill] sm:$0xff] }
 0x3c7   :  { %v13687_v63 = vld [vmem:[#allocation122_spill] sm:$0xff] }
 0x3c8   :  { %2993 = vmatmul.bf16.vlgmr.msrb.gmra.mxu2 %v10149_v34  ;;  %3006 = vmatmul.bf16.vlgmr.msrb.gmra.mxu3 %v10151_v39 }
 0x3c9   :  { %3037 = vmatpush.bf16.msra.mxu2 %v13683_v38  ;;  %3050 = vmatpush.bf16.msra.mxu3 %v13485_v28 }
 0x3ca   :  { %3063 = vmatpush.bf16.msrb.mxu0 %v13684_v55  ;;  %3076 = vmatpush.bf16.msrb.mxu1 %v9234_v0 }
 0x3cb   :  { %3019 = vmatmul.bf16.vlgmr.msra.gmra.mxu0 %v10149_v34  ;;  %3032 = vmatmul.bf16.vlgmr.msra.gmra.mxu1 %v10151_v39 }
 0x3cd   :  { %3038 = vmatpush.bf16.msra.mxu2 %v13685_v36  ;;  %3051 = vmatpush.bf16.msra.mxu3 %v13686_v44 }
 0x3ce   :  { %3064 = vmatpush.bf16.msrb.mxu0 %v9245_v56  ;;  %3077 = vmatpush.bf16.msrb.mxu1 %v9249_v2 }
 0x3d1   :  { %3039 = vmatpush.bf16.msra.mxu2 %v13488_v30  ;;  %3052 = vmatpush.bf16.msra.mxu3 %v13687_v63 }
 0x3d2   :  { %3065 = vmatpush.bf16.msrb.mxu0 %v9262_v9  ;;  %3078 = vmatpush.bf16.msrb.mxu1 %v9268_v4 }
 0x3d5   :  { %3040 = vmatpush.bf16.msra.mxu2 %v13688_v8  ;;  %3053 = vmatpush.bf16.msra.mxu3 %v13491_v45 }
 0x3d6   :  { %3066 = vmatpush.bf16.msrb.mxu0 %v9277_v43  ;;  %3079 = vmatpush.bf16.msrb.mxu1 %v9281_v12 }
 0x3d9   :  { %3041 = vmatpush.bf16.msra.mxu2 %v9191_v61  ;;  %3054 = vmatpush.bf16.msra.mxu3 %v13689_v22 }
 0x3da   :  { %3067 = vmatpush.bf16.msrb.mxu0 %v9290_v24  ;;  %3080 = vmatpush.bf16.msrb.mxu1 %v13690_v7 }
 0x3dd   :  { %3042 = vmatpush.bf16.msra.mxu2 %v9203_v29  ;;  %3055 = vmatpush.bf16.msra.mxu3 %v9206_v58 }
 0x3de   :  { %3068 = vmatpush.bf16.msrb.mxu0 %v13345_v31  ;;  %3081 = vmatpush.bf16.msrb.mxu1 %v13346_v53 }
 0x3e1   :  { %3043 = vmatpush.bf16.msra.mxu2 %v9215_v33  ;;  %3056 = vmatpush.bf16.msra.mxu3 %v9218_v23 }
 0x3e2   :  { %3069 = vmatpush.bf16.msrb.mxu0 %v13349_v46  ;;  %3082 = vmatpush.bf16.msrb.mxu1 %v13350_v19 }
 0x3e5   :  { %3044 = vmatpush.bf16.msra.mxu2 %v9227_v5  ;;  %3057 = vmatpush.bf16.msra.mxu3 %v9230_v51 }
 0x3e6   :  { %3070 = vmatpush.bf16.msrb.mxu0 %v13351_v16  ;;  %3083 = vmatpush.bf16.msrb.mxu1 %v13691_v42 }
 0x3e8   :  { %3045 = vmatmul.bf16.vlgmr.msra.gmra.mxu2 %v10149_v34  ;;  %3058 = vmatmul.bf16.vlgmr.msra.gmra.mxu3 %v10151_v39 }
 0x3e9   :  { %3089 = vmatpush.bf16.msrb.mxu2 %v13692_v59  ;;  %3102 = vmatpush.bf16.msrb.mxu3 %v13693_v57 }
 0x3ea   :  { %3115 = vmatpush.bf16.msra.mxu0 %v13694_v6  ;;  %3128 = vmatpush.bf16.msra.mxu1 %v13695_v21 }
 0x3eb   :  { %3071 = vmatmul.bf16.vlgmr.msrb.gmra.mxu0 %v10149_v34  ;;  %3084 = vmatmul.bf16.vlgmr.msrb.gmra.mxu1 %v10151_v39 }
 0x3ed   :  { %3090 = vmatpush.bf16.msrb.mxu2 %v13544_v15  ;;  %3103 = vmatpush.bf16.msrb.mxu3 %v13696_v11 }
 0x3ee   :  { %3116 = vmatpush.bf16.msra.mxu0 %v13697_v48  ;;  %3129 = vmatpush.bf16.msra.mxu1 %v13698_v37 }
 0x3f1   :  { %3091 = vmatpush.bf16.msrb.mxu2 %v13699_v41  ;;  %3104 = vmatpush.bf16.msrb.mxu3 %v13700_v32 }
 0x3f2   :  { %3117 = vmatpush.bf16.msra.mxu0 %v13701_v54  ;;  %3130 = vmatpush.bf16.msra.mxu1 %v13702_v60 }
 0x3f5   :  { %3092 = vmatpush.bf16.msrb.mxu2 %v13505_v35  ;;  %3105 = vmatpush.bf16.msrb.mxu3 %v13550_v50  ;;  %v13707_v35 = vld [vmem:[#allocation181_spill] sm:$0xff]  ;;  %v13708_v50 = vld [vmem:[#allocation154_spill] sm:$0xff] }
 0x3f6   :  { %3118 = vmatpush.bf16.msra.mxu0 %v13703_v26  ;;  %3131 = vmatpush.bf16.msra.mxu1 %v13508_v47  ;;  %v13709_v26 = vld [vmem:[#allocation155_spill] sm:$0xff]  ;;  %v13710_v47 = vld [vmem:[#allocation184_spill] sm:$0xff] }
 0x3f9   :  { %3093 = vmatpush.bf16.msrb.mxu2 %v13509_v27  ;;  %3106 = vmatpush.bf16.msrb.mxu3 %v13552_v20  ;;  %v13711_v27 = vld [vmem:[#allocation185_spill] sm:$0xff]  ;;  %v13712_v20 = vld [vmem:[#allocation158_spill] sm:$0xff] }
 0x3fa   :  { %3119 = vmatpush.bf16.msra.mxu0 %v13553_v10  ;;  %3132 = vmatpush.bf16.msra.mxu1 %v13371_v52  ;;  %v13713_v10 = vld [vmem:[#allocation159_spill] sm:$0xff]  ;;  %v13714_v52 = vld [vmem:[#allocation188_spill] sm:$0xff] }
 0x3fd   :  { %3094 = vmatpush.bf16.msrb.mxu2 %v13704_v1  ;;  %3107 = vmatpush.bf16.msrb.mxu3 %v13705_v3  ;;  %v13715_v1 = vld [vmem:[#allocation189_spill] sm:$0xff]  ;;  %v13716_v3 = vld [vmem:[#allocation162_spill] sm:$0xff] }
 0x3fe   :  { %3120 = vmatpush.bf16.msra.mxu0 %v13706_v17  ;;  %3133 = vmatpush.bf16.msra.mxu1 %v13707_v35  ;;  %v13717_v17 = vld [vmem:[#allocation163_spill] sm:$0xff]  ;;  %v13718_v35 = vld [vmem:[#allocation192_spill] sm:$0xff] }
 0x401   :  { %3095 = vmatpush.bf16.msrb.mxu2 %v13708_v50  ;;  %3108 = vmatpush.bf16.msrb.mxu3 %v13709_v26  ;;  %v13719_v50 = vld [vmem:[#allocation193_spill] sm:$0xff] }
 0x402   :  { %3121 = vmatpush.bf16.msra.mxu0 %v13710_v47  ;;  %3134 = vmatpush.bf16.msra.mxu1 %v13711_v27  ;;  %v13728_v27 = vld [vmem:[#allocation175_spill] sm:$0xff] }
 0x405   :  { %3096 = vmatpush.bf16.msrb.mxu2 %v13712_v20  ;;  %3109 = vmatpush.bf16.msrb.mxu3 %v13713_v10  ;;  %v13720_v10 = vld [vmem:[#allocation166_spill] sm:$0xff]  ;;  %v13727_v20 = vld [vmem:[#allocation197_spill] sm:$0xff] }
 0x406   :  { %3122 = vmatpush.bf16.msra.mxu0 %v13714_v52  ;;  %3135 = vmatpush.bf16.msra.mxu1 %v13715_v1  ;;  %v13721_v52 = vld [vmem:[#allocation167_spill] sm:$0xff]  ;;  %v13722_v1 = vld [vmem:[#allocation194_spill] sm:$0xff] }
 0x408   :  { %3097 = vmatmul.bf16.vlgmr.msrb.gmra.mxu2 %v10149_v34  ;;  %3110 = vmatmul.bf16.vlgmr.msrb.gmra.mxu3 %v10151_v39 }
 0x409   :  { %3141 = vmatpush.bf16.msra.mxu2 %v13716_v3  ;;  %3154 = vmatpush.bf16.msra.mxu3 %v13717_v17  ;;  %v13723_v3 = vld [vmem:[#allocation195_spill] sm:$0xff]  ;;  %v13724_v17 = vld [vmem:[#allocation170_spill] sm:$0xff] }
 0x40a   :  { %3167 = vmatpush.bf16.msrb.mxu0 %v13718_v35  ;;  %3180 = vmatpush.bf16.msrb.mxu1 %v13719_v50  ;;  %v13725_v35 = vld [vmem:[#allocation171_spill] sm:$0xff]  ;;  %v13726_v50 = vld [vmem:[#allocation196_spill] sm:$0xff] }
 0x40b   :  { %3123 = vmatmul.bf16.vlgmr.msra.gmra.mxu0 %v10149_v34  ;;  %3136 = vmatmul.bf16.vlgmr.msra.gmra.mxu1 %v10151_v39 }
 0x40d   :  { %3142 = vmatpush.bf16.msra.mxu2 %v13720_v10  ;;  %3155 = vmatpush.bf16.msra.mxu3 %v13721_v52 }
 0x40e   :  { %3168 = vmatpush.bf16.msrb.mxu0 %v13722_v1  ;;  %3181 = vmatpush.bf16.msrb.mxu1 %v13723_v3  ;;  %v13729_v3 = vld [vmem:[#allocation200_spill] sm:$0xff] }
 0x411   :  { %3143 = vmatpush.bf16.msra.mxu2 %v13724_v17  ;;  %3156 = vmatpush.bf16.msra.mxu3 %v13725_v35  ;;  %v13730_v17 = vld [vmem:[#allocation201_spill] sm:$0xff]  ;;  %v13731_v35 = vld [vmem:[#allocation182_spill] sm:$0xff] }
 0x412   :  { %3169 = vmatpush.bf16.msrb.mxu0 %v13726_v50  ;;  %3182 = vmatpush.bf16.msrb.mxu1 %v13727_v20  ;;  %v13732_v50 = vld [vmem:[#allocation183_spill] sm:$0xff]  ;;  %v13733_v20 = vld [vmem:[#allocation202_spill] sm:$0xff] }
 0x415   :  { %3144 = vmatpush.bf16.msra.mxu2 %v13570_v62  ;;  %3157 = vmatpush.bf16.msra.mxu3 %v13728_v27  ;;  %v13734_v62 = vld [vmem:[#allocation203_spill] sm:$0xff]  ;;  %v13735_v27 = vld [vmem:[#allocation186_spill] sm:$0xff] }
 0x416   :  { %3170 = vmatpush.bf16.msrb.mxu0 %v13572_v18  ;;  %3183 = vmatpush.bf16.msrb.mxu1 %v13573_v14  ;;  %v13736_v18 = vld [vmem:[#allocation187_spill] sm:$0xff]  ;;  %v13737_v14 = vld [vmem:[#allocation204_spill] sm:$0xff] }
 0x419   :  { %3145 = vmatpush.bf16.msra.mxu2 %v13574_v40  ;;  %3158 = vmatpush.bf16.msra.mxu3 %v13575_v13  ;;  %v13738_v40 = vld [vmem:[#allocation205_spill] sm:$0xff]  ;;  %v13739_v13 = vld [vmem:[#allocation190_spill] sm:$0xff] }
 0x41a   :  { %3171 = vmatpush.bf16.msrb.mxu0 %v13729_v3  ;;  %3184 = vmatpush.bf16.msrb.mxu1 %v13730_v17  ;;  %v13740_v3 = vld [vmem:[#allocation191_spill] sm:$0xff]  ;;  %v13741_v17 = vld [vmem:[#allocation206_spill] sm:$0xff] }
 0x41d   :  { %3146 = vmatpush.bf16.msra.mxu2 %v13731_v35  ;;  %3159 = vmatpush.bf16.msra.mxu3 %v13732_v50  ;;  %v13742_v35 = vld [vmem:[#allocation207_spill] sm:$0xff] }
 0x41e   :  { %3172 = vmatpush.bf16.msrb.mxu0 %v13733_v20  ;;  %3185 = vmatpush.bf16.msrb.mxu1 %v13734_v62 }
 0x421   :  { %3147 = vmatpush.bf16.msra.mxu2 %v13735_v27  ;;  %3160 = vmatpush.bf16.msra.mxu3 %v13736_v18 }
 0x422   :  { %3173 = vmatpush.bf16.msrb.mxu0 %v13737_v14  ;;  %3186 = vmatpush.bf16.msrb.mxu1 %v13738_v40 }
 0x425   :  { %3148 = vmatpush.bf16.msra.mxu2 %v13739_v13  ;;  %3161 = vmatpush.bf16.msra.mxu3 %v13740_v3 }
 0x426   :  { %3174 = vmatpush.bf16.msrb.mxu0 %v13741_v17  ;;  %3187 = vmatpush.bf16.msrb.mxu1 %v13742_v35  ;;  %v2916_v35 = vpop.f32.mrf.mxu0 }
 0x428   :  { %3149 = vmatmul.bf16.vlgmr.msra.gmra.mxu2 %v10149_v34  ;;  %3162 = vmatmul.bf16.vlgmr.msra.gmra.mxu3 %v10151_v39 }
 0x429   :  { %3193 = vmatpush.bf16.msrb.mxu2 %v13683_v38  ;;  %3206 = vmatpush.bf16.msrb.mxu3 %v13485_v28  ;;  %v2929_v38 = vpop.f32.mrf.mxu1 }
 0x42a   :  { %3219 = vmatpush.bf16.msra.mxu0 %v13684_v55  ;;  %3232 = vmatpush.bf16.msra.mxu1 %v9234_v0  ;;  %v10313_v55 = vadd.f32 %v2929_v38, %v2916_v35 }
 0x42b   :  { %3175 = vmatmul.bf16.vlgmr.msrb.gmra.mxu0 %v10149_v34  ;;  %3188 = vmatmul.bf16.vlgmr.msrb.gmra.mxu1 %v10151_v39  ;;  %v2890_v34 = vpop.f32.mrf.mxu2  ;;  %v2903_v39 = vpop.f32.mrf.mxu3 }
 0x42d   :  { %3194 = vmatpush.bf16.msrb.mxu2 %v13685_v36  ;;  %3207 = vmatpush.bf16.msrb.mxu3 %v13686_v44  ;;  %v10319_v36 = vadd.f32 %v2903_v39, %v2890_v34  ;;  %v2860_v44 = vunpack.c.h.bf16 %v10145_v25 }
 0x42e   :  { %3220 = vmatpush.bf16.msra.mxu0 %v9245_v56  ;;  %3233 = vmatpush.bf16.msra.mxu1 %v9249_v2  ;;  %v2918_v35 = vpop.f32.mrf.mxu0 }
 0x431   :  { %3195 = vmatpush.bf16.msrb.mxu2 %v13488_v30  ;;  %3208 = vmatpush.bf16.msrb.mxu3 %v13687_v63  ;;  %v2931_v38 = vpop.f32.mrf.mxu1  ;;  %v2863_v63 = vrot.slane %v2860_v44, 7 }
 0x432   :  { %3221 = vmatpush.bf16.msra.mxu0 %v9262_v9  ;;  %3234 = vmatpush.bf16.msra.mxu1 %v9268_v4 }
 0x433   :  { %v2892_v34 = vpop.f32.mrf.mxu2  ;;  %v2905_v39 = vpop.f32.mrf.mxu3 }
 0x435   :  { %3196 = vmatpush.bf16.msrb.mxu2 %v13688_v8  ;;  %3209 = vmatpush.bf16.msrb.mxu3 %v13491_v45  ;;  %v2859_v8 = vunpack.c.l.bf16 %v10145_v25 }
 0x436   :  { %3222 = vmatpush.bf16.msra.mxu0 %v9277_v43  ;;  %3235 = vmatpush.bf16.msra.mxu1 %v9281_v12  ;;  %v2968_v38 = vpop.f32.mrf.mxu0 }
 0x437   :  { %v2864_v35 = vsel %vm2205_vm0, %v2859_v8, %v2863_v63 }
 0x439   :  { %3197 = vmatpush.bf16.msrb.mxu2 %v9191_v61  ;;  %3210 = vmatpush.bf16.msrb.mxu3 %v13689_v22  ;;  %v2981_v44 = vpop.f32.mrf.mxu1 }
 0x43a   :  { %3223 = vmatpush.bf16.msra.mxu0 %v9290_v24  ;;  %3236 = vmatpush.bf16.msra.mxu1 %v13690_v7  ;;  %v10336_v22 = vadd.f32 %v2981_v44, %v2968_v38  ;;  %v2866_v7 = vsub.f32 %v10137_v49, %v2864_v35 }
 0x43b   :  { %v2942_v63 = vpop.f32.mrf.mxu2  ;;  %v2955_v25 = vpop.f32.mrf.mxu3 }
 0x43c   :  { %v10343_v8 = vadd.f32 %v2955_v25, %v2942_v63  ;;  %v2868_v34 = vperm.slane %v2866_v7, 0  ;;  %v2869_v39 = vperm.slane %v2866_v7, 1 }
 0x43d   :  { %3198 = vmatpush.bf16.msrb.mxu2 %v9203_v29  ;;  %3211 = vmatpush.bf16.msrb.mxu3 %v9206_v58 }
 0x43e   :  { %3224 = vmatpush.bf16.msra.mxu0 %v13345_v31  ;;  %3237 = vmatpush.bf16.msra.mxu1 %v13346_v53  ;;  %v2970_v38 = vpop.f32.mrf.mxu0  ;;  %v10351_v44 = vpack.c.bf16 %v2868_v34, %v2868_v34  ;;  %v10353_v63 = vpack.c.bf16 %v2869_v39, %v2869_v39 }
 0x441   :  { %3199 = vmatpush.bf16.msrb.mxu2 %v9215_v33  ;;  %3212 = vmatpush.bf16.msrb.mxu3 %v9218_v23  ;;  %v2983_v35 = vpop.f32.mrf.mxu1 }
 0x442   :  { %3225 = vmatpush.bf16.msra.mxu0 %v13349_v46  ;;  %3238 = vmatpush.bf16.msra.mxu1 %v13350_v19  ;;  %v13743_v35 = vld [vmem:[#allocation143_spill] sm:$0xff] }
 0x443   :  { %v2944_v7 = vpop.f32.mrf.mxu2  ;;  %v2957_v25 = vpop.f32.mrf.mxu3 }
 0x444   :  { %v13744_v7 = vld [vmem:[#allocation144_spill] sm:$0xff] }
 0x445   :  { %3200 = vmatpush.bf16.msrb.mxu2 %v9227_v5  ;;  %3213 = vmatpush.bf16.msrb.mxu3 %v9230_v51  ;;  %v13745_v25 = vld [vmem:[#allocation172_spill] sm:$0xff] }
 0x446   :  { %3226 = vmatpush.bf16.msra.mxu0 %v13351_v16  ;;  %3239 = vmatpush.bf16.msra.mxu1 %v13691_v42 }
 0x448   :  { %3201 = vmatmul.bf16.vlgmr.msrb.gmra.mxu2 %v10351_v44  ;;  %3214 = vmatmul.bf16.vlgmr.msrb.gmra.mxu3 %v10353_v63  ;;  %v3020_v34 = vpop.f32.mrf.mxu0 }
 0x449   :  { %3245 = vmatpush.bf16.msra.mxu2 %v13692_v59  ;;  %3258 = vmatpush.bf16.msra.mxu3 %v13693_v57  ;;  %v3033_v39 = vpop.f32.mrf.mxu1 }
 0x44a   :  { %3271 = vmatpush.bf16.msrb.mxu0 %v13694_v6  ;;  %3284 = vmatpush.bf16.msrb.mxu1 %v13695_v21  ;;  %v10369_v38 = vadd.f32 %v3033_v39, %v3020_v34  ;;  %v13749_v34 = vld [vmem:[#allocation176_spill] sm:$0xff]  ;;  %v13750_v39 = vld [vmem:[#allocation177_spill] sm:$0xff]  ;;  %v13755_v21 = vld [vmem:[#allocation154_spill] sm:$0xff] }
 0x44b   :  { %3227 = vmatmul.bf16.vlgmr.msra.gmra.mxu0 %v10351_v44  ;;  %3240 = vmatmul.bf16.vlgmr.msra.gmra.mxu1 %v10353_v63 }
 0x44d   :  { %3246 = vmatpush.bf16.msra.mxu2 %v13544_v15  ;;  %3259 = vmatpush.bf16.msra.mxu3 %v13696_v11  ;;  %v13748_v15 = vld [vmem:[#allocation147_spill] sm:$0xff] }
 0x44e   :  { %3272 = vmatpush.bf16.msrb.mxu0 %v13697_v48  ;;  %3285 = vmatpush.bf16.msrb.mxu1 %v13698_v37  ;;  %v13746_v48 = vld [vmem:[#allocation173_spill] sm:$0xff]  ;;  %v2994_v37 = vpop.f32.mrf.mxu2 }
 0x451   :  { %3247 = vmatpush.bf16.msra.mxu2 %v13699_v41  ;;  %3260 = vmatpush.bf16.msra.mxu3 %v13700_v32  ;;  %v3007_v41 = vpop.f32.mrf.mxu3  ;;  %v13747_v32 = vld [vmem:[#allocation146_spill] sm:$0xff] }
 0x452   :  { %3273 = vmatpush.bf16.msrb.mxu0 %v13701_v54  ;;  %3286 = vmatpush.bf16.msrb.mxu1 %v13702_v60  ;;  %v10375_v11 = vadd.f32 %v3007_v41, %v2994_v37  ;;  %v3022_v54 = vpop.f32.mrf.mxu0  ;;  %v3035_v60 = vpop.f32.mrf.mxu1 }
 0x453   :  { %v13756_v60 = vld [vmem:[#allocation185_spill] sm:$0xff]  ;;  %v13757_v54 = vld [vmem:[#allocation158_spill] sm:$0xff] }
 0x455   :  { %3248 = vmatpush.bf16.msra.mxu2 %v13743_v35  ;;  %3261 = vmatpush.bf16.msra.mxu3 %v13744_v7  ;;  %v13751_v35 = vld [vmem:[#allocation150_spill] sm:$0xff]  ;;  %v13752_v7 = vld [vmem:[#allocation151_spill] sm:$0xff] }
 0x456   :  { %3274 = vmatpush.bf16.msrb.mxu0 %v13745_v25  ;;  %3287 = vmatpush.bf16.msrb.mxu1 %v13746_v48  ;;  %v13753_v25 = vld [vmem:[#allocation180_spill] sm:$0xff]  ;;  %v13754_v48 = vld [vmem:[#allocation181_spill] sm:$0xff]  ;;  %v2996_v41 = vpop.f32.mrf.mxu2 }
 0x457   :  { %v13762_v41 = vld [vmem:[#allocation163_spill] sm:$0xff] }
 0x459   :  { %3249 = vmatpush.bf16.msra.mxu2 %v13747_v32  ;;  %3262 = vmatpush.bf16.msra.mxu3 %v13748_v15  ;;  %v3009_v37 = vpop.f32.mrf.mxu3 }
 0x45a   :  { %3275 = vmatpush.bf16.msrb.mxu0 %v13749_v34  ;;  %3288 = vmatpush.bf16.msrb.mxu1 %v13750_v39  ;;  %v13758_v39 = vld [vmem:[#allocation159_spill] sm:$0xff]  ;;  %v13763_v37 = vld [vmem:[#allocation192_spill] sm:$0xff] }
 0x45d   :  { %3250 = vmatpush.bf16.msra.mxu2 %v13751_v35  ;;  %3263 = vmatpush.bf16.msra.mxu3 %v13752_v7  ;;  %v13759_v35 = vld [vmem:[#allocation188_spill] sm:$0xff]  ;;  %v13760_v7 = vld [vmem:[#allocation189_spill] sm:$0xff] }
 0x45e   :  { %3276 = vmatpush.bf16.msrb.mxu0 %v13753_v25  ;;  %3289 = vmatpush.bf16.msrb.mxu1 %v13754_v48  ;;  %v13761_v25 = vld [vmem:[#allocation162_spill] sm:$0xff] }
 0x461   :  { %3251 = vmatpush.bf16.msra.mxu2 %v13755_v21  ;;  %3264 = vmatpush.bf16.msra.mxu3 %v13709_v26  ;;  %v13764_v21 = vld [vmem:[#allocation193_spill] sm:$0xff]  ;;  %v13774_v26 = vld [vmem:[#allocation178_spill] sm:$0xff] }
 0x462   :  { %3277 = vmatpush.bf16.msrb.mxu0 %v13710_v47  ;;  %3290 = vmatpush.bf16.msrb.mxu1 %v13756_v60 }
 0x465   :  { %3252 = vmatpush.bf16.msra.mxu2 %v13757_v54  ;;  %3265 = vmatpush.bf16.msra.mxu3 %v13758_v39  ;;  %v13769_v39 = vld [vmem:[#allocation197_spill] sm:$0xff] }
 0x466   :  { %3278 = vmatpush.bf16.msrb.mxu0 %v13759_v35  ;;  %3291 = vmatpush.bf16.msrb.mxu1 %v13760_v7  ;;  %v13768_v35 = vld [vmem:[#allocation196_spill] sm:$0xff] }
 0x468   :  { %3253 = vmatmul.bf16.vlgmr.msra.gmra.mxu2 %v10351_v44  ;;  %3266 = vmatmul.bf16.vlgmr.msra.gmra.mxu3 %v10353_v63  ;;  %v3085_v7 = vpop.f32.mrf.mxu1 }
 0x469   :  { %3297 = vmatpush.bf16.msrb.mxu2 %v13761_v25  ;;  %3310 = vmatpush.bf16.msrb.mxu3 %v13762_v41  ;;  %v13765_v25 = vld [vmem:[#allocation195_spill] sm:$0xff]  ;;  %v13766_v41 = vld [vmem:[#allocation170_spill] sm:$0xff] }
 0x46a   :  { %3323 = vmatpush.bf16.msra.mxu0 %v13763_v37  ;;  %3336 = vmatpush.bf16.msra.mxu1 %v13764_v21  ;;  %v13767_v37 = vld [vmem:[#allocation171_spill] sm:$0xff]  ;;  %v3072_v21 = vpop.f32.mrf.mxu0 }
 0x46b   :  { %3279 = vmatmul.bf16.vlgmr.msrb.gmra.mxu0 %v10351_v44  ;;  %3292 = vmatmul.bf16.vlgmr.msrb.gmra.mxu1 %v10353_v63  ;;  %v3073_v54 = vadd.f32 %v3072_v21, %v10313_v55 }
 0x46d   :  { %3298 = vmatpush.bf16.msrb.mxu2 %v13720_v10  ;;  %3311 = vmatpush.bf16.msrb.mxu3 %v13721_v52  ;;  %v10410_v60 = vadd.f32 %v3085_v7, %v3073_v54  ;;  %v13770_v10 = vld [vmem:[#allocation174_spill] sm:$0xff]  ;;  %v13771_v52 = vld [vmem:[#allocation175_spill] sm:$0xff]  ;;  %v13776_v7 = vld [vmem:[#allocation200_spill] sm:$0xff] }
 0x46e   :  { %3324 = vmatpush.bf16.msra.mxu0 %v13722_v1  ;;  %3337 = vmatpush.bf16.msra.mxu1 %v13765_v25  ;;  %v13772_v1 = vld [vmem:[#allocation198_spill] sm:$0xff]  ;;  %v13773_v25 = vld [vmem:[#allocation199_spill] sm:$0xff]  ;;  %v13777_v54 = vld [vmem:[#allocation201_spill] sm:$0xff] }
 0x470   :  { %v3087_v55 = vpop.f32.mrf.mxu1 }
 0x471   :  { %3299 = vmatpush.bf16.msrb.mxu2 %v13766_v41  ;;  %3312 = vmatpush.bf16.msrb.mxu3 %v13767_v37  ;;  %v3046_v41 = vpop.f32.mrf.mxu2  ;;  %v3059_v37 = vpop.f32.mrf.mxu3  ;;  %v13782_v55 = vld [vmem:[#allocation47_spill] sm:$0xff] }
 0x472   :  { %3325 = vmatpush.bf16.msra.mxu0 %v13768_v35  ;;  %3338 = vmatpush.bf16.msra.mxu1 %v13769_v39  ;;  %v3047_v47 = vadd.f32 %v3046_v41, %v10319_v36  ;;  %v13775_v35 = vld [vmem:[#allocation179_spill] sm:$0xff]  ;;  %v3074_v21 = vpop.f32.mrf.mxu0 }
 0x473   :  { %v13781_v21 = vld [vmem:[#allocation32_spill] sm:$0xff] }
 0x474   :  { %v10419_v39 = vadd.f32 %v3059_v37, %v3047_v47  ;;  %v13779_v47 = vld [vmem:[#allocation207_spill] sm:$0xff] }
 0x475   :  { %3300 = vmatpush.bf16.msrb.mxu2 %v13770_v10  ;;  %3313 = vmatpush.bf16.msrb.mxu3 %v13771_v52  ;;  %v13778_v52 = vld [vmem:[#allocation182_spill] sm:$0xff]  ;;  %v13780_v37 = vld [vmem:[#allocation31_spill] sm:$0xff] }
 0x476   :  { %3326 = vmatpush.bf16.msra.mxu0 %v13772_v1  ;;  %3339 = vmatpush.bf16.msra.mxu1 %v13773_v25 }
 0x479   :  { %3301 = vmatpush.bf16.msrb.mxu2 %v13774_v26  ;;  %3314 = vmatpush.bf16.msrb.mxu3 %v13775_v35  ;;  %v3048_v36 = vpop.f32.mrf.mxu2  ;;  %v3061_v41 = vpop.f32.mrf.mxu3 }
 0x47a   :  { %3327 = vmatpush.bf16.msra.mxu0 %v13776_v7  ;;  %3340 = vmatpush.bf16.msra.mxu1 %v13777_v54  ;;  %v13783_v36 = vld [vmem:[#allocation48_spill] sm:$0xff]  ;;  %v13784_v41 = vld [vmem:[#allocation33_spill] sm:$0xff] }
 0x47d   :  { %3302 = vmatpush.bf16.msrb.mxu2 %v13778_v52  ;;  %3315 = vmatpush.bf16.msrb.mxu3 %v13732_v50  ;;  %v2851_v52 = vld [vmem:[#allocation2 + $0x2] ss:$8 sm:$0x30] }
 0x47e   :  { %3328 = vmatpush.bf16.msra.mxu0 %v13733_v20  ;;  %3341 = vmatpush.bf16.msra.mxu1 %v13734_v62 }
 0x481   :  { %3303 = vmatpush.bf16.msrb.mxu2 %v13735_v27  ;;  %3316 = vmatpush.bf16.msrb.mxu3 %v13736_v18  ;;  %v13794_v18 = vld [vmem:[#allocation59_spill] sm:$0xff] }
 0x482   :  { %3329 = vmatpush.bf16.msra.mxu0 %v13737_v14  ;;  %3342 = vmatpush.bf16.msra.mxu1 %v13738_v40  ;;  %v13789_v40 = vld [vmem:[#allocation36_spill] sm:$0xff] }
 0x485   :  { %3304 = vmatpush.bf16.msrb.mxu2 %v13739_v13  ;;  %3317 = vmatpush.bf16.msrb.mxu3 %v13740_v3  ;;  %v13788_v13 = vld [vmem:[#allocation35_spill] sm:$0xff] }
 0x486   :  { %3330 = vmatpush.bf16.msra.mxu0 %v13741_v17  ;;  %3343 = vmatpush.bf16.msra.mxu1 %v13779_v47  ;;  %v13785_v17 = vld [vmem:[#allocation34_spill] sm:$0xff]  ;;  %v13786_v47 = vld [vmem:[#allocation51_spill] sm:$0xff] }
 0x488   :  { %3305 = vmatmul.bf16.vlgmr.msrb.gmra.mxu2 %v10351_v44  ;;  %3318 = vmatmul.bf16.vlgmr.msrb.gmra.mxu3 %v10353_v63  ;;  %v3137_v3 = vpop.f32.mrf.mxu1 }
 0x489   :  { %3460 = vmatpush.bf16.msra.mxu2 %v13780_v37  ;;  %3473 = vmatpush.bf16.msra.mxu3 %v13781_v21  ;;  %v13787_v37 = vld [vmem:[#allocation52_spill] sm:$0xff]  ;;  %v3124_v21 = vpop.f32.mrf.mxu0 }
 0x48a   :  { %3331 = vmatmul.bf16.vlgmr.msra.gmra.mxu0 %v10351_v44  ;;  %3344 = vmatmul.bf16.vlgmr.msra.gmra.mxu1 %v10353_v63  ;;  %v3125_v44 = vadd.f32 %v3124_v21, %v10336_v22  ;;  %v13796_v21 = vld [vmem:[#allocation39_spill] sm:$0xff] }
 0x48b   :  { %3486 = vmatpush.bf16.msrb.mxu0 %v13782_v55  ;;  %3499 = vmatpush.bf16.msrb.mxu1 %v13783_v36  ;;  %v13790_v55 = vld [vmem:[#allocation55_spill] sm:$0xff]  ;;  %v13791_v36 = vld [vmem:[#allocation56_spill] sm:$0xff] }
 0x48c   :  { %v10450_v63 = vadd.f32 %v3137_v3, %v3125_v44  ;;  %v13797_v44 = vld [vmem:[#allocation40_spill] sm:$0xff] }
 0x48d   :  { %3461 = vmatpush.bf16.msra.mxu2 %v13784_v41  ;;  %3474 = vmatpush.bf16.msra.mxu3 %v13785_v17  ;;  %v13792_v41 = vld [vmem:[#allocation37_spill] sm:$0xff]  ;;  %v13793_v17 = vld [vmem:[#allocation38_spill] sm:$0xff] }
 0x48f   :  { %3487 = vmatpush.bf16.msrb.mxu0 %v13786_v47  ;;  %3500 = vmatpush.bf16.msrb.mxu1 %v13787_v37  ;;  %v3098_v47 = vpop.f32.mrf.mxu2  ;;  %v3111_v37 = vpop.f32.mrf.mxu3 }
 0x490   :  { %v3099_v14 = vadd.f32 %v3098_v47, %v10343_v8  ;;  %v3139_v22 = vpop.f32.mrf.mxu1 }
 0x491   :  { %3462 = vmatpush.bf16.msra.mxu2 %v13788_v13  ;;  %3475 = vmatpush.bf16.msra.mxu3 %v13789_v40  ;;  %v13795_v13 = vld [vmem:[#allocation60_spill] sm:$0xff]  ;;  %v3126_v3 = vpop.f32.mrf.mxu0  ;;  %v13806_v22 = vld [vmem:[#allocation71_spill] sm:$0xff] }
 0x492   :  { %v10459_v40 = vadd.f32 %v3111_v37, %v3099_v14  ;;  %v13803_v14 = vld [vmem:[#allocation68_spill] sm:$0xff]  ;;  %v13804_v37 = vld [vmem:[#allocation43_spill] sm:$0xff] }
 0x493   :  { %3488 = vmatpush.bf16.msrb.mxu0 %v13790_v55  ;;  %3501 = vmatpush.bf16.msrb.mxu1 %v13791_v36  ;;  %v13798_v36 = vld [vmem:[#allocation63_spill] sm:$0xff]  ;;  %v13801_v55 = vld [vmem:[#allocation42_spill] sm:$0xff]  ;;  %v13805_v3 = vld [vmem:[#allocation44_spill] sm:$0xff] }
 0x495   :  { %3463 = vmatpush.bf16.msra.mxu2 %v13792_v41  ;;  %3476 = vmatpush.bf16.msra.mxu3 %v13793_v17  ;;  %v13799_v41 = vld [vmem:[#allocation64_spill] sm:$0xff]  ;;  %v13800_v17 = vld [vmem:[#allocation41_spill] sm:$0xff] }
 0x497   :  { %3489 = vmatpush.bf16.msrb.mxu0 %v13794_v18  ;;  %3502 = vmatpush.bf16.msrb.mxu1 %v13795_v13  ;;  %v3100_v8 = vpop.f32.mrf.mxu2  ;;  %v3113_v47 = vpop.f32.mrf.mxu3  ;;  %v13802_v18 = vld [vmem:[#allocation67_spill] sm:$0xff]  ;;  %v13828_v13 = vld [vmem:[#allocation65_spill] sm:$0xff] }
 0x498   :  { %v13811_v8 = vld [vmem:[#allocation50_spill] sm:$0xff]  ;;  %v13812_v47 = vld [vmem:[#allocation75_spill] sm:$0xff] }
 0x499   :  { %3464 = vmatpush.bf16.msra.mxu2 %v13796_v21  ;;  %3477 = vmatpush.bf16.msra.mxu3 %v13797_v44  ;;  %v13807_v44 = vld [vmem:[#allocation72_spill] sm:$0xff]  ;;  %v13826_v21 = vld [vmem:[#allocation91_spill] sm:$0xff] }
 0x49b   :  { %3490 = vmatpush.bf16.msrb.mxu0 %v13798_v36  ;;  %3503 = vmatpush.bf16.msrb.mxu1 %v13799_v41  ;;  %v13808_v36 = vld [vmem:[#allocation45_spill] sm:$0xff]  ;;  %v13809_v41 = vld [vmem:[#allocation46_spill] sm:$0xff] }
 0x49d   :  { %3465 = vmatpush.bf16.msra.mxu2 %v13800_v17  ;;  %3478 = vmatpush.bf16.msra.mxu3 %v13801_v55  ;;  %v13810_v17 = vld [vmem:[#allocation49_spill] sm:$0xff]  ;;  %v13822_v55 = vld [vmem:[#allocation87_spill] sm:$0xff] }
 0x49f   :  { %3491 = vmatpush.bf16.msrb.mxu0 %v13802_v18  ;;  %3504 = vmatpush.bf16.msrb.mxu1 %v13803_v14  ;;  %v13813_v18 = vld [vmem:[#allocation76_spill] sm:$0xff]  ;;  %v13814_v14 = vld [vmem:[#allocation79_spill] sm:$0xff] }
 0x4a1   :  { %3466 = vmatpush.bf16.msra.mxu2 %v13804_v37  ;;  %3479 = vmatpush.bf16.msra.mxu3 %v13805_v3  ;;  %v13815_v37 = vld [vmem:[#allocation80_spill] sm:$0xff]  ;;  %v13816_v3 = vld [vmem:[#allocation53_spill] sm:$0xff] }
 0x4a3   :  { %3492 = vmatpush.bf16.msrb.mxu0 %v13806_v22  ;;  %3505 = vmatpush.bf16.msrb.mxu1 %v13807_v44  ;;  %v13817_v22 = vld [vmem:[#allocation54_spill] sm:$0xff]  ;;  %v13818_v44 = vld [vmem:[#allocation83_spill] sm:$0xff] }
 0x4a5   :  { %3467 = vmatpush.bf16.msra.mxu2 %v13808_v36  ;;  %3480 = vmatpush.bf16.msra.mxu3 %v13809_v41  ;;  %v13819_v36 = vld [vmem:[#allocation84_spill] sm:$0xff]  ;;  %v13820_v41 = vld [vmem:[#allocation57_spill] sm:$0xff] }
 0x4a7   :  { %3493 = vmatpush.bf16.msrb.mxu0 %v13812_v47  ;;  %3506 = vmatpush.bf16.msrb.mxu1 %v13813_v18 }
 0x4a8   :  { %v3189_v47 = vpop.f32.mrf.mxu1 }
 0x4a9   :  { %3512 = vmatpush.bf16.msrb.mxu2 %v13810_v17  ;;  %3525 = vmatpush.bf16.msrb.mxu3 %v13811_v8  ;;  %v13821_v17 = vld [vmem:[#allocation58_spill] sm:$0xff]  ;;  %v3176_v8 = vpop.f32.mrf.mxu0 }
 0x4aa   :  { %v3177_v18 = vadd.f32 %v3176_v8, %v10369_v38  ;;  %v13829_v38 = vld [vmem:[#allocation66_spill] sm:$0xff] }
 0x4ab   :  { %3538 = vmatpush.bf16.msra.mxu0 %v13814_v14  ;;  %3551 = vmatpush.bf16.msra.mxu1 %v13815_v37  ;;  %v13823_v14 = vld [vmem:[#allocation88_spill] sm:$0xff] }
 0x4ac   :  { %v10490_v37 = vadd.f32 %v3189_v47, %v3177_v18 }
 0x4ad   :  { %3513 = vmatpush.bf16.msrb.mxu2 %v13816_v3  ;;  %3526 = vmatpush.bf16.msrb.mxu3 %v13817_v22  ;;  %v13824_v3 = vld [vmem:[#allocation61_spill] sm:$0xff]  ;;  %v13825_v22 = vld [vmem:[#allocation62_spill] sm:$0xff] }
 0x4af   :  { %3539 = vmatpush.bf16.msra.mxu0 %v13818_v44  ;;  %3552 = vmatpush.bf16.msra.mxu1 %v13819_v36  ;;  %v3150_v44 = vpop.f32.mrf.mxu2  ;;  %v3163_v36 = vpop.f32.mrf.mxu3 }
 0x4b0   :  { %v3191_v47 = vpop.f32.mrf.mxu1 }
 0x4b1   :  { %3514 = vmatpush.bf16.msrb.mxu2 %v13820_v41  ;;  %3527 = vmatpush.bf16.msrb.mxu3 %v13821_v17  ;;  %v3151_v41 = vadd.f32 %v3150_v44, %v10375_v11  ;;  %v13827_v17 = vld [vmem:[#allocation92_spill] sm:$0xff]  ;;  %v3178_v18 = vpop.f32.mrf.mxu0  ;;  %v13840_v47 = vld [vmem:[#allocation77_spill] sm:$0xff] }
 0x4b2   :  { %v13839_v18 = vld [vmem:[#allocation104_spill] sm:$0xff] }
 0x4b3   :  { %3540 = vmatpush.bf16.msra.mxu0 %v13822_v55  ;;  %3553 = vmatpush.bf16.msra.mxu1 %v13823_v14  ;;  %v10499_v8 = vadd.f32 %v3163_v36, %v3151_v41  ;;  %v13830_v14 = vld [vmem:[#allocation95_spill] sm:$0xff]  ;;  %v13833_v55 = vld [vmem:[#allocation70_spill] sm:$0xff] }
 0x4b4   :  { %v13837_v36 = vld [vmem:[#allocation74_spill] sm:$0xff]  ;;  %v13838_v41 = vld [vmem:[#allocation103_spill] sm:$0xff] }
 0x4b5   :  { %3515 = vmatpush.bf16.msrb.mxu2 %v13824_v3  ;;  %3528 = vmatpush.bf16.msrb.mxu3 %v13825_v22  ;;  %v13831_v3 = vld [vmem:[#allocation96_spill] sm:$0xff]  ;;  %v13832_v22 = vld [vmem:[#allocation69_spill] sm:$0xff] }
 0x4b7   :  { %3541 = vmatpush.bf16.msra.mxu0 %v13826_v21  ;;  %3554 = vmatpush.bf16.msra.mxu1 %v13827_v17  ;;  %v3152_v11 = vpop.f32.mrf.mxu2  ;;  %v3165_v44 = vpop.f32.mrf.mxu3  ;;  %v13834_v21 = vld [vmem:[#allocation99_spill] sm:$0xff]  ;;  %v13835_v17 = vld [vmem:[#allocation100_spill] sm:$0xff] }
 0x4b8   :  { %v13843_v11 = vld [vmem:[#allocation108_spill] sm:$0xff] }
 0x4b9   :  { %3516 = vmatpush.bf16.msrb.mxu2 %v13828_v13  ;;  %3529 = vmatpush.bf16.msrb.mxu3 %v13829_v38  ;;  %v13836_v13 = vld [vmem:[#allocation73_spill] sm:$0xff] }
 0x4bb   :  { %3542 = vmatpush.bf16.msra.mxu0 %v13830_v14  ;;  %3555 = vmatpush.bf16.msra.mxu1 %v13831_v3  ;;  %v13841_v3 = vld [vmem:[#allocation78_spill] sm:$0xff] }
 0x4bd   :  { %3517 = vmatpush.bf16.msrb.mxu2 %v13832_v22  ;;  %3530 = vmatpush.bf16.msrb.mxu3 %v13833_v55  ;;  %v13842_v22 = vld [vmem:[#allocation107_spill] sm:$0xff] }
 0x4bf   :  { %3543 = vmatpush.bf16.msra.mxu0 %v13834_v21  ;;  %3556 = vmatpush.bf16.msra.mxu1 %v13835_v17 }
 0x4c1   :  { %3518 = vmatpush.bf16.msrb.mxu2 %v13836_v13  ;;  %3531 = vmatpush.bf16.msrb.mxu3 %v13837_v36  ;;  %v13844_v36 = vld [vmem:[#allocation148_spill] sm:$0xff] }
 0x4c3   :  { %3544 = vmatpush.bf16.msra.mxu0 %v13838_v41  ;;  %3557 = vmatpush.bf16.msra.mxu1 %v13839_v18 }
 0x4c5   :  { %3519 = vmatpush.bf16.msrb.mxu2 %v13840_v47  ;;  %3532 = vmatpush.bf16.msrb.mxu3 %v13841_v3  ;;  %v13845_v3 = vld [vmem:[#allocation149_spill] sm:$0xff] }
 0x4c7   :  { %3545 = vmatpush.bf16.msra.mxu0 %v13842_v22  ;;  %3558 = vmatpush.bf16.msra.mxu1 %v13843_v11 }
 0x4c8   :  { %v3228_v44 = vpop.f32.mrf.mxu0  ;;  %v3241_v21 = vpop.f32.mrf.mxu1 }
 0x4c9   :  { %v3242_v55 = vadd.f32 %v3241_v21, %v3228_v44  ;;  %v2850_v21 = vld [vmem:[#allocation2 + $0x2] ss:$8 sm:$0xf] }
 0x4ca   :  { %v10520_v44 = vor.u32 %v2851_v52, %v2850_v21 }
 0x4cb   :  { %v3350_v17 = vadd.f32 %v3242_v55, %v10410_v60  ;;  %v3202_v13 = vpop.f32.mrf.mxu2  ;;  %v3215_v14 = vpop.f32.mrf.mxu3 }
 0x4cc   :  { %v3216_v41 = vadd.f32 %v3215_v14, %v3202_v13 }
 0x4cd   :  { %v3356_v38 = vadd.f32 %v3350_v17, %v13844_v36 }
 0x4ce   :  { %v3349_v18 = vadd.f32 %v3216_v41, %v10419_v39 }
 0x4cf   :  { %v3363_v62 = vrot.slane %v3356_v38, 7 }
 0x4d0   :  { %v3230_v27 = vpop.f32.mrf.mxu0  ;;  %v3243_v47 = vpop.f32.mrf.mxu1  ;;  %v3355_v20 = vadd.f32 %v3349_v18, %v13845_v3  ;;  %v13846_v18 = vld [vmem:[#allocation152_spill] sm:$0xff] }
 0x4d2   :  { %v3364_v22 = vsel %vm2205_vm0, %v3355_v20, %v3363_v62 }
 0x4d3   :  { %v3204_v11 = vpop.f32.mrf.mxu2  ;;  %v3217_v50 = vpop.f32.mrf.mxu3  ;;  %v3366_v60 = vadd.f32 %v3364_v22, %v10520_v44  ;;  %v13847_v22 = vld [vmem:[#allocation153_spill] sm:$0xff] }
 0x4d5   :  { %v7911_v55 = vmul.f32 -1.442695, %v3366_v60 }
 0x4d7   :  { %8442 = vpow2.f32 %v7911_v55  ;;  %v3387_v55 = vrot.slane %v10520_v44, 2 }
 0x4dd   :  { %v8443_v41 = vpop.eup %8442 }
 0x4de   :  { %v3370_v11 = vadd.f32 1.0, %v8443_v41 }
 0x4e0   :  { %8444 = vrcp.f32 %v3370_v11  ;;  %vm3376_vm3 = vweird.f32 %v3370_v11 }
 0x4e8   :  { %v3280_v13 = vpop.f32.mrf.mxu0  ;;  %v3293_v17 = vpop.f32.mrf.mxu1 }
 0x4e9   :  { %v3294_v39 = vadd.f32 %v3293_v17, %v3280_v13 }
 0x4eb   :  { %v3352_v27 = vadd.f32 %v3294_v39, %v10450_v63  ;;  %v3254_v14 = vpop.f32.mrf.mxu2  ;;  %v3267_v38 = vpop.f32.mrf.mxu3 }
 0x4ec   :  { %v3268_v62 = vadd.f32 %v3267_v38, %v3254_v14 }
 0x4ed   :  { %v3358_v20 = vadd.f32 %v3352_v27, %v13846_v18  ;;  %v8445_v27 = vpop.eup %8444  ;;  %v3382_v18 = vand.u32 2147483648, %v3370_v11 }
 0x4ee   :  { %v3351_v50 = vadd.f32 %v3268_v62, %v10459_v40  ;;  %v3372_v14 = vmul.f32 %v8445_v27, %v3370_v11  ;;  %vm3377_vm2 = vweird.f32 %v8445_v27 }
 0x4ef   :  { %v3391_v21 = vrot.slane %v3358_v20, 7  ;;  %vm3378_vm4 = vmor %vm3376_vm3, %vm3377_vm2  ;;  %v3383_v7 = vor.u32 1.1754944e-38, %v3382_v18 }
 0x4f0   :  { %v3282_v47 = vpop.f32.mrf.mxu0  ;;  %v3295_v52 = vpop.f32.mrf.mxu1  ;;  %v3357_v60 = vadd.f32 %v3351_v50, %v13847_v22  ;;  %v3373_v62 = vsub.f32 1.0, %v3372_v14 }
 0x4f2   :  { %v3392_v13 = vsel %vm2205_vm0, %v3357_v60, %v3391_v21  ;;  %v3374_v50 = vmul.f32 %v8445_v27, %v3373_v62 }
 0x4f3   :  { %v3394_v63 = vadd.f32 %v3392_v13, %v3387_v55  ;;  %v3256_v17 = vpop.f32.mrf.mxu2  ;;  %v3269_v39 = vpop.f32.mrf.mxu3 }
 0x4f4   :  { %v3375_v13 = vadd.f32 %v8445_v27, %v3374_v50 }
 0x4f5   :  { %v7912_v3 = vmul.f32 -1.442695, %v3394_v63 }
 0x4f7   :  { %8446 = vpow2.f32 %v7912_v3  ;;  %v13848_v3 = vld [vmem:[#allocation156_spill] sm:$0xff] }
 0x4fd   :  { %v8447_v38 = vpop.eup %8446 }
 0x4fe   :  { %v3398_v40 = vadd.f32 1.0, %v8447_v38  ;;  %v3380_v38 = vand.u32 2147483647, %v3370_v11  ;;  %v3420_v11 = vrot.slane %v10520_v44, 4 }
 0x500   :  { %8448 = vrcp.f32 %v3398_v40  ;;  %vm3381_vm5 = vcmp.eq.f32.partialorder %v3380_v38, 8.507059e+37  ;;  %vm3404_vm7 = vweird.f32 %v3398_v40 }
 0x506   :  { %v8449_v52 = vpop.eup %8448 }
 0x507   :  { %v3332_v41 = vpop.f32.mrf.mxu0  ;;  %v3345_v20 = vpop.f32.mrf.mxu1  ;;  %v3400_v21 = vmul.f32 %v8449_v52, %v3398_v40  ;;  %vm3405_vm6 = vweird.f32 %v8449_v52 }
 0x508   :  { %v3346_v47 = vadd.f32 %v3345_v20, %v3332_v41  ;;  %v3379_v20 = vsel %vm3378_vm4, %v8445_v27, %v3375_v13  ;;  %vm3406_vm8 = vmor %vm3404_vm7, %vm3405_vm6  ;;  %vm6329_vm4 = vcmask 1042432  }
 0x509   :  { %v3401_v63 = vsub.f32 1.0, %v3400_v21  ;;  %v3384_v50 = vsel %vm3381_vm5, %v3383_v7, %v3379_v20 }
 0x50a   :  { %v3354_v22 = vadd.f32 %v3346_v47, %v10490_v37  ;;  %v13849_v47 = vld [vmem:[#allocation208_spill] sm:$0xff] }
 0x50b   :  { %v3306_v60 = vpop.f32.mrf.mxu2  ;;  %v3319_v55 = vpop.f32.mrf.mxu3  ;;  %v3402_v14 = vmul.f32 %v8449_v52, %v3401_v63 }
 0x50c   :  { %v3360_v17 = vadd.f32 %v3354_v22, %v13848_v3  ;;  %v3320_v39 = vadd.f32 %v3319_v55, %v3306_v60  ;;  %v3410_v60 = vand.u32 2147483648, %v3398_v40  ;;  %v13909_v3 = vld [vmem:[#allocation151_spill] sm:$0xff] }
 0x50d   :  { %v3403_v21 = vadd.f32 %v8449_v52, %v3402_v14 }
 0x50e   :  { %v3353_v36 = vadd.f32 %v3320_v39, %v10499_v8  ;;  %v3416_v37 = vrot.slane %v3360_v17, 7  ;;  %v3408_v39 = vand.u32 2147483647, %v3398_v40  ;;  %v3411_v17 = vor.u32 1.1754944e-38, %v3410_v60  ;;  %v13854_v60 = vld [vmem:[#allocation209_spill] sm:$0xff] }
 0x50f   :  { %v3334_v62 = vpop.f32.mrf.mxu0  ;;  %v3347_v41 = vpop.f32.mrf.mxu1  ;;  %v3407_v13 = vsel %vm3406_vm8, %v8449_v52, %v3403_v21  ;;  %v13852_v21 = vld [vmem:[#allocation82_spill] sm:$0xff] }
 0x510   :  { %v3359_v54 = vadd.f32 %v3353_v36, %v13849_v47  ;;  %vm3409_vm9 = vcmp.eq.f32.partialorder %v3408_v39, 8.507059e+37  ;;  %v13858_v39 = vld [vmem:[#allocation85_spill] sm:$0xff]  ;;  %v13908_v47 = vld [vmem:[#allocation150_spill] sm:$0xff] }
 0x511   :  { %v3412_v36 = vsel %vm3409_vm9, %v3411_v17, %v3407_v13  ;;  %v13860_v13 = vld [vmem:[#allocation115_spill] sm:$0xff]  ;;  %v13861_v17 = vld [vmem:[#allocation116_spill] sm:$0xff] }
 0x512   :  { %v3417_v22 = vsel %vm2205_vm0, %v3359_v54, %v3416_v37  ;;  %v3424_v18 = vsub.f32 1.0, %v3412_v36  ;;  %v3426_v54 = vmul.f32 %v3412_v36, %v10137_v49  ;;  %v13862_v36 = vld [vmem:[#allocation89_spill] sm:$0xff] }
 0x513   :  { %v3419_v55 = vmul.f32 %v3417_v22, %v3384_v50  ;;  %v3308_v63 = vpop.f32.mrf.mxu2  ;;  %v3321_v8 = vpop.f32.mrf.mxu3  ;;  %v13851_v50 = vld [vmem:[#allocation81_spill] sm:$0xff]  ;;  %v13853_v22 = vperm.slane %v10137_v49, 0 }
 0x514   :  { %v13856_v63 = vld [vmem:[#allocation112_spill] sm:$0xff]  ;;  %v13874_v49 = vld [vmem:[#allocation101_spill] sm:$0xff] }
 0x515   :  { %v3422_v27 = vadd.f32 %v3420_v11, %v3419_v55  ;;  %v6326_v55 = vsel %vm2205_vm0, %v13854_v60, %v13853_v22  ;;  %v13855_v11 = vld [vmem:[#allocation111_spill] sm:$0xff]  ;;  %v13870_v22 = vld [vmem:[#allocation97_spill] sm:$0xff]  ;;  %v13873_v60 = vld [vmem:[#allocation128_spill] sm:$0xff] }
 0x517   :  { %8450 = vtanh.f32 %v3422_v27  ;;  %v13859_v27 = vld [vmem:[#allocation86_spill] sm:$0xff] }
 0x51d   :  { %v8451_v7 = vpop.eup %8450 }
 0x51e   :  { %v3425_v38 = vmul.f32 %v8451_v7, %v3424_v18  ;;  %v13863_v18 = vld [vmem:[#allocation90_spill] sm:$0xff]  ;;  %v13864_v7 = vld [vmem:[#allocation119_spill] sm:$0xff] }
 0x520   :  { %v10536_v14 = vadd.f32 %v3426_v54, %v3425_v38  ;;  %v13865_v38 = vld [vmem:[#allocation120_spill] sm:$0xff]  ;;  %v13866_v54 = vld [vmem:[#allocation93_spill] sm:$0xff] }
 0x522   :  { %13850 = vst [vmem:[#allocation121_spill] sm:$0xff] %v10536_v14  ;;  %v3433_v44 = vperm.slane %v10536_v14, 0  ;;  %v12984_v62 = vperm.slane %v10536_v14, 1 }
 0x524   :  { %v10542_v40 = vpack.c.bf16 %v12984_v62, %v3433_v44  ;;  %v10563_v8 = vsel %vm6327_vm10, %v6326_v55, %v3433_v44  ;;  %v13867_v44 = vld [vmem:[#allocation94_spill] sm:$0xff]  ;;  %v13872_v62 = vld [vmem:[#allocation127_spill] sm:$0xff] }
 0x525   :  { %13857 = vst [vmem:[#allocation126_spill] sm:$0xff] %v10563_v8  ;;  %v13871_v55 = vld [vmem:[#allocation98_spill] sm:$0xff]  ;;  %v13907_v8 = vld [vmem:[#allocation177_spill] sm:$0xff] }
 0x526   :  { %v3454_v52 = vunpack.c.l.b16 %v10542_v40  ;;  %v3455_v41 = vunpack.c.h.b16 %v10542_v40 }
 0x528   :  { %v10546_v20 = vpack.c.b16 %v3454_v52, %v3454_v52  ;;  %v10548_v37 = vpack.c.b16 %v3455_v41, %v3455_v41  ;;  %v13868_v52 = vld [vmem:[#allocation123_spill] sm:$0xff]  ;;  %v13869_v41 = vld [vmem:[#allocation124_spill] sm:$0xff] }
 0x52a   :  { %3468 = vmatmul.bf16.vlgmr.msra.gmra.mxu2 %v10546_v20  ;;  %3481 = vmatmul.bf16.vlgmr.msra.gmra.mxu3 %v10548_v37 }
 0x52b   :  { %3494 = vmatmul.bf16.vlgmr.msrb.gmra.mxu0 %v10546_v20  ;;  %3507 = vmatmul.bf16.vlgmr.msrb.gmra.mxu1 %v10548_v37 }
 0x52c   :  { %3564 = vmatpush.bf16.msra.mxu2 %v13851_v50  ;;  %3577 = vmatpush.bf16.msra.mxu3 %v13852_v21  ;;  %v13905_v21 = vld [vmem:[#allocation172_spill] sm:$0xff]  ;;  %v13906_v50 = vld [vmem:[#allocation173_spill] sm:$0xff] }
 0x52d   :  { %3590 = vmatpush.bf16.msrb.mxu0 %v13855_v11  ;;  %3603 = vmatpush.bf16.msrb.mxu1 %v13856_v63  ;;  %v13903_v63 = vld [vmem:[#allocation143_spill] sm:$0xff]  ;;  %v13904_v11 = vld [vmem:[#allocation144_spill] sm:$0xff] }
 0x530   :  { %3565 = vmatpush.bf16.msra.mxu2 %v13858_v39  ;;  %3578 = vmatpush.bf16.msra.mxu3 %v13859_v27  ;;  %v13901_v27 = vld [vmem:[#allocation168_spill] sm:$0xff]  ;;  %v13902_v39 = vld [vmem:[#allocation169_spill] sm:$0xff] }
 0x531   :  { %3591 = vmatpush.bf16.msrb.mxu0 %v13860_v13  ;;  %3604 = vmatpush.bf16.msrb.mxu1 %v13861_v17  ;;  %v13899_v17 = vld [vmem:[#allocation141_spill] sm:$0xff]  ;;  %v13900_v13 = vld [vmem:[#allocation142_spill] sm:$0xff] }
 0x534   :  { %3566 = vmatpush.bf16.msra.mxu2 %v13862_v36  ;;  %3579 = vmatpush.bf16.msra.mxu3 %v13863_v18  ;;  %v13897_v18 = vld [vmem:[#allocation164_spill] sm:$0xff]  ;;  %v13898_v36 = vld [vmem:[#allocation165_spill] sm:$0xff] }
 0x535   :  { %3592 = vmatpush.bf16.msrb.mxu0 %v13864_v7  ;;  %3605 = vmatpush.bf16.msrb.mxu1 %v13865_v38  ;;  %v13879_v38 = vld [vmem:[#allocation106_spill] sm:$0xff]  ;;  %v13880_v7 = vld [vmem:[#allocation132_spill] sm:$0xff] }
 0x538   :  { %3567 = vmatpush.bf16.msra.mxu2 %v13866_v54  ;;  %3580 = vmatpush.bf16.msra.mxu3 %v13867_v44  ;;  %v13877_v44 = vld [vmem:[#allocation131_spill] sm:$0xff]  ;;  %v13878_v54 = vld [vmem:[#allocation105_spill] sm:$0xff] }
 0x539   :  { %3593 = vmatpush.bf16.msrb.mxu0 %v13868_v52  ;;  %3606 = vmatpush.bf16.msrb.mxu1 %v13869_v41  ;;  %v13875_v52 = vld [vmem:[#allocation102_spill] sm:$0xff] }
 0x53a   :  { %3520 = vmatmul.bf16.vlgmr.msrb.gmra.mxu2 %v10546_v20  ;;  %3533 = vmatmul.bf16.vlgmr.msrb.gmra.mxu3 %v10548_v37  ;;  %v13876_v41 = vld [vmem:[#allocation130_spill] sm:$0xff] }
 0x53b   :  { %3546 = vmatmul.bf16.vlgmr.msra.gmra.mxu0 %v10546_v20  ;;  %3559 = vmatmul.bf16.vlgmr.msra.gmra.mxu1 %v10548_v37 }
 0x53c   :  { %3568 = vmatpush.bf16.msra.mxu2 %v13870_v22  ;;  %3581 = vmatpush.bf16.msra.mxu3 %v13871_v55  ;;  %v13881_v22 = vld [vmem:[#allocation133_spill] sm:$0xff] }
 0x53d   :  { %3594 = vmatpush.bf16.msrb.mxu0 %v13872_v62  ;;  %3607 = vmatpush.bf16.msrb.mxu1 %v13873_v60  ;;  %v13882_v55 = vld [vmem:[#allocation109_spill] sm:$0xff]  ;;  %v13883_v62 = vld [vmem:[#allocation110_spill] sm:$0xff] }
 0x53e   :  { %v13884_v60 = vld [vmem:[#allocation134_spill] sm:$0xff] }
 0x540   :  { %3569 = vmatpush.bf16.msra.mxu2 %v13874_v49  ;;  %3582 = vmatpush.bf16.msra.mxu3 %v13875_v52  ;;  %v13885_v49 = vld [vmem:[#allocation135_spill] sm:$0xff]  ;;  %v13886_v52 = vld [vmem:[#allocation113_spill] sm:$0xff] }
 0x541   :  { %3595 = vmatpush.bf16.msrb.mxu0 %v13876_v41  ;;  %3608 = vmatpush.bf16.msrb.mxu1 %v13877_v44  ;;  %v13887_v44 = vld [vmem:[#allocation136_spill] sm:$0xff] }
 0x542   :  { %v13896_v41 = vld [vmem:[#allocation140_spill] sm:$0xff] }
 0x544   :  { %3570 = vmatpush.bf16.msra.mxu2 %v13878_v54  ;;  %3583 = vmatpush.bf16.msra.mxu3 %v13879_v38  ;;  %v13894_v38 = vld [vmem:[#allocation161_spill] sm:$0xff]  ;;  %v13895_v54 = vld [vmem:[#allocation139_spill] sm:$0xff] }
 0x545   :  { %3596 = vmatpush.bf16.msrb.mxu0 %v13880_v7  ;;  %3609 = vmatpush.bf16.msrb.mxu1 %v13881_v22  ;;  %v13892_v22 = vld [vmem:[#allocation129_spill] sm:$0xff] }
 0x546   :  { %v13893_v7 = vld [vmem:[#allocation145_spill] sm:$0xff] }
 0x548   :  { %3571 = vmatpush.bf16.msra.mxu2 %v13882_v55  ;;  %3584 = vmatpush.bf16.msra.mxu3 %v13883_v62  ;;  %v13888_v62 = vld [vmem:[#allocation117_spill] sm:$0xff] }
 0x549   :  { %3597 = vmatpush.bf16.msrb.mxu0 %v13884_v60  ;;  %3610 = vmatpush.bf16.msrb.mxu1 %v13885_v49  ;;  %v13889_v60 = vld [vmem:[#allocation118_spill] sm:$0xff]  ;;  %v13891_v55 = vld [vmem:[#allocation125_spill] sm:$0xff] }
 0x54a   :  { %v13890_v49 = vld [vmem:[#allocation122_spill] sm:$0xff] }
 0x54b   :  { %3572 = vmatmul.bf16.vlgmr.msra.gmra.mxu2 %v10546_v20  ;;  %3585 = vmatmul.bf16.vlgmr.msra.gmra.mxu3 %v10548_v37 }
 0x54c   :  { %3616 = vmatpush.bf16.msrb.mxu2 %v13886_v52  ;;  %3629 = vmatpush.bf16.msrb.mxu3 %v13485_v28 }
 0x54d   :  { %3642 = vmatpush.bf16.msra.mxu0 %v13887_v44  ;;  %3655 = vmatpush.bf16.msra.mxu1 %v9234_v0 }
 0x54e   :  { %3598 = vmatmul.bf16.vlgmr.msrb.gmra.mxu0 %v10546_v20  ;;  %3611 = vmatmul.bf16.vlgmr.msrb.gmra.mxu1 %v10548_v37 }
 0x550   :  { %3617 = vmatpush.bf16.msrb.mxu2 %v13888_v62  ;;  %3630 = vmatpush.bf16.msrb.mxu3 %v13889_v60 }
 0x551   :  { %3643 = vmatpush.bf16.msra.mxu0 %v9245_v56  ;;  %3656 = vmatpush.bf16.msra.mxu1 %v9249_v2 }
 0x554   :  { %3618 = vmatpush.bf16.msrb.mxu2 %v13488_v30  ;;  %3631 = vmatpush.bf16.msrb.mxu3 %v13890_v49 }
 0x555   :  { %3644 = vmatpush.bf16.msra.mxu0 %v9262_v9  ;;  %3657 = vmatpush.bf16.msra.mxu1 %v9268_v4 }
 0x558   :  { %3619 = vmatpush.bf16.msrb.mxu2 %v13891_v55  ;;  %3632 = vmatpush.bf16.msrb.mxu3 %v13491_v45 }
 0x559   :  { %3645 = vmatpush.bf16.msra.mxu0 %v9277_v43  ;;  %3658 = vmatpush.bf16.msra.mxu1 %v9281_v12 }
 0x55c   :  { %3620 = vmatpush.bf16.msrb.mxu2 %v9191_v61  ;;  %3633 = vmatpush.bf16.msrb.mxu3 %v13892_v22 }
 0x55d   :  { %3646 = vmatpush.bf16.msra.mxu0 %v9290_v24  ;;  %3659 = vmatpush.bf16.msra.mxu1 %v13893_v7 }
 0x560   :  { %3621 = vmatpush.bf16.msrb.mxu2 %v9203_v29  ;;  %3634 = vmatpush.bf16.msrb.mxu3 %v9206_v58 }
 0x561   :  { %3647 = vmatpush.bf16.msra.mxu0 %v13345_v31  ;;  %3660 = vmatpush.bf16.msra.mxu1 %v13346_v53 }
 0x564   :  { %3622 = vmatpush.bf16.msrb.mxu2 %v9215_v33  ;;  %3635 = vmatpush.bf16.msrb.mxu3 %v9218_v23 }
 0x565   :  { %3648 = vmatpush.bf16.msra.mxu0 %v13349_v46  ;;  %3661 = vmatpush.bf16.msra.mxu1 %v13350_v19 }
 0x568   :  { %3623 = vmatpush.bf16.msrb.mxu2 %v9227_v5  ;;  %3636 = vmatpush.bf16.msrb.mxu3 %v9230_v51 }
 0x569   :  { %3649 = vmatpush.bf16.msra.mxu0 %v13351_v16  ;;  %3662 = vmatpush.bf16.msra.mxu1 %v13691_v42 }
 0x56b   :  { %3624 = vmatmul.bf16.vlgmr.msrb.gmra.mxu2 %v10546_v20  ;;  %3637 = vmatmul.bf16.vlgmr.msrb.gmra.mxu3 %v10548_v37 }
 0x56c   :  { %3668 = vmatpush.bf16.msra.mxu2 %v13692_v59  ;;  %3681 = vmatpush.bf16.msra.mxu3 %v13693_v57 }
 0x56d   :  { %3694 = vmatpush.bf16.msrb.mxu0 %v13694_v6  ;;  %3707 = vmatpush.bf16.msrb.mxu1 %v13894_v38 }
 0x56e   :  { %3650 = vmatmul.bf16.vlgmr.msra.gmra.mxu0 %v10546_v20  ;;  %3663 = vmatmul.bf16.vlgmr.msra.gmra.mxu1 %v10548_v37 }
 0x570   :  { %3669 = vmatpush.bf16.msra.mxu2 %v13895_v54  ;;  %3682 = vmatpush.bf16.msra.mxu3 %v13896_v41 }
 0x571   :  { %3695 = vmatpush.bf16.msrb.mxu0 %v13897_v18  ;;  %3708 = vmatpush.bf16.msrb.mxu1 %v13898_v36 }
 0x574   :  { %3670 = vmatpush.bf16.msra.mxu2 %v13899_v17  ;;  %3683 = vmatpush.bf16.msra.mxu3 %v13900_v13 }
 0x575   :  { %3696 = vmatpush.bf16.msrb.mxu0 %v13901_v27  ;;  %3709 = vmatpush.bf16.msrb.mxu1 %v13902_v39  ;;  %v13910_v39 = vld [vmem:[#allocation180_spill] sm:$0xff] }
 0x578   :  { %3671 = vmatpush.bf16.msra.mxu2 %v13903_v63  ;;  %3684 = vmatpush.bf16.msra.mxu3 %v13904_v11  ;;  %v13911_v11 = vld [vmem:[#allocation154_spill] sm:$0xff] }
 0x579   :  { %3697 = vmatpush.bf16.msrb.mxu0 %v13905_v21  ;;  %3710 = vmatpush.bf16.msrb.mxu1 %v13906_v50  ;;  %v13912_v21 = vld [vmem:[#allocation155_spill] sm:$0xff]  ;;  %v13913_v50 = vld [vmem:[#allocation184_spill] sm:$0xff] }
 0x57c   :  { %3672 = vmatpush.bf16.msra.mxu2 %v13747_v32  ;;  %3685 = vmatpush.bf16.msra.mxu3 %v13748_v15  ;;  %v13914_v32 = vld [vmem:[#allocation185_spill] sm:$0xff]  ;;  %v13915_v15 = vld [vmem:[#allocation158_spill] sm:$0xff] }
 0x57d   :  { %3698 = vmatpush.bf16.msrb.mxu0 %v13749_v34  ;;  %3711 = vmatpush.bf16.msrb.mxu1 %v13907_v8  ;;  %v13916_v34 = vld [vmem:[#allocation159_spill] sm:$0xff]  ;;  %v13917_v8 = vld [vmem:[#allocation188_spill] sm:$0xff] }
 0x580   :  { %3673 = vmatpush.bf16.msra.mxu2 %v13908_v47  ;;  %3686 = vmatpush.bf16.msra.mxu3 %v13909_v3  ;;  %v13918_v47 = vld [vmem:[#allocation189_spill] sm:$0xff]  ;;  %v13919_v3 = vld [vmem:[#allocation162_spill] sm:$0xff] }
 0x581   :  { %3699 = vmatpush.bf16.msrb.mxu0 %v13910_v39  ;;  %3712 = vmatpush.bf16.msrb.mxu1 %v13754_v48  ;;  %v13920_v39 = vld [vmem:[#allocation163_spill] sm:$0xff]  ;;  %v13921_v48 = vld [vmem:[#allocation192_spill] sm:$0xff] }
 0x584   :  { %3674 = vmatpush.bf16.msra.mxu2 %v13911_v11  ;;  %3687 = vmatpush.bf16.msra.mxu3 %v13912_v21  ;;  %v13922_v11 = vld [vmem:[#allocation193_spill] sm:$0xff] }
 0x585   :  { %3700 = vmatpush.bf16.msrb.mxu0 %v13913_v50  ;;  %3713 = vmatpush.bf16.msrb.mxu1 %v13914_v32  ;;  %v13931_v32 = vld [vmem:[#allocation175_spill] sm:$0xff] }
 0x588   :  { %3675 = vmatpush.bf16.msra.mxu2 %v13915_v15  ;;  %3688 = vmatpush.bf16.msra.mxu3 %v13916_v34  ;;  %v13923_v34 = vld [vmem:[#allocation166_spill] sm:$0xff]  ;;  %v13930_v15 = vld [vmem:[#allocation197_spill] sm:$0xff] }
 0x589   :  { %3701 = vmatpush.bf16.msrb.mxu0 %v13917_v8  ;;  %3714 = vmatpush.bf16.msrb.mxu1 %v13918_v47  ;;  %v13924_v8 = vld [vmem:[#allocation167_spill] sm:$0xff]  ;;  %v13925_v47 = vld [vmem:[#allocation194_spill] sm:$0xff] }
 0x58b   :  { %3676 = vmatmul.bf16.vlgmr.msra.gmra.mxu2 %v10546_v20  ;;  %3689 = vmatmul.bf16.vlgmr.msra.gmra.mxu3 %v10548_v37 }
 0x58c   :  { %3720 = vmatpush.bf16.msrb.mxu2 %v13919_v3  ;;  %3733 = vmatpush.bf16.msrb.mxu3 %v13920_v39  ;;  %v13926_v3 = vld [vmem:[#allocation195_spill] sm:$0xff]  ;;  %v13927_v39 = vld [vmem:[#allocation170_spill] sm:$0xff] }
 0x58d   :  { %3746 = vmatpush.bf16.msra.mxu0 %v13921_v48  ;;  %3759 = vmatpush.bf16.msra.mxu1 %v13922_v11  ;;  %v13928_v48 = vld [vmem:[#allocation171_spill] sm:$0xff]  ;;  %v13929_v11 = vld [vmem:[#allocation196_spill] sm:$0xff] }
 0x58e   :  { %3702 = vmatmul.bf16.vlgmr.msrb.gmra.mxu0 %v10546_v20  ;;  %3715 = vmatmul.bf16.vlgmr.msrb.gmra.mxu1 %v10548_v37 }
 0x590   :  { %3721 = vmatpush.bf16.msrb.mxu2 %v13923_v34  ;;  %3734 = vmatpush.bf16.msrb.mxu3 %v13924_v8 }
 0x591   :  { %3747 = vmatpush.bf16.msra.mxu0 %v13925_v47  ;;  %3760 = vmatpush.bf16.msra.mxu1 %v13926_v3  ;;  %v13932_v3 = vld [vmem:[#allocation200_spill] sm:$0xff] }
 0x594   :  { %3722 = vmatpush.bf16.msrb.mxu2 %v13927_v39  ;;  %3735 = vmatpush.bf16.msrb.mxu3 %v13928_v48  ;;  %v13933_v39 = vld [vmem:[#allocation201_spill] sm:$0xff]  ;;  %v13934_v48 = vld [vmem:[#allocation182_spill] sm:$0xff] }
 0x595   :  { %3748 = vmatpush.bf16.msra.mxu0 %v13929_v11  ;;  %3761 = vmatpush.bf16.msra.mxu1 %v13930_v15  ;;  %v13935_v11 = vld [vmem:[#allocation183_spill] sm:$0xff]  ;;  %v13936_v15 = vld [vmem:[#allocation202_spill] sm:$0xff] }
 0x598   :  { %3723 = vmatpush.bf16.msrb.mxu2 %v13770_v10  ;;  %3736 = vmatpush.bf16.msrb.mxu3 %v13931_v32  ;;  %v13937_v10 = vld [vmem:[#allocation203_spill] sm:$0xff]  ;;  %v13938_v32 = vld [vmem:[#allocation186_spill] sm:$0xff] }
 0x599   :  { %3749 = vmatpush.bf16.msra.mxu0 %v13772_v1  ;;  %3762 = vmatpush.bf16.msra.mxu1 %v13773_v25  ;;  %v13939_v1 = vld [vmem:[#allocation187_spill] sm:$0xff]  ;;  %v13940_v25 = vld [vmem:[#allocation204_spill] sm:$0xff] }
 0x59c   :  { %3724 = vmatpush.bf16.msrb.mxu2 %v13774_v26  ;;  %3737 = vmatpush.bf16.msrb.mxu3 %v13775_v35  ;;  %v13941_v26 = vld [vmem:[#allocation205_spill] sm:$0xff]  ;;  %v13942_v35 = vld [vmem:[#allocation190_spill] sm:$0xff] }
 0x59d   :  { %3750 = vmatpush.bf16.msra.mxu0 %v13932_v3  ;;  %3763 = vmatpush.bf16.msra.mxu1 %v13933_v39  ;;  %v13943_v3 = vld [vmem:[#allocation191_spill] sm:$0xff]  ;;  %v13944_v39 = vld [vmem:[#allocation206_spill] sm:$0xff] }
 0x5a0   :  { %3725 = vmatpush.bf16.msrb.mxu2 %v13934_v48  ;;  %3738 = vmatpush.bf16.msrb.mxu3 %v13935_v11  ;;  %v13945_v48 = vld [vmem:[#allocation207_spill] sm:$0xff] }
 0x5a1   :  { %3751 = vmatpush.bf16.msra.mxu0 %v13936_v15  ;;  %3764 = vmatpush.bf16.msra.mxu1 %v13937_v10 }
 0x5a4   :  { %3726 = vmatpush.bf16.msrb.mxu2 %v13938_v32  ;;  %3739 = vmatpush.bf16.msrb.mxu3 %v13939_v1 }
 0x5a5   :  { %3752 = vmatpush.bf16.msra.mxu0 %v13940_v25  ;;  %3765 = vmatpush.bf16.msra.mxu1 %v13941_v26 }
 0x5a8   :  { %3727 = vmatpush.bf16.msrb.mxu2 %v13942_v35  ;;  %3740 = vmatpush.bf16.msrb.mxu3 %v13943_v3 }
 0x5a9   :  { %3753 = vmatpush.bf16.msra.mxu0 %v13944_v39  ;;  %3766 = vmatpush.bf16.msra.mxu1 %v13945_v48  ;;  %v3495_v48 = vpop.f32.mrf.mxu0 }
 0x5ab   :  { %3728 = vmatmul.bf16.vlgmr.msrb.gmra.mxu2 %v10546_v20  ;;  %3741 = vmatmul.bf16.vlgmr.msrb.gmra.mxu3 %v10548_v37 }
 0x5ac   :  { %3772 = vmatpush.bf16.msra.mxu2 %v13886_v52  ;;  %3785 = vmatpush.bf16.msra.mxu3 %v13485_v28  ;;  %v3508_v52 = vpop.f32.mrf.mxu1 }
 0x5ad   :  { %3798 = vmatpush.bf16.msrb.mxu0 %v13887_v44  ;;  %3811 = vmatpush.bf16.msrb.mxu1 %v9234_v0  ;;  %v10717_v44 = vadd.f32 %v3508_v52, %v3495_v48 }
 0x5ae   :  { %3754 = vmatmul.bf16.vlgmr.msra.gmra.mxu0 %v10546_v20  ;;  %3767 = vmatmul.bf16.vlgmr.msra.gmra.mxu1 %v10548_v37  ;;  %v3469_v20 = vpop.f32.mrf.mxu2  ;;  %v3482_v37 = vpop.f32.mrf.mxu3 }
 0x5b0   :  { %3773 = vmatpush.bf16.msra.mxu2 %v13888_v62  ;;  %3786 = vmatpush.bf16.msra.mxu3 %v13889_v60  ;;  %v10723_v62 = vadd.f32 %v3482_v37, %v3469_v20  ;;  %v3439_v60 = vunpack.c.h.bf16 %v10542_v40 }
 0x5b1   :  { %3799 = vmatpush.bf16.msrb.mxu0 %v9245_v56  ;;  %3812 = vmatpush.bf16.msrb.mxu1 %v9249_v2  ;;  %v3497_v48 = vpop.f32.mrf.mxu0 }
 0x5b4   :  { %3774 = vmatpush.bf16.msra.mxu2 %v13488_v30  ;;  %3787 = vmatpush.bf16.msra.mxu3 %v13890_v49  ;;  %v3510_v52 = vpop.f32.mrf.mxu1  ;;  %v3442_v49 = vrot.slane %v3439_v60, 7 }
 0x5b5   :  { %3800 = vmatpush.bf16.msrb.mxu0 %v9262_v9  ;;  %3813 = vmatpush.bf16.msrb.mxu1 %v9268_v4 }
 0x5b6   :  { %v3471_v20 = vpop.f32.mrf.mxu2  ;;  %v3484_v37 = vpop.f32.mrf.mxu3 }
 0x5b8   :  { %3775 = vmatpush.bf16.msra.mxu2 %v13891_v55  ;;  %3788 = vmatpush.bf16.msra.mxu3 %v13491_v45  ;;  %v3438_v55 = vunpack.c.l.bf16 %v10542_v40 }
 0x5b9   :  { %3801 = vmatpush.bf16.msrb.mxu0 %v9277_v43  ;;  %3814 = vmatpush.bf16.msrb.mxu1 %v9281_v12  ;;  %v3547_v52 = vpop.f32.mrf.mxu0 }
 0x5ba   :  { %v3443_v48 = vsel %vm2205_vm0, %v3438_v55, %v3442_v49 }
 0x5bc   :  { %3776 = vmatpush.bf16.msra.mxu2 %v9191_v61  ;;  %3789 = vmatpush.bf16.msra.mxu3 %v13892_v22  ;;  %v3560_v60 = vpop.f32.mrf.mxu1 }
 0x5bd   :  { %3802 = vmatpush.bf16.msrb.mxu0 %v9290_v24  ;;  %3815 = vmatpush.bf16.msrb.mxu1 %v13893_v7  ;;  %v10740_v22 = vadd.f32 %v3560_v60, %v3547_v52  ;;  %v3445_v7 = vsub.f32 %v10536_v14, %v3443_v48 }
 0x5be   :  { %v3521_v49 = vpop.f32.mrf.mxu2  ;;  %v3534_v40 = vpop.f32.mrf.mxu3 }
 0x5bf   :  { %v10747_v55 = vadd.f32 %v3534_v40, %v3521_v49  ;;  %v3447_v20 = vperm.slane %v3445_v7, 0  ;;  %v3448_v37 = vperm.slane %v3445_v7, 1 }
 0x5c0   :  { %3777 = vmatpush.bf16.msra.mxu2 %v9203_v29  ;;  %3790 = vmatpush.bf16.msra.mxu3 %v9206_v58 }
 0x5c1   :  { %3803 = vmatpush.bf16.msrb.mxu0 %v13345_v31  ;;  %3816 = vmatpush.bf16.msrb.mxu1 %v13346_v53  ;;  %v3549_v52 = vpop.f32.mrf.mxu0  ;;  %v10755_v60 = vpack.c.bf16 %v3447_v20, %v3447_v20  ;;  %v10757_v49 = vpack.c.bf16 %v3448_v37, %v3448_v37 }
 0x5c2   :  { %v13946_v52 = vld [vmem:[#allocation169_spill] sm:$0xff] }
 0x5c4   :  { %3778 = vmatpush.bf16.msra.mxu2 %v9215_v33  ;;  %3791 = vmatpush.bf16.msra.mxu3 %v9218_v23  ;;  %v3562_v48 = vpop.f32.mrf.mxu1 }
 0x5c5   :  { %3804 = vmatpush.bf16.msrb.mxu0 %v13349_v46  ;;  %3817 = vmatpush.bf16.msrb.mxu1 %v13350_v19 }
 0x5c6   :  { %v3523_v7 = vpop.f32.mrf.mxu2  ;;  %v3536_v40 = vpop.f32.mrf.mxu3 }
 0x5c7   :  { %v13947_v7 = vld [vmem:[#allocation144_spill] sm:$0xff] }
 0x5c8   :  { %3779 = vmatpush.bf16.msra.mxu2 %v9227_v5  ;;  %3792 = vmatpush.bf16.msra.mxu3 %v9230_v51  ;;  %v13948_v40 = vld [vmem:[#allocation172_spill] sm:$0xff] }
 0x5c9   :  { %3805 = vmatpush.bf16.msrb.mxu0 %v13351_v16  ;;  %3818 = vmatpush.bf16.msrb.mxu1 %v13691_v42 }
 0x5cb   :  { %3780 = vmatmul.bf16.vlgmr.msra.gmra.mxu2 %v10755_v60  ;;  %3793 = vmatmul.bf16.vlgmr.msra.gmra.mxu3 %v10757_v49  ;;  %v3599_v20 = vpop.f32.mrf.mxu0 }
 0x5cc   :  { %3824 = vmatpush.bf16.msrb.mxu2 %v13692_v59  ;;  %3837 = vmatpush.bf16.msrb.mxu3 %v13693_v57  ;;  %v3612_v37 = vpop.f32.mrf.mxu1 }
 0x5cd   :  { %3850 = vmatpush.bf16.msra.mxu0 %v13694_v6  ;;  %3863 = vmatpush.bf16.msra.mxu1 %v13894_v38  ;;  %v10773_v48 = vadd.f32 %v3612_v37, %v3599_v20  ;;  %v13952_v20 = vld [vmem:[#allocation176_spill] sm:$0xff]  ;;  %v13953_v37 = vld [vmem:[#allocation177_spill] sm:$0xff]  ;;  %v13958_v38 = vld [vmem:[#allocation154_spill] sm:$0xff] }
 0x5ce   :  { %3806 = vmatmul.bf16.vlgmr.msrb.gmra.mxu0 %v10755_v60  ;;  %3819 = vmatmul.bf16.vlgmr.msrb.gmra.mxu1 %v10757_v49 }
 0x5d0   :  { %3825 = vmatpush.bf16.msrb.mxu2 %v13895_v54  ;;  %3838 = vmatpush.bf16.msrb.mxu3 %v13896_v41  ;;  %v13951_v54 = vld [vmem:[#allocation147_spill] sm:$0xff] }
 0x5d1   :  { %3851 = vmatpush.bf16.msra.mxu0 %v13897_v18  ;;  %3864 = vmatpush.bf16.msra.mxu1 %v13898_v36  ;;  %v13949_v18 = vld [vmem:[#allocation173_spill] sm:$0xff]  ;;  %v3573_v36 = vpop.f32.mrf.mxu2 }
 0x5d4   :  { %3826 = vmatpush.bf16.msrb.mxu2 %v13899_v17  ;;  %3839 = vmatpush.bf16.msrb.mxu3 %v13900_v13  ;;  %v3586_v17 = vpop.f32.mrf.mxu3  ;;  %v13950_v13 = vld [vmem:[#allocation146_spill] sm:$0xff] }
 0x5d5   :  { %3852 = vmatpush.bf16.msra.mxu0 %v13901_v27  ;;  %3865 = vmatpush.bf16.msra.mxu1 %v13946_v52  ;;  %v10779_v41 = vadd.f32 %v3586_v17, %v3573_v36  ;;  %v3601_v27 = vpop.f32.mrf.mxu0  ;;  %v3614_v52 = vpop.f32.mrf.mxu1 }
 0x5d6   :  { %v13959_v27 = vld [vmem:[#allocation185_spill] sm:$0xff]  ;;  %v13960_v52 = vld [vmem:[#allocation158_spill] sm:$0xff] }
 0x5d8   :  { %3827 = vmatpush.bf16.msrb.mxu2 %v13903_v63  ;;  %3840 = vmatpush.bf16.msrb.mxu3 %v13947_v7  ;;  %v13954_v63 = vld [vmem:[#allocation150_spill] sm:$0xff]  ;;  %v13955_v7 = vld [vmem:[#allocation151_spill] sm:$0xff] }
 0x5d9   :  { %3853 = vmatpush.bf16.msra.mxu0 %v13948_v40  ;;  %3866 = vmatpush.bf16.msra.mxu1 %v13949_v18  ;;  %v13956_v40 = vld [vmem:[#allocation180_spill] sm:$0xff]  ;;  %v13957_v18 = vld [vmem:[#allocation181_spill] sm:$0xff]  ;;  %v3575_v17 = vpop.f32.mrf.mxu2 }
 0x5da   :  { %v13965_v17 = vld [vmem:[#allocation163_spill] sm:$0xff] }
 0x5dc   :  { %3828 = vmatpush.bf16.msrb.mxu2 %v13950_v13  ;;  %3841 = vmatpush.bf16.msrb.mxu3 %v13951_v54  ;;  %v3588_v36 = vpop.f32.mrf.mxu3 }
 0x5dd   :  { %3854 = vmatpush.bf16.msra.mxu0 %v13952_v20  ;;  %3867 = vmatpush.bf16.msra.mxu1 %v13953_v37  ;;  %v13961_v37 = vld [vmem:[#allocation159_spill] sm:$0xff]  ;;  %v13966_v36 = vld [vmem:[#allocation192_spill] sm:$0xff] }
 0x5e0   :  { %3829 = vmatpush.bf16.msrb.mxu2 %v13954_v63  ;;  %3842 = vmatpush.bf16.msrb.mxu3 %v13955_v7  ;;  %v13962_v63 = vld [vmem:[#allocation188_spill] sm:$0xff]  ;;  %v13963_v7 = vld [vmem:[#allocation189_spill] sm:$0xff] }
 0x5e1   :  { %3855 = vmatpush.bf16.msra.mxu0 %v13956_v40  ;;  %3868 = vmatpush.bf16.msra.mxu1 %v13957_v18  ;;  %v13964_v40 = vld [vmem:[#allocation162_spill] sm:$0xff] }
 0x5e4   :  { %3830 = vmatpush.bf16.msrb.mxu2 %v13958_v38  ;;  %3843 = vmatpush.bf16.msrb.mxu3 %v13912_v21  ;;  %v13967_v38 = vld [vmem:[#allocation193_spill] sm:$0xff]  ;;  %v13977_v21 = vld [vmem:[#allocation178_spill] sm:$0xff] }
 0x5e5   :  { %3856 = vmatpush.bf16.msra.mxu0 %v13913_v50  ;;  %3869 = vmatpush.bf16.msra.mxu1 %v13959_v27 }
 0x5e8   :  { %3831 = vmatpush.bf16.msrb.mxu2 %v13960_v52  ;;  %3844 = vmatpush.bf16.msrb.mxu3 %v13961_v37  ;;  %v13972_v37 = vld [vmem:[#allocation197_spill] sm:$0xff] }
 0x5e9   :  { %3857 = vmatpush.bf16.msra.mxu0 %v13962_v63  ;;  %3870 = vmatpush.bf16.msra.mxu1 %v13963_v7  ;;  %v13971_v63 = vld [vmem:[#allocation196_spill] sm:$0xff] }
 0x5eb   :  { %3832 = vmatmul.bf16.vlgmr.msrb.gmra.mxu2 %v10755_v60  ;;  %3845 = vmatmul.bf16.vlgmr.msrb.gmra.mxu3 %v10757_v49  ;;  %v3664_v7 = vpop.f32.mrf.mxu1 }
 0x5ec   :  { %3876 = vmatpush.bf16.msra.mxu2 %v13964_v40  ;;  %3889 = vmatpush.bf16.msra.mxu3 %v13965_v17  ;;  %v13968_v40 = vld [vmem:[#allocation195_spill] sm:$0xff]  ;;  %v13969_v17 = vld [vmem:[#allocation170_spill] sm:$0xff] }
 0x5ed   :  { %3902 = vmatpush.bf16.msrb.mxu0 %v13966_v36  ;;  %3915 = vmatpush.bf16.msrb.mxu1 %v13967_v38  ;;  %v13970_v36 = vld [vmem:[#allocation171_spill] sm:$0xff]  ;;  %v3651_v38 = vpop.f32.mrf.mxu0 }
 0x5ee   :  { %3858 = vmatmul.bf16.vlgmr.msra.gmra.mxu0 %v10755_v60  ;;  %3871 = vmatmul.bf16.vlgmr.msra.gmra.mxu1 %v10757_v49  ;;  %v3652_v52 = vadd.f32 %v3651_v38, %v10717_v44 }
 0x5f0   :  { %3877 = vmatpush.bf16.msra.mxu2 %v13923_v34  ;;  %3890 = vmatpush.bf16.msra.mxu3 %v13924_v8  ;;  %v10814_v27 = vadd.f32 %v3664_v7, %v3652_v52  ;;  %v13973_v34 = vld [vmem:[#allocation174_spill] sm:$0xff]  ;;  %v13974_v8 = vld [vmem:[#allocation175_spill] sm:$0xff]  ;;  %v13979_v7 = vld [vmem:[#allocation200_spill] sm:$0xff] }
 0x5f1   :  { %3903 = vmatpush.bf16.msrb.mxu0 %v13925_v47  ;;  %3916 = vmatpush.bf16.msrb.mxu1 %v13968_v40  ;;  %v13975_v47 = vld [vmem:[#allocation198_spill] sm:$0xff]  ;;  %v13976_v40 = vld [vmem:[#allocation199_spill] sm:$0xff]  ;;  %v13980_v52 = vld [vmem:[#allocation201_spill] sm:$0xff] }
 0x5f3   :  { %v3666_v44 = vpop.f32.mrf.mxu1 }
 0x5f4   :  { %3878 = vmatpush.bf16.msra.mxu2 %v13969_v17  ;;  %3891 = vmatpush.bf16.msra.mxu3 %v13970_v36  ;;  %v3625_v17 = vpop.f32.mrf.mxu2  ;;  %v3638_v36 = vpop.f32.mrf.mxu3  ;;  %v13985_v44 = vld [vmem:[#allocation47_spill] sm:$0xff] }
 0x5f5   :  { %3904 = vmatpush.bf16.msrb.mxu0 %v13971_v63  ;;  %3917 = vmatpush.bf16.msrb.mxu1 %v13972_v37  ;;  %v3626_v50 = vadd.f32 %v3625_v17, %v10723_v62  ;;  %v13978_v63 = vld [vmem:[#allocation179_spill] sm:$0xff]  ;;  %v3653_v38 = vpop.f32.mrf.mxu0 }
 0x5f6   :  { %v13984_v38 = vld [vmem:[#allocation32_spill] sm:$0xff] }
 0x5f7   :  { %v10823_v37 = vadd.f32 %v3638_v36, %v3626_v50  ;;  %v13982_v50 = vld [vmem:[#allocation207_spill] sm:$0xff] }
 0x5f8   :  { %3879 = vmatpush.bf16.msra.mxu2 %v13973_v34  ;;  %3892 = vmatpush.bf16.msra.mxu3 %v13974_v8  ;;  %v13981_v8 = vld [vmem:[#allocation182_spill] sm:$0xff]  ;;  %v13983_v36 = vld [vmem:[#allocation31_spill] sm:$0xff] }
 0x5f9   :  { %3905 = vmatpush.bf16.msrb.mxu0 %v13975_v47  ;;  %3918 = vmatpush.bf16.msrb.mxu1 %v13976_v40 }
 0x5fc   :  { %3880 = vmatpush.bf16.msra.mxu2 %v13977_v21  ;;  %3893 = vmatpush.bf16.msra.mxu3 %v13978_v63  ;;  %v3627_v62 = vpop.f32.mrf.mxu2  ;;  %v3640_v17 = vpop.f32.mrf.mxu3 }
 0x5fd   :  { %3906 = vmatpush.bf16.msrb.mxu0 %v13979_v7  ;;  %3919 = vmatpush.bf16.msrb.mxu1 %v13980_v52  ;;  %v13986_v62 = vld [vmem:[#allocation48_spill] sm:$0xff]  ;;  %v13987_v17 = vld [vmem:[#allocation33_spill] sm:$0xff] }
 0x600   :  { %3881 = vmatpush.bf16.msra.mxu2 %v13981_v8  ;;  %3894 = vmatpush.bf16.msra.mxu3 %v13935_v11  ;;  %v3430_v8 = vld [vmem:[#allocation2 + $0x3] ss:$8 sm:$0x30] }
 0x601   :  { %3907 = vmatpush.bf16.msrb.mxu0 %v13936_v15  ;;  %3920 = vmatpush.bf16.msrb.mxu1 %v13937_v10 }
 0x604   :  { %3882 = vmatpush.bf16.msra.mxu2 %v13938_v32  ;;  %3895 = vmatpush.bf16.msra.mxu3 %v13939_v1  ;;  %v13997_v1 = vld [vmem:[#allocation59_spill] sm:$0xff] }
 0x605   :  { %3908 = vmatpush.bf16.msrb.mxu0 %v13940_v25  ;;  %3921 = vmatpush.bf16.msrb.mxu1 %v13941_v26  ;;  %v13992_v26 = vld [vmem:[#allocation36_spill] sm:$0xff] }
 0x608   :  { %3883 = vmatpush.bf16.msra.mxu2 %v13942_v35  ;;  %3896 = vmatpush.bf16.msra.mxu3 %v13943_v3  ;;  %v13991_v35 = vld [vmem:[#allocation35_spill] sm:$0xff] }
 0x609   :  { %3909 = vmatpush.bf16.msrb.mxu0 %v13944_v39  ;;  %3922 = vmatpush.bf16.msrb.mxu1 %v13982_v50  ;;  %v13988_v39 = vld [vmem:[#allocation34_spill] sm:$0xff]  ;;  %v13989_v50 = vld [vmem:[#allocation51_spill] sm:$0xff] }
 0x60b   :  { %3884 = vmatmul.bf16.vlgmr.msra.gmra.mxu2 %v10755_v60  ;;  %3897 = vmatmul.bf16.vlgmr.msra.gmra.mxu3 %v10757_v49  ;;  %v3716_v3 = vpop.f32.mrf.mxu1 }
 0x60c   :  { %4039 = vmatpush.bf16.msrb.mxu2 %v13983_v36  ;;  %4052 = vmatpush.bf16.msrb.mxu3 %v13984_v38  ;;  %v13990_v36 = vld [vmem:[#allocation52_spill] sm:$0xff]  ;;  %v3703_v38 = vpop.f32.mrf.mxu0 }
 0x60d   :  { %3910 = vmatmul.bf16.vlgmr.msrb.gmra.mxu0 %v10755_v60  ;;  %3923 = vmatmul.bf16.vlgmr.msrb.gmra.mxu1 %v10757_v49  ;;  %v3704_v60 = vadd.f32 %v3703_v38, %v10740_v22  ;;  %v13999_v38 = vld [vmem:[#allocation39_spill] sm:$0xff] }
 0x60e   :  { %4065 = vmatpush.bf16.msra.mxu0 %v13985_v44  ;;  %4078 = vmatpush.bf16.msra.mxu1 %v13986_v62  ;;  %v13993_v44 = vld [vmem:[#allocation55_spill] sm:$0xff]  ;;  %v13994_v62 = vld [vmem:[#allocation56_spill] sm:$0xff] }
 0x60f   :  { %v10854_v49 = vadd.f32 %v3716_v3, %v3704_v60  ;;  %v14000_v60 = vld [vmem:[#allocation40_spill] sm:$0xff] }
 0x610   :  { %4040 = vmatpush.bf16.msrb.mxu2 %v13987_v17  ;;  %4053 = vmatpush.bf16.msrb.mxu3 %v13988_v39  ;;  %v13995_v17 = vld [vmem:[#allocation37_spill] sm:$0xff]  ;;  %v13996_v39 = vld [vmem:[#allocation38_spill] sm:$0xff] }
 0x612   :  { %4066 = vmatpush.bf16.msra.mxu0 %v13989_v50  ;;  %4079 = vmatpush.bf16.msra.mxu1 %v13990_v36  ;;  %v3677_v50 = vpop.f32.mrf.mxu2  ;;  %v3690_v36 = vpop.f32.mrf.mxu3 }
 0x613   :  { %v3678_v25 = vadd.f32 %v3677_v50, %v10747_v55  ;;  %v3718_v22 = vpop.f32.mrf.mxu1 }
 0x614   :  { %4041 = vmatpush.bf16.msrb.mxu2 %v13991_v35  ;;  %4054 = vmatpush.bf16.msrb.mxu3 %v13992_v26  ;;  %v13998_v35 = vld [vmem:[#allocation60_spill] sm:$0xff]  ;;  %v3705_v3 = vpop.f32.mrf.mxu0  ;;  %v14009_v22 = vld [vmem:[#allocation71_spill] sm:$0xff] }
 0x615   :  { %v10863_v26 = vadd.f32 %v3690_v36, %v3678_v25  ;;  %v14006_v25 = vld [vmem:[#allocation68_spill] sm:$0xff]  ;;  %v14007_v36 = vld [vmem:[#allocation43_spill] sm:$0xff] }
 0x616   :  { %4067 = vmatpush.bf16.msra.mxu0 %v13993_v44  ;;  %4080 = vmatpush.bf16.msra.mxu1 %v13994_v62  ;;  %v14001_v62 = vld [vmem:[#allocation63_spill] sm:$0xff]  ;;  %v14004_v44 = vld [vmem:[#allocation42_spill] sm:$0xff]  ;;  %v14008_v3 = vld [vmem:[#allocation44_spill] sm:$0xff] }
 0x618   :  { %4042 = vmatpush.bf16.msrb.mxu2 %v13995_v17  ;;  %4055 = vmatpush.bf16.msrb.mxu3 %v13996_v39  ;;  %v14002_v17 = vld [vmem:[#allocation64_spill] sm:$0xff]  ;;  %v14003_v39 = vld [vmem:[#allocation41_spill] sm:$0xff] }
 0x61a   :  { %4068 = vmatpush.bf16.msra.mxu0 %v13997_v1  ;;  %4081 = vmatpush.bf16.msra.mxu1 %v13998_v35  ;;  %v3679_v55 = vpop.f32.mrf.mxu2  ;;  %v3692_v50 = vpop.f32.mrf.mxu3  ;;  %v14005_v1 = vld [vmem:[#allocation67_spill] sm:$0xff]  ;;  %v14031_v35 = vld [vmem:[#allocation65_spill] sm:$0xff] }
 0x61b   :  { %v14014_v55 = vld [vmem:[#allocation50_spill] sm:$0xff]  ;;  %v14015_v50 = vld [vmem:[#allocation75_spill] sm:$0xff] }
 0x61c   :  { %4043 = vmatpush.bf16.msrb.mxu2 %v13999_v38  ;;  %4056 = vmatpush.bf16.msrb.mxu3 %v14000_v60  ;;  %v14010_v60 = vld [vmem:[#allocation72_spill] sm:$0xff]  ;;  %v14029_v38 = vld [vmem:[#allocation91_spill] sm:$0xff] }
 0x61e   :  { %4069 = vmatpush.bf16.msra.mxu0 %v14001_v62  ;;  %4082 = vmatpush.bf16.msra.mxu1 %v14002_v17  ;;  %v14011_v62 = vld [vmem:[#allocation45_spill] sm:$0xff]  ;;  %v14012_v17 = vld [vmem:[#allocation46_spill] sm:$0xff] }
 0x620   :  { %4044 = vmatpush.bf16.msrb.mxu2 %v14003_v39  ;;  %4057 = vmatpush.bf16.msrb.mxu3 %v14004_v44  ;;  %v14013_v39 = vld [vmem:[#allocation49_spill] sm:$0xff]  ;;  %v14025_v44 = vld [vmem:[#allocation87_spill] sm:$0xff] }
 0x622   :  { %4070 = vmatpush.bf16.msra.mxu0 %v14005_v1  ;;  %4083 = vmatpush.bf16.msra.mxu1 %v14006_v25  ;;  %v14016_v1 = vld [vmem:[#allocation76_spill] sm:$0xff]  ;;  %v14017_v25 = vld [vmem:[#allocation79_spill] sm:$0xff] }
 0x624   :  { %4045 = vmatpush.bf16.msrb.mxu2 %v14007_v36  ;;  %4058 = vmatpush.bf16.msrb.mxu3 %v14008_v3  ;;  %v14018_v36 = vld [vmem:[#allocation80_spill] sm:$0xff]  ;;  %v14019_v3 = vld [vmem:[#allocation53_spill] sm:$0xff] }
 0x626   :  { %4071 = vmatpush.bf16.msra.mxu0 %v14009_v22  ;;  %4084 = vmatpush.bf16.msra.mxu1 %v14010_v60  ;;  %v14020_v22 = vld [vmem:[#allocation54_spill] sm:$0xff]  ;;  %v14021_v60 = vld [vmem:[#allocation83_spill] sm:$0xff] }
 0x628   :  { %4046 = vmatpush.bf16.msrb.mxu2 %v14011_v62  ;;  %4059 = vmatpush.bf16.msrb.mxu3 %v14012_v17  ;;  %v14022_v62 = vld [vmem:[#allocation84_spill] sm:$0xff]  ;;  %v14023_v17 = vld [vmem:[#allocation57_spill] sm:$0xff] }
 0x62a   :  { %4072 = vmatpush.bf16.msra.mxu0 %v14015_v50  ;;  %4085 = vmatpush.bf16.msra.mxu1 %v14016_v1 }
 0x62b   :  { %v3768_v50 = vpop.f32.mrf.mxu1 }
 0x62c   :  { %4091 = vmatpush.bf16.msra.mxu2 %v14013_v39  ;;  %4104 = vmatpush.bf16.msra.mxu3 %v14014_v55  ;;  %v14024_v39 = vld [vmem:[#allocation58_spill] sm:$0xff]  ;;  %v3755_v55 = vpop.f32.mrf.mxu0 }
 0x62d   :  { %v3756_v1 = vadd.f32 %v3755_v55, %v10773_v48  ;;  %v14032_v48 = vld [vmem:[#allocation66_spill] sm:$0xff] }
 0x62e   :  { %4117 = vmatpush.bf16.msrb.mxu0 %v14017_v25  ;;  %4130 = vmatpush.bf16.msrb.mxu1 %v14018_v36  ;;  %v14026_v25 = vld [vmem:[#allocation88_spill] sm:$0xff] }
 0x62f   :  { %v10894_v36 = vadd.f32 %v3768_v50, %v3756_v1 }
 0x630   :  { %4092 = vmatpush.bf16.msra.mxu2 %v14019_v3  ;;  %4105 = vmatpush.bf16.msra.mxu3 %v14020_v22  ;;  %v14027_v3 = vld [vmem:[#allocation61_spill] sm:$0xff]  ;;  %v14028_v22 = vld [vmem:[#allocation62_spill] sm:$0xff] }
 0x632   :  { %4118 = vmatpush.bf16.msrb.mxu0 %v14021_v60  ;;  %4131 = vmatpush.bf16.msrb.mxu1 %v14022_v62  ;;  %v3729_v60 = vpop.f32.mrf.mxu2  ;;  %v3742_v62 = vpop.f32.mrf.mxu3 }
 0x633   :  { %v3770_v50 = vpop.f32.mrf.mxu1 }
 0x634   :  { %4093 = vmatpush.bf16.msra.mxu2 %v14023_v17  ;;  %4106 = vmatpush.bf16.msra.mxu3 %v14024_v39  ;;  %v3730_v17 = vadd.f32 %v3729_v60, %v10779_v41  ;;  %v14030_v39 = vld [vmem:[#allocation92_spill] sm:$0xff]  ;;  %v3757_v1 = vpop.f32.mrf.mxu0  ;;  %v14043_v50 = vld [vmem:[#allocation77_spill] sm:$0xff] }
 0x635   :  { %v14042_v1 = vld [vmem:[#allocation104_spill] sm:$0xff] }
 0x636   :  { %4119 = vmatpush.bf16.msrb.mxu0 %v14025_v44  ;;  %4132 = vmatpush.bf16.msrb.mxu1 %v14026_v25  ;;  %v10903_v55 = vadd.f32 %v3742_v62, %v3730_v17  ;;  %v14033_v25 = vld [vmem:[#allocation95_spill] sm:$0xff]  ;;  %v14036_v44 = vld [vmem:[#allocation70_spill] sm:$0xff] }
 0x637   :  { %v14040_v62 = vld [vmem:[#allocation74_spill] sm:$0xff]  ;;  %v14041_v17 = vld [vmem:[#allocation103_spill] sm:$0xff] }
 0x638   :  { %4094 = vmatpush.bf16.msra.mxu2 %v14027_v3  ;;  %4107 = vmatpush.bf16.msra.mxu3 %v14028_v22  ;;  %v14034_v3 = vld [vmem:[#allocation96_spill] sm:$0xff]  ;;  %v14035_v22 = vld [vmem:[#allocation69_spill] sm:$0xff] }
 0x63a   :  { %4120 = vmatpush.bf16.msrb.mxu0 %v14029_v38  ;;  %4133 = vmatpush.bf16.msrb.mxu1 %v14030_v39  ;;  %v3731_v41 = vpop.f32.mrf.mxu2  ;;  %v3744_v60 = vpop.f32.mrf.mxu3  ;;  %v14037_v38 = vld [vmem:[#allocation99_spill] sm:$0xff]  ;;  %v14038_v39 = vld [vmem:[#allocation100_spill] sm:$0xff] }
 0x63b   :  { %v14046_v41 = vld [vmem:[#allocation108_spill] sm:$0xff] }
 0x63c   :  { %4095 = vmatpush.bf16.msra.mxu2 %v14031_v35  ;;  %4108 = vmatpush.bf16.msra.mxu3 %v14032_v48  ;;  %v14039_v35 = vld [vmem:[#allocation73_spill] sm:$0xff] }
 0x63e   :  { %4121 = vmatpush.bf16.msrb.mxu0 %v14033_v25  ;;  %4134 = vmatpush.bf16.msrb.mxu1 %v14034_v3  ;;  %v14044_v3 = vld [vmem:[#allocation78_spill] sm:$0xff] }
 0x640   :  { %4096 = vmatpush.bf16.msra.mxu2 %v14035_v22  ;;  %4109 = vmatpush.bf16.msra.mxu3 %v14036_v44  ;;  %v14045_v22 = vld [vmem:[#allocation107_spill] sm:$0xff] }
 0x642   :  { %4122 = vmatpush.bf16.msrb.mxu0 %v14037_v38  ;;  %4135 = vmatpush.bf16.msrb.mxu1 %v14038_v39 }
 0x644   :  { %4097 = vmatpush.bf16.msra.mxu2 %v14039_v35  ;;  %4110 = vmatpush.bf16.msra.mxu3 %v14040_v62  ;;  %v14047_v62 = vld [vmem:[#allocation148_spill] sm:$0xff] }
 0x646   :  { %4123 = vmatpush.bf16.msrb.mxu0 %v14041_v17  ;;  %4136 = vmatpush.bf16.msrb.mxu1 %v14042_v1 }
 0x648   :  { %4098 = vmatpush.bf16.msra.mxu2 %v14043_v50  ;;  %4111 = vmatpush.bf16.msra.mxu3 %v14044_v3  ;;  %v14048_v3 = vld [vmem:[#allocation149_spill] sm:$0xff] }
 0x64a   :  { %4124 = vmatpush.bf16.msrb.mxu0 %v14045_v22  ;;  %4137 = vmatpush.bf16.msrb.mxu1 %v14046_v41 }
 0x64b   :  { %v3807_v60 = vpop.f32.mrf.mxu0  ;;  %v3820_v38 = vpop.f32.mrf.mxu1 }
 0x64c   :  { %v3821_v44 = vadd.f32 %v3820_v38, %v3807_v60  ;;  %v3429_v38 = vld [vmem:[#allocation2 + $0x3] ss:$8 sm:$0xf] }
 0x64d   :  { %v10924_v60 = vor.u32 %v3430_v8, %v3429_v38 }
 0x64e   :  { %v3929_v39 = vadd.f32 %v3821_v44, %v10814_v27  ;;  %v3781_v35 = vpop.f32.mrf.mxu2  ;;  %v3794_v25 = vpop.f32.mrf.mxu3 }
 0x64f   :  { %v3795_v17 = vadd.f32 %v3794_v25, %v3781_v35 }
 0x650   :  { %v3935_v48 = vadd.f32 %v3929_v39, %v14047_v62 }
 0x651   :  { %v3928_v1 = vadd.f32 %v3795_v17, %v10823_v37 }
 0x652   :  { %v3942_v10 = vrot.slane %v3935_v48, 7 }
 0x653   :  { %v3809_v32 = vpop.f32.mrf.mxu0  ;;  %v3822_v50 = vpop.f32.mrf.mxu1  ;;  %v3934_v15 = vadd.f32 %v3928_v1, %v14048_v3  ;;  %v14049_v1 = vld [vmem:[#allocation152_spill] sm:$0xff] }
 0x655   :  { %v3943_v22 = vsel %vm2205_vm0, %v3934_v15, %v3942_v10 }
 0x656   :  { %v3783_v41 = vpop.f32.mrf.mxu2  ;;  %v3796_v11 = vpop.f32.mrf.mxu3  ;;  %v3945_v27 = vadd.f32 %v3943_v22, %v10924_v60  ;;  %v14050_v22 = vld [vmem:[#allocation153_spill] sm:$0xff] }
 0x658   :  { %v7913_v44 = vmul.f32 -1.442695, %v3945_v27 }
 0x65a   :  { %8452 = vpow2.f32 %v7913_v44  ;;  %v3966_v44 = vrot.slane %v10924_v60, 2 }
 0x660   :  { %v8453_v17 = vpop.eup %8452 }
 0x661   :  { %v3949_v41 = vadd.f32 1.0, %v8453_v17 }
 0x663   :  { %8454 = vrcp.f32 %v3949_v41  ;;  %vm3955_vm12 = vweird.f32 %v3949_v41 }
 0x66b   :  { %v3859_v35 = vpop.f32.mrf.mxu0  ;;  %v3872_v39 = vpop.f32.mrf.mxu1 }
 0x66c   :  { %v3873_v37 = vadd.f32 %v3872_v39, %v3859_v35 }
 0x66e   :  { %v3931_v32 = vadd.f32 %v3873_v37, %v10854_v49  ;;  %v3833_v25 = vpop.f32.mrf.mxu2  ;;  %v3846_v48 = vpop.f32.mrf.mxu3 }
 0x66f   :  { %v3847_v10 = vadd.f32 %v3846_v48, %v3833_v25 }
 0x670   :  { %v3937_v15 = vadd.f32 %v3931_v32, %v14049_v1  ;;  %v8455_v32 = vpop.eup %8454  ;;  %v3961_v1 = vand.u32 2147483648, %v3949_v41 }
 0x671   :  { %v3930_v11 = vadd.f32 %v3847_v10, %v10863_v26  ;;  %v3951_v25 = vmul.f32 %v8455_v32, %v3949_v41  ;;  %vm3956_vm11 = vweird.f32 %v8455_v32 }
 0x672   :  { %v3970_v38 = vrot.slane %v3937_v15, 7  ;;  %vm3957_vm13 = vmor %vm3955_vm12, %vm3956_vm11  ;;  %v3962_v7 = vor.u32 1.1754944e-38, %v3961_v1 }
 0x673   :  { %v3861_v50 = vpop.f32.mrf.mxu0  ;;  %v3874_v8 = vpop.f32.mrf.mxu1  ;;  %v3936_v27 = vadd.f32 %v3930_v11, %v14050_v22  ;;  %v3952_v10 = vsub.f32 1.0, %v3951_v25 }
 0x675   :  { %v3971_v35 = vsel %vm2205_vm0, %v3936_v27, %v3970_v38  ;;  %v3953_v11 = vmul.f32 %v8455_v32, %v3952_v10 }
 0x676   :  { %v3973_v49 = vadd.f32 %v3971_v35, %v3966_v44  ;;  %v3835_v39 = vpop.f32.mrf.mxu2  ;;  %v3848_v37 = vpop.f32.mrf.mxu3 }
 0x677   :  { %v3954_v35 = vadd.f32 %v8455_v32, %v3953_v11 }
 0x678   :  { %v7914_v3 = vmul.f32 -1.442695, %v3973_v49 }
 0x67a   :  { %8456 = vpow2.f32 %v7914_v3  ;;  %v14051_v3 = vld [vmem:[#allocation156_spill] sm:$0xff] }
 0x680   :  { %v8457_v48 = vpop.eup %8456 }
 0x681   :  { %v3977_v26 = vadd.f32 1.0, %v8457_v48  ;;  %v3959_v48 = vand.u32 2147483647, %v3949_v41  ;;  %v3999_v41 = vrot.slane %v10924_v60, 4 }
 0x683   :  { %8458 = vrcp.f32 %v3977_v26  ;;  %vm3960_vm14 = vcmp.eq.f32.partialorder %v3959_v48, 8.507059e+37  ;;  %vm3983_vm1 = vweird.f32 %v3977_v26 }
 0x689   :  { %v8459_v8 = vpop.eup %8458 }
 0x68a   :  { %v3911_v17 = vpop.f32.mrf.mxu0  ;;  %v3924_v15 = vpop.f32.mrf.mxu1  ;;  %v3979_v38 = vmul.f32 %v8459_v8, %v3977_v26  ;;  %vm3984_vm15 = vweird.f32 %v8459_v8 }
 0x68b   :  { %v3925_v50 = vadd.f32 %v3924_v15, %v3911_v17  ;;  %v3958_v15 = vsel %vm3957_vm13, %v8455_v32, %v3954_v35  ;;  %vm3985_vm2 = vmor %vm3983_vm1, %vm3984_vm15 }
 0x68c   :  { %v3980_v49 = vsub.f32 1.0, %v3979_v38  ;;  %v3963_v11 = vsel %vm3960_vm14, %v3962_v7, %v3958_v15  ;;  %vm6331_vm14 = vcmask 1043456  }
 0x68d   :  { %v3933_v22 = vadd.f32 %v3925_v50, %v10894_v36  ;;  %v14052_v50 = vld [vmem:[#allocation208_spill] sm:$0xff] }
 0x68e   :  { %v3885_v27 = vpop.f32.mrf.mxu2  ;;  %v3898_v44 = vpop.f32.mrf.mxu3  ;;  %v3981_v25 = vmul.f32 %v8459_v8, %v3980_v49 }
 0x68f   :  { %v3939_v39 = vadd.f32 %v3933_v22, %v14051_v3  ;;  %v3899_v37 = vadd.f32 %v3898_v44, %v3885_v27  ;;  %v3989_v27 = vand.u32 2147483648, %v3977_v26  ;;  %v14111_v3 = vld [vmem:[#allocation151_spill] sm:$0xff] }
 0x690   :  { %v3982_v38 = vadd.f32 %v8459_v8, %v3981_v25 }
 0x691   :  { %v3932_v62 = vadd.f32 %v3899_v37, %v10903_v55  ;;  %v3995_v36 = vrot.slane %v3939_v39, 7  ;;  %v3987_v37 = vand.u32 2147483647, %v3977_v26  ;;  %v3990_v39 = vor.u32 1.1754944e-38, %v3989_v27  ;;  %v14057_v27 = vld [vmem:[#allocation82_spill] sm:$0xff] }
 0x692   :  { %v3913_v10 = vpop.f32.mrf.mxu0  ;;  %v3926_v17 = vpop.f32.mrf.mxu1  ;;  %v3986_v35 = vsel %vm3985_vm2, %v8459_v8, %v3982_v38  ;;  %v14054_v8 = vld [vmem:[#allocation126_spill] sm:$0xff] }
 0x693   :  { %v3938_v52 = vadd.f32 %v3932_v62, %v14052_v50  ;;  %vm3988_vm3 = vcmp.eq.f32.partialorder %v3987_v37, 8.507059e+37  ;;  %v14062_v37 = vld [vmem:[#allocation115_spill] sm:$0xff]  ;;  %v14110_v50 = vld [vmem:[#allocation150_spill] sm:$0xff] }
 0x694   :  { %v3991_v62 = vsel %vm3988_vm3, %v3990_v39, %v3986_v35  ;;  %v14064_v35 = vld [vmem:[#allocation89_spill] sm:$0xff]  ;;  %v14065_v39 = vld [vmem:[#allocation90_spill] sm:$0xff] }
 0x695   :  { %v3996_v22 = vsel %vm2205_vm0, %v3938_v52, %v3995_v36  ;;  %v4003_v1 = vsub.f32 1.0, %v3991_v62  ;;  %v4005_v52 = vmul.f32 %v3991_v62, %v10536_v14  ;;  %v14066_v62 = vld [vmem:[#allocation119_spill] sm:$0xff]  ;;  %v14076_v14 = vld [vmem:[#allocation101_spill] sm:$0xff] }
 0x696   :  { %v3998_v44 = vmul.f32 %v3996_v22, %v3963_v11  ;;  %v3887_v49 = vpop.f32.mrf.mxu2  ;;  %v3900_v55 = vpop.f32.mrf.mxu3  ;;  %v14056_v22 = vld [vmem:[#allocation81_spill] sm:$0xff] }
 0x697   :  { %v14060_v49 = vld [vmem:[#allocation85_spill] sm:$0xff]  ;;  %v14061_v55 = vld [vmem:[#allocation86_spill] sm:$0xff] }
 0x698   :  { %v4001_v32 = vadd.f32 %v3999_v41, %v3998_v44  ;;  %v14058_v44 = vld [vmem:[#allocation111_spill] sm:$0xff]  ;;  %v14059_v41 = vld [vmem:[#allocation112_spill] sm:$0xff] }
 0x69a   :  { %8460 = vtanh.f32 %v4001_v32  ;;  %v14063_v32 = vld [vmem:[#allocation116_spill] sm:$0xff] }
 0x6a0   :  { %v8461_v7 = vpop.eup %8460 }
 0x6a1   :  { %v4004_v48 = vmul.f32 %v8461_v7, %v4003_v1  ;;  %v14067_v1 = vld [vmem:[#allocation120_spill] sm:$0xff]  ;;  %v14068_v7 = vld [vmem:[#allocation93_spill] sm:$0xff] }
 0x6a3   :  { %v10940_v25 = vadd.f32 %v4005_v52, %v4004_v48  ;;  %v14069_v48 = vld [vmem:[#allocation94_spill] sm:$0xff]  ;;  %v14070_v52 = vld [vmem:[#allocation123_spill] sm:$0xff] }
 0x6a5   :  { %14053 = vst [vmem:[#allocation157_spill] sm:$0xff] %v10940_v25  ;;  %v4012_v60 = vperm.slane %v10940_v25, 0  ;;  %v13027_v10 = vperm.slane %v10940_v25, 1 }
 0x6a7   :  { %v10946_v26 = vpack.c.bf16 %v13027_v10, %v4012_v60  ;;  %v10950_v17 = vsel %vm6329_vm4, %v14054_v8, %v4012_v60  ;;  %v14071_v60 = vld [vmem:[#allocation124_spill] sm:$0xff]  ;;  %v14072_v8 = vld [vmem:[#allocation97_spill] sm:$0xff] }
 0x6a8   :  { %14055 = vst [vmem:[#allocation137_spill] sm:$0xff] %v10950_v17  ;;  %v14075_v10 = vld [vmem:[#allocation128_spill] sm:$0xff]  ;;  %v14109_v17 = vld [vmem:[#allocation177_spill] sm:$0xff] }
 0x6a9   :  { %v4033_v15 = vunpack.c.l.b16 %v10946_v26  ;;  %v4034_v36 = vunpack.c.h.b16 %v10946_v26 }
 0x6ab   :  { %v10954_v11 = vpack.c.b16 %v4033_v15, %v4033_v15  ;;  %v10956_v38 = vpack.c.b16 %v4034_v36, %v4034_v36  ;;  %v14073_v15 = vld [vmem:[#allocation98_spill] sm:$0xff]  ;;  %v14074_v36 = vld [vmem:[#allocation127_spill] sm:$0xff] }
 0x6ad   :  { %4047 = vmatmul.bf16.vlgmr.msrb.gmra.mxu2 %v10954_v11  ;;  %4060 = vmatmul.bf16.vlgmr.msrb.gmra.mxu3 %v10956_v38 }
 0x6ae   :  { %4073 = vmatmul.bf16.vlgmr.msra.gmra.mxu0 %v10954_v11  ;;  %4086 = vmatmul.bf16.vlgmr.msra.gmra.mxu1 %v10956_v38 }
 0x6af   :  { %4143 = vmatpush.bf16.msrb.mxu2 %v14056_v22  ;;  %4156 = vmatpush.bf16.msrb.mxu3 %v14057_v27  ;;  %v14107_v27 = vld [vmem:[#allocation172_spill] sm:$0xff]  ;;  %v14108_v22 = vld [vmem:[#allocation173_spill] sm:$0xff] }
 0x6b0   :  { %4169 = vmatpush.bf16.msra.mxu0 %v14058_v44  ;;  %4182 = vmatpush.bf16.msra.mxu1 %v14059_v41  ;;  %v14105_v41 = vld [vmem:[#allocation143_spill] sm:$0xff]  ;;  %v14106_v44 = vld [vmem:[#allocation144_spill] sm:$0xff] }
 0x6b3   :  { %4144 = vmatpush.bf16.msrb.mxu2 %v14060_v49  ;;  %4157 = vmatpush.bf16.msrb.mxu3 %v14061_v55  ;;  %v14103_v55 = vld [vmem:[#allocation168_spill] sm:$0xff]  ;;  %v14104_v49 = vld [vmem:[#allocation169_spill] sm:$0xff] }
 0x6b4   :  { %4170 = vmatpush.bf16.msra.mxu0 %v14062_v37  ;;  %4183 = vmatpush.bf16.msra.mxu1 %v14063_v32  ;;  %v14101_v32 = vld [vmem:[#allocation141_spill] sm:$0xff]  ;;  %v14102_v37 = vld [vmem:[#allocation142_spill] sm:$0xff] }
 0x6b7   :  { %4145 = vmatpush.bf16.msrb.mxu2 %v14064_v35  ;;  %4158 = vmatpush.bf16.msrb.mxu3 %v14065_v39  ;;  %v14099_v39 = vld [vmem:[#allocation164_spill] sm:$0xff]  ;;  %v14100_v35 = vld [vmem:[#allocation165_spill] sm:$0xff] }
 0x6b8   :  { %4171 = vmatpush.bf16.msra.mxu0 %v14066_v62  ;;  %4184 = vmatpush.bf16.msra.mxu1 %v14067_v1  ;;  %v14081_v1 = vld [vmem:[#allocation106_spill] sm:$0xff]  ;;  %v14082_v62 = vld [vmem:[#allocation132_spill] sm:$0xff] }
 0x6bb   :  { %4146 = vmatpush.bf16.msrb.mxu2 %v14068_v7  ;;  %4159 = vmatpush.bf16.msrb.mxu3 %v14069_v48  ;;  %v14079_v48 = vld [vmem:[#allocation131_spill] sm:$0xff]  ;;  %v14080_v7 = vld [vmem:[#allocation105_spill] sm:$0xff] }
 0x6bc   :  { %4172 = vmatpush.bf16.msra.mxu0 %v14070_v52  ;;  %4185 = vmatpush.bf16.msra.mxu1 %v14071_v60  ;;  %v14077_v52 = vld [vmem:[#allocation102_spill] sm:$0xff] }
 0x6bd   :  { %4099 = vmatmul.bf16.vlgmr.msra.gmra.mxu2 %v10954_v11  ;;  %4112 = vmatmul.bf16.vlgmr.msra.gmra.mxu3 %v10956_v38  ;;  %v14078_v60 = vld [vmem:[#allocation130_spill] sm:$0xff] }
 0x6be   :  { %4125 = vmatmul.bf16.vlgmr.msrb.gmra.mxu0 %v10954_v11  ;;  %4138 = vmatmul.bf16.vlgmr.msrb.gmra.mxu1 %v10956_v38 }
 0x6bf   :  { %4147 = vmatpush.bf16.msrb.mxu2 %v14072_v8  ;;  %4160 = vmatpush.bf16.msrb.mxu3 %v14073_v15  ;;  %v14083_v8 = vld [vmem:[#allocation133_spill] sm:$0xff] }
 0x6c0   :  { %4173 = vmatpush.bf16.msra.mxu0 %v14074_v36  ;;  %4186 = vmatpush.bf16.msra.mxu1 %v14075_v10  ;;  %v14084_v15 = vld [vmem:[#allocation109_spill] sm:$0xff]  ;;  %v14085_v36 = vld [vmem:[#allocation110_spill] sm:$0xff] }
 0x6c1   :  { %v14086_v10 = vld [vmem:[#allocation134_spill] sm:$0xff] }
 0x6c3   :  { %4148 = vmatpush.bf16.msrb.mxu2 %v14076_v14  ;;  %4161 = vmatpush.bf16.msrb.mxu3 %v14077_v52  ;;  %v14087_v14 = vld [vmem:[#allocation135_spill] sm:$0xff]  ;;  %v14088_v52 = vld [vmem:[#allocation113_spill] sm:$0xff] }
 0x6c4   :  { %4174 = vmatpush.bf16.msra.mxu0 %v14078_v60  ;;  %4187 = vmatpush.bf16.msra.mxu1 %v14079_v48  ;;  %v14089_v48 = vld [vmem:[#allocation136_spill] sm:$0xff] }
 0x6c5   :  { %v14098_v60 = vld [vmem:[#allocation140_spill] sm:$0xff] }
 0x6c7   :  { %4149 = vmatpush.bf16.msrb.mxu2 %v14080_v7  ;;  %4162 = vmatpush.bf16.msrb.mxu3 %v14081_v1  ;;  %v14096_v1 = vld [vmem:[#allocation161_spill] sm:$0xff]  ;;  %v14097_v7 = vld [vmem:[#allocation139_spill] sm:$0xff] }
 0x6c8   :  { %4175 = vmatpush.bf16.msra.mxu0 %v14082_v62  ;;  %4188 = vmatpush.bf16.msra.mxu1 %v14083_v8  ;;  %v14094_v8 = vld [vmem:[#allocation129_spill] sm:$0xff] }
 0x6c9   :  { %v14095_v62 = vld [vmem:[#allocation145_spill] sm:$0xff] }
 0x6cb   :  { %4150 = vmatpush.bf16.msrb.mxu2 %v14084_v15  ;;  %4163 = vmatpush.bf16.msrb.mxu3 %v14085_v36  ;;  %v14090_v36 = vld [vmem:[#allocation117_spill] sm:$0xff] }
 0x6cc   :  { %4176 = vmatpush.bf16.msra.mxu0 %v14086_v10  ;;  %4189 = vmatpush.bf16.msra.mxu1 %v14087_v14  ;;  %v14091_v10 = vld [vmem:[#allocation118_spill] sm:$0xff]  ;;  %v14093_v15 = vld [vmem:[#allocation125_spill] sm:$0xff] }
 0x6cd   :  { %v14092_v14 = vld [vmem:[#allocation122_spill] sm:$0xff] }
 0x6ce   :  { %4151 = vmatmul.bf16.vlgmr.msrb.gmra.mxu2 %v10954_v11  ;;  %4164 = vmatmul.bf16.vlgmr.msrb.gmra.mxu3 %v10956_v38 }
 0x6cf   :  { %4195 = vmatpush.bf16.msra.mxu2 %v14088_v52  ;;  %4208 = vmatpush.bf16.msra.mxu3 %v13485_v28 }
 0x6d0   :  { %4221 = vmatpush.bf16.msrb.mxu0 %v14089_v48  ;;  %4234 = vmatpush.bf16.msrb.mxu1 %v9234_v0 }
 0x6d1   :  { %4177 = vmatmul.bf16.vlgmr.msra.gmra.mxu0 %v10954_v11  ;;  %4190 = vmatmul.bf16.vlgmr.msra.gmra.mxu1 %v10956_v38 }
 0x6d3   :  { %4196 = vmatpush.bf16.msra.mxu2 %v14090_v36  ;;  %4209 = vmatpush.bf16.msra.mxu3 %v14091_v10 }
 0x6d4   :  { %4222 = vmatpush.bf16.msrb.mxu0 %v9245_v56  ;;  %4235 = vmatpush.bf16.msrb.mxu1 %v9249_v2 }
 0x6d7   :  { %4197 = vmatpush.bf16.msra.mxu2 %v13488_v30  ;;  %4210 = vmatpush.bf16.msra.mxu3 %v14092_v14 }
 0x6d8   :  { %4223 = vmatpush.bf16.msrb.mxu0 %v9262_v9  ;;  %4236 = vmatpush.bf16.msrb.mxu1 %v9268_v4 }
 0x6db   :  { %4198 = vmatpush.bf16.msra.mxu2 %v14093_v15  ;;  %4211 = vmatpush.bf16.msra.mxu3 %v13491_v45 }
 0x6dc   :  { %4224 = vmatpush.bf16.msrb.mxu0 %v9277_v43  ;;  %4237 = vmatpush.bf16.msrb.mxu1 %v9281_v12 }
 0x6df   :  { %4199 = vmatpush.bf16.msra.mxu2 %v9191_v61  ;;  %4212 = vmatpush.bf16.msra.mxu3 %v14094_v8 }
 0x6e0   :  { %4225 = vmatpush.bf16.msrb.mxu0 %v9290_v24  ;;  %4238 = vmatpush.bf16.msrb.mxu1 %v14095_v62 }
 0x6e3   :  { %4200 = vmatpush.bf16.msra.mxu2 %v9203_v29  ;;  %4213 = vmatpush.bf16.msra.mxu3 %v9206_v58 }
 0x6e4   :  { %4226 = vmatpush.bf16.msrb.mxu0 %v13345_v31  ;;  %4239 = vmatpush.bf16.msrb.mxu1 %v13346_v53 }
 0x6e7   :  { %4201 = vmatpush.bf16.msra.mxu2 %v9215_v33  ;;  %4214 = vmatpush.bf16.msra.mxu3 %v9218_v23 }
 0x6e8   :  { %4227 = vmatpush.bf16.msrb.mxu0 %v13349_v46  ;;  %4240 = vmatpush.bf16.msrb.mxu1 %v13350_v19 }
 0x6eb   :  { %4202 = vmatpush.bf16.msra.mxu2 %v9227_v5  ;;  %4215 = vmatpush.bf16.msra.mxu3 %v9230_v51 }
 0x6ec   :  { %4228 = vmatpush.bf16.msrb.mxu0 %v13351_v16  ;;  %4241 = vmatpush.bf16.msrb.mxu1 %v13691_v42 }
 0x6ee   :  { %4203 = vmatmul.bf16.vlgmr.msra.gmra.mxu2 %v10954_v11  ;;  %4216 = vmatmul.bf16.vlgmr.msra.gmra.mxu3 %v10956_v38 }
 0x6ef   :  { %4247 = vmatpush.bf16.msrb.mxu2 %v13692_v59  ;;  %4260 = vmatpush.bf16.msrb.mxu3 %v13693_v57 }
 0x6f0   :  { %4273 = vmatpush.bf16.msra.mxu0 %v13694_v6  ;;  %4286 = vmatpush.bf16.msra.mxu1 %v14096_v1 }
 0x6f1   :  { %4229 = vmatmul.bf16.vlgmr.msrb.gmra.mxu0 %v10954_v11  ;;  %4242 = vmatmul.bf16.vlgmr.msrb.gmra.mxu1 %v10956_v38 }
 0x6f3   :  { %4248 = vmatpush.bf16.msrb.mxu2 %v14097_v7  ;;  %4261 = vmatpush.bf16.msrb.mxu3 %v14098_v60 }
 0x6f4   :  { %4274 = vmatpush.bf16.msra.mxu0 %v14099_v39  ;;  %4287 = vmatpush.bf16.msra.mxu1 %v14100_v35 }
 0x6f7   :  { %4249 = vmatpush.bf16.msrb.mxu2 %v14101_v32  ;;  %4262 = vmatpush.bf16.msrb.mxu3 %v14102_v37 }
 0x6f8   :  { %4275 = vmatpush.bf16.msra.mxu0 %v14103_v55  ;;  %4288 = vmatpush.bf16.msra.mxu1 %v14104_v49  ;;  %v14112_v49 = vld [vmem:[#allocation180_spill] sm:$0xff] }
 0x6fb   :  { %4250 = vmatpush.bf16.msrb.mxu2 %v14105_v41  ;;  %4263 = vmatpush.bf16.msrb.mxu3 %v14106_v44  ;;  %v14113_v44 = vld [vmem:[#allocation154_spill] sm:$0xff] }
 0x6fc   :  { %4276 = vmatpush.bf16.msra.mxu0 %v14107_v27  ;;  %4289 = vmatpush.bf16.msra.mxu1 %v14108_v22  ;;  %v14114_v27 = vld [vmem:[#allocation155_spill] sm:$0xff]  ;;  %v14115_v22 = vld [vmem:[#allocation184_spill] sm:$0xff] }
 0x6ff   :  { %4251 = vmatpush.bf16.msrb.mxu2 %v13950_v13  ;;  %4264 = vmatpush.bf16.msrb.mxu3 %v13951_v54  ;;  %v14116_v13 = vld [vmem:[#allocation185_spill] sm:$0xff]  ;;  %v14117_v54 = vld [vmem:[#allocation158_spill] sm:$0xff] }
 0x700   :  { %4277 = vmatpush.bf16.msra.mxu0 %v13952_v20  ;;  %4290 = vmatpush.bf16.msra.mxu1 %v14109_v17  ;;  %v14118_v20 = vld [vmem:[#allocation159_spill] sm:$0xff]  ;;  %v14119_v17 = vld [vmem:[#allocation188_spill] sm:$0xff] }
 0x703   :  { %4252 = vmatpush.bf16.msrb.mxu2 %v14110_v50  ;;  %4265 = vmatpush.bf16.msrb.mxu3 %v14111_v3  ;;  %v14120_v50 = vld [vmem:[#allocation189_spill] sm:$0xff]  ;;  %v14121_v3 = vld [vmem:[#allocation162_spill] sm:$0xff] }
 0x704   :  { %4278 = vmatpush.bf16.msra.mxu0 %v14112_v49  ;;  %4291 = vmatpush.bf16.msra.mxu1 %v13957_v18  ;;  %v14122_v49 = vld [vmem:[#allocation163_spill] sm:$0xff]  ;;  %v14123_v18 = vld [vmem:[#allocation192_spill] sm:$0xff] }
 0x707   :  { %4253 = vmatpush.bf16.msrb.mxu2 %v14113_v44  ;;  %4266 = vmatpush.bf16.msrb.mxu3 %v14114_v27  ;;  %v14124_v44 = vld [vmem:[#allocation193_spill] sm:$0xff] }
 0x708   :  { %4279 = vmatpush.bf16.msra.mxu0 %v14115_v22  ;;  %4292 = vmatpush.bf16.msra.mxu1 %v14116_v13  ;;  %v14133_v13 = vld [vmem:[#allocation175_spill] sm:$0xff] }
 0x70b   :  { %4254 = vmatpush.bf16.msrb.mxu2 %v14117_v54  ;;  %4267 = vmatpush.bf16.msrb.mxu3 %v14118_v20  ;;  %v14125_v20 = vld [vmem:[#allocation166_spill] sm:$0xff]  ;;  %v14132_v54 = vld [vmem:[#allocation197_spill] sm:$0xff] }
 0x70c   :  { %4280 = vmatpush.bf16.msra.mxu0 %v14119_v17  ;;  %4293 = vmatpush.bf16.msra.mxu1 %v14120_v50  ;;  %v14126_v17 = vld [vmem:[#allocation167_spill] sm:$0xff]  ;;  %v14127_v50 = vld [vmem:[#allocation194_spill] sm:$0xff] }
 0x70e   :  { %4255 = vmatmul.bf16.vlgmr.msrb.gmra.mxu2 %v10954_v11  ;;  %4268 = vmatmul.bf16.vlgmr.msrb.gmra.mxu3 %v10956_v38 }
 0x70f   :  { %4299 = vmatpush.bf16.msra.mxu2 %v14121_v3  ;;  %4312 = vmatpush.bf16.msra.mxu3 %v14122_v49  ;;  %v14128_v3 = vld [vmem:[#allocation195_spill] sm:$0xff]  ;;  %v14129_v49 = vld [vmem:[#allocation170_spill] sm:$0xff] }
 0x710   :  { %4325 = vmatpush.bf16.msrb.mxu0 %v14123_v18  ;;  %4338 = vmatpush.bf16.msrb.mxu1 %v14124_v44  ;;  %v14130_v18 = vld [vmem:[#allocation171_spill] sm:$0xff]  ;;  %v14131_v44 = vld [vmem:[#allocation196_spill] sm:$0xff] }
 0x711   :  { %4281 = vmatmul.bf16.vlgmr.msra.gmra.mxu0 %v10954_v11  ;;  %4294 = vmatmul.bf16.vlgmr.msra.gmra.mxu1 %v10956_v38 }
 0x713   :  { %4300 = vmatpush.bf16.msra.mxu2 %v14125_v20  ;;  %4313 = vmatpush.bf16.msra.mxu3 %v14126_v17 }
 0x714   :  { %4326 = vmatpush.bf16.msrb.mxu0 %v14127_v50  ;;  %4339 = vmatpush.bf16.msrb.mxu1 %v14128_v3  ;;  %v14134_v3 = vld [vmem:[#allocation200_spill] sm:$0xff] }
 0x717   :  { %4301 = vmatpush.bf16.msra.mxu2 %v14129_v49  ;;  %4314 = vmatpush.bf16.msra.mxu3 %v14130_v18  ;;  %v14135_v49 = vld [vmem:[#allocation201_spill] sm:$0xff]  ;;  %v14136_v18 = vld [vmem:[#allocation182_spill] sm:$0xff] }
 0x718   :  { %4327 = vmatpush.bf16.msrb.mxu0 %v14131_v44  ;;  %4340 = vmatpush.bf16.msrb.mxu1 %v14132_v54  ;;  %v14137_v44 = vld [vmem:[#allocation183_spill] sm:$0xff]  ;;  %v14138_v54 = vld [vmem:[#allocation202_spill] sm:$0xff] }
 0x71b   :  { %4302 = vmatpush.bf16.msra.mxu2 %v13973_v34  ;;  %4315 = vmatpush.bf16.msra.mxu3 %v14133_v13  ;;  %v14139_v34 = vld [vmem:[#allocation203_spill] sm:$0xff]  ;;  %v14140_v13 = vld [vmem:[#allocation186_spill] sm:$0xff] }
 0x71c   :  { %4328 = vmatpush.bf16.msrb.mxu0 %v13975_v47  ;;  %4341 = vmatpush.bf16.msrb.mxu1 %v13976_v40  ;;  %v14141_v47 = vld [vmem:[#allocation187_spill] sm:$0xff]  ;;  %v14142_v40 = vld [vmem:[#allocation204_spill] sm:$0xff] }
 0x71f   :  { %4303 = vmatpush.bf16.msra.mxu2 %v13977_v21  ;;  %4316 = vmatpush.bf16.msra.mxu3 %v13978_v63  ;;  %v14143_v21 = vld [vmem:[#allocation205_spill] sm:$0xff]  ;;  %v14144_v63 = vld [vmem:[#allocation190_spill] sm:$0xff] }
 0x720   :  { %4329 = vmatpush.bf16.msrb.mxu0 %v14134_v3  ;;  %4342 = vmatpush.bf16.msrb.mxu1 %v14135_v49  ;;  %v14145_v3 = vld [vmem:[#allocation191_spill] sm:$0xff]  ;;  %v14146_v49 = vld [vmem:[#allocation206_spill] sm:$0xff] }
 0x723   :  { %4304 = vmatpush.bf16.msra.mxu2 %v14136_v18  ;;  %4317 = vmatpush.bf16.msra.mxu3 %v14137_v44  ;;  %v14147_v18 = vld [vmem:[#allocation207_spill] sm:$0xff] }
 0x724   :  { %4330 = vmatpush.bf16.msrb.mxu0 %v14138_v54  ;;  %4343 = vmatpush.bf16.msrb.mxu1 %v14139_v34 }
 0x727   :  { %4305 = vmatpush.bf16.msra.mxu2 %v14140_v13  ;;  %4318 = vmatpush.bf16.msra.mxu3 %v14141_v47 }
 0x728   :  { %4331 = vmatpush.bf16.msrb.mxu0 %v14142_v40  ;;  %4344 = vmatpush.bf16.msrb.mxu1 %v14143_v21 }
 0x72b   :  { %4306 = vmatpush.bf16.msra.mxu2 %v14144_v63  ;;  %4319 = vmatpush.bf16.msra.mxu3 %v14145_v3 }
 0x72c   :  { %4332 = vmatpush.bf16.msrb.mxu0 %v14146_v49  ;;  %4345 = vmatpush.bf16.msrb.mxu1 %v14147_v18  ;;  %v4074_v18 = vpop.f32.mrf.mxu0 }
 0x72e   :  { %4307 = vmatmul.bf16.vlgmr.msra.gmra.mxu2 %v10954_v11  ;;  %4320 = vmatmul.bf16.vlgmr.msra.gmra.mxu3 %v10956_v38 }
 0x72f   :  { %4351 = vmatpush.bf16.msrb.mxu2 %v14088_v52  ;;  %4364 = vmatpush.bf16.msrb.mxu3 %v13485_v28  ;;  %v4087_v52 = vpop.f32.mrf.mxu1 }
 0x730   :  { %4377 = vmatpush.bf16.msra.mxu0 %v14089_v48  ;;  %4390 = vmatpush.bf16.msra.mxu1 %v9234_v0  ;;  %v11118_v48 = vadd.f32 %v4087_v52, %v4074_v18 }
 0x731   :  { %4333 = vmatmul.bf16.vlgmr.msrb.gmra.mxu0 %v10954_v11  ;;  %4346 = vmatmul.bf16.vlgmr.msrb.gmra.mxu1 %v10956_v38  ;;  %v4048_v11 = vpop.f32.mrf.mxu2  ;;  %v4061_v38 = vpop.f32.mrf.mxu3 }
 0x733   :  { %4352 = vmatpush.bf16.msrb.mxu2 %v14090_v36  ;;  %4365 = vmatpush.bf16.msrb.mxu3 %v14091_v10  ;;  %v11124_v36 = vadd.f32 %v4061_v38, %v4048_v11  ;;  %v4018_v10 = vunpack.c.h.bf16 %v10946_v26 }
 0x734   :  { %4378 = vmatpush.bf16.msra.mxu0 %v9245_v56  ;;  %4391 = vmatpush.bf16.msra.mxu1 %v9249_v2  ;;  %v4076_v18 = vpop.f32.mrf.mxu0 }
 0x737   :  { %4353 = vmatpush.bf16.msrb.mxu2 %v13488_v30  ;;  %4366 = vmatpush.bf16.msrb.mxu3 %v14092_v14  ;;  %v4089_v52 = vpop.f32.mrf.mxu1  ;;  %v4021_v14 = vrot.slane %v4018_v10, 7 }
 0x738   :  { %4379 = vmatpush.bf16.msra.mxu0 %v9262_v9  ;;  %4392 = vmatpush.bf16.msra.mxu1 %v9268_v4 }
 0x739   :  { %v4050_v11 = vpop.f32.mrf.mxu2  ;;  %v4063_v38 = vpop.f32.mrf.mxu3 }
 0x73b   :  { %4354 = vmatpush.bf16.msrb.mxu2 %v14093_v15  ;;  %4367 = vmatpush.bf16.msrb.mxu3 %v13491_v45  ;;  %v4017_v15 = vunpack.c.l.bf16 %v10946_v26 }
 0x73c   :  { %4380 = vmatpush.bf16.msra.mxu0 %v9277_v43  ;;  %4393 = vmatpush.bf16.msra.mxu1 %v9281_v12  ;;  %v4126_v52 = vpop.f32.mrf.mxu0 }
 0x73d   :  { %v4022_v18 = vsel %vm2205_vm0, %v4017_v15, %v4021_v14 }
 0x73f   :  { %4355 = vmatpush.bf16.msrb.mxu2 %v9191_v61  ;;  %4368 = vmatpush.bf16.msrb.mxu3 %v14094_v8  ;;  %v4139_v10 = vpop.f32.mrf.mxu1 }
 0x740   :  { %4381 = vmatpush.bf16.msra.mxu0 %v9290_v24  ;;  %4394 = vmatpush.bf16.msra.mxu1 %v14095_v62  ;;  %v11141_v8 = vadd.f32 %v4139_v10, %v4126_v52  ;;  %v4024_v62 = vsub.f32 %v10940_v25, %v4022_v18 }
 0x741   :  { %v4100_v14 = vpop.f32.mrf.mxu2  ;;  %v4113_v26 = vpop.f32.mrf.mxu3 }
 0x742   :  { %v11148_v15 = vadd.f32 %v4113_v26, %v4100_v14  ;;  %v4026_v11 = vperm.slane %v4024_v62, 0  ;;  %v4027_v38 = vperm.slane %v4024_v62, 1 }
 0x743   :  { %4356 = vmatpush.bf16.msrb.mxu2 %v9203_v29  ;;  %4369 = vmatpush.bf16.msrb.mxu3 %v9206_v58 }
 0x744   :  { %4382 = vmatpush.bf16.msra.mxu0 %v13345_v31  ;;  %4395 = vmatpush.bf16.msra.mxu1 %v13346_v53  ;;  %v4128_v52 = vpop.f32.mrf.mxu0  ;;  %v11156_v10 = vpack.c.bf16 %v4026_v11, %v4026_v11  ;;  %v11158_v14 = vpack.c.bf16 %v4027_v38, %v4027_v38 }
 0x745   :  { %v14148_v52 = vld [vmem:[#allocation169_spill] sm:$0xff] }
 0x747   :  { %4357 = vmatpush.bf16.msrb.mxu2 %v9215_v33  ;;  %4370 = vmatpush.bf16.msrb.mxu3 %v9218_v23  ;;  %v4141_v18 = vpop.f32.mrf.mxu1 }
 0x748   :  { %4383 = vmatpush.bf16.msra.mxu0 %v13349_v46  ;;  %4396 = vmatpush.bf16.msra.mxu1 %v13350_v19 }
 0x749   :  { %v4102_v62 = vpop.f32.mrf.mxu2  ;;  %v4115_v26 = vpop.f32.mrf.mxu3 }
 0x74a   :  { %v14149_v62 = vld [vmem:[#allocation144_spill] sm:$0xff] }
 0x74b   :  { %4358 = vmatpush.bf16.msrb.mxu2 %v9227_v5  ;;  %4371 = vmatpush.bf16.msrb.mxu3 %v9230_v51  ;;  %v14150_v26 = vld [vmem:[#allocation172_spill] sm:$0xff] }
 0x74c   :  { %4384 = vmatpush.bf16.msra.mxu0 %v13351_v16  ;;  %4397 = vmatpush.bf16.msra.mxu1 %v13691_v42 }
 0x74e   :  { %4359 = vmatmul.bf16.vlgmr.msrb.gmra.mxu2 %v11156_v10  ;;  %4372 = vmatmul.bf16.vlgmr.msrb.gmra.mxu3 %v11158_v14  ;;  %v4178_v11 = vpop.f32.mrf.mxu0 }
 0x74f   :  { %4403 = vmatpush.bf16.msra.mxu2 %v13692_v59  ;;  %4416 = vmatpush.bf16.msra.mxu3 %v13693_v57  ;;  %v4191_v38 = vpop.f32.mrf.mxu1 }
 0x750   :  { %4429 = vmatpush.bf16.msrb.mxu0 %v13694_v6  ;;  %4442 = vmatpush.bf16.msrb.mxu1 %v14096_v1  ;;  %v11174_v18 = vadd.f32 %v4191_v38, %v4178_v11  ;;  %v14154_v11 = vld [vmem:[#allocation176_spill] sm:$0xff]  ;;  %v14155_v38 = vld [vmem:[#allocation177_spill] sm:$0xff]  ;;  %v14160_v1 = vld [vmem:[#allocation154_spill] sm:$0xff] }
 0x751   :  { %4385 = vmatmul.bf16.vlgmr.msra.gmra.mxu0 %v11156_v10  ;;  %4398 = vmatmul.bf16.vlgmr.msra.gmra.mxu1 %v11158_v14 }
 0x753   :  { %4404 = vmatpush.bf16.msra.mxu2 %v14097_v7  ;;  %4417 = vmatpush.bf16.msra.mxu3 %v14098_v60  ;;  %v14153_v7 = vld [vmem:[#allocation147_spill] sm:$0xff] }
 0x754   :  { %4430 = vmatpush.bf16.msrb.mxu0 %v14099_v39  ;;  %4443 = vmatpush.bf16.msrb.mxu1 %v14100_v35  ;;  %v14151_v39 = vld [vmem:[#allocation173_spill] sm:$0xff]  ;;  %v4152_v35 = vpop.f32.mrf.mxu2 }
 0x757   :  { %4405 = vmatpush.bf16.msra.mxu2 %v14101_v32  ;;  %4418 = vmatpush.bf16.msra.mxu3 %v14102_v37  ;;  %v4165_v32 = vpop.f32.mrf.mxu3  ;;  %v14152_v37 = vld [vmem:[#allocation146_spill] sm:$0xff] }
 0x758   :  { %4431 = vmatpush.bf16.msrb.mxu0 %v14103_v55  ;;  %4444 = vmatpush.bf16.msrb.mxu1 %v14148_v52  ;;  %v11180_v60 = vadd.f32 %v4165_v32, %v4152_v35  ;;  %v4180_v55 = vpop.f32.mrf.mxu0  ;;  %v4193_v52 = vpop.f32.mrf.mxu1 }
 0x759   :  { %v14161_v55 = vld [vmem:[#allocation185_spill] sm:$0xff]  ;;  %v14162_v52 = vld [vmem:[#allocation158_spill] sm:$0xff] }
 0x75b   :  { %4406 = vmatpush.bf16.msra.mxu2 %v14105_v41  ;;  %4419 = vmatpush.bf16.msra.mxu3 %v14149_v62  ;;  %v14156_v41 = vld [vmem:[#allocation150_spill] sm:$0xff]  ;;  %v14157_v62 = vld [vmem:[#allocation151_spill] sm:$0xff] }
 0x75c   :  { %4432 = vmatpush.bf16.msrb.mxu0 %v14150_v26  ;;  %4445 = vmatpush.bf16.msrb.mxu1 %v14151_v39  ;;  %v14158_v26 = vld [vmem:[#allocation180_spill] sm:$0xff]  ;;  %v14159_v39 = vld [vmem:[#allocation181_spill] sm:$0xff]  ;;  %v4154_v32 = vpop.f32.mrf.mxu2 }
 0x75d   :  { %v14167_v32 = vld [vmem:[#allocation163_spill] sm:$0xff] }
 0x75f   :  { %4407 = vmatpush.bf16.msra.mxu2 %v14152_v37  ;;  %4420 = vmatpush.bf16.msra.mxu3 %v14153_v7  ;;  %v4167_v35 = vpop.f32.mrf.mxu3 }
 0x760   :  { %4433 = vmatpush.bf16.msrb.mxu0 %v14154_v11  ;;  %4446 = vmatpush.bf16.msrb.mxu1 %v14155_v38  ;;  %v14163_v38 = vld [vmem:[#allocation159_spill] sm:$0xff]  ;;  %v14168_v35 = vld [vmem:[#allocation192_spill] sm:$0xff] }
 0x763   :  { %4408 = vmatpush.bf16.msra.mxu2 %v14156_v41  ;;  %4421 = vmatpush.bf16.msra.mxu3 %v14157_v62  ;;  %v14164_v41 = vld [vmem:[#allocation188_spill] sm:$0xff]  ;;  %v14165_v62 = vld [vmem:[#allocation189_spill] sm:$0xff] }
 0x764   :  { %4434 = vmatpush.bf16.msrb.mxu0 %v14158_v26  ;;  %4447 = vmatpush.bf16.msrb.mxu1 %v14159_v39  ;;  %v14166_v26 = vld [vmem:[#allocation162_spill] sm:$0xff] }
 0x767   :  { %4409 = vmatpush.bf16.msra.mxu2 %v14160_v1  ;;  %4422 = vmatpush.bf16.msra.mxu3 %v14114_v27  ;;  %v14169_v1 = vld [vmem:[#allocation193_spill] sm:$0xff]  ;;  %v14179_v27 = vld [vmem:[#allocation178_spill] sm:$0xff] }
 0x768   :  { %4435 = vmatpush.bf16.msrb.mxu0 %v14115_v22  ;;  %4448 = vmatpush.bf16.msrb.mxu1 %v14161_v55 }
 0x76b   :  { %4410 = vmatpush.bf16.msra.mxu2 %v14162_v52  ;;  %4423 = vmatpush.bf16.msra.mxu3 %v14163_v38  ;;  %v14174_v38 = vld [vmem:[#allocation197_spill] sm:$0xff] }
 0x76c   :  { %4436 = vmatpush.bf16.msrb.mxu0 %v14164_v41  ;;  %4449 = vmatpush.bf16.msrb.mxu1 %v14165_v62  ;;  %v14173_v41 = vld [vmem:[#allocation196_spill] sm:$0xff] }
 0x76e   :  { %4411 = vmatmul.bf16.vlgmr.msra.gmra.mxu2 %v11156_v10  ;;  %4424 = vmatmul.bf16.vlgmr.msra.gmra.mxu3 %v11158_v14  ;;  %v4243_v62 = vpop.f32.mrf.mxu1 }
 0x76f   :  { %4455 = vmatpush.bf16.msrb.mxu2 %v14166_v26  ;;  %4468 = vmatpush.bf16.msrb.mxu3 %v14167_v32  ;;  %v14170_v26 = vld [vmem:[#allocation195_spill] sm:$0xff]  ;;  %v14171_v32 = vld [vmem:[#allocation170_spill] sm:$0xff] }
 0x770   :  { %4481 = vmatpush.bf16.msra.mxu0 %v14168_v35  ;;  %4494 = vmatpush.bf16.msra.mxu1 %v14169_v1  ;;  %v14172_v35 = vld [vmem:[#allocation171_spill] sm:$0xff]  ;;  %v4230_v1 = vpop.f32.mrf.mxu0 }
 0x771   :  { %4437 = vmatmul.bf16.vlgmr.msrb.gmra.mxu0 %v11156_v10  ;;  %4450 = vmatmul.bf16.vlgmr.msrb.gmra.mxu1 %v11158_v14  ;;  %v4231_v52 = vadd.f32 %v4230_v1, %v11118_v48 }
 0x773   :  { %4456 = vmatpush.bf16.msrb.mxu2 %v14125_v20  ;;  %4469 = vmatpush.bf16.msrb.mxu3 %v14126_v17  ;;  %v11215_v55 = vadd.f32 %v4243_v62, %v4231_v52  ;;  %v14175_v20 = vld [vmem:[#allocation174_spill] sm:$0xff]  ;;  %v14176_v17 = vld [vmem:[#allocation175_spill] sm:$0xff]  ;;  %v14181_v62 = vld [vmem:[#allocation200_spill] sm:$0xff] }
 0x774   :  { %4482 = vmatpush.bf16.msra.mxu0 %v14127_v50  ;;  %4495 = vmatpush.bf16.msra.mxu1 %v14170_v26  ;;  %v14177_v50 = vld [vmem:[#allocation198_spill] sm:$0xff]  ;;  %v14178_v26 = vld [vmem:[#allocation199_spill] sm:$0xff]  ;;  %v14182_v52 = vld [vmem:[#allocation201_spill] sm:$0xff] }
 0x776   :  { %v4245_v48 = vpop.f32.mrf.mxu1 }
 0x777   :  { %4457 = vmatpush.bf16.msrb.mxu2 %v14171_v32  ;;  %4470 = vmatpush.bf16.msrb.mxu3 %v14172_v35  ;;  %v4204_v32 = vpop.f32.mrf.mxu2  ;;  %v4217_v35 = vpop.f32.mrf.mxu3  ;;  %v14187_v48 = vld [vmem:[#allocation47_spill] sm:$0xff] }
 0x778   :  { %4483 = vmatpush.bf16.msra.mxu0 %v14173_v41  ;;  %4496 = vmatpush.bf16.msra.mxu1 %v14174_v38  ;;  %v4205_v22 = vadd.f32 %v4204_v32, %v11124_v36  ;;  %v14180_v41 = vld [vmem:[#allocation179_spill] sm:$0xff]  ;;  %v4232_v1 = vpop.f32.mrf.mxu0 }
 0x779   :  { %v14186_v1 = vld [vmem:[#allocation32_spill] sm:$0xff] }
 0x77a   :  { %v11224_v38 = vadd.f32 %v4217_v35, %v4205_v22  ;;  %v14184_v22 = vld [vmem:[#allocation207_spill] sm:$0xff] }
 0x77b   :  { %4458 = vmatpush.bf16.msrb.mxu2 %v14175_v20  ;;  %4471 = vmatpush.bf16.msrb.mxu3 %v14176_v17  ;;  %v14183_v17 = vld [vmem:[#allocation182_spill] sm:$0xff]  ;;  %v14185_v35 = vld [vmem:[#allocation31_spill] sm:$0xff] }
 0x77c   :  { %4484 = vmatpush.bf16.msra.mxu0 %v14177_v50  ;;  %4497 = vmatpush.bf16.msra.mxu1 %v14178_v26 }
 0x77f   :  { %4459 = vmatpush.bf16.msrb.mxu2 %v14179_v27  ;;  %4472 = vmatpush.bf16.msrb.mxu3 %v14180_v41  ;;  %v4206_v36 = vpop.f32.mrf.mxu2  ;;  %v4219_v32 = vpop.f32.mrf.mxu3 }
 0x780   :  { %4485 = vmatpush.bf16.msra.mxu0 %v14181_v62  ;;  %4498 = vmatpush.bf16.msra.mxu1 %v14182_v52  ;;  %v14188_v36 = vld [vmem:[#allocation48_spill] sm:$0xff]  ;;  %v14189_v32 = vld [vmem:[#allocation33_spill] sm:$0xff] }
 0x783   :  { %4460 = vmatpush.bf16.msrb.mxu2 %v14183_v17  ;;  %4473 = vmatpush.bf16.msrb.mxu3 %v14137_v44  ;;  %v4009_v17 = vld [vmem:[#allocation2 + $0x4] ss:$8 sm:$0x30] }
 0x784   :  { %4486 = vmatpush.bf16.msra.mxu0 %v14138_v54  ;;  %4499 = vmatpush.bf16.msra.mxu1 %v14139_v34 }
 0x787   :  { %4461 = vmatpush.bf16.msrb.mxu2 %v14140_v13  ;;  %4474 = vmatpush.bf16.msrb.mxu3 %v14141_v47  ;;  %v14199_v47 = vld [vmem:[#allocation59_spill] sm:$0xff] }
 0x788   :  { %4487 = vmatpush.bf16.msra.mxu0 %v14142_v40  ;;  %4500 = vmatpush.bf16.msra.mxu1 %v14143_v21  ;;  %v14194_v21 = vld [vmem:[#allocation36_spill] sm:$0xff] }
 0x78b   :  { %4462 = vmatpush.bf16.msrb.mxu2 %v14144_v63  ;;  %4475 = vmatpush.bf16.msrb.mxu3 %v14145_v3  ;;  %v14193_v63 = vld [vmem:[#allocation35_spill] sm:$0xff] }
 0x78c   :  { %4488 = vmatpush.bf16.msra.mxu0 %v14146_v49  ;;  %4501 = vmatpush.bf16.msra.mxu1 %v14184_v22  ;;  %v14190_v49 = vld [vmem:[#allocation34_spill] sm:$0xff]  ;;  %v14191_v22 = vld [vmem:[#allocation51_spill] sm:$0xff] }
 0x78e   :  { %4463 = vmatmul.bf16.vlgmr.msrb.gmra.mxu2 %v11156_v10  ;;  %4476 = vmatmul.bf16.vlgmr.msrb.gmra.mxu3 %v11158_v14  ;;  %v4295_v3 = vpop.f32.mrf.mxu1 }
 0x78f   :  { %4618 = vmatpush.bf16.msra.mxu2 %v14185_v35  ;;  %4631 = vmatpush.bf16.msra.mxu3 %v14186_v1  ;;  %v14192_v35 = vld [vmem:[#allocation52_spill] sm:$0xff]  ;;  %v4282_v1 = vpop.f32.mrf.mxu0 }
 0x790   :  { %4489 = vmatmul.bf16.vlgmr.msra.gmra.mxu0 %v11156_v10  ;;  %4502 = vmatmul.bf16.vlgmr.msra.gmra.mxu1 %v11158_v14  ;;  %v4283_v10 = vadd.f32 %v4282_v1, %v11141_v8  ;;  %v14201_v1 = vld [vmem:[#allocation39_spill] sm:$0xff] }
 0x791   :  { %4644 = vmatpush.bf16.msrb.mxu0 %v14187_v48  ;;  %4657 = vmatpush.bf16.msrb.mxu1 %v14188_v36  ;;  %v14195_v48 = vld [vmem:[#allocation55_spill] sm:$0xff]  ;;  %v14196_v36 = vld [vmem:[#allocation56_spill] sm:$0xff] }
 0x792   :  { %v11255_v14 = vadd.f32 %v4295_v3, %v4283_v10  ;;  %v14202_v10 = vld [vmem:[#allocation40_spill] sm:$0xff] }
 0x793   :  { %4619 = vmatpush.bf16.msra.mxu2 %v14189_v32  ;;  %4632 = vmatpush.bf16.msra.mxu3 %v14190_v49  ;;  %v14197_v32 = vld [vmem:[#allocation37_spill] sm:$0xff]  ;;  %v14198_v49 = vld [vmem:[#allocation38_spill] sm:$0xff] }
 0x795   :  { %4645 = vmatpush.bf16.msrb.mxu0 %v14191_v22  ;;  %4658 = vmatpush.bf16.msrb.mxu1 %v14192_v35  ;;  %v4256_v22 = vpop.f32.mrf.mxu2  ;;  %v4269_v35 = vpop.f32.mrf.mxu3 }
 0x796   :  { %v4257_v40 = vadd.f32 %v4256_v22, %v11148_v15  ;;  %v4297_v8 = vpop.f32.mrf.mxu1 }
 0x797   :  { %4620 = vmatpush.bf16.msra.mxu2 %v14193_v63  ;;  %4633 = vmatpush.bf16.msra.mxu3 %v14194_v21  ;;  %v14200_v63 = vld [vmem:[#allocation60_spill] sm:$0xff]  ;;  %v4284_v3 = vpop.f32.mrf.mxu0  ;;  %v14211_v8 = vld [vmem:[#allocation71_spill] sm:$0xff] }
 0x798   :  { %v11264_v21 = vadd.f32 %v4269_v35, %v4257_v40  ;;  %v14208_v40 = vld [vmem:[#allocation68_spill] sm:$0xff]  ;;  %v14209_v35 = vld [vmem:[#allocation43_spill] sm:$0xff] }
 0x799   :  { %4646 = vmatpush.bf16.msrb.mxu0 %v14195_v48  ;;  %4659 = vmatpush.bf16.msrb.mxu1 %v14196_v36  ;;  %v14203_v36 = vld [vmem:[#allocation63_spill] sm:$0xff]  ;;  %v14206_v48 = vld [vmem:[#allocation42_spill] sm:$0xff]  ;;  %v14210_v3 = vld [vmem:[#allocation44_spill] sm:$0xff] }
 0x79b   :  { %4621 = vmatpush.bf16.msra.mxu2 %v14197_v32  ;;  %4634 = vmatpush.bf16.msra.mxu3 %v14198_v49  ;;  %v14204_v32 = vld [vmem:[#allocation64_spill] sm:$0xff]  ;;  %v14205_v49 = vld [vmem:[#allocation41_spill] sm:$0xff] }
 0x79d   :  { %4647 = vmatpush.bf16.msrb.mxu0 %v14199_v47  ;;  %4660 = vmatpush.bf16.msrb.mxu1 %v14200_v63  ;;  %v4258_v15 = vpop.f32.mrf.mxu2  ;;  %v4271_v22 = vpop.f32.mrf.mxu3  ;;  %v14207_v47 = vld [vmem:[#allocation67_spill] sm:$0xff]  ;;  %v14233_v63 = vld [vmem:[#allocation65_spill] sm:$0xff] }
 0x79e   :  { %v14216_v15 = vld [vmem:[#allocation50_spill] sm:$0xff]  ;;  %v14217_v22 = vld [vmem:[#allocation75_spill] sm:$0xff] }
 0x79f   :  { %4622 = vmatpush.bf16.msra.mxu2 %v14201_v1  ;;  %4635 = vmatpush.bf16.msra.mxu3 %v14202_v10  ;;  %v14212_v10 = vld [vmem:[#allocation72_spill] sm:$0xff]  ;;  %v14231_v1 = vld [vmem:[#allocation91_spill] sm:$0xff] }
 0x7a1   :  { %4648 = vmatpush.bf16.msrb.mxu0 %v14203_v36  ;;  %4661 = vmatpush.bf16.msrb.mxu1 %v14204_v32  ;;  %v14213_v36 = vld [vmem:[#allocation45_spill] sm:$0xff]  ;;  %v14214_v32 = vld [vmem:[#allocation46_spill] sm:$0xff] }
 0x7a3   :  { %4623 = vmatpush.bf16.msra.mxu2 %v14205_v49  ;;  %4636 = vmatpush.bf16.msra.mxu3 %v14206_v48  ;;  %v14215_v49 = vld [vmem:[#allocation49_spill] sm:$0xff]  ;;  %v14227_v48 = vld [vmem:[#allocation87_spill] sm:$0xff] }
 0x7a5   :  { %4649 = vmatpush.bf16.msrb.mxu0 %v14207_v47  ;;  %4662 = vmatpush.bf16.msrb.mxu1 %v14208_v40  ;;  %v14218_v47 = vld [vmem:[#allocation76_spill] sm:$0xff]  ;;  %v14219_v40 = vld [vmem:[#allocation79_spill] sm:$0xff] }
 0x7a7   :  { %4624 = vmatpush.bf16.msra.mxu2 %v14209_v35  ;;  %4637 = vmatpush.bf16.msra.mxu3 %v14210_v3  ;;  %v14220_v35 = vld [vmem:[#allocation80_spill] sm:$0xff]  ;;  %v14221_v3 = vld [vmem:[#allocation53_spill] sm:$0xff] }
 0x7a9   :  { %4650 = vmatpush.bf16.msrb.mxu0 %v14211_v8  ;;  %4663 = vmatpush.bf16.msrb.mxu1 %v14212_v10  ;;  %v14222_v8 = vld [vmem:[#allocation54_spill] sm:$0xff]  ;;  %v14223_v10 = vld [vmem:[#allocation83_spill] sm:$0xff] }
 0x7ab   :  { %4625 = vmatpush.bf16.msra.mxu2 %v14213_v36  ;;  %4638 = vmatpush.bf16.msra.mxu3 %v14214_v32  ;;  %v14224_v36 = vld [vmem:[#allocation84_spill] sm:$0xff]  ;;  %v14225_v32 = vld [vmem:[#allocation57_spill] sm:$0xff] }
 0x7ad   :  { %4651 = vmatpush.bf16.msrb.mxu0 %v14217_v22  ;;  %4664 = vmatpush.bf16.msrb.mxu1 %v14218_v47 }
 0x7ae   :  { %v4347_v22 = vpop.f32.mrf.mxu1 }
 0x7af   :  { %4670 = vmatpush.bf16.msrb.mxu2 %v14215_v49  ;;  %4683 = vmatpush.bf16.msrb.mxu3 %v14216_v15  ;;  %v14226_v49 = vld [vmem:[#allocation58_spill] sm:$0xff]  ;;  %v4334_v15 = vpop.f32.mrf.mxu0 }
 0x7b0   :  { %v4335_v47 = vadd.f32 %v4334_v15, %v11174_v18  ;;  %v14234_v18 = vld [vmem:[#allocation66_spill] sm:$0xff] }
 0x7b1   :  { %4696 = vmatpush.bf16.msra.mxu0 %v14219_v40  ;;  %4709 = vmatpush.bf16.msra.mxu1 %v14220_v35  ;;  %v14228_v40 = vld [vmem:[#allocation88_spill] sm:$0xff] }
 0x7b2   :  { %v11295_v35 = vadd.f32 %v4347_v22, %v4335_v47 }
 0x7b3   :  { %4671 = vmatpush.bf16.msrb.mxu2 %v14221_v3  ;;  %4684 = vmatpush.bf16.msrb.mxu3 %v14222_v8  ;;  %v14229_v3 = vld [vmem:[#allocation61_spill] sm:$0xff]  ;;  %v14230_v8 = vld [vmem:[#allocation62_spill] sm:$0xff] }
 0x7b5   :  { %4697 = vmatpush.bf16.msra.mxu0 %v14223_v10  ;;  %4710 = vmatpush.bf16.msra.mxu1 %v14224_v36  ;;  %v4308_v10 = vpop.f32.mrf.mxu2  ;;  %v4321_v36 = vpop.f32.mrf.mxu3 }
 0x7b6   :  { %v4349_v22 = vpop.f32.mrf.mxu1 }
 0x7b7   :  { %4672 = vmatpush.bf16.msrb.mxu2 %v14225_v32  ;;  %4685 = vmatpush.bf16.msrb.mxu3 %v14226_v49  ;;  %v4309_v32 = vadd.f32 %v4308_v10, %v11180_v60  ;;  %v14232_v49 = vld [vmem:[#allocation92_spill] sm:$0xff]  ;;  %v4336_v47 = vpop.f32.mrf.mxu0  ;;  %v14245_v22 = vld [vmem:[#allocation77_spill] sm:$0xff] }
 0x7b8   :  { %v14244_v47 = vld [vmem:[#allocation104_spill] sm:$0xff] }
 0x7b9   :  { %4698 = vmatpush.bf16.msra.mxu0 %v14227_v48  ;;  %4711 = vmatpush.bf16.msra.mxu1 %v14228_v40  ;;  %v11304_v15 = vadd.f32 %v4321_v36, %v4309_v32  ;;  %v14235_v40 = vld [vmem:[#allocation95_spill] sm:$0xff]  ;;  %v14238_v48 = vld [vmem:[#allocation70_spill] sm:$0xff] }
 0x7ba   :  { %v14242_v36 = vld [vmem:[#allocation74_spill] sm:$0xff]  ;;  %v14243_v32 = vld [vmem:[#allocation103_spill] sm:$0xff] }
 0x7bb   :  { %4673 = vmatpush.bf16.msrb.mxu2 %v14229_v3  ;;  %4686 = vmatpush.bf16.msrb.mxu3 %v14230_v8  ;;  %v14236_v3 = vld [vmem:[#allocation96_spill] sm:$0xff]  ;;  %v14237_v8 = vld [vmem:[#allocation69_spill] sm:$0xff] }
 0x7bd   :  { %4699 = vmatpush.bf16.msra.mxu0 %v14231_v1  ;;  %4712 = vmatpush.bf16.msra.mxu1 %v14232_v49  ;;  %v4310_v60 = vpop.f32.mrf.mxu2  ;;  %v4323_v10 = vpop.f32.mrf.mxu3  ;;  %v14239_v1 = vld [vmem:[#allocation99_spill] sm:$0xff]  ;;  %v14240_v49 = vld [vmem:[#allocation100_spill] sm:$0xff] }
 0x7be   :  { %v14248_v60 = vld [vmem:[#allocation108_spill] sm:$0xff] }
 0x7bf   :  { %4674 = vmatpush.bf16.msrb.mxu2 %v14233_v63  ;;  %4687 = vmatpush.bf16.msrb.mxu3 %v14234_v18  ;;  %v14241_v63 = vld [vmem:[#allocation73_spill] sm:$0xff] }
 0x7c1   :  { %4700 = vmatpush.bf16.msra.mxu0 %v14235_v40  ;;  %4713 = vmatpush.bf16.msra.mxu1 %v14236_v3  ;;  %v14246_v3 = vld [vmem:[#allocation78_spill] sm:$0xff] }
 0x7c3   :  { %4675 = vmatpush.bf16.msrb.mxu2 %v14237_v8  ;;  %4688 = vmatpush.bf16.msrb.mxu3 %v14238_v48  ;;  %v14247_v8 = vld [vmem:[#allocation107_spill] sm:$0xff] }
 0x7c5   :  { %4701 = vmatpush.bf16.msra.mxu0 %v14239_v1  ;;  %4714 = vmatpush.bf16.msra.mxu1 %v14240_v49 }
 0x7c7   :  { %4676 = vmatpush.bf16.msrb.mxu2 %v14241_v63  ;;  %4689 = vmatpush.bf16.msrb.mxu3 %v14242_v36  ;;  %v14249_v36 = vld [vmem:[#allocation148_spill] sm:$0xff] }
 0x7c9   :  { %4702 = vmatpush.bf16.msra.mxu0 %v14243_v32  ;;  %4715 = vmatpush.bf16.msra.mxu1 %v14244_v47 }
 0x7cb   :  { %4677 = vmatpush.bf16.msrb.mxu2 %v14245_v22  ;;  %4690 = vmatpush.bf16.msrb.mxu3 %v14246_v3  ;;  %v14250_v3 = vld [vmem:[#allocation149_spill] sm:$0xff] }
 0x7cd   :  { %4703 = vmatpush.bf16.msra.mxu0 %v14247_v8  ;;  %4716 = vmatpush.bf16.msra.mxu1 %v14248_v60 }
 0x7ce   :  { %v4386_v10 = vpop.f32.mrf.mxu0  ;;  %v4399_v1 = vpop.f32.mrf.mxu1 }
 0x7cf   :  { %v4400_v48 = vadd.f32 %v4399_v1, %v4386_v10  ;;  %v4008_v1 = vld [vmem:[#allocation2 + $0x4] ss:$8 sm:$0xf] }
 0x7d0   :  { %v11325_v10 = vor.u32 %v4009_v17, %v4008_v1 }
 0x7d1   :  { %v4508_v49 = vadd.f32 %v4400_v48, %v11215_v55  ;;  %v4360_v63 = vpop.f32.mrf.mxu2  ;;  %v4373_v40 = vpop.f32.mrf.mxu3 }
 0x7d2   :  { %v4374_v32 = vadd.f32 %v4373_v40, %v4360_v63 }
 0x7d3   :  { %v4514_v18 = vadd.f32 %v4508_v49, %v14249_v36 }
 0x7d4   :  { %v4507_v47 = vadd.f32 %v4374_v32, %v11224_v38 }
 0x7d5   :  { %v4521_v34 = vrot.slane %v4514_v18, 7 }
 0x7d6   :  { %v4388_v13 = vpop.f32.mrf.mxu0  ;;  %v4401_v22 = vpop.f32.mrf.mxu1  ;;  %v4513_v54 = vadd.f32 %v4507_v47, %v14250_v3  ;;  %v14251_v47 = vld [vmem:[#allocation152_spill] sm:$0xff] }
 0x7d8   :  { %v4522_v8 = vsel %vm2205_vm0, %v4513_v54, %v4521_v34 }
 0x7d9   :  { %v4362_v60 = vpop.f32.mrf.mxu2  ;;  %v4375_v44 = vpop.f32.mrf.mxu3  ;;  %v4524_v55 = vadd.f32 %v4522_v8, %v11325_v10  ;;  %v14252_v8 = vld [vmem:[#allocation153_spill] sm:$0xff] }
 0x7db   :  { %v7915_v48 = vmul.f32 -1.442695, %v4524_v55 }
 0x7dd   :  { %8462 = vpow2.f32 %v7915_v48  ;;  %v4545_v48 = vrot.slane %v11325_v10, 2 }
 0x7e3   :  { %v8463_v32 = vpop.eup %8462 }
 0x7e4   :  { %v4528_v60 = vadd.f32 1.0, %v8463_v32 }
 0x7e6   :  { %8464 = vrcp.f32 %v4528_v60  ;;  %vm4534_vm6 = vweird.f32 %v4528_v60 }
 0x7ee   :  { %v4438_v63 = vpop.f32.mrf.mxu0  ;;  %v4451_v49 = vpop.f32.mrf.mxu1 }
 0x7ef   :  { %v4452_v38 = vadd.f32 %v4451_v49, %v4438_v63 }
 0x7f1   :  { %v4510_v13 = vadd.f32 %v4452_v38, %v11255_v14  ;;  %v4412_v40 = vpop.f32.mrf.mxu2  ;;  %v4425_v18 = vpop.f32.mrf.mxu3 }
 0x7f2   :  { %v4426_v54 = vadd.f32 %v4425_v18, %v4412_v40 }
 0x7f3   :  { %v4516_v34 = vadd.f32 %v4510_v13, %v14251_v47  ;;  %v8465_v13 = vpop.eup %8464  ;;  %v4540_v47 = vand.u32 2147483648, %v4528_v60 }
 0x7f4   :  { %v4509_v44 = vadd.f32 %v4426_v54, %v11264_v21  ;;  %v4530_v40 = vmul.f32 %v8465_v13, %v4528_v60  ;;  %vm4535_vm5 = vweird.f32 %v8465_v13 }
 0x7f5   :  { %v4549_v1 = vrot.slane %v4516_v34, 7  ;;  %vm4536_vm7 = vmor %vm4534_vm6, %vm4535_vm5  ;;  %v4541_v62 = vor.u32 1.1754944e-38, %v4540_v47 }
 0x7f6   :  { %v4440_v22 = vpop.f32.mrf.mxu0  ;;  %v4453_v17 = vpop.f32.mrf.mxu1  ;;  %v4515_v55 = vadd.f32 %v4509_v44, %v14252_v8  ;;  %v4531_v54 = vsub.f32 1.0, %v4530_v40 }
 0x7f8   :  { %v4550_v63 = vsel %vm2205_vm0, %v4515_v55, %v4549_v1  ;;  %v4532_v44 = vmul.f32 %v8465_v13, %v4531_v54 }
 0x7f9   :  { %v4552_v14 = vadd.f32 %v4550_v63, %v4545_v48  ;;  %v4414_v49 = vpop.f32.mrf.mxu2  ;;  %v4427_v38 = vpop.f32.mrf.mxu3 }
 0x7fa   :  { %v4533_v63 = vadd.f32 %v8465_v13, %v4532_v44 }
 0x7fb   :  { %v7916_v3 = vmul.f32 -1.442695, %v4552_v14 }
 0x7fd   :  { %8466 = vpow2.f32 %v7916_v3  ;;  %v14253_v3 = vld [vmem:[#allocation156_spill] sm:$0xff] }
 0x803   :  { %v8467_v18 = vpop.eup %8466 }
 0x804   :  { %v4556_v21 = vadd.f32 1.0, %v8467_v18  ;;  %v4538_v18 = vand.u32 2147483647, %v4528_v60  ;;  %v4578_v60 = vrot.slane %v11325_v10, 4 }
 0x806   :  { %8468 = vrcp.f32 %v4556_v21  ;;  %vm4539_vm8 = vcmp.eq.f32.partialorder %v4538_v18, 8.507059e+37  ;;  %vm4562_vm11 = vweird.f32 %v4556_v21 }
 0x80c   :  { %v8469_v17 = vpop.eup %8468 }
 0x80d   :  { %v4490_v32 = vpop.f32.mrf.mxu0  ;;  %v4503_v34 = vpop.f32.mrf.mxu1  ;;  %v4558_v1 = vmul.f32 %v8469_v17, %v4556_v21  ;;  %vm4563_vm9 = vweird.f32 %v8469_v17 }
 0x80e   :  { %v4504_v22 = vadd.f32 %v4503_v34, %v4490_v32  ;;  %v4537_v34 = vsel %vm4536_vm7, %v8465_v13, %v4533_v63  ;;  %vm4564_vm12 = vmor %vm4562_vm11, %vm4563_vm9  ;;  %vm6333_vm9 = vcmask 1044480  }
 0x80f   :  { %v4559_v14 = vsub.f32 1.0, %v4558_v1  ;;  %v4542_v44 = vsel %vm4539_vm8, %v4541_v62, %v4537_v34 }
 0x810   :  { %v4512_v8 = vadd.f32 %v4504_v22, %v11295_v35  ;;  %v14254_v22 = vld [vmem:[#allocation208_spill] sm:$0xff] }
 0x811   :  { %v4464_v55 = vpop.f32.mrf.mxu2  ;;  %v4477_v48 = vpop.f32.mrf.mxu3  ;;  %v4560_v40 = vmul.f32 %v8469_v17, %v4559_v14 }
 0x812   :  { %v4518_v49 = vadd.f32 %v4512_v8, %v14253_v3  ;;  %v4478_v38 = vadd.f32 %v4477_v48, %v4464_v55  ;;  %v4568_v55 = vand.u32 2147483648, %v4556_v21  ;;  %v14313_v3 = vld [vmem:[#allocation151_spill] sm:$0xff] }
 0x813   :  { %v4561_v1 = vadd.f32 %v8469_v17, %v4560_v40 }
 0x814   :  { %v4511_v36 = vadd.f32 %v4478_v38, %v11304_v15  ;;  %v4574_v35 = vrot.slane %v4518_v49, 7  ;;  %v4566_v38 = vand.u32 2147483647, %v4556_v21  ;;  %v4569_v49 = vor.u32 1.1754944e-38, %v4568_v55  ;;  %v14259_v55 = vld [vmem:[#allocation82_spill] sm:$0xff] }
 0x815   :  { %v4492_v54 = vpop.f32.mrf.mxu0  ;;  %v4505_v32 = vpop.f32.mrf.mxu1  ;;  %v4565_v63 = vsel %vm4564_vm12, %v8469_v17, %v4561_v1  ;;  %v14256_v17 = vld [vmem:[#allocation137_spill] sm:$0xff] }
 0x816   :  { %v4517_v52 = vadd.f32 %v4511_v36, %v14254_v22  ;;  %vm4567_vm13 = vcmp.eq.f32.partialorder %v4566_v38, 8.507059e+37  ;;  %v14264_v38 = vld [vmem:[#allocation115_spill] sm:$0xff]  ;;  %v14312_v22 = vld [vmem:[#allocation150_spill] sm:$0xff] }
 0x817   :  { %v4570_v36 = vsel %vm4567_vm13, %v4569_v49, %v4565_v63  ;;  %v14266_v63 = vld [vmem:[#allocation89_spill] sm:$0xff]  ;;  %v14267_v49 = vld [vmem:[#allocation90_spill] sm:$0xff] }
 0x818   :  { %v4575_v8 = vsel %vm2205_vm0, %v4517_v52, %v4574_v35  ;;  %v4582_v47 = vsub.f32 1.0, %v4570_v36  ;;  %v4584_v52 = vmul.f32 %v4570_v36, %v10940_v25  ;;  %v14268_v36 = vld [vmem:[#allocation119_spill] sm:$0xff]  ;;  %v14278_v25 = vld [vmem:[#allocation101_spill] sm:$0xff] }
 0x819   :  { %v4577_v48 = vmul.f32 %v4575_v8, %v4542_v44  ;;  %v4466_v14 = vpop.f32.mrf.mxu2  ;;  %v4479_v15 = vpop.f32.mrf.mxu3  ;;  %v14258_v8 = vld [vmem:[#allocation81_spill] sm:$0xff] }
 0x81a   :  { %v14262_v14 = vld [vmem:[#allocation85_spill] sm:$0xff]  ;;  %v14263_v15 = vld [vmem:[#allocation86_spill] sm:$0xff] }
 0x81b   :  { %v4580_v13 = vadd.f32 %v4578_v60, %v4577_v48  ;;  %v14260_v48 = vld [vmem:[#allocation111_spill] sm:$0xff]  ;;  %v14261_v60 = vld [vmem:[#allocation112_spill] sm:$0xff] }
 0x81d   :  { %8470 = vtanh.f32 %v4580_v13  ;;  %v14265_v13 = vld [vmem:[#allocation116_spill] sm:$0xff] }
 0x823   :  { %v8471_v62 = vpop.eup %8470 }
 0x824   :  { %v4583_v18 = vmul.f32 %v8471_v62, %v4582_v47  ;;  %v14269_v47 = vld [vmem:[#allocation120_spill] sm:$0xff]  ;;  %v14270_v62 = vld [vmem:[#allocation93_spill] sm:$0xff] }
 0x826   :  { %v11341_v40 = vadd.f32 %v4584_v52, %v4583_v18  ;;  %v14271_v18 = vld [vmem:[#allocation94_spill] sm:$0xff]  ;;  %v14272_v52 = vld [vmem:[#allocation123_spill] sm:$0xff] }
 0x828   :  { %14255 = vst [vmem:[#allocation138_spill] sm:$0xff] %v11341_v40  ;;  %v4591_v10 = vperm.slane %v11341_v40, 0  ;;  %v13070_v54 = vperm.slane %v11341_v40, 1 }
 0x82a   :  { %v11347_v21 = vpack.c.bf16 %v13070_v54, %v4591_v10  ;;  %v11351_v32 = vsel %vm6331_vm14, %v14256_v17, %v4591_v10  ;;  %v14273_v10 = vld [vmem:[#allocation124_spill] sm:$0xff]  ;;  %v14274_v17 = vld [vmem:[#allocation97_spill] sm:$0xff] }
 0x82b   :  { %14257 = vst [vmem:[#allocation160_spill] sm:$0xff] %v11351_v32  ;;  %v14277_v54 = vld [vmem:[#allocation128_spill] sm:$0xff]  ;;  %v14311_v32 = vld [vmem:[#allocation177_spill] sm:$0xff] }
 0x82c   :  { %v4612_v34 = vunpack.c.l.b16 %v11347_v21  ;;  %v4613_v35 = vunpack.c.h.b16 %v11347_v21 }
 0x82e   :  { %v11355_v44 = vpack.c.b16 %v4612_v34, %v4612_v34  ;;  %v11357_v1 = vpack.c.b16 %v4613_v35, %v4613_v35  ;;  %v14275_v34 = vld [vmem:[#allocation98_spill] sm:$0xff]  ;;  %v14276_v35 = vld [vmem:[#allocation127_spill] sm:$0xff] }
 0x830   :  { %4626 = vmatmul.bf16.vlgmr.msra.gmra.mxu2 %v11355_v44  ;;  %4639 = vmatmul.bf16.vlgmr.msra.gmra.mxu3 %v11357_v1 }
 0x831   :  { %4652 = vmatmul.bf16.vlgmr.msrb.gmra.mxu0 %v11355_v44  ;;  %4665 = vmatmul.bf16.vlgmr.msrb.gmra.mxu1 %v11357_v1 }
 0x832   :  { %4722 = vmatpush.bf16.msra.mxu2 %v14258_v8  ;;  %4735 = vmatpush.bf16.msra.mxu3 %v14259_v55  ;;  %v14309_v55 = vld [vmem:[#allocation172_spill] sm:$0xff]  ;;  %v14310_v8 = vld [vmem:[#allocation173_spill] sm:$0xff] }
 0x833   :  { %4748 = vmatpush.bf16.msrb.mxu0 %v14260_v48  ;;  %4761 = vmatpush.bf16.msrb.mxu1 %v14261_v60  ;;  %v14307_v60 = vld [vmem:[#allocation143_spill] sm:$0xff]  ;;  %v14308_v48 = vld [vmem:[#allocation144_spill] sm:$0xff] }
 0x836   :  { %4723 = vmatpush.bf16.msra.mxu2 %v14262_v14  ;;  %4736 = vmatpush.bf16.msra.mxu3 %v14263_v15  ;;  %v14305_v15 = vld [vmem:[#allocation168_spill] sm:$0xff]  ;;  %v14306_v14 = vld [vmem:[#allocation169_spill] sm:$0xff] }
 0x837   :  { %4749 = vmatpush.bf16.msrb.mxu0 %v14264_v38  ;;  %4762 = vmatpush.bf16.msrb.mxu1 %v14265_v13  ;;  %v14303_v13 = vld [vmem:[#allocation141_spill] sm:$0xff]  ;;  %v14304_v38 = vld [vmem:[#allocation142_spill] sm:$0xff] }
 0x83a   :  { %4724 = vmatpush.bf16.msra.mxu2 %v14266_v63  ;;  %4737 = vmatpush.bf16.msra.mxu3 %v14267_v49  ;;  %v14301_v49 = vld [vmem:[#allocation164_spill] sm:$0xff]  ;;  %v14302_v63 = vld [vmem:[#allocation165_spill] sm:$0xff] }
 0x83b   :  { %4750 = vmatpush.bf16.msrb.mxu0 %v14268_v36  ;;  %4763 = vmatpush.bf16.msrb.mxu1 %v14269_v47  ;;  %v14283_v47 = vld [vmem:[#allocation106_spill] sm:$0xff]  ;;  %v14284_v36 = vld [vmem:[#allocation132_spill] sm:$0xff] }
 0x83e   :  { %4725 = vmatpush.bf16.msra.mxu2 %v14270_v62  ;;  %4738 = vmatpush.bf16.msra.mxu3 %v14271_v18  ;;  %v14281_v18 = vld [vmem:[#allocation131_spill] sm:$0xff]  ;;  %v14282_v62 = vld [vmem:[#allocation105_spill] sm:$0xff] }
 0x83f   :  { %4751 = vmatpush.bf16.msrb.mxu0 %v14272_v52  ;;  %4764 = vmatpush.bf16.msrb.mxu1 %v14273_v10  ;;  %v14279_v52 = vld [vmem:[#allocation102_spill] sm:$0xff] }
 0x840   :  { %4678 = vmatmul.bf16.vlgmr.msrb.gmra.mxu2 %v11355_v44  ;;  %4691 = vmatmul.bf16.vlgmr.msrb.gmra.mxu3 %v11357_v1  ;;  %v14280_v10 = vld [vmem:[#allocation130_spill] sm:$0xff] }
 0x841   :  { %4704 = vmatmul.bf16.vlgmr.msra.gmra.mxu0 %v11355_v44  ;;  %4717 = vmatmul.bf16.vlgmr.msra.gmra.mxu1 %v11357_v1 }
 0x842   :  { %4726 = vmatpush.bf16.msra.mxu2 %v14274_v17  ;;  %4739 = vmatpush.bf16.msra.mxu3 %v14275_v34  ;;  %v14285_v17 = vld [vmem:[#allocation133_spill] sm:$0xff] }
 0x843   :  { %4752 = vmatpush.bf16.msrb.mxu0 %v14276_v35  ;;  %4765 = vmatpush.bf16.msrb.mxu1 %v14277_v54  ;;  %v14286_v34 = vld [vmem:[#allocation109_spill] sm:$0xff]  ;;  %v14287_v35 = vld [vmem:[#allocation110_spill] sm:$0xff] }
 0x844   :  { %v14288_v54 = vld [vmem:[#allocation134_spill] sm:$0xff] }
 0x846   :  { %4727 = vmatpush.bf16.msra.mxu2 %v14278_v25  ;;  %4740 = vmatpush.bf16.msra.mxu3 %v14279_v52  ;;  %v14289_v25 = vld [vmem:[#allocation135_spill] sm:$0xff]  ;;  %v14290_v52 = vld [vmem:[#allocation113_spill] sm:$0xff] }
 0x847   :  { %4753 = vmatpush.bf16.msrb.mxu0 %v14280_v10  ;;  %4766 = vmatpush.bf16.msrb.mxu1 %v14281_v18  ;;  %v14291_v18 = vld [vmem:[#allocation136_spill] sm:$0xff] }
 0x848   :  { %v14300_v10 = vld [vmem:[#allocation140_spill] sm:$0xff] }
 0x84a   :  { %4728 = vmatpush.bf16.msra.mxu2 %v14282_v62  ;;  %4741 = vmatpush.bf16.msra.mxu3 %v14283_v47  ;;  %v14298_v47 = vld [vmem:[#allocation161_spill] sm:$0xff]  ;;  %v14299_v62 = vld [vmem:[#allocation139_spill] sm:$0xff] }
 0x84b   :  { %4754 = vmatpush.bf16.msrb.mxu0 %v14284_v36  ;;  %4767 = vmatpush.bf16.msrb.mxu1 %v14285_v17  ;;  %v14296_v17 = vld [vmem:[#allocation129_spill] sm:$0xff] }
 0x84c   :  { %v14297_v36 = vld [vmem:[#allocation145_spill] sm:$0xff] }
 0x84e   :  { %4729 = vmatpush.bf16.msra.mxu2 %v14286_v34  ;;  %4742 = vmatpush.bf16.msra.mxu3 %v14287_v35  ;;  %v14292_v35 = vld [vmem:[#allocation117_spill] sm:$0xff] }
 0x84f   :  { %4755 = vmatpush.bf16.msrb.mxu0 %v14288_v54  ;;  %4768 = vmatpush.bf16.msrb.mxu1 %v14289_v25  ;;  %v14293_v54 = vld [vmem:[#allocation118_spill] sm:$0xff]  ;;  %v14295_v34 = vld [vmem:[#allocation125_spill] sm:$0xff] }
 0x850   :  { %v14294_v25 = vld [vmem:[#allocation122_spill] sm:$0xff] }
 0x851   :  { %4730 = vmatmul.bf16.vlgmr.msra.gmra.mxu2 %v11355_v44  ;;  %4743 = vmatmul.bf16.vlgmr.msra.gmra.mxu3 %v11357_v1 }
 0x852   :  { %4774 = vmatpush.bf16.msrb.mxu2 %v14290_v52  ;;  %4787 = vmatpush.bf16.msrb.mxu3 %v13485_v28 }
 0x853   :  { %4800 = vmatpush.bf16.msra.mxu0 %v14291_v18  ;;  %4813 = vmatpush.bf16.msra.mxu1 %v9234_v0 }
 0x854   :  { %4756 = vmatmul.bf16.vlgmr.msrb.gmra.mxu0 %v11355_v44  ;;  %4769 = vmatmul.bf16.vlgmr.msrb.gmra.mxu1 %v11357_v1 }
 0x856   :  { %4775 = vmatpush.bf16.msrb.mxu2 %v14292_v35  ;;  %4788 = vmatpush.bf16.msrb.mxu3 %v14293_v54 }
 0x857   :  { %4801 = vmatpush.bf16.msra.mxu0 %v9245_v56  ;;  %4814 = vmatpush.bf16.msra.mxu1 %v9249_v2 }
 0x85a   :  { %4776 = vmatpush.bf16.msrb.mxu2 %v13488_v30  ;;  %4789 = vmatpush.bf16.msrb.mxu3 %v14294_v25 }
 0x85b   :  { %4802 = vmatpush.bf16.msra.mxu0 %v9262_v9  ;;  %4815 = vmatpush.bf16.msra.mxu1 %v9268_v4 }
 0x85e   :  { %4777 = vmatpush.bf16.msrb.mxu2 %v14295_v34  ;;  %4790 = vmatpush.bf16.msrb.mxu3 %v13491_v45 }
 0x85f   :  { %4803 = vmatpush.bf16.msra.mxu0 %v9277_v43  ;;  %4816 = vmatpush.bf16.msra.mxu1 %v9281_v12 }
 0x862   :  { %4778 = vmatpush.bf16.msrb.mxu2 %v9191_v61  ;;  %4791 = vmatpush.bf16.msrb.mxu3 %v14296_v17 }
 0x863   :  { %4804 = vmatpush.bf16.msra.mxu0 %v9290_v24  ;;  %4817 = vmatpush.bf16.msra.mxu1 %v14297_v36 }
 0x866   :  { %4779 = vmatpush.bf16.msrb.mxu2 %v9203_v29  ;;  %4792 = vmatpush.bf16.msrb.mxu3 %v9206_v58 }
 0x867   :  { %4805 = vmatpush.bf16.msra.mxu0 %v13345_v31  ;;  %4818 = vmatpush.bf16.msra.mxu1 %v13346_v53 }
 0x86a   :  { %4780 = vmatpush.bf16.msrb.mxu2 %v9215_v33  ;;  %4793 = vmatpush.bf16.msrb.mxu3 %v9218_v23 }
 0x86b   :  { %4806 = vmatpush.bf16.msra.mxu0 %v13349_v46  ;;  %4819 = vmatpush.bf16.msra.mxu1 %v13350_v19 }
 0x86e   :  { %4781 = vmatpush.bf16.msrb.mxu2 %v9227_v5  ;;  %4794 = vmatpush.bf16.msrb.mxu3 %v9230_v51 }
 0x86f   :  { %4807 = vmatpush.bf16.msra.mxu0 %v13351_v16  ;;  %4820 = vmatpush.bf16.msra.mxu1 %v13691_v42 }
 0x871   :  { %4782 = vmatmul.bf16.vlgmr.msrb.gmra.mxu2 %v11355_v44  ;;  %4795 = vmatmul.bf16.vlgmr.msrb.gmra.mxu3 %v11357_v1 }
 0x872   :  { %4826 = vmatpush.bf16.msra.mxu2 %v13692_v59  ;;  %4839 = vmatpush.bf16.msra.mxu3 %v13693_v57 }
 0x873   :  { %4852 = vmatpush.bf16.msrb.mxu0 %v13694_v6  ;;  %4865 = vmatpush.bf16.msrb.mxu1 %v14298_v47 }
 0x874   :  { %4808 = vmatmul.bf16.vlgmr.msra.gmra.mxu0 %v11355_v44  ;;  %4821 = vmatmul.bf16.vlgmr.msra.gmra.mxu1 %v11357_v1 }
 0x876   :  { %4827 = vmatpush.bf16.msra.mxu2 %v14299_v62  ;;  %4840 = vmatpush.bf16.msra.mxu3 %v14300_v10 }
 0x877   :  { %4853 = vmatpush.bf16.msrb.mxu0 %v14301_v49  ;;  %4866 = vmatpush.bf16.msrb.mxu1 %v14302_v63 }
 0x87a   :  { %4828 = vmatpush.bf16.msra.mxu2 %v14303_v13  ;;  %4841 = vmatpush.bf16.msra.mxu3 %v14304_v38 }
 0x87b   :  { %4854 = vmatpush.bf16.msrb.mxu0 %v14305_v15  ;;  %4867 = vmatpush.bf16.msrb.mxu1 %v14306_v14  ;;  %v14314_v14 = vld [vmem:[#allocation180_spill] sm:$0xff] }
 0x87e   :  { %4829 = vmatpush.bf16.msra.mxu2 %v14307_v60  ;;  %4842 = vmatpush.bf16.msra.mxu3 %v14308_v48  ;;  %v14315_v48 = vld [vmem:[#allocation154_spill] sm:$0xff] }
 0x87f   :  { %4855 = vmatpush.bf16.msrb.mxu0 %v14309_v55  ;;  %4868 = vmatpush.bf16.msrb.mxu1 %v14310_v8  ;;  %v14316_v55 = vld [vmem:[#allocation155_spill] sm:$0xff]  ;;  %v14317_v8 = vld [vmem:[#allocation184_spill] sm:$0xff] }
 0x882   :  { %4830 = vmatpush.bf16.msra.mxu2 %v14152_v37  ;;  %4843 = vmatpush.bf16.msra.mxu3 %v14153_v7  ;;  %v14318_v37 = vld [vmem:[#allocation185_spill] sm:$0xff]  ;;  %v14319_v7 = vld [vmem:[#allocation158_spill] sm:$0xff] }
 0x883   :  { %4856 = vmatpush.bf16.msrb.mxu0 %v14154_v11  ;;  %4869 = vmatpush.bf16.msrb.mxu1 %v14311_v32  ;;  %v14320_v11 = vld [vmem:[#allocation159_spill] sm:$0xff]  ;;  %v14321_v32 = vld [vmem:[#allocation188_spill] sm:$0xff] }
 0x886   :  { %4831 = vmatpush.bf16.msra.mxu2 %v14312_v22  ;;  %4844 = vmatpush.bf16.msra.mxu3 %v14313_v3  ;;  %v14322_v22 = vld [vmem:[#allocation189_spill] sm:$0xff]  ;;  %v14323_v3 = vld [vmem:[#allocation162_spill] sm:$0xff] }
 0x887   :  { %4857 = vmatpush.bf16.msrb.mxu0 %v14314_v14  ;;  %4870 = vmatpush.bf16.msrb.mxu1 %v14159_v39  ;;  %v14324_v14 = vld [vmem:[#allocation163_spill] sm:$0xff]  ;;  %v14325_v39 = vld [vmem:[#allocation192_spill] sm:$0xff] }
 0x88a   :  { %4832 = vmatpush.bf16.msra.mxu2 %v14315_v48  ;;  %4845 = vmatpush.bf16.msra.mxu3 %v14316_v55  ;;  %v14326_v48 = vld [vmem:[#allocation193_spill] sm:$0xff] }
 0x88b   :  { %4858 = vmatpush.bf16.msrb.mxu0 %v14317_v8  ;;  %4871 = vmatpush.bf16.msrb.mxu1 %v14318_v37  ;;  %v14335_v37 = vld [vmem:[#allocation175_spill] sm:$0xff] }
 0x88e   :  { %4833 = vmatpush.bf16.msra.mxu2 %v14319_v7  ;;  %4846 = vmatpush.bf16.msra.mxu3 %v14320_v11  ;;  %v14327_v11 = vld [vmem:[#allocation166_spill] sm:$0xff]  ;;  %v14334_v7 = vld [vmem:[#allocation197_spill] sm:$0xff] }
 0x88f   :  { %4859 = vmatpush.bf16.msrb.mxu0 %v14321_v32  ;;  %4872 = vmatpush.bf16.msrb.mxu1 %v14322_v22  ;;  %v14328_v32 = vld [vmem:[#allocation167_spill] sm:$0xff]  ;;  %v14329_v22 = vld [vmem:[#allocation194_spill] sm:$0xff] }
 0x891   :  { %4834 = vmatmul.bf16.vlgmr.msra.gmra.mxu2 %v11355_v44  ;;  %4847 = vmatmul.bf16.vlgmr.msra.gmra.mxu3 %v11357_v1 }
 0x892   :  { %4878 = vmatpush.bf16.msrb.mxu2 %v14323_v3  ;;  %4891 = vmatpush.bf16.msrb.mxu3 %v14324_v14  ;;  %v14330_v3 = vld [vmem:[#allocation195_spill] sm:$0xff]  ;;  %v14331_v14 = vld [vmem:[#allocation170_spill] sm:$0xff] }
 0x893   :  { %4904 = vmatpush.bf16.msra.mxu0 %v14325_v39  ;;  %4917 = vmatpush.bf16.msra.mxu1 %v14326_v48  ;;  %v14332_v39 = vld [vmem:[#allocation171_spill] sm:$0xff]  ;;  %v14333_v48 = vld [vmem:[#allocation196_spill] sm:$0xff] }
 0x894   :  { %4860 = vmatmul.bf16.vlgmr.msrb.gmra.mxu0 %v11355_v44  ;;  %4873 = vmatmul.bf16.vlgmr.msrb.gmra.mxu1 %v11357_v1 }
 0x896   :  { %4879 = vmatpush.bf16.msrb.mxu2 %v14327_v11  ;;  %4892 = vmatpush.bf16.msrb.mxu3 %v14328_v32 }
 0x897   :  { %4905 = vmatpush.bf16.msra.mxu0 %v14329_v22  ;;  %4918 = vmatpush.bf16.msra.mxu1 %v14330_v3  ;;  %v14336_v3 = vld [vmem:[#allocation200_spill] sm:$0xff] }
 0x89a   :  { %4880 = vmatpush.bf16.msrb.mxu2 %v14331_v14  ;;  %4893 = vmatpush.bf16.msrb.mxu3 %v14332_v39  ;;  %v14337_v14 = vld [vmem:[#allocation201_spill] sm:$0xff]  ;;  %v14338_v39 = vld [vmem:[#allocation182_spill] sm:$0xff] }
 0x89b   :  { %4906 = vmatpush.bf16.msra.mxu0 %v14333_v48  ;;  %4919 = vmatpush.bf16.msra.mxu1 %v14334_v7  ;;  %v14339_v48 = vld [vmem:[#allocation183_spill] sm:$0xff]  ;;  %v14340_v7 = vld [vmem:[#allocation202_spill] sm:$0xff] }
 0x89e   :  { %4881 = vmatpush.bf16.msrb.mxu2 %v14175_v20  ;;  %4894 = vmatpush.bf16.msrb.mxu3 %v14335_v37  ;;  %v14341_v20 = vld [vmem:[#allocation203_spill] sm:$0xff]  ;;  %v14342_v37 = vld [vmem:[#allocation186_spill] sm:$0xff] }
 0x89f   :  { %4907 = vmatpush.bf16.msra.mxu0 %v14177_v50  ;;  %4920 = vmatpush.bf16.msra.mxu1 %v14178_v26  ;;  %v14343_v50 = vld [vmem:[#allocation187_spill] sm:$0xff]  ;;  %v14344_v26 = vld [vmem:[#allocation204_spill] sm:$0xff] }
 0x8a2   :  { %4882 = vmatpush.bf16.msrb.mxu2 %v14179_v27  ;;  %4895 = vmatpush.bf16.msrb.mxu3 %v14180_v41  ;;  %v14345_v27 = vld [vmem:[#allocation205_spill] sm:$0xff]  ;;  %v14346_v41 = vld [vmem:[#allocation190_spill] sm:$0xff] }
 0x8a3   :  { %4908 = vmatpush.bf16.msra.mxu0 %v14336_v3  ;;  %4921 = vmatpush.bf16.msra.mxu1 %v14337_v14  ;;  %v14347_v3 = vld [vmem:[#allocation191_spill] sm:$0xff]  ;;  %v14348_v14 = vld [vmem:[#allocation206_spill] sm:$0xff] }
 0x8a6   :  { %4883 = vmatpush.bf16.msrb.mxu2 %v14338_v39  ;;  %4896 = vmatpush.bf16.msrb.mxu3 %v14339_v48  ;;  %v14349_v39 = vld [vmem:[#allocation207_spill] sm:$0xff] }
 0x8a7   :  { %4909 = vmatpush.bf16.msra.mxu0 %v14340_v7  ;;  %4922 = vmatpush.bf16.msra.mxu1 %v14341_v20 }
 0x8aa   :  { %4884 = vmatpush.bf16.msrb.mxu2 %v14342_v37  ;;  %4897 = vmatpush.bf16.msrb.mxu3 %v14343_v50 }
 0x8ab   :  { %4910 = vmatpush.bf16.msra.mxu0 %v14344_v26  ;;  %4923 = vmatpush.bf16.msra.mxu1 %v14345_v27 }
 0x8ae   :  { %4885 = vmatpush.bf16.msrb.mxu2 %v14346_v41  ;;  %4898 = vmatpush.bf16.msrb.mxu3 %v14347_v3 }
 0x8af   :  { %4911 = vmatpush.bf16.msra.mxu0 %v14348_v14  ;;  %4924 = vmatpush.bf16.msra.mxu1 %v14349_v39  ;;  %v4653_v39 = vpop.f32.mrf.mxu0 }
 0x8b1   :  { %4886 = vmatmul.bf16.vlgmr.msrb.gmra.mxu2 %v11355_v44  ;;  %4899 = vmatmul.bf16.vlgmr.msrb.gmra.mxu3 %v11357_v1 }
 0x8b2   :  { %4930 = vmatpush.bf16.msra.mxu2 %v14290_v52  ;;  %4943 = vmatpush.bf16.msra.mxu3 %v13485_v28  ;;  %v4666_v52 = vpop.f32.mrf.mxu1 }
 0x8b3   :  { %4956 = vmatpush.bf16.msrb.mxu0 %v14291_v18  ;;  %4969 = vmatpush.bf16.msrb.mxu1 %v9234_v0  ;;  %v11519_v18 = vadd.f32 %v4666_v52, %v4653_v39 }
 0x8b4   :  { %4912 = vmatmul.bf16.vlgmr.msra.gmra.mxu0 %v11355_v44  ;;  %4925 = vmatmul.bf16.vlgmr.msra.gmra.mxu1 %v11357_v1  ;;  %v4627_v44 = vpop.f32.mrf.mxu2  ;;  %v4640_v1 = vpop.f32.mrf.mxu3 }
 0x8b6   :  { %4931 = vmatpush.bf16.msra.mxu2 %v14292_v35  ;;  %4944 = vmatpush.bf16.msra.mxu3 %v14293_v54  ;;  %v11525_v35 = vadd.f32 %v4640_v1, %v4627_v44  ;;  %v4597_v54 = vunpack.c.h.bf16 %v11347_v21 }
 0x8b7   :  { %4957 = vmatpush.bf16.msrb.mxu0 %v9245_v56  ;;  %4970 = vmatpush.bf16.msrb.mxu1 %v9249_v2  ;;  %v4655_v39 = vpop.f32.mrf.mxu0 }
 0x8ba   :  { %4932 = vmatpush.bf16.msra.mxu2 %v13488_v30  ;;  %4945 = vmatpush.bf16.msra.mxu3 %v14294_v25  ;;  %v4668_v52 = vpop.f32.mrf.mxu1  ;;  %v4600_v25 = vrot.slane %v4597_v54, 7 }
 0x8bb   :  { %4958 = vmatpush.bf16.msrb.mxu0 %v9262_v9  ;;  %4971 = vmatpush.bf16.msrb.mxu1 %v9268_v4 }
 0x8bc   :  { %v4629_v44 = vpop.f32.mrf.mxu2  ;;  %v4642_v1 = vpop.f32.mrf.mxu3 }
 0x8be   :  { %4933 = vmatpush.bf16.msra.mxu2 %v14295_v34  ;;  %4946 = vmatpush.bf16.msra.mxu3 %v13491_v45  ;;  %v4596_v34 = vunpack.c.l.bf16 %v11347_v21 }
 0x8bf   :  { %4959 = vmatpush.bf16.msrb.mxu0 %v9277_v43  ;;  %4972 = vmatpush.bf16.msrb.mxu1 %v9281_v12  ;;  %v4705_v52 = vpop.f32.mrf.mxu0 }
 0x8c0   :  { %v4601_v39 = vsel %vm2205_vm0, %v4596_v34, %v4600_v25 }
 0x8c2   :  { %4934 = vmatpush.bf16.msra.mxu2 %v9191_v61  ;;  %4947 = vmatpush.bf16.msra.mxu3 %v14296_v17  ;;  %v4718_v54 = vpop.f32.mrf.mxu1 }
 0x8c3   :  { %4960 = vmatpush.bf16.msrb.mxu0 %v9290_v24  ;;  %4973 = vmatpush.bf16.msrb.mxu1 %v14297_v36  ;;  %v11542_v17 = vadd.f32 %v4718_v54, %v4705_v52  ;;  %v4603_v36 = vsub.f32 %v11341_v40, %v4601_v39 }
 0x8c4   :  { %v4679_v25 = vpop.f32.mrf.mxu2  ;;  %v4692_v21 = vpop.f32.mrf.mxu3 }
 0x8c5   :  { %v11549_v34 = vadd.f32 %v4692_v21, %v4679_v25  ;;  %v4605_v44 = vperm.slane %v4603_v36, 0  ;;  %v4606_v1 = vperm.slane %v4603_v36, 1 }
 0x8c6   :  { %4935 = vmatpush.bf16.msra.mxu2 %v9203_v29  ;;  %4948 = vmatpush.bf16.msra.mxu3 %v9206_v58 }
 0x8c7   :  { %4961 = vmatpush.bf16.msrb.mxu0 %v13345_v31  ;;  %4974 = vmatpush.bf16.msrb.mxu1 %v13346_v53  ;;  %v4707_v52 = vpop.f32.mrf.mxu0  ;;  %v11557_v54 = vpack.c.bf16 %v4605_v44, %v4605_v44  ;;  %v11559_v25 = vpack.c.bf16 %v4606_v1, %v4606_v1 }
 0x8c8   :  { %v14350_v52 = vld [vmem:[#allocation169_spill] sm:$0xff] }
 0x8ca   :  { %4936 = vmatpush.bf16.msra.mxu2 %v9215_v33  ;;  %4949 = vmatpush.bf16.msra.mxu3 %v9218_v23  ;;  %v4720_v39 = vpop.f32.mrf.mxu1 }
 0x8cb   :  { %4962 = vmatpush.bf16.msrb.mxu0 %v13349_v46  ;;  %4975 = vmatpush.bf16.msrb.mxu1 %v13350_v19 }
 0x8cc   :  { %v4681_v36 = vpop.f32.mrf.mxu2  ;;  %v4694_v21 = vpop.f32.mrf.mxu3 }
 0x8cd   :  { %v14351_v36 = vld [vmem:[#allocation144_spill] sm:$0xff] }
 0x8ce   :  { %4937 = vmatpush.bf16.msra.mxu2 %v9227_v5  ;;  %4950 = vmatpush.bf16.msra.mxu3 %v9230_v51  ;;  %v14352_v21 = vld [vmem:[#allocation172_spill] sm:$0xff] }
 0x8cf   :  { %4963 = vmatpush.bf16.msrb.mxu0 %v13351_v16  ;;  %4976 = vmatpush.bf16.msrb.mxu1 %v13691_v42 }
 0x8d1   :  { %4938 = vmatmul.bf16.vlgmr.msra.gmra.mxu2 %v11557_v54  ;;  %4951 = vmatmul.bf16.vlgmr.msra.gmra.mxu3 %v11559_v25  ;;  %v4757_v44 = vpop.f32.mrf.mxu0 }
 0x8d2   :  { %4982 = vmatpush.bf16.msrb.mxu2 %v13692_v59  ;;  %4995 = vmatpush.bf16.msrb.mxu3 %v13693_v57  ;;  %v4770_v1 = vpop.f32.mrf.mxu1 }
 0x8d3   :  { %5008 = vmatpush.bf16.msra.mxu0 %v13694_v6  ;;  %5021 = vmatpush.bf16.msra.mxu1 %v14298_v47  ;;  %v11575_v39 = vadd.f32 %v4770_v1, %v4757_v44  ;;  %v14356_v44 = vld [vmem:[#allocation176_spill] sm:$0xff]  ;;  %v14357_v1 = vld [vmem:[#allocation177_spill] sm:$0xff]  ;;  %v14362_v47 = vld [vmem:[#allocation154_spill] sm:$0xff] }
 0x8d4   :  { %4964 = vmatmul.bf16.vlgmr.msrb.gmra.mxu0 %v11557_v54  ;;  %4977 = vmatmul.bf16.vlgmr.msrb.gmra.mxu1 %v11559_v25 }
 0x8d6   :  { %4983 = vmatpush.bf16.msrb.mxu2 %v14299_v62  ;;  %4996 = vmatpush.bf16.msrb.mxu3 %v14300_v10  ;;  %v14355_v62 = vld [vmem:[#allocation147_spill] sm:$0xff] }
 0x8d7   :  { %5009 = vmatpush.bf16.msra.mxu0 %v14301_v49  ;;  %5022 = vmatpush.bf16.msra.mxu1 %v14302_v63  ;;  %v14353_v49 = vld [vmem:[#allocation173_spill] sm:$0xff]  ;;  %v4731_v63 = vpop.f32.mrf.mxu2 }
 0x8da   :  { %4984 = vmatpush.bf16.msrb.mxu2 %v14303_v13  ;;  %4997 = vmatpush.bf16.msrb.mxu3 %v14304_v38  ;;  %v4744_v13 = vpop.f32.mrf.mxu3  ;;  %v14354_v38 = vld [vmem:[#allocation146_spill] sm:$0xff] }
 0x8db   :  { %5010 = vmatpush.bf16.msra.mxu0 %v14305_v15  ;;  %5023 = vmatpush.bf16.msra.mxu1 %v14350_v52  ;;  %v11581_v10 = vadd.f32 %v4744_v13, %v4731_v63  ;;  %v4759_v15 = vpop.f32.mrf.mxu0  ;;  %v4772_v52 = vpop.f32.mrf.mxu1 }
 0x8dc   :  { %v14363_v15 = vld [vmem:[#allocation185_spill] sm:$0xff]  ;;  %v14364_v52 = vld [vmem:[#allocation158_spill] sm:$0xff] }
 0x8de   :  { %4985 = vmatpush.bf16.msrb.mxu2 %v14307_v60  ;;  %4998 = vmatpush.bf16.msrb.mxu3 %v14351_v36  ;;  %v14358_v60 = vld [vmem:[#allocation150_spill] sm:$0xff]  ;;  %v14359_v36 = vld [vmem:[#allocation151_spill] sm:$0xff] }
 0x8df   :  { %5011 = vmatpush.bf16.msra.mxu0 %v14352_v21  ;;  %5024 = vmatpush.bf16.msra.mxu1 %v14353_v49  ;;  %v14360_v21 = vld [vmem:[#allocation180_spill] sm:$0xff]  ;;  %v14361_v49 = vld [vmem:[#allocation181_spill] sm:$0xff]  ;;  %v4733_v13 = vpop.f32.mrf.mxu2 }
 0x8e0   :  { %v14369_v13 = vld [vmem:[#allocation163_spill] sm:$0xff] }
 0x8e2   :  { %4986 = vmatpush.bf16.msrb.mxu2 %v14354_v38  ;;  %4999 = vmatpush.bf16.msrb.mxu3 %v14355_v62  ;;  %v4746_v63 = vpop.f32.mrf.mxu3 }
 0x8e3   :  { %5012 = vmatpush.bf16.msra.mxu0 %v14356_v44  ;;  %5025 = vmatpush.bf16.msra.mxu1 %v14357_v1  ;;  %v14365_v1 = vld [vmem:[#allocation159_spill] sm:$0xff]  ;;  %v14370_v63 = vld [vmem:[#allocation192_spill] sm:$0xff] }
 0x8e6   :  { %4987 = vmatpush.bf16.msrb.mxu2 %v14358_v60  ;;  %5000 = vmatpush.bf16.msrb.mxu3 %v14359_v36  ;;  %v14366_v60 = vld [vmem:[#allocation188_spill] sm:$0xff]  ;;  %v14367_v36 = vld [vmem:[#allocation189_spill] sm:$0xff] }
 0x8e7   :  { %5013 = vmatpush.bf16.msra.mxu0 %v14360_v21  ;;  %5026 = vmatpush.bf16.msra.mxu1 %v14361_v49  ;;  %v14368_v21 = vld [vmem:[#allocation162_spill] sm:$0xff] }
 0x8ea   :  { %4988 = vmatpush.bf16.msrb.mxu2 %v14362_v47  ;;  %5001 = vmatpush.bf16.msrb.mxu3 %v14316_v55  ;;  %v14371_v47 = vld [vmem:[#allocation193_spill] sm:$0xff]  ;;  %v14381_v55 = vld [vmem:[#allocation178_spill] sm:$0xff] }
 0x8eb   :  { %5014 = vmatpush.bf16.msra.mxu0 %v14317_v8  ;;  %5027 = vmatpush.bf16.msra.mxu1 %v14363_v15 }
 0x8ee   :  { %4989 = vmatpush.bf16.msrb.mxu2 %v14364_v52  ;;  %5002 = vmatpush.bf16.msrb.mxu3 %v14365_v1  ;;  %v14376_v1 = vld [vmem:[#allocation197_spill] sm:$0xff] }
 0x8ef   :  { %5015 = vmatpush.bf16.msra.mxu0 %v14366_v60  ;;  %5028 = vmatpush.bf16.msra.mxu1 %v14367_v36  ;;  %v14375_v60 = vld [vmem:[#allocation196_spill] sm:$0xff] }
 0x8f1   :  { %4990 = vmatmul.bf16.vlgmr.msrb.gmra.mxu2 %v11557_v54  ;;  %5003 = vmatmul.bf16.vlgmr.msrb.gmra.mxu3 %v11559_v25  ;;  %v4822_v36 = vpop.f32.mrf.mxu1 }
 0x8f2   :  { %5034 = vmatpush.bf16.msra.mxu2 %v14368_v21  ;;  %5047 = vmatpush.bf16.msra.mxu3 %v14369_v13  ;;  %v14372_v21 = vld [vmem:[#allocation195_spill] sm:$0xff]  ;;  %v14373_v13 = vld [vmem:[#allocation170_spill] sm:$0xff] }
 0x8f3   :  { %5060 = vmatpush.bf16.msrb.mxu0 %v14370_v63  ;;  %5073 = vmatpush.bf16.msrb.mxu1 %v14371_v47  ;;  %v14374_v63 = vld [vmem:[#allocation171_spill] sm:$0xff]  ;;  %v4809_v47 = vpop.f32.mrf.mxu0 }
 0x8f4   :  { %5016 = vmatmul.bf16.vlgmr.msra.gmra.mxu0 %v11557_v54  ;;  %5029 = vmatmul.bf16.vlgmr.msra.gmra.mxu1 %v11559_v25  ;;  %v4810_v52 = vadd.f32 %v4809_v47, %v11519_v18 }
 0x8f6   :  { %5035 = vmatpush.bf16.msra.mxu2 %v14327_v11  ;;  %5048 = vmatpush.bf16.msra.mxu3 %v14328_v32  ;;  %v11616_v15 = vadd.f32 %v4822_v36, %v4810_v52  ;;  %v14377_v11 = vld [vmem:[#allocation174_spill] sm:$0xff]  ;;  %v14378_v32 = vld [vmem:[#allocation175_spill] sm:$0xff]  ;;  %v14383_v36 = vld [vmem:[#allocation200_spill] sm:$0xff] }
 0x8f7   :  { %5061 = vmatpush.bf16.msrb.mxu0 %v14329_v22  ;;  %5074 = vmatpush.bf16.msrb.mxu1 %v14372_v21  ;;  %v14379_v22 = vld [vmem:[#allocation198_spill] sm:$0xff]  ;;  %v14380_v21 = vld [vmem:[#allocation199_spill] sm:$0xff]  ;;  %v14384_v52 = vld [vmem:[#allocation201_spill] sm:$0xff] }
 0x8f9   :  { %v4824_v18 = vpop.f32.mrf.mxu1 }
 0x8fa   :  { %5036 = vmatpush.bf16.msra.mxu2 %v14373_v13  ;;  %5049 = vmatpush.bf16.msra.mxu3 %v14374_v63  ;;  %v4783_v13 = vpop.f32.mrf.mxu2  ;;  %v4796_v63 = vpop.f32.mrf.mxu3  ;;  %v14389_v18 = vld [vmem:[#allocation47_spill] sm:$0xff] }
 0x8fb   :  { %5062 = vmatpush.bf16.msrb.mxu0 %v14375_v60  ;;  %5075 = vmatpush.bf16.msrb.mxu1 %v14376_v1  ;;  %v4784_v8 = vadd.f32 %v4783_v13, %v11525_v35  ;;  %v14382_v60 = vld [vmem:[#allocation179_spill] sm:$0xff]  ;;  %v4811_v47 = vpop.f32.mrf.mxu0 }
 0x8fc   :  { %v14388_v47 = vld [vmem:[#allocation32_spill] sm:$0xff] }
 0x8fd   :  { %v11625_v1 = vadd.f32 %v4796_v63, %v4784_v8  ;;  %v14386_v8 = vld [vmem:[#allocation207_spill] sm:$0xff] }
 0x8fe   :  { %5037 = vmatpush.bf16.msra.mxu2 %v14377_v11  ;;  %5050 = vmatpush.bf16.msra.mxu3 %v14378_v32  ;;  %v14385_v32 = vld [vmem:[#allocation182_spill] sm:$0xff]  ;;  %v14387_v63 = vld [vmem:[#allocation31_spill] sm:$0xff] }
 0x8ff   :  { %5063 = vmatpush.bf16.msrb.mxu0 %v14379_v22  ;;  %5076 = vmatpush.bf16.msrb.mxu1 %v14380_v21 }
 0x902   :  { %5038 = vmatpush.bf16.msra.mxu2 %v14381_v55  ;;  %5051 = vmatpush.bf16.msra.mxu3 %v14382_v60  ;;  %v4785_v35 = vpop.f32.mrf.mxu2  ;;  %v4798_v13 = vpop.f32.mrf.mxu3 }
 0x903   :  { %5064 = vmatpush.bf16.msrb.mxu0 %v14383_v36  ;;  %5077 = vmatpush.bf16.msrb.mxu1 %v14384_v52  ;;  %v14390_v35 = vld [vmem:[#allocation48_spill] sm:$0xff]  ;;  %v14391_v13 = vld [vmem:[#allocation33_spill] sm:$0xff] }
 0x906   :  { %5039 = vmatpush.bf16.msra.mxu2 %v14385_v32  ;;  %5052 = vmatpush.bf16.msra.mxu3 %v14339_v48  ;;  %v4588_v32 = vld [vmem:[#allocation2 + $0x5] ss:$8 sm:$0x30] }
 0x907   :  { %5065 = vmatpush.bf16.msrb.mxu0 %v14340_v7  ;;  %5078 = vmatpush.bf16.msrb.mxu1 %v14341_v20 }
 0x90a   :  { %5040 = vmatpush.bf16.msra.mxu2 %v14342_v37  ;;  %5053 = vmatpush.bf16.msra.mxu3 %v14343_v50  ;;  %v14401_v50 = vld [vmem:[#allocation59_spill] sm:$0xff] }
 0x90b   :  { %5066 = vmatpush.bf16.msrb.mxu0 %v14344_v26  ;;  %5079 = vmatpush.bf16.msrb.mxu1 %v14345_v27  ;;  %v14396_v27 = vld [vmem:[#allocation36_spill] sm:$0xff] }
 0x90e   :  { %5041 = vmatpush.bf16.msra.mxu2 %v14346_v41  ;;  %5054 = vmatpush.bf16.msra.mxu3 %v14347_v3  ;;  %v14395_v41 = vld [vmem:[#allocation35_spill] sm:$0xff] }
 0x90f   :  { %5067 = vmatpush.bf16.msrb.mxu0 %v14348_v14  ;;  %5080 = vmatpush.bf16.msrb.mxu1 %v14386_v8  ;;  %v14392_v14 = vld [vmem:[#allocation34_spill] sm:$0xff]  ;;  %v14393_v8 = vld [vmem:[#allocation51_spill] sm:$0xff] }
 0x911   :  { %5042 = vmatmul.bf16.vlgmr.msra.gmra.mxu2 %v11557_v54  ;;  %5055 = vmatmul.bf16.vlgmr.msra.gmra.mxu3 %v11559_v25  ;;  %v4874_v3 = vpop.f32.mrf.mxu1 }
 0x912   :  { %5197 = vmatpush.bf16.msrb.mxu2 %v14387_v63  ;;  %5210 = vmatpush.bf16.msrb.mxu3 %v14388_v47  ;;  %v14394_v63 = vld [vmem:[#allocation52_spill] sm:$0xff]  ;;  %v4861_v47 = vpop.f32.mrf.mxu0 }
 0x913   :  { %5068 = vmatmul.bf16.vlgmr.msrb.gmra.mxu0 %v11557_v54  ;;  %5081 = vmatmul.bf16.vlgmr.msrb.gmra.mxu1 %v11559_v25  ;;  %v4862_v54 = vadd.f32 %v4861_v47, %v11542_v17  ;;  %v14403_v47 = vld [vmem:[#allocation39_spill] sm:$0xff] }
 0x914   :  { %5223 = vmatpush.bf16.msra.mxu0 %v14389_v18  ;;  %5236 = vmatpush.bf16.msra.mxu1 %v14390_v35  ;;  %v14397_v18 = vld [vmem:[#allocation55_spill] sm:$0xff]  ;;  %v14398_v35 = vld [vmem:[#allocation56_spill] sm:$0xff] }
 0x915   :  { %v11656_v25 = vadd.f32 %v4874_v3, %v4862_v54  ;;  %v14404_v54 = vld [vmem:[#allocation40_spill] sm:$0xff] }
 0x916   :  { %5198 = vmatpush.bf16.msrb.mxu2 %v14391_v13  ;;  %5211 = vmatpush.bf16.msrb.mxu3 %v14392_v14  ;;  %v14399_v13 = vld [vmem:[#allocation37_spill] sm:$0xff]  ;;  %v14400_v14 = vld [vmem:[#allocation38_spill] sm:$0xff] }
 0x918   :  { %5224 = vmatpush.bf16.msra.mxu0 %v14393_v8  ;;  %5237 = vmatpush.bf16.msra.mxu1 %v14394_v63  ;;  %v4835_v8 = vpop.f32.mrf.mxu2  ;;  %v4848_v63 = vpop.f32.mrf.mxu3 }
 0x919   :  { %v4836_v26 = vadd.f32 %v4835_v8, %v11549_v34  ;;  %v4876_v17 = vpop.f32.mrf.mxu1 }
 0x91a   :  { %5199 = vmatpush.bf16.msrb.mxu2 %v14395_v41  ;;  %5212 = vmatpush.bf16.msrb.mxu3 %v14396_v27  ;;  %v14402_v41 = vld [vmem:[#allocation60_spill] sm:$0xff]  ;;  %v4863_v3 = vpop.f32.mrf.mxu0  ;;  %v14413_v17 = vld [vmem:[#allocation71_spill] sm:$0xff] }
 0x91b   :  { %v11665_v27 = vadd.f32 %v4848_v63, %v4836_v26  ;;  %v14410_v26 = vld [vmem:[#allocation68_spill] sm:$0xff]  ;;  %v14411_v63 = vld [vmem:[#allocation43_spill] sm:$0xff] }
 0x91c   :  { %5225 = vmatpush.bf16.msra.mxu0 %v14397_v18  ;;  %5238 = vmatpush.bf16.msra.mxu1 %v14398_v35  ;;  %v14405_v35 = vld [vmem:[#allocation63_spill] sm:$0xff]  ;;  %v14408_v18 = vld [vmem:[#allocation42_spill] sm:$0xff]  ;;  %v14412_v3 = vld [vmem:[#allocation44_spill] sm:$0xff] }
 0x91e   :  { %5200 = vmatpush.bf16.msrb.mxu2 %v14399_v13  ;;  %5213 = vmatpush.bf16.msrb.mxu3 %v14400_v14  ;;  %v14406_v13 = vld [vmem:[#allocation64_spill] sm:$0xff]  ;;  %v14407_v14 = vld [vmem:[#allocation41_spill] sm:$0xff] }
 0x920   :  { %5226 = vmatpush.bf16.msra.mxu0 %v14401_v50  ;;  %5239 = vmatpush.bf16.msra.mxu1 %v14402_v41  ;;  %v4837_v34 = vpop.f32.mrf.mxu2  ;;  %v4850_v8 = vpop.f32.mrf.mxu3  ;;  %v14409_v50 = vld [vmem:[#allocation67_spill] sm:$0xff]  ;;  %v14435_v41 = vld [vmem:[#allocation65_spill] sm:$0xff] }
 0x921   :  { %v14418_v34 = vld [vmem:[#allocation50_spill] sm:$0xff]  ;;  %v14419_v8 = vld [vmem:[#allocation75_spill] sm:$0xff] }
 0x922   :  { %5201 = vmatpush.bf16.msrb.mxu2 %v14403_v47  ;;  %5214 = vmatpush.bf16.msrb.mxu3 %v14404_v54  ;;  %v14414_v54 = vld [vmem:[#allocation72_spill] sm:$0xff]  ;;  %v14433_v47 = vld [vmem:[#allocation91_spill] sm:$0xff] }
 0x924   :  { %5227 = vmatpush.bf16.msra.mxu0 %v14405_v35  ;;  %5240 = vmatpush.bf16.msra.mxu1 %v14406_v13  ;;  %v14415_v35 = vld [vmem:[#allocation45_spill] sm:$0xff]  ;;  %v14416_v13 = vld [vmem:[#allocation46_spill] sm:$0xff] }
 0x926   :  { %5202 = vmatpush.bf16.msrb.mxu2 %v14407_v14  ;;  %5215 = vmatpush.bf16.msrb.mxu3 %v14408_v18  ;;  %v14417_v14 = vld [vmem:[#allocation49_spill] sm:$0xff]  ;;  %v14429_v18 = vld [vmem:[#allocation87_spill] sm:$0xff] }
 0x928   :  { %5228 = vmatpush.bf16.msra.mxu0 %v14409_v50  ;;  %5241 = vmatpush.bf16.msra.mxu1 %v14410_v26  ;;  %v14420_v50 = vld [vmem:[#allocation76_spill] sm:$0xff]  ;;  %v14421_v26 = vld [vmem:[#allocation79_spill] sm:$0xff] }
 0x92a   :  { %5203 = vmatpush.bf16.msrb.mxu2 %v14411_v63  ;;  %5216 = vmatpush.bf16.msrb.mxu3 %v14412_v3  ;;  %v14422_v63 = vld [vmem:[#allocation80_spill] sm:$0xff]  ;;  %v14423_v3 = vld [vmem:[#allocation53_spill] sm:$0xff] }
 0x92c   :  { %5229 = vmatpush.bf16.msra.mxu0 %v14413_v17  ;;  %5242 = vmatpush.bf16.msra.mxu1 %v14414_v54  ;;  %v14424_v17 = vld [vmem:[#allocation54_spill] sm:$0xff]  ;;  %v14425_v54 = vld [vmem:[#allocation83_spill] sm:$0xff] }
 0x92e   :  { %5204 = vmatpush.bf16.msrb.mxu2 %v14415_v35  ;;  %5217 = vmatpush.bf16.msrb.mxu3 %v14416_v13  ;;  %v14426_v35 = vld [vmem:[#allocation84_spill] sm:$0xff]  ;;  %v14427_v13 = vld [vmem:[#allocation57_spill] sm:$0xff] }
 0x930   :  { %5230 = vmatpush.bf16.msra.mxu0 %v14419_v8  ;;  %5243 = vmatpush.bf16.msra.mxu1 %v14420_v50 }
 0x931   :  { %v4926_v8 = vpop.f32.mrf.mxu1 }
 0x932   :  { %5249 = vmatpush.bf16.msra.mxu2 %v14417_v14  ;;  %5262 = vmatpush.bf16.msra.mxu3 %v14418_v34  ;;  %v14428_v14 = vld [vmem:[#allocation58_spill] sm:$0xff]  ;;  %v4913_v34 = vpop.f32.mrf.mxu0 }
 0x933   :  { %v4914_v50 = vadd.f32 %v4913_v34, %v11575_v39  ;;  %v14436_v39 = vld [vmem:[#allocation66_spill] sm:$0xff] }
 0x934   :  { %5275 = vmatpush.bf16.msrb.mxu0 %v14421_v26  ;;  %5288 = vmatpush.bf16.msrb.mxu1 %v14422_v63  ;;  %v14430_v26 = vld [vmem:[#allocation88_spill] sm:$0xff] }
 0x935   :  { %v11696_v63 = vadd.f32 %v4926_v8, %v4914_v50 }
 0x936   :  { %5250 = vmatpush.bf16.msra.mxu2 %v14423_v3  ;;  %5263 = vmatpush.bf16.msra.mxu3 %v14424_v17  ;;  %v14431_v3 = vld [vmem:[#allocation61_spill] sm:$0xff]  ;;  %v14432_v17 = vld [vmem:[#allocation62_spill] sm:$0xff] }
 0x938   :  { %5276 = vmatpush.bf16.msrb.mxu0 %v14425_v54  ;;  %5289 = vmatpush.bf16.msrb.mxu1 %v14426_v35  ;;  %v4887_v54 = vpop.f32.mrf.mxu2  ;;  %v4900_v35 = vpop.f32.mrf.mxu3 }
 0x939   :  { %v4928_v8 = vpop.f32.mrf.mxu1 }
 0x93a   :  { %5251 = vmatpush.bf16.msra.mxu2 %v14427_v13  ;;  %5264 = vmatpush.bf16.msra.mxu3 %v14428_v14  ;;  %v4888_v13 = vadd.f32 %v4887_v54, %v11581_v10  ;;  %v14434_v14 = vld [vmem:[#allocation92_spill] sm:$0xff]  ;;  %v4915_v50 = vpop.f32.mrf.mxu0  ;;  %v14447_v8 = vld [vmem:[#allocation77_spill] sm:$0xff] }
 0x93b   :  { %v14446_v50 = vld [vmem:[#allocation104_spill] sm:$0xff] }
 0x93c   :  { %5277 = vmatpush.bf16.msrb.mxu0 %v14429_v18  ;;  %5290 = vmatpush.bf16.msrb.mxu1 %v14430_v26  ;;  %v11705_v34 = vadd.f32 %v4900_v35, %v4888_v13  ;;  %v14437_v26 = vld [vmem:[#allocation95_spill] sm:$0xff]  ;;  %v14440_v18 = vld [vmem:[#allocation70_spill] sm:$0xff] }
 0x93d   :  { %v14444_v35 = vld [vmem:[#allocation74_spill] sm:$0xff]  ;;  %v14445_v13 = vld [vmem:[#allocation103_spill] sm:$0xff] }
 0x93e   :  { %5252 = vmatpush.bf16.msra.mxu2 %v14431_v3  ;;  %5265 = vmatpush.bf16.msra.mxu3 %v14432_v17  ;;  %v14438_v3 = vld [vmem:[#allocation96_spill] sm:$0xff]  ;;  %v14439_v17 = vld [vmem:[#allocation69_spill] sm:$0xff] }
 0x940   :  { %5278 = vmatpush.bf16.msrb.mxu0 %v14433_v47  ;;  %5291 = vmatpush.bf16.msrb.mxu1 %v14434_v14  ;;  %v4889_v10 = vpop.f32.mrf.mxu2  ;;  %v4902_v54 = vpop.f32.mrf.mxu3  ;;  %v14441_v47 = vld [vmem:[#allocation99_spill] sm:$0xff]  ;;  %v14442_v14 = vld [vmem:[#allocation100_spill] sm:$0xff] }
 0x941   :  { %v14450_v10 = vld [vmem:[#allocation108_spill] sm:$0xff] }
 0x942   :  { %5253 = vmatpush.bf16.msra.mxu2 %v14435_v41  ;;  %5266 = vmatpush.bf16.msra.mxu3 %v14436_v39  ;;  %v14443_v41 = vld [vmem:[#allocation73_spill] sm:$0xff] }
 0x944   :  { %5279 = vmatpush.bf16.msrb.mxu0 %v14437_v26  ;;  %5292 = vmatpush.bf16.msrb.mxu1 %v14438_v3  ;;  %v14448_v3 = vld [vmem:[#allocation78_spill] sm:$0xff] }
 0x946   :  { %5254 = vmatpush.bf16.msra.mxu2 %v14439_v17  ;;  %5267 = vmatpush.bf16.msra.mxu3 %v14440_v18  ;;  %v14449_v17 = vld [vmem:[#allocation107_spill] sm:$0xff] }
 0x948   :  { %5280 = vmatpush.bf16.msrb.mxu0 %v14441_v47  ;;  %5293 = vmatpush.bf16.msrb.mxu1 %v14442_v14 }
 0x94a   :  { %5255 = vmatpush.bf16.msra.mxu2 %v14443_v41  ;;  %5268 = vmatpush.bf16.msra.mxu3 %v14444_v35  ;;  %v14451_v35 = vld [vmem:[#allocation148_spill] sm:$0xff] }
 0x94c   :  { %5281 = vmatpush.bf16.msrb.mxu0 %v14445_v13  ;;  %5294 = vmatpush.bf16.msrb.mxu1 %v14446_v50 }
 0x94e   :  { %5256 = vmatpush.bf16.msra.mxu2 %v14447_v8  ;;  %5269 = vmatpush.bf16.msra.mxu3 %v14448_v3  ;;  %v14452_v3 = vld [vmem:[#allocation149_spill] sm:$0xff] }
 0x950   :  { %5282 = vmatpush.bf16.msrb.mxu0 %v14449_v17  ;;  %5295 = vmatpush.bf16.msrb.mxu1 %v14450_v10 }
 0x951   :  { %v4965_v54 = vpop.f32.mrf.mxu0  ;;  %v4978_v47 = vpop.f32.mrf.mxu1 }
 0x952   :  { %v4979_v18 = vadd.f32 %v4978_v47, %v4965_v54  ;;  %v4587_v47 = vld [vmem:[#allocation2 + $0x5] ss:$8 sm:$0xf] }
 0x953   :  { %v11726_v54 = vor.u32 %v4588_v32, %v4587_v47 }
 0x954   :  { %v5087_v14 = vadd.f32 %v4979_v18, %v11616_v15  ;;  %v4939_v41 = vpop.f32.mrf.mxu2  ;;  %v4952_v26 = vpop.f32.mrf.mxu3 }
 0x955   :  { %v4953_v13 = vadd.f32 %v4952_v26, %v4939_v41 }
 0x956   :  { %v5093_v39 = vadd.f32 %v5087_v14, %v14451_v35 }
 0x957   :  { %v5086_v50 = vadd.f32 %v4953_v13, %v11625_v1 }
 0x958   :  { %v5100_v20 = vrot.slane %v5093_v39, 7 }
 0x959   :  { %v4967_v37 = vpop.f32.mrf.mxu0  ;;  %v4980_v8 = vpop.f32.mrf.mxu1  ;;  %v5092_v7 = vadd.f32 %v5086_v50, %v14452_v3  ;;  %v14453_v50 = vld [vmem:[#allocation152_spill] sm:$0xff] }
 0x95b   :  { %v5101_v17 = vsel %vm2205_vm0, %v5092_v7, %v5100_v20 }
 0x95c   :  { %v4941_v10 = vpop.f32.mrf.mxu2  ;;  %v4954_v48 = vpop.f32.mrf.mxu3  ;;  %v5103_v15 = vadd.f32 %v5101_v17, %v11726_v54  ;;  %v14454_v17 = vld [vmem:[#allocation153_spill] sm:$0xff] }
 0x95e   :  { %v7917_v18 = vmul.f32 -1.442695, %v5103_v15 }
 0x960   :  { %8472 = vpow2.f32 %v7917_v18  ;;  %v5124_v18 = vrot.slane %v11726_v54, 2 }
 0x966   :  { %v8473_v13 = vpop.eup %8472 }
 0x967   :  { %v5107_v10 = vadd.f32 1.0, %v8473_v13 }
 0x969   :  { %8474 = vrcp.f32 %v5107_v10  ;;  %vm5113_vm1 = vweird.f32 %v5107_v10 }
 0x971   :  { %v5017_v41 = vpop.f32.mrf.mxu0  ;;  %v5030_v14 = vpop.f32.mrf.mxu1 }
 0x972   :  { %v5031_v1 = vadd.f32 %v5030_v14, %v5017_v41 }
 0x974   :  { %v5089_v37 = vadd.f32 %v5031_v1, %v11656_v25  ;;  %v4991_v26 = vpop.f32.mrf.mxu2  ;;  %v5004_v39 = vpop.f32.mrf.mxu3 }
 0x975   :  { %v5005_v7 = vadd.f32 %v5004_v39, %v4991_v26 }
 0x976   :  { %v5095_v20 = vadd.f32 %v5089_v37, %v14453_v50  ;;  %v8475_v37 = vpop.eup %8474  ;;  %v5119_v50 = vand.u32 2147483648, %v5107_v10 }
 0x977   :  { %v5088_v48 = vadd.f32 %v5005_v7, %v11665_v27  ;;  %v5109_v26 = vmul.f32 %v8475_v37, %v5107_v10  ;;  %vm5114_vm15 = vweird.f32 %v8475_v37 }
 0x978   :  { %v5128_v47 = vrot.slane %v5095_v20, 7  ;;  %vm5115_vm2 = vmor %vm5113_vm1, %vm5114_vm15  ;;  %v5120_v36 = vor.u32 1.1754944e-38, %v5119_v50 }
 0x979   :  { %v5019_v8 = vpop.f32.mrf.mxu0  ;;  %v5032_v32 = vpop.f32.mrf.mxu1  ;;  %v5094_v15 = vadd.f32 %v5088_v48, %v14454_v17  ;;  %v5110_v7 = vsub.f32 1.0, %v5109_v26 }
 0x97b   :  { %v5129_v41 = vsel %vm2205_vm0, %v5094_v15, %v5128_v47  ;;  %v5111_v48 = vmul.f32 %v8475_v37, %v5110_v7 }
 0x97c   :  { %v5131_v25 = vadd.f32 %v5129_v41, %v5124_v18  ;;  %v4993_v14 = vpop.f32.mrf.mxu2  ;;  %v5006_v1 = vpop.f32.mrf.mxu3 }
 0x97d   :  { %v5112_v41 = vadd.f32 %v8475_v37, %v5111_v48 }
 0x97e   :  { %v7918_v3 = vmul.f32 -1.442695, %v5131_v25 }
 0x980   :  { %8476 = vpow2.f32 %v7918_v3  ;;  %v14455_v3 = vld [vmem:[#allocation156_spill] sm:$0xff] }
 0x986   :  { %v8477_v39 = vpop.eup %8476 }
 0x987   :  { %v5135_v27 = vadd.f32 1.0, %v8477_v39  ;;  %v5117_v39 = vand.u32 2147483647, %v5107_v10  ;;  %v5157_v10 = vrot.slane %v11726_v54, 4 }
 0x989   :  { %8478 = vrcp.f32 %v5135_v27  ;;  %vm5118_vm3 = vcmp.eq.f32.partialorder %v5117_v39, 8.507059e+37  ;;  %vm5141_vm6 = vweird.f32 %v5135_v27 }
 0x98f   :  { %v8479_v32 = vpop.eup %8478 }
 0x990   :  { %v5069_v13 = vpop.f32.mrf.mxu0  ;;  %v5082_v20 = vpop.f32.mrf.mxu1  ;;  %v5137_v47 = vmul.f32 %v8479_v32, %v5135_v27  ;;  %vm5142_vm5 = vweird.f32 %v8479_v32 }
 0x991   :  { %v5083_v8 = vadd.f32 %v5082_v20, %v5069_v13  ;;  %v5116_v20 = vsel %vm5115_vm2, %v8475_v37, %v5112_v41  ;;  %vm5143_vm7 = vmor %vm5141_vm6, %vm5142_vm5  ;;  %vm6335_vm6 = vcmask 1045504  }
 0x992   :  { %v5138_v25 = vsub.f32 1.0, %v5137_v47  ;;  %v5121_v48 = vsel %vm5118_vm3, %v5120_v36, %v5116_v20 }
 0x993   :  { %v5091_v17 = vadd.f32 %v5083_v8, %v11696_v63  ;;  %v14456_v8 = vld [vmem:[#allocation208_spill] sm:$0xff] }
 0x994   :  { %v5043_v15 = vpop.f32.mrf.mxu2  ;;  %v5056_v18 = vpop.f32.mrf.mxu3  ;;  %v5139_v26 = vmul.f32 %v8479_v32, %v5138_v25 }
 0x995   :  { %v5097_v14 = vadd.f32 %v5091_v17, %v14455_v3  ;;  %v5057_v1 = vadd.f32 %v5056_v18, %v5043_v15  ;;  %v5147_v15 = vand.u32 2147483648, %v5135_v27  ;;  %v14515_v3 = vld [vmem:[#allocation151_spill] sm:$0xff] }
 0x996   :  { %v5140_v47 = vadd.f32 %v8479_v32, %v5139_v26 }
 0x997   :  { %v5090_v35 = vadd.f32 %v5057_v1, %v11705_v34  ;;  %v5153_v63 = vrot.slane %v5097_v14, 7  ;;  %v5145_v1 = vand.u32 2147483647, %v5135_v27  ;;  %v5148_v14 = vor.u32 1.1754944e-38, %v5147_v15  ;;  %v14461_v15 = vld [vmem:[#allocation82_spill] sm:$0xff] }
 0x998   :  { %v5071_v7 = vpop.f32.mrf.mxu0  ;;  %v5084_v13 = vpop.f32.mrf.mxu1  ;;  %v5144_v41 = vsel %vm5143_vm7, %v8479_v32, %v5140_v47  ;;  %v14458_v32 = vld [vmem:[#allocation160_spill] sm:$0xff] }
 0x999   :  { %v5096_v52 = vadd.f32 %v5090_v35, %v14456_v8  ;;  %vm5146_vm8 = vcmp.eq.f32.partialorder %v5145_v1, 8.507059e+37  ;;  %v14466_v1 = vld [vmem:[#allocation115_spill] sm:$0xff]  ;;  %v14514_v8 = vld [vmem:[#allocation150_spill] sm:$0xff] }
 0x99a   :  { %v5149_v35 = vsel %vm5146_vm8, %v5148_v14, %v5144_v41  ;;  %v14468_v41 = vld [vmem:[#allocation89_spill] sm:$0xff]  ;;  %v14469_v14 = vld [vmem:[#allocation90_spill] sm:$0xff] }
 0x99b   :  { %v5154_v17 = vsel %vm2205_vm0, %v5096_v52, %v5153_v63  ;;  %v5161_v50 = vsub.f32 1.0, %v5149_v35  ;;  %v5163_v52 = vmul.f32 %v5149_v35, %v11341_v40  ;;  %v14470_v35 = vld [vmem:[#allocation119_spill] sm:$0xff]  ;;  %v14480_v40 = vld [vmem:[#allocation101_spill] sm:$0xff] }
 0x99c   :  { %v5156_v18 = vmul.f32 %v5154_v17, %v5121_v48  ;;  %v5045_v25 = vpop.f32.mrf.mxu2  ;;  %v5058_v34 = vpop.f32.mrf.mxu3  ;;  %v14460_v17 = vld [vmem:[#allocation81_spill] sm:$0xff] }
 0x99d   :  { %v14464_v25 = vld [vmem:[#allocation85_spill] sm:$0xff]  ;;  %v14465_v34 = vld [vmem:[#allocation86_spill] sm:$0xff] }
 0x99e   :  { %v5159_v37 = vadd.f32 %v5157_v10, %v5156_v18  ;;  %v14462_v18 = vld [vmem:[#allocation111_spill] sm:$0xff]  ;;  %v14463_v10 = vld [vmem:[#allocation112_spill] sm:$0xff] }
 0x9a0   :  { %8480 = vtanh.f32 %v5159_v37  ;;  %v14467_v37 = vld [vmem:[#allocation116_spill] sm:$0xff] }
 0x9a6   :  { %v8481_v36 = vpop.eup %8480 }
 0x9a7   :  { %v5162_v39 = vmul.f32 %v8481_v36, %v5161_v50  ;;  %v14471_v50 = vld [vmem:[#allocation120_spill] sm:$0xff]  ;;  %v14472_v36 = vld [vmem:[#allocation93_spill] sm:$0xff] }
 0x9a9   :  { %v11742_v26 = vadd.f32 %v5163_v52, %v5162_v39  ;;  %v14473_v39 = vld [vmem:[#allocation94_spill] sm:$0xff]  ;;  %v14474_v52 = vld [vmem:[#allocation123_spill] sm:$0xff] }
 0x9ab   :  { %14457 = vst [vmem:[#allocation126_spill] sm:$0xff] %v11742_v26  ;;  %v5170_v54 = vperm.slane %v11742_v26, 0  ;;  %v13113_v7 = vperm.slane %v11742_v26, 1 }
 0x9ad   :  { %v11748_v27 = vpack.c.bf16 %v13113_v7, %v5170_v54  ;;  %v11752_v13 = vsel %vm6333_vm9, %v14458_v32, %v5170_v54  ;;  %v14475_v54 = vld [vmem:[#allocation124_spill] sm:$0xff]  ;;  %v14476_v32 = vld [vmem:[#allocation97_spill] sm:$0xff] }
 0x9ae   :  { %14459 = vst [vmem:[#allocation137_spill] sm:$0xff] %v11752_v13  ;;  %v14479_v7 = vld [vmem:[#allocation128_spill] sm:$0xff]  ;;  %v14513_v13 = vld [vmem:[#allocation177_spill] sm:$0xff] }
 0x9af   :  { %v5191_v20 = vunpack.c.l.b16 %v11748_v27  ;;  %v5192_v63 = vunpack.c.h.b16 %v11748_v27 }
 0x9b1   :  { %v11756_v48 = vpack.c.b16 %v5191_v20, %v5191_v20  ;;  %v11758_v47 = vpack.c.b16 %v5192_v63, %v5192_v63  ;;  %v14477_v20 = vld [vmem:[#allocation98_spill] sm:$0xff]  ;;  %v14478_v63 = vld [vmem:[#allocation127_spill] sm:$0xff] }
 0x9b3   :  { %5205 = vmatmul.bf16.vlgmr.msrb.gmra.mxu2 %v11756_v48  ;;  %5218 = vmatmul.bf16.vlgmr.msrb.gmra.mxu3 %v11758_v47 }
 0x9b4   :  { %5231 = vmatmul.bf16.vlgmr.msra.gmra.mxu0 %v11756_v48  ;;  %5244 = vmatmul.bf16.vlgmr.msra.gmra.mxu1 %v11758_v47 }
 0x9b5   :  { %5301 = vmatpush.bf16.msrb.mxu2 %v14460_v17  ;;  %5314 = vmatpush.bf16.msrb.mxu3 %v14461_v15  ;;  %v14511_v15 = vld [vmem:[#allocation172_spill] sm:$0xff]  ;;  %v14512_v17 = vld [vmem:[#allocation173_spill] sm:$0xff] }
 0x9b6   :  { %5327 = vmatpush.bf16.msra.mxu0 %v14462_v18  ;;  %5340 = vmatpush.bf16.msra.mxu1 %v14463_v10  ;;  %v14509_v10 = vld [vmem:[#allocation143_spill] sm:$0xff]  ;;  %v14510_v18 = vld [vmem:[#allocation144_spill] sm:$0xff] }
 0x9b9   :  { %5302 = vmatpush.bf16.msrb.mxu2 %v14464_v25  ;;  %5315 = vmatpush.bf16.msrb.mxu3 %v14465_v34  ;;  %v14507_v34 = vld [vmem:[#allocation168_spill] sm:$0xff]  ;;  %v14508_v25 = vld [vmem:[#allocation169_spill] sm:$0xff] }
 0x9ba   :  { %5328 = vmatpush.bf16.msra.mxu0 %v14466_v1  ;;  %5341 = vmatpush.bf16.msra.mxu1 %v14467_v37  ;;  %v14505_v37 = vld [vmem:[#allocation141_spill] sm:$0xff]  ;;  %v14506_v1 = vld [vmem:[#allocation142_spill] sm:$0xff] }
 0x9bd   :  { %5303 = vmatpush.bf16.msrb.mxu2 %v14468_v41  ;;  %5316 = vmatpush.bf16.msrb.mxu3 %v14469_v14  ;;  %v14503_v14 = vld [vmem:[#allocation164_spill] sm:$0xff]  ;;  %v14504_v41 = vld [vmem:[#allocation165_spill] sm:$0xff] }
 0x9be   :  { %5329 = vmatpush.bf16.msra.mxu0 %v14470_v35  ;;  %5342 = vmatpush.bf16.msra.mxu1 %v14471_v50  ;;  %v14485_v50 = vld [vmem:[#allocation106_spill] sm:$0xff]  ;;  %v14486_v35 = vld [vmem:[#allocation132_spill] sm:$0xff] }
 0x9c1   :  { %5304 = vmatpush.bf16.msrb.mxu2 %v14472_v36  ;;  %5317 = vmatpush.bf16.msrb.mxu3 %v14473_v39  ;;  %v14483_v39 = vld [vmem:[#allocation131_spill] sm:$0xff]  ;;  %v14484_v36 = vld [vmem:[#allocation105_spill] sm:$0xff] }
 0x9c2   :  { %5330 = vmatpush.bf16.msra.mxu0 %v14474_v52  ;;  %5343 = vmatpush.bf16.msra.mxu1 %v14475_v54  ;;  %v14481_v52 = vld [vmem:[#allocation102_spill] sm:$0xff] }
 0x9c3   :  { %5257 = vmatmul.bf16.vlgmr.msra.gmra.mxu2 %v11756_v48  ;;  %5270 = vmatmul.bf16.vlgmr.msra.gmra.mxu3 %v11758_v47  ;;  %v14482_v54 = vld [vmem:[#allocation130_spill] sm:$0xff] }
 0x9c4   :  { %5283 = vmatmul.bf16.vlgmr.msrb.gmra.mxu0 %v11756_v48  ;;  %5296 = vmatmul.bf16.vlgmr.msrb.gmra.mxu1 %v11758_v47 }
 0x9c5   :  { %5305 = vmatpush.bf16.msrb.mxu2 %v14476_v32  ;;  %5318 = vmatpush.bf16.msrb.mxu3 %v14477_v20  ;;  %v14487_v32 = vld [vmem:[#allocation133_spill] sm:$0xff] }
 0x9c6   :  { %5331 = vmatpush.bf16.msra.mxu0 %v14478_v63  ;;  %5344 = vmatpush.bf16.msra.mxu1 %v14479_v7  ;;  %v14488_v20 = vld [vmem:[#allocation109_spill] sm:$0xff]  ;;  %v14489_v63 = vld [vmem:[#allocation110_spill] sm:$0xff] }
 0x9c7   :  { %v14490_v7 = vld [vmem:[#allocation134_spill] sm:$0xff] }
 0x9c9   :  { %5306 = vmatpush.bf16.msrb.mxu2 %v14480_v40  ;;  %5319 = vmatpush.bf16.msrb.mxu3 %v14481_v52  ;;  %v14491_v40 = vld [vmem:[#allocation135_spill] sm:$0xff]  ;;  %v14492_v52 = vld [vmem:[#allocation113_spill] sm:$0xff] }
 0x9ca   :  { %5332 = vmatpush.bf16.msra.mxu0 %v14482_v54  ;;  %5345 = vmatpush.bf16.msra.mxu1 %v14483_v39  ;;  %v14493_v39 = vld [vmem:[#allocation136_spill] sm:$0xff] }
 0x9cb   :  { %v14502_v54 = vld [vmem:[#allocation140_spill] sm:$0xff] }
 0x9cd   :  { %5307 = vmatpush.bf16.msrb.mxu2 %v14484_v36  ;;  %5320 = vmatpush.bf16.msrb.mxu3 %v14485_v50  ;;  %v14500_v50 = vld [vmem:[#allocation161_spill] sm:$0xff]  ;;  %v14501_v36 = vld [vmem:[#allocation139_spill] sm:$0xff] }
 0x9ce   :  { %5333 = vmatpush.bf16.msra.mxu0 %v14486_v35  ;;  %5346 = vmatpush.bf16.msra.mxu1 %v14487_v32  ;;  %v14498_v32 = vld [vmem:[#allocation129_spill] sm:$0xff] }
 0x9cf   :  { %v14499_v35 = vld [vmem:[#allocation145_spill] sm:$0xff] }
 0x9d1   :  { %5308 = vmatpush.bf16.msrb.mxu2 %v14488_v20  ;;  %5321 = vmatpush.bf16.msrb.mxu3 %v14489_v63  ;;  %v14494_v63 = vld [vmem:[#allocation117_spill] sm:$0xff] }
 0x9d2   :  { %5334 = vmatpush.bf16.msra.mxu0 %v14490_v7  ;;  %5347 = vmatpush.bf16.msra.mxu1 %v14491_v40  ;;  %v14495_v7 = vld [vmem:[#allocation118_spill] sm:$0xff]  ;;  %v14497_v20 = vld [vmem:[#allocation125_spill] sm:$0xff] }
 0x9d3   :  { %v14496_v40 = vld [vmem:[#allocation122_spill] sm:$0xff] }
 0x9d4   :  { %5309 = vmatmul.bf16.vlgmr.msrb.gmra.mxu2 %v11756_v48  ;;  %5322 = vmatmul.bf16.vlgmr.msrb.gmra.mxu3 %v11758_v47 }
 0x9d5   :  { %5353 = vmatpush.bf16.msra.mxu2 %v14492_v52  ;;  %5366 = vmatpush.bf16.msra.mxu3 %v13485_v28 }
 0x9d6   :  { %5379 = vmatpush.bf16.msrb.mxu0 %v14493_v39  ;;  %5392 = vmatpush.bf16.msrb.mxu1 %v9234_v0 }
 0x9d7   :  { %5335 = vmatmul.bf16.vlgmr.msra.gmra.mxu0 %v11756_v48  ;;  %5348 = vmatmul.bf16.vlgmr.msra.gmra.mxu1 %v11758_v47 }
 0x9d9   :  { %5354 = vmatpush.bf16.msra.mxu2 %v14494_v63  ;;  %5367 = vmatpush.bf16.msra.mxu3 %v14495_v7 }
 0x9da   :  { %5380 = vmatpush.bf16.msrb.mxu0 %v9245_v56  ;;  %5393 = vmatpush.bf16.msrb.mxu1 %v9249_v2 }
 0x9dd   :  { %5355 = vmatpush.bf16.msra.mxu2 %v13488_v30  ;;  %5368 = vmatpush.bf16.msra.mxu3 %v14496_v40 }
 0x9de   :  { %5381 = vmatpush.bf16.msrb.mxu0 %v9262_v9  ;;  %5394 = vmatpush.bf16.msrb.mxu1 %v9268_v4 }
 0x9e1   :  { %5356 = vmatpush.bf16.msra.mxu2 %v14497_v20  ;;  %5369 = vmatpush.bf16.msra.mxu3 %v13491_v45 }
 0x9e2   :  { %5382 = vmatpush.bf16.msrb.mxu0 %v9277_v43  ;;  %5395 = vmatpush.bf16.msrb.mxu1 %v9281_v12 }
 0x9e5   :  { %5357 = vmatpush.bf16.msra.mxu2 %v9191_v61  ;;  %5370 = vmatpush.bf16.msra.mxu3 %v14498_v32 }
 0x9e6   :  { %5383 = vmatpush.bf16.msrb.mxu0 %v9290_v24  ;;  %5396 = vmatpush.bf16.msrb.mxu1 %v14499_v35 }
 0x9e9   :  { %5358 = vmatpush.bf16.msra.mxu2 %v9203_v29  ;;  %5371 = vmatpush.bf16.msra.mxu3 %v9206_v58 }
 0x9ea   :  { %5384 = vmatpush.bf16.msrb.mxu0 %v13345_v31  ;;  %5397 = vmatpush.bf16.msrb.mxu1 %v13346_v53 }
 0x9ed   :  { %5359 = vmatpush.bf16.msra.mxu2 %v9215_v33  ;;  %5372 = vmatpush.bf16.msra.mxu3 %v9218_v23 }
 0x9ee   :  { %5385 = vmatpush.bf16.msrb.mxu0 %v13349_v46  ;;  %5398 = vmatpush.bf16.msrb.mxu1 %v13350_v19 }
 0x9f1   :  { %5360 = vmatpush.bf16.msra.mxu2 %v9227_v5  ;;  %5373 = vmatpush.bf16.msra.mxu3 %v9230_v51 }
 0x9f2   :  { %5386 = vmatpush.bf16.msrb.mxu0 %v13351_v16  ;;  %5399 = vmatpush.bf16.msrb.mxu1 %v13691_v42 }
 0x9f4   :  { %5361 = vmatmul.bf16.vlgmr.msra.gmra.mxu2 %v11756_v48  ;;  %5374 = vmatmul.bf16.vlgmr.msra.gmra.mxu3 %v11758_v47 }
 0x9f5   :  { %5405 = vmatpush.bf16.msrb.mxu2 %v13692_v59  ;;  %5418 = vmatpush.bf16.msrb.mxu3 %v13693_v57 }
 0x9f6   :  { %5431 = vmatpush.bf16.msra.mxu0 %v13694_v6  ;;  %5444 = vmatpush.bf16.msra.mxu1 %v14500_v50 }
 0x9f7   :  { %5387 = vmatmul.bf16.vlgmr.msrb.gmra.mxu0 %v11756_v48  ;;  %5400 = vmatmul.bf16.vlgmr.msrb.gmra.mxu1 %v11758_v47 }
 0x9f9   :  { %5406 = vmatpush.bf16.msrb.mxu2 %v14501_v36  ;;  %5419 = vmatpush.bf16.msrb.mxu3 %v14502_v54 }
 0x9fa   :  { %5432 = vmatpush.bf16.msra.mxu0 %v14503_v14  ;;  %5445 = vmatpush.bf16.msra.mxu1 %v14504_v41 }
 0x9fd   :  { %5407 = vmatpush.bf16.msrb.mxu2 %v14505_v37  ;;  %5420 = vmatpush.bf16.msrb.mxu3 %v14506_v1 }
 0x9fe   :  { %5433 = vmatpush.bf16.msra.mxu0 %v14507_v34  ;;  %5446 = vmatpush.bf16.msra.mxu1 %v14508_v25  ;;  %v14516_v25 = vld [vmem:[#allocation180_spill] sm:$0xff] }
 0xa01   :  { %5408 = vmatpush.bf16.msrb.mxu2 %v14509_v10  ;;  %5421 = vmatpush.bf16.msrb.mxu3 %v14510_v18  ;;  %v14517_v18 = vld [vmem:[#allocation154_spill] sm:$0xff] }
 0xa02   :  { %5434 = vmatpush.bf16.msra.mxu0 %v14511_v15  ;;  %5447 = vmatpush.bf16.msra.mxu1 %v14512_v17  ;;  %v14518_v15 = vld [vmem:[#allocation155_spill] sm:$0xff]  ;;  %v14519_v17 = vld [vmem:[#allocation184_spill] sm:$0xff] }
 0xa05   :  { %5409 = vmatpush.bf16.msrb.mxu2 %v14354_v38  ;;  %5422 = vmatpush.bf16.msrb.mxu3 %v14355_v62  ;;  %v14520_v38 = vld [vmem:[#allocation185_spill] sm:$0xff]  ;;  %v14521_v62 = vld [vmem:[#allocation158_spill] sm:$0xff] }
 0xa06   :  { %5435 = vmatpush.bf16.msra.mxu0 %v14356_v44  ;;  %5448 = vmatpush.bf16.msra.mxu1 %v14513_v13  ;;  %v14522_v44 = vld [vmem:[#allocation159_spill] sm:$0xff]  ;;  %v14523_v13 = vld [vmem:[#allocation188_spill] sm:$0xff] }
 0xa09   :  { %5410 = vmatpush.bf16.msrb.mxu2 %v14514_v8  ;;  %5423 = vmatpush.bf16.msrb.mxu3 %v14515_v3  ;;  %v14524_v8 = vld [vmem:[#allocation189_spill] sm:$0xff]  ;;  %v14525_v3 = vld [vmem:[#allocation162_spill] sm:$0xff] }
 0xa0a   :  { %5436 = vmatpush.bf16.msra.mxu0 %v14516_v25  ;;  %5449 = vmatpush.bf16.msra.mxu1 %v14361_v49  ;;  %v14526_v25 = vld [vmem:[#allocation163_spill] sm:$0xff]  ;;  %v14527_v49 = vld [vmem:[#allocation192_spill] sm:$0xff] }
 0xa0d   :  { %5411 = vmatpush.bf16.msrb.mxu2 %v14517_v18  ;;  %5424 = vmatpush.bf16.msrb.mxu3 %v14518_v15  ;;  %v14528_v18 = vld [vmem:[#allocation193_spill] sm:$0xff] }
 0xa0e   :  { %5437 = vmatpush.bf16.msra.mxu0 %v14519_v17  ;;  %5450 = vmatpush.bf16.msra.mxu1 %v14520_v38  ;;  %v14537_v38 = vld [vmem:[#allocation175_spill] sm:$0xff] }
 0xa11   :  { %5412 = vmatpush.bf16.msrb.mxu2 %v14521_v62  ;;  %5425 = vmatpush.bf16.msrb.mxu3 %v14522_v44  ;;  %v14529_v44 = vld [vmem:[#allocation166_spill] sm:$0xff]  ;;  %v14536_v62 = vld [vmem:[#allocation197_spill] sm:$0xff] }
 0xa12   :  { %5438 = vmatpush.bf16.msra.mxu0 %v14523_v13  ;;  %5451 = vmatpush.bf16.msra.mxu1 %v14524_v8  ;;  %v14530_v13 = vld [vmem:[#allocation167_spill] sm:$0xff]  ;;  %v14531_v8 = vld [vmem:[#allocation194_spill] sm:$0xff] }
 0xa14   :  { %5413 = vmatmul.bf16.vlgmr.msrb.gmra.mxu2 %v11756_v48  ;;  %5426 = vmatmul.bf16.vlgmr.msrb.gmra.mxu3 %v11758_v47 }
 0xa15   :  { %5457 = vmatpush.bf16.msra.mxu2 %v14525_v3  ;;  %5470 = vmatpush.bf16.msra.mxu3 %v14526_v25  ;;  %v14532_v3 = vld [vmem:[#allocation195_spill] sm:$0xff]  ;;  %v14533_v25 = vld [vmem:[#allocation170_spill] sm:$0xff] }
 0xa16   :  { %5483 = vmatpush.bf16.msrb.mxu0 %v14527_v49  ;;  %5496 = vmatpush.bf16.msrb.mxu1 %v14528_v18  ;;  %v14534_v49 = vld [vmem:[#allocation171_spill] sm:$0xff]  ;;  %v14535_v18 = vld [vmem:[#allocation196_spill] sm:$0xff] }
 0xa17   :  { %5439 = vmatmul.bf16.vlgmr.msra.gmra.mxu0 %v11756_v48  ;;  %5452 = vmatmul.bf16.vlgmr.msra.gmra.mxu1 %v11758_v47 }
 0xa19   :  { %5458 = vmatpush.bf16.msra.mxu2 %v14529_v44  ;;  %5471 = vmatpush.bf16.msra.mxu3 %v14530_v13 }
 0xa1a   :  { %5484 = vmatpush.bf16.msrb.mxu0 %v14531_v8  ;;  %5497 = vmatpush.bf16.msrb.mxu1 %v14532_v3  ;;  %v14538_v3 = vld [vmem:[#allocation200_spill] sm:$0xff] }
 0xa1d   :  { %5459 = vmatpush.bf16.msra.mxu2 %v14533_v25  ;;  %5472 = vmatpush.bf16.msra.mxu3 %v14534_v49  ;;  %v14539_v25 = vld [vmem:[#allocation201_spill] sm:$0xff]  ;;  %v14540_v49 = vld [vmem:[#allocation182_spill] sm:$0xff] }
 0xa1e   :  { %5485 = vmatpush.bf16.msrb.mxu0 %v14535_v18  ;;  %5498 = vmatpush.bf16.msrb.mxu1 %v14536_v62  ;;  %v14541_v18 = vld [vmem:[#allocation183_spill] sm:$0xff]  ;;  %v14542_v62 = vld [vmem:[#allocation202_spill] sm:$0xff] }
 0xa21   :  { %5460 = vmatpush.bf16.msra.mxu2 %v14377_v11  ;;  %5473 = vmatpush.bf16.msra.mxu3 %v14537_v38  ;;  %v14543_v11 = vld [vmem:[#allocation203_spill] sm:$0xff]  ;;  %v14544_v38 = vld [vmem:[#allocation186_spill] sm:$0xff] }
 0xa22   :  { %5486 = vmatpush.bf16.msrb.mxu0 %v14379_v22  ;;  %5499 = vmatpush.bf16.msrb.mxu1 %v14380_v21  ;;  %v14545_v22 = vld [vmem:[#allocation187_spill] sm:$0xff]  ;;  %v14546_v21 = vld [vmem:[#allocation204_spill] sm:$0xff] }
 0xa25   :  { %5461 = vmatpush.bf16.msra.mxu2 %v14381_v55  ;;  %5474 = vmatpush.bf16.msra.mxu3 %v14382_v60  ;;  %v14547_v55 = vld [vmem:[#allocation205_spill] sm:$0xff]  ;;  %v14548_v60 = vld [vmem:[#allocation190_spill] sm:$0xff] }
 0xa26   :  { %5487 = vmatpush.bf16.msrb.mxu0 %v14538_v3  ;;  %5500 = vmatpush.bf16.msrb.mxu1 %v14539_v25  ;;  %v14549_v3 = vld [vmem:[#allocation191_spill] sm:$0xff]  ;;  %v14550_v25 = vld [vmem:[#allocation206_spill] sm:$0xff] }
 0xa29   :  { %5462 = vmatpush.bf16.msra.mxu2 %v14540_v49  ;;  %5475 = vmatpush.bf16.msra.mxu3 %v14541_v18  ;;  %v14551_v49 = vld [vmem:[#allocation207_spill] sm:$0xff] }
 0xa2a   :  { %5488 = vmatpush.bf16.msrb.mxu0 %v14542_v62  ;;  %5501 = vmatpush.bf16.msrb.mxu1 %v14543_v11 }
 0xa2d   :  { %5463 = vmatpush.bf16.msra.mxu2 %v14544_v38  ;;  %5476 = vmatpush.bf16.msra.mxu3 %v14545_v22 }
 0xa2e   :  { %5489 = vmatpush.bf16.msrb.mxu0 %v14546_v21  ;;  %5502 = vmatpush.bf16.msrb.mxu1 %v14547_v55 }
 0xa31   :  { %5464 = vmatpush.bf16.msra.mxu2 %v14548_v60  ;;  %5477 = vmatpush.bf16.msra.mxu3 %v14549_v3 }
 0xa32   :  { %5490 = vmatpush.bf16.msrb.mxu0 %v14550_v25  ;;  %5503 = vmatpush.bf16.msrb.mxu1 %v14551_v49  ;;  %v5232_v49 = vpop.f32.mrf.mxu0 }
 0xa34   :  { %5465 = vmatmul.bf16.vlgmr.msra.gmra.mxu2 %v11756_v48  ;;  %5478 = vmatmul.bf16.vlgmr.msra.gmra.mxu3 %v11758_v47 }
 0xa35   :  { %5509 = vmatpush.bf16.msrb.mxu2 %v14492_v52  ;;  %5522 = vmatpush.bf16.msrb.mxu3 %v13485_v28  ;;  %v5245_v52 = vpop.f32.mrf.mxu1 }
 0xa36   :  { %5535 = vmatpush.bf16.msra.mxu0 %v14493_v39  ;;  %5548 = vmatpush.bf16.msra.mxu1 %v9234_v0  ;;  %v11920_v39 = vadd.f32 %v5245_v52, %v5232_v49 }
 0xa37   :  { %5491 = vmatmul.bf16.vlgmr.msrb.gmra.mxu0 %v11756_v48  ;;  %5504 = vmatmul.bf16.vlgmr.msrb.gmra.mxu1 %v11758_v47  ;;  %v5206_v48 = vpop.f32.mrf.mxu2  ;;  %v5219_v47 = vpop.f32.mrf.mxu3 }
 0xa39   :  { %5510 = vmatpush.bf16.msrb.mxu2 %v14494_v63  ;;  %5523 = vmatpush.bf16.msrb.mxu3 %v14495_v7  ;;  %v11926_v63 = vadd.f32 %v5219_v47, %v5206_v48  ;;  %v5176_v7 = vunpack.c.h.bf16 %v11748_v27 }
 0xa3a   :  { %5536 = vmatpush.bf16.msra.mxu0 %v9245_v56  ;;  %5549 = vmatpush.bf16.msra.mxu1 %v9249_v2  ;;  %v5234_v49 = vpop.f32.mrf.mxu0 }
 0xa3d   :  { %5511 = vmatpush.bf16.msrb.mxu2 %v13488_v30  ;;  %5524 = vmatpush.bf16.msrb.mxu3 %v14496_v40  ;;  %v5247_v52 = vpop.f32.mrf.mxu1  ;;  %v5179_v40 = vrot.slane %v5176_v7, 7 }
 0xa3e   :  { %5537 = vmatpush.bf16.msra.mxu0 %v9262_v9  ;;  %5550 = vmatpush.bf16.msra.mxu1 %v9268_v4 }
 0xa3f   :  { %v5208_v48 = vpop.f32.mrf.mxu2  ;;  %v5221_v47 = vpop.f32.mrf.mxu3 }
 0xa41   :  { %5512 = vmatpush.bf16.msrb.mxu2 %v14497_v20  ;;  %5525 = vmatpush.bf16.msrb.mxu3 %v13491_v45  ;;  %v5175_v20 = vunpack.c.l.bf16 %v11748_v27 }
 0xa42   :  { %5538 = vmatpush.bf16.msra.mxu0 %v9277_v43  ;;  %5551 = vmatpush.bf16.msra.mxu1 %v9281_v12  ;;  %v5284_v52 = vpop.f32.mrf.mxu0 }
 0xa43   :  { %v5180_v49 = vsel %vm2205_vm0, %v5175_v20, %v5179_v40 }
 0xa45   :  { %5513 = vmatpush.bf16.msrb.mxu2 %v9191_v61  ;;  %5526 = vmatpush.bf16.msrb.mxu3 %v14498_v32  ;;  %v5297_v7 = vpop.f32.mrf.mxu1 }
 0xa46   :  { %5539 = vmatpush.bf16.msra.mxu0 %v9290_v24  ;;  %5552 = vmatpush.bf16.msra.mxu1 %v14499_v35  ;;  %v11943_v32 = vadd.f32 %v5297_v7, %v5284_v52  ;;  %v5182_v35 = vsub.f32 %v11742_v26, %v5180_v49 }
 0xa47   :  { %v5258_v40 = vpop.f32.mrf.mxu2  ;;  %v5271_v27 = vpop.f32.mrf.mxu3 }
 0xa48   :  { %v11950_v20 = vadd.f32 %v5271_v27, %v5258_v40  ;;  %v5184_v48 = vperm.slane %v5182_v35, 0  ;;  %v5185_v47 = vperm.slane %v5182_v35, 1 }
 0xa49   :  { %5514 = vmatpush.bf16.msrb.mxu2 %v9203_v29  ;;  %5527 = vmatpush.bf16.msrb.mxu3 %v9206_v58 }
 0xa4a   :  { %5540 = vmatpush.bf16.msra.mxu0 %v13345_v31  ;;  %5553 = vmatpush.bf16.msra.mxu1 %v13346_v53  ;;  %v5286_v52 = vpop.f32.mrf.mxu0  ;;  %v11958_v7 = vpack.c.bf16 %v5184_v48, %v5184_v48  ;;  %v11960_v40 = vpack.c.bf16 %v5185_v47, %v5185_v47 }
 0xa4b   :  { %v14552_v52 = vld [vmem:[#allocation169_spill] sm:$0xff] }
 0xa4d   :  { %5515 = vmatpush.bf16.msrb.mxu2 %v9215_v33  ;;  %5528 = vmatpush.bf16.msrb.mxu3 %v9218_v23  ;;  %v5299_v49 = vpop.f32.mrf.mxu1 }
 0xa4e   :  { %5541 = vmatpush.bf16.msra.mxu0 %v13349_v46  ;;  %5554 = vmatpush.bf16.msra.mxu1 %v13350_v19 }
 0xa4f   :  { %v5260_v35 = vpop.f32.mrf.mxu2  ;;  %v5273_v27 = vpop.f32.mrf.mxu3 }
 0xa50   :  { %v14553_v35 = vld [vmem:[#allocation144_spill] sm:$0xff] }
 0xa51   :  { %5516 = vmatpush.bf16.msrb.mxu2 %v9227_v5  ;;  %5529 = vmatpush.bf16.msrb.mxu3 %v9230_v51  ;;  %v14554_v27 = vld [vmem:[#allocation172_spill] sm:$0xff] }
 0xa52   :  { %5542 = vmatpush.bf16.msra.mxu0 %v13351_v16  ;;  %5555 = vmatpush.bf16.msra.mxu1 %v13691_v42 }
 0xa54   :  { %5517 = vmatmul.bf16.vlgmr.msrb.gmra.mxu2 %v11958_v7  ;;  %5530 = vmatmul.bf16.vlgmr.msrb.gmra.mxu3 %v11960_v40  ;;  %v5336_v48 = vpop.f32.mrf.mxu0 }
 0xa55   :  { %5561 = vmatpush.bf16.msra.mxu2 %v13692_v59  ;;  %5574 = vmatpush.bf16.msra.mxu3 %v13693_v57  ;;  %v5349_v47 = vpop.f32.mrf.mxu1 }
 0xa56   :  { %5587 = vmatpush.bf16.msrb.mxu0 %v13694_v6  ;;  %5600 = vmatpush.bf16.msrb.mxu1 %v14500_v50  ;;  %v11976_v49 = vadd.f32 %v5349_v47, %v5336_v48  ;;  %v14558_v48 = vld [vmem:[#allocation176_spill] sm:$0xff]  ;;  %v14559_v47 = vld [vmem:[#allocation177_spill] sm:$0xff]  ;;  %v14564_v50 = vld [vmem:[#allocation154_spill] sm:$0xff] }
 0xa57   :  { %5543 = vmatmul.bf16.vlgmr.msra.gmra.mxu0 %v11958_v7  ;;  %5556 = vmatmul.bf16.vlgmr.msra.gmra.mxu1 %v11960_v40 }
 0xa59   :  { %5562 = vmatpush.bf16.msra.mxu2 %v14501_v36  ;;  %5575 = vmatpush.bf16.msra.mxu3 %v14502_v54  ;;  %v14557_v36 = vld [vmem:[#allocation147_spill] sm:$0xff] }
 0xa5a   :  { %5588 = vmatpush.bf16.msrb.mxu0 %v14503_v14  ;;  %5601 = vmatpush.bf16.msrb.mxu1 %v14504_v41  ;;  %v14555_v14 = vld [vmem:[#allocation173_spill] sm:$0xff]  ;;  %v5310_v41 = vpop.f32.mrf.mxu2 }
 0xa5d   :  { %5563 = vmatpush.bf16.msra.mxu2 %v14505_v37  ;;  %5576 = vmatpush.bf16.msra.mxu3 %v14506_v1  ;;  %v5323_v37 = vpop.f32.mrf.mxu3  ;;  %v14556_v1 = vld [vmem:[#allocation146_spill] sm:$0xff] }
 0xa5e   :  { %5589 = vmatpush.bf16.msrb.mxu0 %v14507_v34  ;;  %5602 = vmatpush.bf16.msrb.mxu1 %v14552_v52  ;;  %v11982_v54 = vadd.f32 %v5323_v37, %v5310_v41  ;;  %v5338_v34 = vpop.f32.mrf.mxu0  ;;  %v5351_v52 = vpop.f32.mrf.mxu1 }
 0xa5f   :  { %v14565_v34 = vld [vmem:[#allocation185_spill] sm:$0xff]  ;;  %v14566_v52 = vld [vmem:[#allocation158_spill] sm:$0xff] }
 0xa61   :  { %5564 = vmatpush.bf16.msra.mxu2 %v14509_v10  ;;  %5577 = vmatpush.bf16.msra.mxu3 %v14553_v35  ;;  %v14560_v10 = vld [vmem:[#allocation150_spill] sm:$0xff]  ;;  %v14561_v35 = vld [vmem:[#allocation151_spill] sm:$0xff] }
 0xa62   :  { %5590 = vmatpush.bf16.msrb.mxu0 %v14554_v27  ;;  %5603 = vmatpush.bf16.msrb.mxu1 %v14555_v14  ;;  %v14562_v27 = vld [vmem:[#allocation180_spill] sm:$0xff]  ;;  %v14563_v14 = vld [vmem:[#allocation181_spill] sm:$0xff]  ;;  %v5312_v37 = vpop.f32.mrf.mxu2 }
 0xa63   :  { %v14571_v37 = vld [vmem:[#allocation163_spill] sm:$0xff] }
 0xa65   :  { %5565 = vmatpush.bf16.msra.mxu2 %v14556_v1  ;;  %5578 = vmatpush.bf16.msra.mxu3 %v14557_v36  ;;  %v5325_v41 = vpop.f32.mrf.mxu3 }
 0xa66   :  { %5591 = vmatpush.bf16.msrb.mxu0 %v14558_v48  ;;  %5604 = vmatpush.bf16.msrb.mxu1 %v14559_v47  ;;  %v14567_v47 = vld [vmem:[#allocation159_spill] sm:$0xff]  ;;  %v14572_v41 = vld [vmem:[#allocation192_spill] sm:$0xff] }
 0xa69   :  { %5566 = vmatpush.bf16.msra.mxu2 %v14560_v10  ;;  %5579 = vmatpush.bf16.msra.mxu3 %v14561_v35  ;;  %v14568_v10 = vld [vmem:[#allocation188_spill] sm:$0xff]  ;;  %v14569_v35 = vld [vmem:[#allocation189_spill] sm:$0xff] }
 0xa6a   :  { %5592 = vmatpush.bf16.msrb.mxu0 %v14562_v27  ;;  %5605 = vmatpush.bf16.msrb.mxu1 %v14563_v14  ;;  %v14570_v27 = vld [vmem:[#allocation162_spill] sm:$0xff] }
 0xa6d   :  { %5567 = vmatpush.bf16.msra.mxu2 %v14564_v50  ;;  %5580 = vmatpush.bf16.msra.mxu3 %v14518_v15  ;;  %v14573_v50 = vld [vmem:[#allocation193_spill] sm:$0xff]  ;;  %v14583_v15 = vld [vmem:[#allocation178_spill] sm:$0xff] }
 0xa6e   :  { %5593 = vmatpush.bf16.msrb.mxu0 %v14519_v17  ;;  %5606 = vmatpush.bf16.msrb.mxu1 %v14565_v34 }
 0xa71   :  { %5568 = vmatpush.bf16.msra.mxu2 %v14566_v52  ;;  %5581 = vmatpush.bf16.msra.mxu3 %v14567_v47  ;;  %v14578_v47 = vld [vmem:[#allocation197_spill] sm:$0xff] }
 0xa72   :  { %5594 = vmatpush.bf16.msrb.mxu0 %v14568_v10  ;;  %5607 = vmatpush.bf16.msrb.mxu1 %v14569_v35  ;;  %v14577_v10 = vld [vmem:[#allocation196_spill] sm:$0xff] }
 0xa74   :  { %5569 = vmatmul.bf16.vlgmr.msra.gmra.mxu2 %v11958_v7  ;;  %5582 = vmatmul.bf16.vlgmr.msra.gmra.mxu3 %v11960_v40  ;;  %v5401_v35 = vpop.f32.mrf.mxu1 }
 0xa75   :  { %5613 = vmatpush.bf16.msrb.mxu2 %v14570_v27  ;;  %5626 = vmatpush.bf16.msrb.mxu3 %v14571_v37  ;;  %v14574_v27 = vld [vmem:[#allocation195_spill] sm:$0xff]  ;;  %v14575_v37 = vld [vmem:[#allocation170_spill] sm:$0xff] }
 0xa76   :  { %5639 = vmatpush.bf16.msra.mxu0 %v14572_v41  ;;  %5652 = vmatpush.bf16.msra.mxu1 %v14573_v50  ;;  %v14576_v41 = vld [vmem:[#allocation171_spill] sm:$0xff]  ;;  %v5388_v50 = vpop.f32.mrf.mxu0 }
 0xa77   :  { %5595 = vmatmul.bf16.vlgmr.msrb.gmra.mxu0 %v11958_v7  ;;  %5608 = vmatmul.bf16.vlgmr.msrb.gmra.mxu1 %v11960_v40  ;;  %v5389_v52 = vadd.f32 %v5388_v50, %v11920_v39 }
 0xa79   :  { %5614 = vmatpush.bf16.msrb.mxu2 %v14529_v44  ;;  %5627 = vmatpush.bf16.msrb.mxu3 %v14530_v13  ;;  %v12017_v34 = vadd.f32 %v5401_v35, %v5389_v52  ;;  %v14579_v44 = vld [vmem:[#allocation174_spill] sm:$0xff]  ;;  %v14580_v13 = vld [vmem:[#allocation175_spill] sm:$0xff]  ;;  %v14585_v35 = vld [vmem:[#allocation200_spill] sm:$0xff] }
 0xa7a   :  { %5640 = vmatpush.bf16.msra.mxu0 %v14531_v8  ;;  %5653 = vmatpush.bf16.msra.mxu1 %v14574_v27  ;;  %v14581_v8 = vld [vmem:[#allocation198_spill] sm:$0xff]  ;;  %v14582_v27 = vld [vmem:[#allocation199_spill] sm:$0xff]  ;;  %v14586_v52 = vld [vmem:[#allocation201_spill] sm:$0xff] }
 0xa7c   :  { %v5403_v39 = vpop.f32.mrf.mxu1 }
 0xa7d   :  { %5615 = vmatpush.bf16.msrb.mxu2 %v14575_v37  ;;  %5628 = vmatpush.bf16.msrb.mxu3 %v14576_v41  ;;  %v5362_v37 = vpop.f32.mrf.mxu2  ;;  %v5375_v41 = vpop.f32.mrf.mxu3  ;;  %v14591_v39 = vld [vmem:[#allocation47_spill] sm:$0xff] }
 0xa7e   :  { %5641 = vmatpush.bf16.msra.mxu0 %v14577_v10  ;;  %5654 = vmatpush.bf16.msra.mxu1 %v14578_v47  ;;  %v5363_v17 = vadd.f32 %v5362_v37, %v11926_v63  ;;  %v14584_v10 = vld [vmem:[#allocation179_spill] sm:$0xff]  ;;  %v5390_v50 = vpop.f32.mrf.mxu0 }
 0xa7f   :  { %v14590_v50 = vld [vmem:[#allocation32_spill] sm:$0xff] }
 0xa80   :  { %v12026_v47 = vadd.f32 %v5375_v41, %v5363_v17  ;;  %v14588_v17 = vld [vmem:[#allocation207_spill] sm:$0xff] }
 0xa81   :  { %5616 = vmatpush.bf16.msrb.mxu2 %v14579_v44  ;;  %5629 = vmatpush.bf16.msrb.mxu3 %v14580_v13  ;;  %v14587_v13 = vld [vmem:[#allocation182_spill] sm:$0xff]  ;;  %v14589_v41 = vld [vmem:[#allocation31_spill] sm:$0xff] }
 0xa82   :  { %5642 = vmatpush.bf16.msra.mxu0 %v14581_v8  ;;  %5655 = vmatpush.bf16.msra.mxu1 %v14582_v27 }
 0xa85   :  { %5617 = vmatpush.bf16.msrb.mxu2 %v14583_v15  ;;  %5630 = vmatpush.bf16.msrb.mxu3 %v14584_v10  ;;  %v5364_v63 = vpop.f32.mrf.mxu2  ;;  %v5377_v37 = vpop.f32.mrf.mxu3 }
 0xa86   :  { %5643 = vmatpush.bf16.msra.mxu0 %v14585_v35  ;;  %5656 = vmatpush.bf16.msra.mxu1 %v14586_v52  ;;  %v14592_v63 = vld [vmem:[#allocation48_spill] sm:$0xff]  ;;  %v14593_v37 = vld [vmem:[#allocation33_spill] sm:$0xff] }
 0xa89   :  { %5618 = vmatpush.bf16.msrb.mxu2 %v14587_v13  ;;  %5631 = vmatpush.bf16.msrb.mxu3 %v14541_v18  ;;  %v5167_v13 = vld [vmem:[#allocation2 + $0x6] ss:$8 sm:$0x30] }
 0xa8a   :  { %5644 = vmatpush.bf16.msra.mxu0 %v14542_v62  ;;  %5657 = vmatpush.bf16.msra.mxu1 %v14543_v11 }
 0xa8d   :  { %5619 = vmatpush.bf16.msrb.mxu2 %v14544_v38  ;;  %5632 = vmatpush.bf16.msrb.mxu3 %v14545_v22  ;;  %v14603_v22 = vld [vmem:[#allocation59_spill] sm:$0xff] }
 0xa8e   :  { %5645 = vmatpush.bf16.msra.mxu0 %v14546_v21  ;;  %5658 = vmatpush.bf16.msra.mxu1 %v14547_v55  ;;  %v14598_v55 = vld [vmem:[#allocation36_spill] sm:$0xff] }
 0xa91   :  { %5620 = vmatpush.bf16.msrb.mxu2 %v14548_v60  ;;  %5633 = vmatpush.bf16.msrb.mxu3 %v14549_v3  ;;  %v14597_v60 = vld [vmem:[#allocation35_spill] sm:$0xff] }
 0xa92   :  { %5646 = vmatpush.bf16.msra.mxu0 %v14550_v25  ;;  %5659 = vmatpush.bf16.msra.mxu1 %v14588_v17  ;;  %v14594_v25 = vld [vmem:[#allocation34_spill] sm:$0xff]  ;;  %v14595_v17 = vld [vmem:[#allocation51_spill] sm:$0xff] }
 0xa94   :  { %5621 = vmatmul.bf16.vlgmr.msrb.gmra.mxu2 %v11958_v7  ;;  %5634 = vmatmul.bf16.vlgmr.msrb.gmra.mxu3 %v11960_v40  ;;  %v5453_v3 = vpop.f32.mrf.mxu1 }
 0xa95   :  { %5776 = vmatpush.bf16.msra.mxu2 %v14589_v41  ;;  %5789 = vmatpush.bf16.msra.mxu3 %v14590_v50  ;;  %v14596_v41 = vld [vmem:[#allocation52_spill] sm:$0xff]  ;;  %v5440_v50 = vpop.f32.mrf.mxu0 }
 0xa96   :  { %5647 = vmatmul.bf16.vlgmr.msra.gmra.mxu0 %v11958_v7  ;;  %5660 = vmatmul.bf16.vlgmr.msra.gmra.mxu1 %v11960_v40  ;;  %v5441_v7 = vadd.f32 %v5440_v50, %v11943_v32  ;;  %v14605_v50 = vld [vmem:[#allocation39_spill] sm:$0xff] }
 0xa97   :  { %5802 = vmatpush.bf16.msrb.mxu0 %v14591_v39  ;;  %5815 = vmatpush.bf16.msrb.mxu1 %v14592_v63  ;;  %v14599_v39 = vld [vmem:[#allocation55_spill] sm:$0xff]  ;;  %v14600_v63 = vld [vmem:[#allocation56_spill] sm:$0xff] }
 0xa98   :  { %v12057_v40 = vadd.f32 %v5453_v3, %v5441_v7  ;;  %v14606_v7 = vld [vmem:[#allocation40_spill] sm:$0xff] }
 0xa99   :  { %5777 = vmatpush.bf16.msra.mxu2 %v14593_v37  ;;  %5790 = vmatpush.bf16.msra.mxu3 %v14594_v25  ;;  %v14601_v37 = vld [vmem:[#allocation37_spill] sm:$0xff]  ;;  %v14602_v25 = vld [vmem:[#allocation38_spill] sm:$0xff] }
 0xa9b   :  { %5803 = vmatpush.bf16.msrb.mxu0 %v14595_v17  ;;  %5816 = vmatpush.bf16.msrb.mxu1 %v14596_v41  ;;  %v5414_v17 = vpop.f32.mrf.mxu2  ;;  %v5427_v41 = vpop.f32.mrf.mxu3 }
 0xa9c   :  { %v5415_v21 = vadd.f32 %v5414_v17, %v11950_v20  ;;  %v5455_v32 = vpop.f32.mrf.mxu1  ;;  %v14611_v17 = vld [vmem:[#allocation67_spill] sm:$0xff] }
 0xa9d   :  { %5778 = vmatpush.bf16.msra.mxu2 %v14597_v60  ;;  %5791 = vmatpush.bf16.msra.mxu3 %v14598_v55  ;;  %v14604_v60 = vld [vmem:[#allocation60_spill] sm:$0xff]  ;;  %v5442_v3 = vpop.f32.mrf.mxu0 }
 0xa9e   :  { %v12066_v55 = vadd.f32 %v5427_v41, %v5415_v21  ;;  %v14612_v21 = vld [vmem:[#allocation68_spill] sm:$0xff]  ;;  %v14613_v41 = vld [vmem:[#allocation43_spill] sm:$0xff] }
 0xa9f   :  { %5804 = vmatpush.bf16.msrb.mxu0 %v14599_v39  ;;  %5817 = vmatpush.bf16.msrb.mxu1 %v14600_v63  ;;  %v14607_v39 = vld [vmem:[#allocation63_spill] sm:$0xff]  ;;  %v14608_v63 = vld [vmem:[#allocation64_spill] sm:$0xff] }
 0xaa0   :  { %v14615_v3 = vld [vmem:[#allocation71_spill] sm:$0xff]  ;;  %v14616_v32 = vld [vmem:[#allocation72_spill] sm:$0xff] }
 0xaa1   :  { %5779 = vmatpush.bf16.msra.mxu2 %v14601_v37  ;;  %5792 = vmatpush.bf16.msra.mxu3 %v14602_v25  ;;  %v14609_v37 = vld [vmem:[#allocation41_spill] sm:$0xff]  ;;  %v14610_v25 = vld [vmem:[#allocation42_spill] sm:$0xff] }
 0xaa3   :  { %5805 = vmatpush.bf16.msrb.mxu0 %v14603_v22  ;;  %5818 = vmatpush.bf16.msrb.mxu1 %v14604_v60  ;;  %v5416_v20 = vpop.f32.mrf.mxu2  ;;  %v5429_v22 = vpop.f32.mrf.mxu3  ;;  %v14614_v60 = vld [vmem:[#allocation44_spill] sm:$0xff] }
 0xaa4   :  { %v14623_v20 = vld [vmem:[#allocation79_spill] sm:$0xff]  ;;  %v14624_v22 = vld [vmem:[#allocation80_spill] sm:$0xff] }
 0xaa5   :  { %5780 = vmatpush.bf16.msra.mxu2 %v14605_v50  ;;  %5793 = vmatpush.bf16.msra.mxu3 %v14606_v7  ;;  %v14617_v50 = vld [vmem:[#allocation45_spill] sm:$0xff]  ;;  %v14618_v7 = vld [vmem:[#allocation46_spill] sm:$0xff] }
 0xaa7   :  { %5806 = vmatpush.bf16.msrb.mxu0 %v14607_v39  ;;  %5819 = vmatpush.bf16.msrb.mxu1 %v14608_v63  ;;  %v14619_v39 = vld [vmem:[#allocation49_spill] sm:$0xff]  ;;  %v14620_v63 = vld [vmem:[#allocation50_spill] sm:$0xff] }
 0xaa9   :  { %5781 = vmatpush.bf16.msra.mxu2 %v14609_v37  ;;  %5794 = vmatpush.bf16.msra.mxu3 %v14610_v25  ;;  %v14621_v37 = vld [vmem:[#allocation75_spill] sm:$0xff]  ;;  %v14622_v25 = vld [vmem:[#allocation76_spill] sm:$0xff] }
 0xaab   :  { %5807 = vmatpush.bf16.msrb.mxu0 %v14611_v17  ;;  %5820 = vmatpush.bf16.msrb.mxu1 %v14612_v21  ;;  %v14625_v17 = vld [vmem:[#allocation53_spill] sm:$0xff]  ;;  %v14626_v21 = vld [vmem:[#allocation54_spill] sm:$0xff] }
 0xaad   :  { %5782 = vmatpush.bf16.msra.mxu2 %v14613_v41  ;;  %5795 = vmatpush.bf16.msra.mxu3 %v14614_v60  ;;  %v14627_v41 = vld [vmem:[#allocation83_spill] sm:$0xff]  ;;  %v14628_v60 = vld [vmem:[#allocation84_spill] sm:$0xff] }
 0xaaf   :  { %5808 = vmatpush.bf16.msrb.mxu0 %v14615_v3  ;;  %5821 = vmatpush.bf16.msrb.mxu1 %v14616_v32  ;;  %v14629_v3 = vld [vmem:[#allocation57_spill] sm:$0xff]  ;;  %v14630_v32 = vld [vmem:[#allocation58_spill] sm:$0xff] }
 0xab1   :  { %5783 = vmatpush.bf16.msra.mxu2 %v14617_v50  ;;  %5796 = vmatpush.bf16.msra.mxu3 %v14618_v7 }
 0xab3   :  { %5809 = vmatpush.bf16.msrb.mxu0 %v14621_v37  ;;  %5822 = vmatpush.bf16.msrb.mxu1 %v14622_v25  ;;  %v14632_v37 = vld [vmem:[#allocation88_spill] sm:$0xff] }
 0xab4   :  { %v5492_v50 = vpop.f32.mrf.mxu0  ;;  %v5505_v7 = vpop.f32.mrf.mxu1 }
 0xab5   :  { %5828 = vmatpush.bf16.msrb.mxu2 %v14619_v39  ;;  %5841 = vmatpush.bf16.msrb.mxu3 %v14620_v63  ;;  %v5493_v39 = vadd.f32 %v5492_v50, %v11976_v49  ;;  %v14631_v63 = vld [vmem:[#allocation87_spill] sm:$0xff]  ;;  %v14638_v49 = vld [vmem:[#allocation66_spill] sm:$0xff] }
 0xab7   :  { %5854 = vmatpush.bf16.msra.mxu0 %v14623_v20  ;;  %5867 = vmatpush.bf16.msra.mxu1 %v14624_v22  ;;  %v12097_v25 = vadd.f32 %v5505_v7, %v5493_v39  ;;  %v14633_v20 = vld [vmem:[#allocation61_spill] sm:$0xff]  ;;  %v14634_v22 = vld [vmem:[#allocation62_spill] sm:$0xff] }
 0xab9   :  { %5829 = vmatpush.bf16.msrb.mxu2 %v14625_v17  ;;  %5842 = vmatpush.bf16.msrb.mxu3 %v14626_v21  ;;  %v5466_v17 = vpop.f32.mrf.mxu2  ;;  %v5479_v21 = vpop.f32.mrf.mxu3 }
 0xabb   :  { %5855 = vmatpush.bf16.msra.mxu0 %v14627_v41  ;;  %5868 = vmatpush.bf16.msra.mxu1 %v14628_v60  ;;  %v5467_v41 = vadd.f32 %v5466_v17, %v11982_v54  ;;  %v14635_v60 = vld [vmem:[#allocation91_spill] sm:$0xff] }
 0xabc   :  { %v5494_v7 = vpop.f32.mrf.mxu0  ;;  %v5507_v39 = vpop.f32.mrf.mxu1 }
 0xabd   :  { %5830 = vmatpush.bf16.msrb.mxu2 %v14629_v3  ;;  %5843 = vmatpush.bf16.msrb.mxu3 %v14630_v32  ;;  %v14636_v3 = vld [vmem:[#allocation92_spill] sm:$0xff]  ;;  %v14637_v32 = vld [vmem:[#allocation65_spill] sm:$0xff]  ;;  %v12106_v50 = vadd.f32 %v5479_v21, %v5467_v41  ;;  %v14646_v21 = vld [vmem:[#allocation74_spill] sm:$0xff] }
 0xabe   :  { %v14647_v41 = vld [vmem:[#allocation103_spill] sm:$0xff]  ;;  %v14649_v7 = vld [vmem:[#allocation77_spill] sm:$0xff]  ;;  %v14650_v39 = vld [vmem:[#allocation78_spill] sm:$0xff] }
 0xabf   :  { %5856 = vmatpush.bf16.msra.mxu0 %v14631_v63  ;;  %5869 = vmatpush.bf16.msra.mxu1 %v14632_v37  ;;  %v14639_v63 = vld [vmem:[#allocation95_spill] sm:$0xff]  ;;  %v14640_v37 = vld [vmem:[#allocation96_spill] sm:$0xff] }
 0xac1   :  { %5831 = vmatpush.bf16.msrb.mxu2 %v14633_v20  ;;  %5844 = vmatpush.bf16.msrb.mxu3 %v14634_v22  ;;  %v14641_v20 = vld [vmem:[#allocation69_spill] sm:$0xff]  ;;  %v14642_v22 = vld [vmem:[#allocation70_spill] sm:$0xff]  ;;  %v5468_v54 = vpop.f32.mrf.mxu2  ;;  %v5481_v17 = vpop.f32.mrf.mxu3 }
 0xac3   :  { %5857 = vmatpush.bf16.msra.mxu0 %v14635_v60  ;;  %5870 = vmatpush.bf16.msra.mxu1 %v14636_v3  ;;  %v14643_v60 = vld [vmem:[#allocation99_spill] sm:$0xff]  ;;  %v14644_v3 = vld [vmem:[#allocation100_spill] sm:$0xff] }
 0xac5   :  { %5832 = vmatpush.bf16.msrb.mxu2 %v14637_v32  ;;  %5845 = vmatpush.bf16.msrb.mxu3 %v14638_v49  ;;  %v14645_v32 = vld [vmem:[#allocation73_spill] sm:$0xff]  ;;  %v14648_v49 = vld [vmem:[#allocation104_spill] sm:$0xff] }
 0xac7   :  { %5858 = vmatpush.bf16.msra.mxu0 %v14639_v63  ;;  %5871 = vmatpush.bf16.msra.mxu1 %v14640_v37  ;;  %v14651_v63 = vld [vmem:[#allocation107_spill] sm:$0xff]  ;;  %v14652_v37 = vld [vmem:[#allocation108_spill] sm:$0xff] }
 0xac9   :  { %5833 = vmatpush.bf16.msrb.mxu2 %v14641_v20  ;;  %5846 = vmatpush.bf16.msrb.mxu3 %v14642_v22 }
 0xacb   :  { %5859 = vmatpush.bf16.msra.mxu0 %v14643_v60  ;;  %5872 = vmatpush.bf16.msra.mxu1 %v14644_v3 }
 0xacd   :  { %5834 = vmatpush.bf16.msrb.mxu2 %v14645_v32  ;;  %5847 = vmatpush.bf16.msrb.mxu3 %v14646_v21  ;;  %v14653_v32 = vld [vmem:[#allocation148_spill] sm:$0xff] }
 0xacf   :  { %5860 = vmatpush.bf16.msra.mxu0 %v14647_v41  ;;  %5873 = vmatpush.bf16.msra.mxu1 %v14648_v49 }
 0xad1   :  { %5835 = vmatpush.bf16.msrb.mxu2 %v14649_v7  ;;  %5848 = vmatpush.bf16.msrb.mxu3 %v14650_v39  ;;  %v14654_v39 = vld [vmem:[#allocation149_spill] sm:$0xff] }
 0xad3   :  { %5861 = vmatpush.bf16.msra.mxu0 %v14651_v63  ;;  %5874 = vmatpush.bf16.msra.mxu1 %v14652_v37 }
 0xad4   :  { %v5544_v20 = vpop.f32.mrf.mxu0  ;;  %v5557_v22 = vpop.f32.mrf.mxu1 }
 0xad5   :  { %v5558_v54 = vadd.f32 %v5557_v22, %v5544_v20  ;;  %v5166_v20 = vld [vmem:[#allocation2 + $0x6] ss:$8 sm:$0xf] }
 0xad6   :  { %v12127_v22 = vor.u32 %v5167_v13, %v5166_v20 }
 0xad7   :  { %v5666_v17 = vadd.f32 %v5558_v54, %v12017_v34  ;;  %v5518_v60 = vpop.f32.mrf.mxu2  ;;  %v5531_v3 = vpop.f32.mrf.mxu3 }
 0xad8   :  { %v5532_v41 = vadd.f32 %v5531_v3, %v5518_v60 }
 0xad9   :  { %v5672_v21 = vadd.f32 %v5666_v17, %v14653_v32 }
 0xada   :  { %v5665_v49 = vadd.f32 %v5532_v41, %v12026_v47 }
 0xadb   :  { %v5679_v11 = vrot.slane %v5672_v21, 7 }
 0xadc   :  { %v5546_v38 = vpop.f32.mrf.mxu0  ;;  %v5559_v7 = vpop.f32.mrf.mxu1  ;;  %v5671_v62 = vadd.f32 %v5665_v49, %v14654_v39  ;;  %v14655_v49 = vld [vmem:[#allocation152_spill] sm:$0xff] }
 0xade   :  { %v5680_v63 = vsel %vm2205_vm0, %v5671_v62, %v5679_v11 }
 0xadf   :  { %v5520_v37 = vpop.f32.mrf.mxu2  ;;  %v5533_v18 = vpop.f32.mrf.mxu3  ;;  %v5682_v34 = vadd.f32 %v5680_v63, %v12127_v22  ;;  %v14656_v63 = vld [vmem:[#allocation153_spill] sm:$0xff] }
 0xae1   :  { %v7919_v54 = vmul.f32 -1.442695, %v5682_v34 }
 0xae3   :  { %8482 = vpow2.f32 %v7919_v54  ;;  %v5703_v54 = vrot.slane %v12127_v22, 2 }
 0xae9   :  { %v8483_v41 = vpop.eup %8482 }
 0xaea   :  { %v5686_v37 = vadd.f32 1.0, %v8483_v41 }
 0xaec   :  { %8484 = vrcp.f32 %v5686_v37  ;;  %vm5692_vm12 = vweird.f32 %v5686_v37 }
 0xaf4   :  { %v5596_v17 = vpop.f32.mrf.mxu0  ;;  %v5609_v60 = vpop.f32.mrf.mxu1 }
 0xaf5   :  { %v5610_v47 = vadd.f32 %v5609_v60, %v5596_v17 }
 0xaf7   :  { %v5668_v38 = vadd.f32 %v5610_v47, %v12057_v40  ;;  %v5570_v3 = vpop.f32.mrf.mxu2  ;;  %v5583_v21 = vpop.f32.mrf.mxu3 }
 0xaf8   :  { %v5584_v62 = vadd.f32 %v5583_v21, %v5570_v3 }
 0xaf9   :  { %v5674_v11 = vadd.f32 %v5668_v38, %v14655_v49  ;;  %v8485_v38 = vpop.eup %8484  ;;  %v5698_v49 = vand.u32 2147483648, %v5686_v37 }
 0xafa   :  { %v5667_v18 = vadd.f32 %v5584_v62, %v12066_v55  ;;  %v5688_v3 = vmul.f32 %v8485_v38, %v5686_v37  ;;  %vm5693_vm11 = vweird.f32 %v8485_v38 }
 0xafb   :  { %v5707_v20 = vrot.slane %v5674_v11, 7  ;;  %vm5694_vm13 = vmor %vm5692_vm12, %vm5693_vm11  ;;  %v5699_v35 = vor.u32 1.1754944e-38, %v5698_v49 }
 0xafc   :  { %v5598_v7 = vpop.f32.mrf.mxu0  ;;  %v5611_v13 = vpop.f32.mrf.mxu1  ;;  %v5673_v34 = vadd.f32 %v5667_v18, %v14656_v63  ;;  %v5689_v62 = vsub.f32 1.0, %v5688_v3 }
 0xafe   :  { %v5708_v17 = vsel %vm2205_vm0, %v5673_v34, %v5707_v20  ;;  %v5690_v18 = vmul.f32 %v8485_v38, %v5689_v62 }
 0xaff   :  { %v5710_v40 = vadd.f32 %v5708_v17, %v5703_v54  ;;  %v5572_v60 = vpop.f32.mrf.mxu2  ;;  %v5585_v47 = vpop.f32.mrf.mxu3 }
 0xb00   :  { %v5691_v17 = vadd.f32 %v8485_v38, %v5690_v18 }
 0xb01   :  { %v7920_v39 = vmul.f32 -1.442695, %v5710_v40 }
 0xb03   :  { %8486 = vpow2.f32 %v7920_v39  ;;  %v14657_v39 = vld [vmem:[#allocation156_spill] sm:$0xff] }
 0xb09   :  { %v8487_v21 = vpop.eup %8486 }
 0xb0a   :  { %v5714_v55 = vadd.f32 1.0, %v8487_v21  ;;  %v5696_v21 = vand.u32 2147483647, %v5686_v37  ;;  %v5736_v37 = vrot.slane %v12127_v22, 4 }
 0xb0c   :  { %8488 = vrcp.f32 %v5714_v55  ;;  %vm5697_vm15 = vcmp.eq.f32.partialorder %v5696_v21, 8.507059e+37  ;;  %vm5720_vm2 = vweird.f32 %v5714_v55 }
 0xb12   :  { %v8489_v13 = vpop.eup %8488 }
 0xb13   :  { %v5648_v41 = vpop.f32.mrf.mxu0  ;;  %v5661_v11 = vpop.f32.mrf.mxu1  ;;  %v5716_v20 = vmul.f32 %v8489_v13, %v5714_v55  ;;  %vm5721_vm1 = vweird.f32 %v8489_v13 }
 0xb14   :  { %v5662_v7 = vadd.f32 %v5661_v11, %v5648_v41  ;;  %v5695_v11 = vsel %vm5694_vm13, %v8485_v38, %v5691_v17  ;;  %vm5722_vm3 = vmor %vm5720_vm2, %vm5721_vm1 }
 0xb15   :  { %v5717_v40 = vsub.f32 1.0, %v5716_v20  ;;  %v5700_v18 = vsel %vm5697_vm15, %v5699_v35, %v5695_v11 }
 0xb16   :  { %v5670_v63 = vadd.f32 %v5662_v7, %v12097_v25  ;;  %v14658_v7 = vld [vmem:[#allocation208_spill] sm:$0xff] }
 0xb17   :  { %v5622_v34 = vpop.f32.mrf.mxu2  ;;  %v5635_v54 = vpop.f32.mrf.mxu3  ;;  %v5718_v3 = vmul.f32 %v8489_v13, %v5717_v40 }
 0xb18   :  { %v5676_v60 = vadd.f32 %v5670_v63, %v14657_v39  ;;  %v5636_v47 = vadd.f32 %v5635_v54, %v5622_v34  ;;  %v5726_v34 = vand.u32 2147483648, %v5714_v55  ;;  %v14716_v39 = vld [vmem:[#allocation151_spill] sm:$0xff] }
 0xb19   :  { %v5719_v20 = vadd.f32 %v8489_v13, %v5718_v3 }
 0xb1a   :  { %v5669_v32 = vadd.f32 %v5636_v47, %v12106_v50  ;;  %v5732_v25 = vrot.slane %v5676_v60, 7  ;;  %v5724_v47 = vand.u32 2147483647, %v5714_v55  ;;  %v5727_v60 = vor.u32 1.1754944e-38, %v5726_v34  ;;  %v14662_v34 = vld [vmem:[#allocation82_spill] sm:$0xff] }
 0xb1b   :  { %v5650_v62 = vpop.f32.mrf.mxu0  ;;  %v5663_v41 = vpop.f32.mrf.mxu1  ;;  %v5723_v17 = vsel %vm5722_vm3, %v8489_v13, %v5719_v20  ;;  %v14659_v13 = vld [vmem:[#allocation137_spill] sm:$0xff]  ;;  %vm6337_vm3 = vcmask 1046528  }
 0xb1c   :  { %v5675_v52 = vadd.f32 %v5669_v32, %v14658_v7  ;;  %vm5725_vm5 = vcmp.eq.f32.partialorder %v5724_v47, 8.507059e+37  ;;  %v14667_v47 = vld [vmem:[#allocation115_spill] sm:$0xff]  ;;  %v14715_v7 = vld [vmem:[#allocation150_spill] sm:$0xff] }
 0xb1d   :  { %v5728_v32 = vsel %vm5725_vm5, %v5727_v60, %v5723_v17  ;;  %v14669_v17 = vld [vmem:[#allocation89_spill] sm:$0xff]  ;;  %v14670_v60 = vld [vmem:[#allocation90_spill] sm:$0xff] }
 0xb1e   :  { %v5733_v63 = vsel %vm2205_vm0, %v5675_v52, %v5732_v25  ;;  %v5740_v49 = vsub.f32 1.0, %v5728_v32  ;;  %v5742_v52 = vmul.f32 %v5728_v32, %v11742_v26  ;;  %v14671_v32 = vld [vmem:[#allocation119_spill] sm:$0xff]  ;;  %v14713_v26 = vld [vmem:[#allocation173_spill] sm:$0xff] }
 0xb1f   :  { %v5735_v54 = vmul.f32 %v5733_v63, %v5700_v18  ;;  %v5624_v40 = vpop.f32.mrf.mxu2  ;;  %v5637_v50 = vpop.f32.mrf.mxu3  ;;  %v14661_v63 = vld [vmem:[#allocation81_spill] sm:$0xff] }
 0xb20   :  { %v14665_v40 = vld [vmem:[#allocation85_spill] sm:$0xff]  ;;  %v14666_v50 = vld [vmem:[#allocation86_spill] sm:$0xff] }
 0xb21   :  { %v5738_v38 = vadd.f32 %v5736_v37, %v5735_v54  ;;  %v14663_v54 = vld [vmem:[#allocation111_spill] sm:$0xff]  ;;  %v14664_v37 = vld [vmem:[#allocation112_spill] sm:$0xff] }
 0xb23   :  { %8490 = vtanh.f32 %v5738_v38  ;;  %v14668_v38 = vld [vmem:[#allocation116_spill] sm:$0xff] }
 0xb29   :  { %v8491_v35 = vpop.eup %8490 }
 0xb2a   :  { %v5741_v21 = vmul.f32 %v8491_v35, %v5740_v49  ;;  %v14672_v49 = vld [vmem:[#allocation120_spill] sm:$0xff]  ;;  %v14673_v35 = vld [vmem:[#allocation93_spill] sm:$0xff] }
 0xb2c   :  { %v12143_v3 = vadd.f32 %v5742_v52, %v5741_v21  ;;  %v14674_v21 = vld [vmem:[#allocation94_spill] sm:$0xff]  ;;  %v14675_v52 = vld [vmem:[#allocation123_spill] sm:$0xff] }
 0xb2e   :  { %v5749_v22 = vperm.slane %v12143_v3, 0  ;;  %v13156_v62 = vperm.slane %v12143_v3, 1 }
 0xb30   :  { %v12149_v55 = vpack.c.bf16 %v13156_v62, %v5749_v22  ;;  %v12153_v41 = vsel %vm6335_vm6, %v14659_v13, %v5749_v22  ;;  %v14676_v22 = vld [vmem:[#allocation124_spill] sm:$0xff]  ;;  %v14677_v13 = vld [vmem:[#allocation97_spill] sm:$0xff] }
 0xb31   :  { %14660 = vst [vmem:[#allocation160_spill] sm:$0xff] %v12153_v41  ;;  %v14712_v62 = vld [vmem:[#allocation172_spill] sm:$0xff]  ;;  %v14714_v41 = vld [vmem:[#allocation177_spill] sm:$0xff] }
 0xb32   :  { %v5770_v11 = vunpack.c.l.b16 %v12149_v55  ;;  %v5771_v25 = vunpack.c.h.b16 %v12149_v55 }
 0xb34   :  { %v12157_v18 = vpack.c.b16 %v5770_v11, %v5770_v11  ;;  %v12159_v20 = vpack.c.b16 %v5771_v25, %v5771_v25  ;;  %v14678_v11 = vld [vmem:[#allocation98_spill] sm:$0xff]  ;;  %v14679_v25 = vld [vmem:[#allocation127_spill] sm:$0xff] }
 0xb36   :  { %5784 = vmatmul.bf16.vlgmr.msra.gmra.mxu2 %v12157_v18  ;;  %5797 = vmatmul.bf16.vlgmr.msra.gmra.mxu3 %v12159_v20 }
 0xb37   :  { %5810 = vmatmul.bf16.vlgmr.msrb.gmra.mxu0 %v12157_v18  ;;  %5823 = vmatmul.bf16.vlgmr.msrb.gmra.mxu1 %v12159_v20 }
 0xb38   :  { %5880 = vmatpush.bf16.msra.mxu2 %v14661_v63  ;;  %5893 = vmatpush.bf16.msra.mxu3 %v14662_v34  ;;  %v14680_v63 = vld [vmem:[#allocation128_spill] sm:$0xff]  ;;  %v14681_v34 = vld [vmem:[#allocation101_spill] sm:$0xff] }
 0xb39   :  { %5906 = vmatpush.bf16.msrb.mxu0 %v14663_v54  ;;  %5919 = vmatpush.bf16.msrb.mxu1 %v14664_v37  ;;  %v14682_v54 = vld [vmem:[#allocation102_spill] sm:$0xff] }
 0xb3a   :  { %v14683_v37 = vld [vmem:[#allocation130_spill] sm:$0xff] }
 0xb3c   :  { %5881 = vmatpush.bf16.msra.mxu2 %v14665_v40  ;;  %5894 = vmatpush.bf16.msra.mxu3 %v14666_v50  ;;  %v14684_v40 = vld [vmem:[#allocation131_spill] sm:$0xff]  ;;  %v14685_v50 = vld [vmem:[#allocation105_spill] sm:$0xff] }
 0xb3d   :  { %5907 = vmatpush.bf16.msrb.mxu0 %v14667_v47  ;;  %5920 = vmatpush.bf16.msrb.mxu1 %v14668_v38  ;;  %v14686_v47 = vld [vmem:[#allocation106_spill] sm:$0xff]  ;;  %v14687_v38 = vld [vmem:[#allocation132_spill] sm:$0xff] }
 0xb40   :  { %5882 = vmatpush.bf16.msra.mxu2 %v14669_v17  ;;  %5895 = vmatpush.bf16.msra.mxu3 %v14670_v60  ;;  %v14688_v17 = vld [vmem:[#allocation133_spill] sm:$0xff] }
 0xb41   :  { %5908 = vmatpush.bf16.msrb.mxu0 %v14671_v32  ;;  %5921 = vmatpush.bf16.msrb.mxu1 %v14672_v49  ;;  %v14689_v60 = vld [vmem:[#allocation109_spill] sm:$0xff]  ;;  %v14690_v32 = vld [vmem:[#allocation110_spill] sm:$0xff] }
 0xb42   :  { %v14691_v49 = vld [vmem:[#allocation134_spill] sm:$0xff] }
 0xb44   :  { %5883 = vmatpush.bf16.msra.mxu2 %v14673_v35  ;;  %5896 = vmatpush.bf16.msra.mxu3 %v14674_v21  ;;  %v14692_v35 = vld [vmem:[#allocation135_spill] sm:$0xff]  ;;  %v14693_v21 = vld [vmem:[#allocation113_spill] sm:$0xff] }
 0xb45   :  { %5909 = vmatpush.bf16.msrb.mxu0 %v14675_v52  ;;  %5922 = vmatpush.bf16.msrb.mxu1 %v14676_v22  ;;  %v14694_v52 = vld [vmem:[#allocation136_spill] sm:$0xff]  ;;  %v14695_v22 = vld [vmem:[#allocation117_spill] sm:$0xff] }
 0xb46   :  { %5836 = vmatmul.bf16.vlgmr.msrb.gmra.mxu2 %v12157_v18  ;;  %5849 = vmatmul.bf16.vlgmr.msrb.gmra.mxu3 %v12159_v20 }
 0xb47   :  { %5862 = vmatmul.bf16.vlgmr.msra.gmra.mxu0 %v12157_v18  ;;  %5875 = vmatmul.bf16.vlgmr.msra.gmra.mxu1 %v12159_v20 }
 0xb48   :  { %5884 = vmatpush.bf16.msra.mxu2 %v14677_v13  ;;  %5897 = vmatpush.bf16.msra.mxu3 %v14678_v11  ;;  %v14696_v13 = vld [vmem:[#allocation118_spill] sm:$0xff] }
 0xb49   :  { %5910 = vmatpush.bf16.msrb.mxu0 %v14679_v25  ;;  %5923 = vmatpush.bf16.msrb.mxu1 %v14680_v63  ;;  %v14697_v11 = vld [vmem:[#allocation122_spill] sm:$0xff]  ;;  %v14698_v25 = vld [vmem:[#allocation125_spill] sm:$0xff] }
 0xb4a   :  { %v14699_v63 = vld [vmem:[#allocation129_spill] sm:$0xff] }
 0xb4c   :  { %5885 = vmatpush.bf16.msra.mxu2 %v14681_v34  ;;  %5898 = vmatpush.bf16.msra.mxu3 %v14682_v54  ;;  %v14700_v34 = vld [vmem:[#allocation145_spill] sm:$0xff] }
 0xb4d   :  { %5911 = vmatpush.bf16.msrb.mxu0 %v14683_v37  ;;  %5924 = vmatpush.bf16.msrb.mxu1 %v14684_v40  ;;  %v14701_v54 = vld [vmem:[#allocation161_spill] sm:$0xff]  ;;  %v14702_v37 = vld [vmem:[#allocation139_spill] sm:$0xff]  ;;  %v14703_v40 = vld [vmem:[#allocation140_spill] sm:$0xff] }
 0xb50   :  { %5886 = vmatpush.bf16.msra.mxu2 %v14685_v50  ;;  %5899 = vmatpush.bf16.msra.mxu3 %v14686_v47  ;;  %v14704_v50 = vld [vmem:[#allocation164_spill] sm:$0xff]  ;;  %v14705_v47 = vld [vmem:[#allocation165_spill] sm:$0xff] }
 0xb51   :  { %5912 = vmatpush.bf16.msrb.mxu0 %v14687_v38  ;;  %5925 = vmatpush.bf16.msrb.mxu1 %v14688_v17  ;;  %v14706_v38 = vld [vmem:[#allocation141_spill] sm:$0xff]  ;;  %v14707_v17 = vld [vmem:[#allocation142_spill] sm:$0xff] }
 0xb54   :  { %5887 = vmatpush.bf16.msra.mxu2 %v14689_v60  ;;  %5900 = vmatpush.bf16.msra.mxu3 %v14690_v32  ;;  %v14708_v60 = vld [vmem:[#allocation168_spill] sm:$0xff]  ;;  %v14709_v32 = vld [vmem:[#allocation169_spill] sm:$0xff] }
 0xb55   :  { %5913 = vmatpush.bf16.msrb.mxu0 %v14691_v49  ;;  %5926 = vmatpush.bf16.msrb.mxu1 %v14692_v35  ;;  %v14710_v49 = vld [vmem:[#allocation143_spill] sm:$0xff]  ;;  %v14711_v35 = vld [vmem:[#allocation144_spill] sm:$0xff] }
 0xb57   :  { %5888 = vmatmul.bf16.vlgmr.msra.gmra.mxu2 %v12157_v18  ;;  %5901 = vmatmul.bf16.vlgmr.msra.gmra.mxu3 %v12159_v20 }
 0xb58   :  { %5932 = vmatpush.bf16.msrb.mxu2 %v14693_v21  ;;  %5945 = vmatpush.bf16.msrb.mxu3 %v13485_v28 }
 0xb59   :  { %5958 = vmatpush.bf16.msra.mxu0 %v14694_v52  ;;  %5971 = vmatpush.bf16.msra.mxu1 %v9234_v0 }
 0xb5a   :  { %5914 = vmatmul.bf16.vlgmr.msrb.gmra.mxu0 %v12157_v18  ;;  %5927 = vmatmul.bf16.vlgmr.msrb.gmra.mxu1 %v12159_v20 }
 0xb5c   :  { %5933 = vmatpush.bf16.msrb.mxu2 %v14695_v22  ;;  %5946 = vmatpush.bf16.msrb.mxu3 %v14696_v13 }
 0xb5d   :  { %5959 = vmatpush.bf16.msra.mxu0 %v9245_v56  ;;  %5972 = vmatpush.bf16.msra.mxu1 %v9249_v2 }
 0xb60   :  { %5934 = vmatpush.bf16.msrb.mxu2 %v13488_v30  ;;  %5947 = vmatpush.bf16.msrb.mxu3 %v14697_v11 }
 0xb61   :  { %5960 = vmatpush.bf16.msra.mxu0 %v9262_v9  ;;  %5973 = vmatpush.bf16.msra.mxu1 %v9268_v4 }
 0xb64   :  { %5935 = vmatpush.bf16.msrb.mxu2 %v14698_v25  ;;  %5948 = vmatpush.bf16.msrb.mxu3 %v13491_v45 }
 0xb65   :  { %5961 = vmatpush.bf16.msra.mxu0 %v9277_v43  ;;  %5974 = vmatpush.bf16.msra.mxu1 %v9281_v12 }
 0xb68   :  { %5936 = vmatpush.bf16.msrb.mxu2 %v9191_v61  ;;  %5949 = vmatpush.bf16.msrb.mxu3 %v14699_v63 }
 0xb69   :  { %5962 = vmatpush.bf16.msra.mxu0 %v9290_v24  ;;  %5975 = vmatpush.bf16.msra.mxu1 %v14700_v34 }
 0xb6c   :  { %5937 = vmatpush.bf16.msrb.mxu2 %v9203_v29  ;;  %5950 = vmatpush.bf16.msrb.mxu3 %v9206_v58 }
 0xb6d   :  { %5963 = vmatpush.bf16.msra.mxu0 %v13345_v31  ;;  %5976 = vmatpush.bf16.msra.mxu1 %v13346_v53 }
 0xb70   :  { %5938 = vmatpush.bf16.msrb.mxu2 %v9215_v33  ;;  %5951 = vmatpush.bf16.msrb.mxu3 %v9218_v23 }
 0xb71   :  { %5964 = vmatpush.bf16.msra.mxu0 %v13349_v46  ;;  %5977 = vmatpush.bf16.msra.mxu1 %v13350_v19 }
 0xb74   :  { %5939 = vmatpush.bf16.msrb.mxu2 %v9227_v5  ;;  %5952 = vmatpush.bf16.msrb.mxu3 %v9230_v51 }
 0xb75   :  { %5965 = vmatpush.bf16.msra.mxu0 %v13351_v16  ;;  %5978 = vmatpush.bf16.msra.mxu1 %v13691_v42 }
 0xb77   :  { %5940 = vmatmul.bf16.vlgmr.msrb.gmra.mxu2 %v12157_v18  ;;  %5953 = vmatmul.bf16.vlgmr.msrb.gmra.mxu3 %v12159_v20 }
 0xb78   :  { %5984 = vmatpush.bf16.msra.mxu2 %v13692_v59  ;;  %5997 = vmatpush.bf16.msra.mxu3 %v13693_v57 }
 0xb79   :  { %6010 = vmatpush.bf16.msrb.mxu0 %v13694_v6  ;;  %6023 = vmatpush.bf16.msrb.mxu1 %v14701_v54 }
 0xb7a   :  { %5966 = vmatmul.bf16.vlgmr.msra.gmra.mxu0 %v12157_v18  ;;  %5979 = vmatmul.bf16.vlgmr.msra.gmra.mxu1 %v12159_v20 }
 0xb7c   :  { %5985 = vmatpush.bf16.msra.mxu2 %v14702_v37  ;;  %5998 = vmatpush.bf16.msra.mxu3 %v14703_v40 }
 0xb7d   :  { %6011 = vmatpush.bf16.msrb.mxu0 %v14704_v50  ;;  %6024 = vmatpush.bf16.msrb.mxu1 %v14705_v47 }
 0xb80   :  { %5986 = vmatpush.bf16.msra.mxu2 %v14706_v38  ;;  %5999 = vmatpush.bf16.msra.mxu3 %v14707_v17 }
 0xb81   :  { %6012 = vmatpush.bf16.msrb.mxu0 %v14708_v60  ;;  %6025 = vmatpush.bf16.msrb.mxu1 %v14709_v32  ;;  %v14717_v32 = vld [vmem:[#allocation180_spill] sm:$0xff] }
 0xb84   :  { %5987 = vmatpush.bf16.msra.mxu2 %v14710_v49  ;;  %6000 = vmatpush.bf16.msra.mxu3 %v14711_v35  ;;  %v14718_v35 = vld [vmem:[#allocation154_spill] sm:$0xff] }
 0xb85   :  { %6013 = vmatpush.bf16.msrb.mxu0 %v14712_v62  ;;  %6026 = vmatpush.bf16.msrb.mxu1 %v14713_v26  ;;  %v14719_v62 = vld [vmem:[#allocation155_spill] sm:$0xff]  ;;  %v14720_v26 = vld [vmem:[#allocation184_spill] sm:$0xff] }
 0xb88   :  { %5988 = vmatpush.bf16.msra.mxu2 %v14556_v1  ;;  %6001 = vmatpush.bf16.msra.mxu3 %v14557_v36  ;;  %v14721_v1 = vld [vmem:[#allocation185_spill] sm:$0xff]  ;;  %v14722_v36 = vld [vmem:[#allocation158_spill] sm:$0xff] }
 0xb89   :  { %6014 = vmatpush.bf16.msrb.mxu0 %v14558_v48  ;;  %6027 = vmatpush.bf16.msrb.mxu1 %v14714_v41  ;;  %v14723_v48 = vld [vmem:[#allocation159_spill] sm:$0xff]  ;;  %v14724_v41 = vld [vmem:[#allocation188_spill] sm:$0xff] }
 0xb8c   :  { %5989 = vmatpush.bf16.msra.mxu2 %v14715_v7  ;;  %6002 = vmatpush.bf16.msra.mxu3 %v14716_v39  ;;  %v14725_v7 = vld [vmem:[#allocation189_spill] sm:$0xff]  ;;  %v14726_v39 = vld [vmem:[#allocation162_spill] sm:$0xff] }
 0xb8d   :  { %6015 = vmatpush.bf16.msrb.mxu0 %v14717_v32  ;;  %6028 = vmatpush.bf16.msrb.mxu1 %v14563_v14  ;;  %v14727_v32 = vld [vmem:[#allocation163_spill] sm:$0xff]  ;;  %v14728_v14 = vld [vmem:[#allocation192_spill] sm:$0xff] }
 0xb90   :  { %5990 = vmatpush.bf16.msra.mxu2 %v14718_v35  ;;  %6003 = vmatpush.bf16.msra.mxu3 %v14719_v62  ;;  %v14729_v35 = vld [vmem:[#allocation193_spill] sm:$0xff] }
 0xb91   :  { %6016 = vmatpush.bf16.msrb.mxu0 %v14720_v26  ;;  %6029 = vmatpush.bf16.msrb.mxu1 %v14721_v1  ;;  %v14738_v1 = vld [vmem:[#allocation175_spill] sm:$0xff] }
 0xb94   :  { %5991 = vmatpush.bf16.msra.mxu2 %v14722_v36  ;;  %6004 = vmatpush.bf16.msra.mxu3 %v14723_v48  ;;  %v14730_v48 = vld [vmem:[#allocation166_spill] sm:$0xff]  ;;  %v14737_v36 = vld [vmem:[#allocation197_spill] sm:$0xff] }
 0xb95   :  { %6017 = vmatpush.bf16.msrb.mxu0 %v14724_v41  ;;  %6030 = vmatpush.bf16.msrb.mxu1 %v14725_v7  ;;  %v14731_v41 = vld [vmem:[#allocation167_spill] sm:$0xff]  ;;  %v14732_v7 = vld [vmem:[#allocation194_spill] sm:$0xff] }
 0xb97   :  { %5992 = vmatmul.bf16.vlgmr.msra.gmra.mxu2 %v12157_v18  ;;  %6005 = vmatmul.bf16.vlgmr.msra.gmra.mxu3 %v12159_v20 }
 0xb98   :  { %6036 = vmatpush.bf16.msrb.mxu2 %v14726_v39  ;;  %6049 = vmatpush.bf16.msrb.mxu3 %v14727_v32  ;;  %v14733_v39 = vld [vmem:[#allocation195_spill] sm:$0xff]  ;;  %v14734_v32 = vld [vmem:[#allocation170_spill] sm:$0xff] }
 0xb99   :  { %6062 = vmatpush.bf16.msra.mxu0 %v14728_v14  ;;  %6075 = vmatpush.bf16.msra.mxu1 %v14729_v35  ;;  %v14735_v14 = vld [vmem:[#allocation171_spill] sm:$0xff]  ;;  %v14736_v35 = vld [vmem:[#allocation196_spill] sm:$0xff] }
 0xb9a   :  { %6018 = vmatmul.bf16.vlgmr.msrb.gmra.mxu0 %v12157_v18  ;;  %6031 = vmatmul.bf16.vlgmr.msrb.gmra.mxu1 %v12159_v20 }
 0xb9c   :  { %6037 = vmatpush.bf16.msrb.mxu2 %v14730_v48  ;;  %6050 = vmatpush.bf16.msrb.mxu3 %v14731_v41 }
 0xb9d   :  { %6063 = vmatpush.bf16.msra.mxu0 %v14732_v7  ;;  %6076 = vmatpush.bf16.msra.mxu1 %v14733_v39  ;;  %v14739_v39 = vld [vmem:[#allocation200_spill] sm:$0xff] }
 0xba0   :  { %6038 = vmatpush.bf16.msrb.mxu2 %v14734_v32  ;;  %6051 = vmatpush.bf16.msrb.mxu3 %v14735_v14  ;;  %v14740_v32 = vld [vmem:[#allocation201_spill] sm:$0xff]  ;;  %v14741_v14 = vld [vmem:[#allocation182_spill] sm:$0xff] }
 0xba1   :  { %6064 = vmatpush.bf16.msra.mxu0 %v14736_v35  ;;  %6077 = vmatpush.bf16.msra.mxu1 %v14737_v36  ;;  %v14742_v35 = vld [vmem:[#allocation183_spill] sm:$0xff]  ;;  %v14743_v36 = vld [vmem:[#allocation202_spill] sm:$0xff] }
 0xba4   :  { %6039 = vmatpush.bf16.msrb.mxu2 %v14579_v44  ;;  %6052 = vmatpush.bf16.msrb.mxu3 %v14738_v1  ;;  %v14744_v44 = vld [vmem:[#allocation203_spill] sm:$0xff]  ;;  %v14745_v1 = vld [vmem:[#allocation186_spill] sm:$0xff] }
 0xba5   :  { %6065 = vmatpush.bf16.msra.mxu0 %v14581_v8  ;;  %6078 = vmatpush.bf16.msra.mxu1 %v14582_v27  ;;  %v14746_v8 = vld [vmem:[#allocation187_spill] sm:$0xff]  ;;  %v14747_v27 = vld [vmem:[#allocation204_spill] sm:$0xff] }
 0xba8   :  { %6040 = vmatpush.bf16.msrb.mxu2 %v14583_v15  ;;  %6053 = vmatpush.bf16.msrb.mxu3 %v14584_v10  ;;  %v14748_v15 = vld [vmem:[#allocation205_spill] sm:$0xff]  ;;  %v14749_v10 = vld [vmem:[#allocation190_spill] sm:$0xff] }
 0xba9   :  { %6066 = vmatpush.bf16.msra.mxu0 %v14739_v39  ;;  %6079 = vmatpush.bf16.msra.mxu1 %v14740_v32  ;;  %v14750_v39 = vld [vmem:[#allocation191_spill] sm:$0xff]  ;;  %v14751_v32 = vld [vmem:[#allocation206_spill] sm:$0xff] }
 0xbac   :  { %6041 = vmatpush.bf16.msrb.mxu2 %v14741_v14  ;;  %6054 = vmatpush.bf16.msrb.mxu3 %v14742_v35  ;;  %v14752_v14 = vld [vmem:[#allocation207_spill] sm:$0xff] }
 0xbad   :  { %6067 = vmatpush.bf16.msra.mxu0 %v14743_v36  ;;  %6080 = vmatpush.bf16.msra.mxu1 %v14744_v44 }
 0xbb0   :  { %6042 = vmatpush.bf16.msrb.mxu2 %v14745_v1  ;;  %6055 = vmatpush.bf16.msrb.mxu3 %v14746_v8 }
 0xbb1   :  { %6068 = vmatpush.bf16.msra.mxu0 %v14747_v27  ;;  %6081 = vmatpush.bf16.msra.mxu1 %v14748_v15 }
 0xbb4   :  { %6043 = vmatpush.bf16.msrb.mxu2 %v14749_v10  ;;  %6056 = vmatpush.bf16.msrb.mxu3 %v14750_v39 }
 0xbb5   :  { %6069 = vmatpush.bf16.msra.mxu0 %v14751_v32  ;;  %6082 = vmatpush.bf16.msra.mxu1 %v14752_v14  ;;  %v5811_v14 = vpop.f32.mrf.mxu0 }
 0xbb7   :  { %6044 = vmatmul.bf16.vlgmr.msrb.gmra.mxu2 %v12157_v18  ;;  %6057 = vmatmul.bf16.vlgmr.msrb.gmra.mxu3 %v12159_v20 }
 0xbb8   :  { %6088 = vmatpush.bf16.msra.mxu2 %v14693_v21  ;;  %6101 = vmatpush.bf16.msra.mxu3 %v13485_v28  ;;  %v5824_v21 = vpop.f32.mrf.mxu1 }
 0xbb9   :  { %6114 = vmatpush.bf16.msrb.mxu0 %v14694_v52  ;;  %6127 = vmatpush.bf16.msrb.mxu1 %v9234_v0  ;;  %v12321_v28 = vadd.f32 %v5824_v21, %v5811_v14  ;;  %v5785_v0 = vpop.f32.mrf.mxu2  ;;  %v5755_v52 = vunpack.c.h.bf16 %v12149_v55  ;;  %v5754_v14 = vunpack.c.l.bf16 %v12149_v55 }
 0xbba   :  { %6070 = vmatmul.bf16.vlgmr.msra.gmra.mxu0 %v12157_v18  ;;  %6083 = vmatmul.bf16.vlgmr.msra.gmra.mxu1 %v12159_v20  ;;  %v5798_v18 = vpop.f32.mrf.mxu3 }
 0xbbb   :  { %v12327_v20 = vadd.f32 %v5798_v18, %v5785_v0  ;;  %v14765_v18 = vld [vmem:[#allocation154_spill] sm:$0xff] }
 0xbbc   :  { %6089 = vmatpush.bf16.msra.mxu2 %v14695_v22  ;;  %6102 = vmatpush.bf16.msra.mxu3 %v14696_v13 }
 0xbbd   :  { %6115 = vmatpush.bf16.msrb.mxu0 %v9245_v56  ;;  %6128 = vmatpush.bf16.msrb.mxu1 %v9249_v2  ;;  %v5813_v56 = vpop.f32.mrf.mxu0 }
 0xbbe   :  { %v14767_v56 = vld [vmem:[#allocation158_spill] sm:$0xff] }
 0xbc0   :  { %6090 = vmatpush.bf16.msra.mxu2 %v13488_v30  ;;  %6103 = vmatpush.bf16.msra.mxu3 %v14697_v11  ;;  %v5826_v2 = vpop.f32.mrf.mxu1  ;;  %v5758_v30 = vrot.slane %v5755_v52, 7  ;;  %v14766_v52 = vld [vmem:[#allocation185_spill] sm:$0xff] }
 0xbc1   :  { %6116 = vmatpush.bf16.msrb.mxu0 %v9262_v9  ;;  %6129 = vmatpush.bf16.msrb.mxu1 %v9268_v4  ;;  %v5787_v9 = vpop.f32.mrf.mxu2  ;;  %v14768_v2 = vld [vmem:[#allocation159_spill] sm:$0xff] }
 0xbc2   :  { %v5800_v4 = vpop.f32.mrf.mxu3  ;;  %v14770_v9 = vld [vmem:[#allocation189_spill] sm:$0xff] }
 0xbc3   :  { %v14771_v4 = vld [vmem:[#allocation162_spill] sm:$0xff] }
 0xbc4   :  { %6091 = vmatpush.bf16.msra.mxu2 %v14698_v25  ;;  %6104 = vmatpush.bf16.msra.mxu3 %v13491_v45  ;;  %v5759_v45 = vsel %vm2205_vm0, %v5754_v14, %v5758_v30  ;;  %v14769_v30 = vld [vmem:[#allocation188_spill] sm:$0xff]  ;;  %v14772_v14 = vld [vmem:[#allocation163_spill] sm:$0xff] }
 0xbc5   :  { %6117 = vmatpush.bf16.msrb.mxu0 %v9277_v43  ;;  %6130 = vmatpush.bf16.msrb.mxu1 %v9281_v12  ;;  %v5863_v12 = vpop.f32.mrf.mxu0 }
 0xbc8   :  { %6092 = vmatpush.bf16.msra.mxu2 %v9191_v61  ;;  %6105 = vmatpush.bf16.msra.mxu3 %v14699_v63  ;;  %v5876_v43 = vpop.f32.mrf.mxu1 }
 0xbc9   :  { %6118 = vmatpush.bf16.msrb.mxu0 %v9290_v24  ;;  %6131 = vmatpush.bf16.msrb.mxu1 %v14700_v34  ;;  %v12344_v61 = vadd.f32 %v5876_v43, %v5863_v12  ;;  %v5761_v24 = vsub.f32 %v12143_v3, %v5759_v45  ;;  %v14757_v34 = vld [vmem:[#allocation146_spill] sm:$0xff]  ;;  %v14773_v45 = vld [vmem:[#allocation192_spill] sm:$0xff]  ;;  %v14774_v12 = vld [vmem:[#allocation193_spill] sm:$0xff] }
 0xbca   :  { %v14777_v43 = vld [vmem:[#allocation171_spill] sm:$0xff] }
 0xbcb   :  { %v5763_v22 = vperm.slane %v5761_v24, 0 }
 0xbcc   :  { %6093 = vmatpush.bf16.msra.mxu2 %v9203_v29  ;;  %6106 = vmatpush.bf16.msra.mxu3 %v9206_v58  ;;  %v5837_v29 = vpop.f32.mrf.mxu2  ;;  %v5850_v58 = vpop.f32.mrf.mxu3 }
 0xbcd   :  { %6119 = vmatpush.bf16.msrb.mxu0 %v13345_v31  ;;  %6132 = vmatpush.bf16.msrb.mxu1 %v13346_v53  ;;  %v12351_v55 = vadd.f32 %v5850_v58, %v5837_v29  ;;  %v5764_v31 = vperm.slane %v5761_v24, 1  ;;  %v5865_v53 = vpop.f32.mrf.mxu0  ;;  %v14778_v58 = vld [vmem:[#allocation196_spill] sm:$0xff] }
 0xbd0   :  { %6094 = vmatpush.bf16.msra.mxu2 %v9215_v33  ;;  %6107 = vmatpush.bf16.msra.mxu3 %v9218_v23  ;;  %v5878_v13 = vpop.f32.mrf.mxu1  ;;  %v12359_v23 = vpack.c.bf16 %v5763_v22, %v5763_v22  ;;  %v12361_v33 = vpack.c.bf16 %v5764_v31, %v5764_v31  ;;  %v14779_v22 = vld [vmem:[#allocation197_spill] sm:$0xff] }
 0xbd1   :  { %6120 = vmatpush.bf16.msrb.mxu0 %v13349_v46  ;;  %6133 = vmatpush.bf16.msrb.mxu1 %v13350_v19  ;;  %v14783_v13 = vld [vmem:[#allocation199_spill] sm:$0xff] }
 0xbd4   :  { %6095 = vmatpush.bf16.msra.mxu2 %v9227_v5  ;;  %6108 = vmatpush.bf16.msra.mxu3 %v9230_v51  ;;  %v5839_v51 = vpop.f32.mrf.mxu2  ;;  %v5852_v5 = vpop.f32.mrf.mxu3 }
 0xbd5   :  { %6121 = vmatpush.bf16.msrb.mxu0 %v13351_v16  ;;  %6134 = vmatpush.bf16.msrb.mxu1 %v13691_v42  ;;  %v14753_v16 = vld [vmem:[#allocation169_spill] sm:$0xff]  ;;  %v14754_v42 = vld [vmem:[#allocation144_spill] sm:$0xff] }
 0xbd7   :  { %6096 = vmatmul.bf16.vlgmr.msra.gmra.mxu2 %v12359_v23  ;;  %6109 = vmatmul.bf16.vlgmr.msra.gmra.mxu3 %v12361_v33  ;;  %v5915_v46 = vpop.f32.mrf.mxu0 }
 0xbd8   :  { %6140 = vmatpush.bf16.msrb.mxu2 %v13692_v59  ;;  %6153 = vmatpush.bf16.msrb.mxu3 %v13693_v57  ;;  %v5928_v19 = vpop.f32.mrf.mxu1  ;;  %v14755_v59 = vld [vmem:[#allocation172_spill] sm:$0xff]  ;;  %v14756_v57 = vld [vmem:[#allocation173_spill] sm:$0xff] }
 0xbd9   :  { %6166 = vmatpush.bf16.msra.mxu0 %v13694_v6  ;;  %6179 = vmatpush.bf16.msra.mxu1 %v14701_v54  ;;  %v12377_v6 = vadd.f32 %v5928_v19, %v5915_v46  ;;  %v14758_v54 = vld [vmem:[#allocation147_spill] sm:$0xff]  ;;  %v14784_v19 = vld [vmem:[#allocation178_spill] sm:$0xff] }
 0xbda   :  { %6122 = vmatmul.bf16.vlgmr.msrb.gmra.mxu0 %v12359_v23  ;;  %6135 = vmatmul.bf16.vlgmr.msrb.gmra.mxu1 %v12361_v33 }
 0xbdc   :  { %6141 = vmatpush.bf16.msrb.mxu2 %v14702_v37  ;;  %6154 = vmatpush.bf16.msrb.mxu3 %v14703_v40  ;;  %v5889_v11 = vpop.f32.mrf.mxu2  ;;  %v5902_v25 = vpop.f32.mrf.mxu3 }
 0xbdd   :  { %6167 = vmatpush.bf16.msra.mxu0 %v14704_v50  ;;  %6180 = vmatpush.bf16.msra.mxu1 %v14705_v47  ;;  %v12383_v63 = vadd.f32 %v5902_v25, %v5889_v11  ;;  %v14759_v50 = vld [vmem:[#allocation176_spill] sm:$0xff]  ;;  %v14760_v47 = vld [vmem:[#allocation177_spill] sm:$0xff]  ;;  %v14788_v25 = vld [vmem:[#allocation182_spill] sm:$0xff] }
 0xbde   :  { %v14787_v11 = vld [vmem:[#allocation201_spill] sm:$0xff] }
 0xbdf   :  { %v5917_v37 = vpop.f32.mrf.mxu0 }
 0xbe0   :  { %6142 = vmatpush.bf16.msrb.mxu2 %v14706_v38  ;;  %6155 = vmatpush.bf16.msrb.mxu3 %v14707_v17  ;;  %v5930_v40 = vpop.f32.mrf.mxu1  ;;  %v14761_v38 = vld [vmem:[#allocation150_spill] sm:$0xff]  ;;  %v14762_v17 = vld [vmem:[#allocation151_spill] sm:$0xff] }
 0xbe1   :  { %6168 = vmatpush.bf16.msra.mxu0 %v14708_v60  ;;  %6181 = vmatpush.bf16.msra.mxu1 %v14753_v16  ;;  %v14763_v60 = vld [vmem:[#allocation180_spill] sm:$0xff]  ;;  %v14785_v16 = vld [vmem:[#allocation179_spill] sm:$0xff] }
 0xbe4   :  { %6143 = vmatpush.bf16.msrb.mxu2 %v14710_v49  ;;  %6156 = vmatpush.bf16.msrb.mxu3 %v14754_v42  ;;  %v14764_v49 = vld [vmem:[#allocation181_spill] sm:$0xff]  ;;  %v5891_v21 = vpop.f32.mrf.mxu2  ;;  %v5904_v0 = vpop.f32.mrf.mxu3 }
 0xbe5   :  { %6169 = vmatpush.bf16.msra.mxu0 %v14755_v59  ;;  %6182 = vmatpush.bf16.msra.mxu1 %v14756_v57  ;;  %v14786_v57 = vld [vmem:[#allocation200_spill] sm:$0xff] }
 0xbe8   :  { %6144 = vmatpush.bf16.msrb.mxu2 %v14757_v34  ;;  %6157 = vmatpush.bf16.msrb.mxu3 %v14758_v54 }
 0xbe9   :  { %6170 = vmatpush.bf16.msra.mxu0 %v14759_v50  ;;  %6183 = vmatpush.bf16.msra.mxu1 %v14760_v47 }
 0xbec   :  { %6145 = vmatpush.bf16.msrb.mxu2 %v14761_v38  ;;  %6158 = vmatpush.bf16.msrb.mxu3 %v14762_v17 }
 0xbed   :  { %6171 = vmatpush.bf16.msra.mxu0 %v14763_v60  ;;  %6184 = vmatpush.bf16.msra.mxu1 %v14764_v49 }
 0xbf0   :  { %6146 = vmatpush.bf16.msrb.mxu2 %v14765_v18  ;;  %6159 = vmatpush.bf16.msrb.mxu3 %v14719_v62  ;;  %v14776_v62 = vld [vmem:[#allocation170_spill] sm:$0xff] }
 0xbf1   :  { %6172 = vmatpush.bf16.msra.mxu0 %v14720_v26  ;;  %6185 = vmatpush.bf16.msra.mxu1 %v14766_v52  ;;  %v14775_v26 = vld [vmem:[#allocation195_spill] sm:$0xff] }
 0xbf4   :  { %6147 = vmatpush.bf16.msrb.mxu2 %v14767_v56  ;;  %6160 = vmatpush.bf16.msrb.mxu3 %v14768_v2 }
 0xbf5   :  { %6173 = vmatpush.bf16.msra.mxu0 %v14769_v30  ;;  %6186 = vmatpush.bf16.msra.mxu1 %v14770_v9 }
 0xbf7   :  { %6148 = vmatmul.bf16.vlgmr.msrb.gmra.mxu2 %v12359_v23  ;;  %6161 = vmatmul.bf16.vlgmr.msrb.gmra.mxu3 %v12361_v33  ;;  %v5967_v24 = vpop.f32.mrf.mxu0  ;;  %v5980_v29 = vpop.f32.mrf.mxu1 }
 0xbf8   :  { %6192 = vmatpush.bf16.msra.mxu2 %v14771_v4  ;;  %6205 = vmatpush.bf16.msra.mxu3 %v14772_v14  ;;  %v5968_v31 = vadd.f32 %v5967_v24, %v12321_v28  ;;  %v14790_v4 = vld [vmem:[#allocation148_spill] sm:$0xff] }
 0xbf9   :  { %6218 = vmatpush.bf16.msrb.mxu0 %v14773_v45  ;;  %6231 = vmatpush.bf16.msrb.mxu1 %v14774_v12 }
 0xbfa   :  { %6174 = vmatmul.bf16.vlgmr.msra.gmra.mxu0 %v12359_v23  ;;  %6187 = vmatmul.bf16.vlgmr.msra.gmra.mxu1 %v12361_v33  ;;  %v5981_v53 = vadd.f32 %v5980_v29, %v5968_v31  ;;  %v5941_v51 = vpop.f32.mrf.mxu2  ;;  %v5954_v5 = vpop.f32.mrf.mxu3  ;;  %v5745_v31 = vld [vmem:[#allocation2 + $0x7] ss:$8 sm:$0xf] }
 0xbfb   :  { %v5942_v46 = vadd.f32 %v5941_v51, %v12327_v20 }
 0xbfc   :  { %6193 = vmatpush.bf16.msra.mxu2 %v14730_v48  ;;  %6206 = vmatpush.bf16.msra.mxu3 %v14731_v41  ;;  %v14780_v48 = vld [vmem:[#allocation174_spill] sm:$0xff]  ;;  %v14781_v41 = vld [vmem:[#allocation175_spill] sm:$0xff] }
 0xbfd   :  { %6219 = vmatpush.bf16.msrb.mxu0 %v14732_v7  ;;  %6232 = vmatpush.bf16.msrb.mxu1 %v14775_v26  ;;  %v14782_v7 = vld [vmem:[#allocation198_spill] sm:$0xff]  ;;  %v5955_v42 = vadd.f32 %v5954_v5, %v5942_v46 }
 0xbff   :  { %v5969_v59 = vpop.f32.mrf.mxu0  ;;  %v5982_v28 = vpop.f32.mrf.mxu1 }
 0xc00   :  { %6194 = vmatpush.bf16.msra.mxu2 %v14776_v62  ;;  %6207 = vmatpush.bf16.msra.mxu3 %v14777_v43 }
 0xc01   :  { %6220 = vmatpush.bf16.msrb.mxu0 %v14778_v58  ;;  %6233 = vmatpush.bf16.msrb.mxu1 %v14779_v22  ;;  %v5746_v22 = vld [vmem:[#allocation2 + $0x7] ss:$8 sm:$0x30] }
 0xc02   :  { %v5943_v20 = vpop.f32.mrf.mxu2  ;;  %v5956_v34 = vpop.f32.mrf.mxu3 }
 0xc04   :  { %6195 = vmatpush.bf16.msra.mxu2 %v14780_v48  ;;  %6208 = vmatpush.bf16.msra.mxu3 %v14781_v41  ;;  %v12454_v48 = vor.u32 %v5746_v22, %v5745_v31 }
 0xc05   :  { %6221 = vmatpush.bf16.msrb.mxu0 %v14782_v7  ;;  %6234 = vmatpush.bf16.msrb.mxu1 %v14783_v13 }
 0xc06   :  { %v6315_v22 = vrot.slane %v12454_v48, 4 }
 0xc08   :  { %6196 = vmatpush.bf16.msra.mxu2 %v14784_v19  ;;  %6209 = vmatpush.bf16.msra.mxu3 %v14785_v16 }
 0xc09   :  { %6222 = vmatpush.bf16.msrb.mxu0 %v14786_v57  ;;  %6235 = vmatpush.bf16.msrb.mxu1 %v14787_v11 }
 0xc0c   :  { %6197 = vmatpush.bf16.msra.mxu2 %v14788_v25  ;;  %6210 = vmatpush.bf16.msra.mxu3 %v14742_v35  ;;  %v14789_v35 = vld [vmem:[#allocation207_spill] sm:$0xff] }
 0xc0d   :  { %6223 = vmatpush.bf16.msrb.mxu0 %v14743_v36  ;;  %6236 = vmatpush.bf16.msrb.mxu1 %v14744_v44 }
 0xc10   :  { %6198 = vmatpush.bf16.msra.mxu2 %v14745_v1  ;;  %6211 = vmatpush.bf16.msra.mxu3 %v14746_v8 }
 0xc11   :  { %6224 = vmatpush.bf16.msrb.mxu0 %v14747_v27  ;;  %6237 = vmatpush.bf16.msrb.mxu1 %v14748_v15 }
 0xc14   :  { %6199 = vmatpush.bf16.msra.mxu2 %v14749_v10  ;;  %6212 = vmatpush.bf16.msra.mxu3 %v14750_v39 }
 0xc15   :  { %6225 = vmatpush.bf16.msrb.mxu0 %v14751_v32  ;;  %6238 = vmatpush.bf16.msrb.mxu1 %v14789_v35  ;;  %v14793_v35 = vld [vmem:[#allocation153_spill] sm:$0xff] }
 0xc17   :  { %6200 = vmatmul.bf16.vlgmr.msra.gmra.mxu2 %v12359_v23  ;;  %6213 = vmatmul.bf16.vlgmr.msra.gmra.mxu3 %v12361_v33  ;;  %v6019_v44 = vpop.f32.mrf.mxu0  ;;  %v6032_v8 = vpop.f32.mrf.mxu1 }
 0xc18   :  { %6226 = vmatmul.bf16.vlgmr.msrb.gmra.mxu0 %v12359_v23  ;;  %6239 = vmatmul.bf16.vlgmr.msrb.gmra.mxu1 %v12361_v33  ;;  %v6020_v15 = vadd.f32 %v6019_v44, %v12344_v61 }
 0xc1a   :  { %v6033_v1 = vadd.f32 %v6032_v8, %v6020_v15  ;;  %v5993_v10 = vpop.f32.mrf.mxu2  ;;  %v6006_v36 = vpop.f32.mrf.mxu3  ;;  %v6282_v8 = vrot.slane %v12454_v48, 2 }
 0xc1b   :  { %v5994_v27 = vadd.f32 %v5993_v10, %v12351_v55 }
 0xc1d   :  { %v6007_v39 = vadd.f32 %v6006_v36, %v5994_v27 }
 0xc1f   :  { %v6021_v32 = vpop.f32.mrf.mxu0  ;;  %v6034_v54 = vpop.f32.mrf.mxu1 }
 0xc22   :  { %v5995_v37 = vpop.f32.mrf.mxu2  ;;  %v6008_v40 = vpop.f32.mrf.mxu3 }
 0xc37   :  { %v6071_v50 = vpop.f32.mrf.mxu0  ;;  %v6084_v47 = vpop.f32.mrf.mxu1 }
 0xc38   :  { %v6072_v23 = vadd.f32 %v6071_v50, %v12377_v6 }
 0xc3a   :  { %v12446_v38 = vadd.f32 %v6084_v47, %v6072_v23  ;;  %v6045_v33 = vpop.f32.mrf.mxu2  ;;  %v6058_v17 = vpop.f32.mrf.mxu3 }
 0xc3b   :  { %v6046_v61 = vadd.f32 %v6045_v33, %v12383_v63  ;;  %v14791_v63 = vld [vmem:[#allocation149_spill] sm:$0xff] }
 0xc3d   :  { %v12449_v60 = vadd.f32 %v6058_v17, %v6046_v61 }
 0xc3f   :  { %v6073_v49 = vpop.f32.mrf.mxu0  ;;  %v6086_v21 = vpop.f32.mrf.mxu1 }
 0xc42   :  { %v6047_v55 = vpop.f32.mrf.mxu2  ;;  %v6060_v0 = vpop.f32.mrf.mxu3 }
 0xc57   :  { %v6123_v18 = vpop.f32.mrf.mxu0  ;;  %v6136_v52 = vpop.f32.mrf.mxu1 }
 0xc58   :  { %v6137_v56 = vadd.f32 %v6136_v52, %v6123_v18  ;;  %v14794_v18 = vld [vmem:[#allocation156_spill] sm:$0xff] }
 0xc5a   :  { %v6245_v2 = vadd.f32 %v6137_v56, %v5981_v53  ;;  %v6097_v30 = vpop.f32.mrf.mxu2  ;;  %v6110_v9 = vpop.f32.mrf.mxu3 }
 0xc5b   :  { %v6111_v14 = vadd.f32 %v6110_v9, %v6097_v30 }
 0xc5c   :  { %v6251_v6 = vadd.f32 %v6245_v2, %v14790_v4 }
 0xc5d   :  { %v6244_v45 = vadd.f32 %v6111_v14, %v5955_v42  ;;  %v14792_v42 = vld [vmem:[#allocation152_spill] sm:$0xff] }
 0xc5e   :  { %v6258_v62 = vrot.slane %v6251_v6, 7 }
 0xc5f   :  { %v6125_v12 = vpop.f32.mrf.mxu0  ;;  %v6138_v26 = vpop.f32.mrf.mxu1  ;;  %v6250_v43 = vadd.f32 %v6244_v45, %v14791_v63 }
 0xc60   :  { %v14795_v26 = vld [vmem:[#allocation208_spill] sm:$0xff] }
 0xc61   :  { %v6259_v24 = vsel %vm2205_vm0, %v6250_v43, %v6258_v62 }
 0xc62   :  { %v6099_v29 = vpop.f32.mrf.mxu2  ;;  %v6112_v58 = vpop.f32.mrf.mxu3  ;;  %v6261_v53 = vadd.f32 %v6259_v24, %v12454_v48 }
 0xc64   :  { %v7921_v41 = vmul.f32 -1.442695, %v6261_v53 }
 0xc66   :  { %8492 = vpow2.f32 %v7921_v41 }
 0xc6c   :  { %v8493_v16 = vpop.eup %8492 }
 0xc6d   :  { %v6265_v20 = vadd.f32 1.0, %v8493_v16 }
 0xc6f   :  { %8494 = vrcp.f32 %v6265_v20  ;;  %v6277_v2 = vand.u32 2147483648, %v6265_v20  ;;  %vm6271_vm8 = vweird.f32 %v6265_v20  ;;  %v6275_v9 = vand.u32 2147483647, %v6265_v20 }
 0xc71   :  { %v6278_v63 = vor.u32 1.1754944e-38, %v6277_v2  ;;  %vm6276_vm12 = vcmp.eq.f32.partialorder %v6275_v9, 8.507059e+37 }
 0xc75   :  { %v8495_v32 = vpop.eup %8494 }
 0xc76   :  { %v6267_v54 = vmul.f32 %v8495_v32, %v6265_v20  ;;  %vm6272_vm7 = vweird.f32 %v8495_v32 }
 0xc77   :  { %v6175_v7 = vpop.f32.mrf.mxu0  ;;  %v6188_v13 = vpop.f32.mrf.mxu1  ;;  %vm6273_vm11 = vmor %vm6271_vm8, %vm6272_vm7 }
 0xc78   :  { %v6189_v51 = vadd.f32 %v6188_v13, %v6175_v7  ;;  %v6268_v40 = vsub.f32 1.0, %v6267_v54 }
 0xc7a   :  { %v6247_v5 = vadd.f32 %v6189_v51, %v6033_v1  ;;  %v6149_v46 = vpop.f32.mrf.mxu2  ;;  %v6162_v19 = vpop.f32.mrf.mxu3  ;;  %v6269_v33 = vmul.f32 %v8495_v32, %v6268_v40 }
 0xc7b   :  { %v6163_v28 = vadd.f32 %v6162_v19, %v6149_v46 }
 0xc7c   :  { %v6253_v59 = vadd.f32 %v6247_v5, %v14792_v42  ;;  %v6270_v0 = vadd.f32 %v8495_v32, %v6269_v33 }
 0xc7d   :  { %v6246_v57 = vadd.f32 %v6163_v28, %v6007_v39 }
 0xc7e   :  { %v6286_v34 = vrot.slane %v6253_v59, 7  ;;  %v6274_v12 = vsel %vm6273_vm11, %v8495_v32, %v6270_v0  ;;  %v14804_v32 = vld [vmem:[#allocation121_spill] sm:$0xff] }
 0xc7f   :  { %v6177_v11 = vpop.f32.mrf.mxu0  ;;  %v6190_v25 = vpop.f32.mrf.mxu1  ;;  %v6252_v44 = vadd.f32 %v6246_v57, %v14793_v35  ;;  %v6279_v43 = vsel %vm6276_vm12, %v6278_v63, %v6274_v12  ;;  %v14796_v57 = vld [vmem:[#allocation160_spill] sm:$0xff]  ;;  %v14805_v54 = vperm.slane %v14804_v32, 1 }
 0xc80   :  { %v14797_v25 = vperm.slane %v12143_v3, 1 }
 0xc81   :  { %v6287_v15 = vsel %vm2205_vm0, %v6252_v44, %v6286_v34  ;;  %v14798_v34 = vld [vmem:[#allocation126_spill] sm:$0xff] }
 0xc82   :  { %v6289_v10 = vadd.f32 %v6287_v15, %v6282_v8  ;;  %v6151_v1 = vpop.f32.mrf.mxu2  ;;  %v6164_v36 = vpop.f32.mrf.mxu3  ;;  %v14799_v35 = vperm.slane %v14798_v34, 1  ;;  %v14800_v8 = vld [vmem:[#allocation138_spill] sm:$0xff] }
 0xc83   :  { %v14801_v15 = vperm.slane %v14800_v8, 1  ;;  %v14802_v1 = vld [vmem:[#allocation157_spill] sm:$0xff] }
 0xc84   :  { %v7922_v27 = vmul.f32 -1.442695, %v6289_v10  ;;  %v14803_v36 = vperm.slane %v14802_v1, 1 }
 0xc86   :  { %8496 = vpow2.f32 %v7922_v27 }
 0xc8c   :  { %v8497_v37 = vpop.eup %8496 }
 0xc8d   :  { %v6293_v39 = vadd.f32 1.0, %v8497_v37 }
 0xc8f   :  { %8498 = vrcp.f32 %v6293_v39  ;;  %v6305_v53 = vand.u32 2147483648, %v6293_v39  ;;  %vm6299_vm15 = vweird.f32 %v6293_v39  ;;  %v6303_v41 = vand.u32 2147483647, %v6293_v39 }
 0xc91   :  { %v6306_v51 = vor.u32 1.1754944e-38, %v6305_v53  ;;  %vm6304_vm2 = vcmp.eq.f32.partialorder %v6303_v41, 8.507059e+37 }
 0xc95   :  { %v6227_v50 = vpop.f32.mrf.mxu0  ;;  %v6240_v47 = vpop.f32.mrf.mxu1 }
 0xc96   :  { %v6241_v23 = vadd.f32 %v6240_v47, %v6227_v50  ;;  %v8499_v17 = vpop.eup %8498  ;;  %v14808_v50 = vld [vmem:[#allocation209_spill] sm:$0xff] }
 0xc97   :  { %v6295_v49 = vmul.f32 %v8499_v17, %v6293_v39  ;;  %vm6300_vm13 = vweird.f32 %v8499_v17  ;;  %v14806_v39 = vld [vmem:[#allocation114_spill] sm:$0xff]  ;;  %v14809_v47 = vperm.slane %v14808_v50, 1 }
 0xc98   :  { %v6249_v61 = vadd.f32 %v6241_v23, %v12446_v38  ;;  %vm6301_vm1 = vmor %vm6299_vm15, %vm6300_vm13 }
 0xc99   :  { %v6296_v30 = vsub.f32 1.0, %v6295_v49 }
 0xc9a   :  { %v6201_v21 = vpop.f32.mrf.mxu2  ;;  %v6214_v55 = vpop.f32.mrf.mxu3  ;;  %v6255_v52 = vadd.f32 %v6249_v61, %v14794_v18 }
 0xc9b   :  { %v6215_v56 = vadd.f32 %v6214_v55, %v6201_v21  ;;  %v6297_v45 = vmul.f32 %v8499_v17, %v6296_v30 }
 0xc9c   :  { %v6311_v38 = vrot.slane %v6255_v52, 7 }
 0xc9d   :  { %v6248_v4 = vadd.f32 %v6215_v56, %v12449_v60  ;;  %v6229_v6 = vpop.f32.mrf.mxu0  ;;  %v6242_v14 = vpop.f32.mrf.mxu1  ;;  %v6298_v29 = vadd.f32 %v8499_v17, %v6297_v45 }
 0xc9f   :  { %v6254_v62 = vadd.f32 %v6248_v4, %v14795_v26  ;;  %v6302_v13 = vsel %vm6301_vm1, %v8499_v17, %v6298_v29  ;;  %v8785_v17 = vmov 256.0   ;;  %v6388_v29 = vld [vmem:[#allocation16] sm:$0x3] }
 0xca0   :  { %v6307_v5 = vsel %vm6304_vm2, %v6306_v51, %v6302_v13  ;;  %v6390_v53 = vperm.slane %v6388_v29, 0  ;;  %v6391_v41 = vperm.slane %v6388_v29, 1 }
 0xca1   :  { %v6312_v24 = vsel %vm2205_vm0, %v6254_v62, %v6311_v38  ;;  %v6319_v46 = vsub.f32 1.0, %v6307_v5  ;;  %v6321_v42 = vmul.f32 %v6307_v5, %v12143_v3  ;;  %v14807_v3 = vperm.slane %v14806_v39, 1 }
 0xca2   :  { %v6314_v58 = vmul.f32 %v6312_v24, %v6279_v43  ;;  %v6203_v31 = vpop.f32.mrf.mxu2  ;;  %v6216_v60 = vpop.f32.mrf.mxu3  ;;  %v6380_v43 = vld [vmem:[%s12531_s6] sm:$0x3] }
 0xca3   :  { %v6383_v31 = vperm.slane %v6380_v43, 1 }
 0xca4   :  { %v6317_v7 = vadd.f32 %v6315_v22, %v6314_v58  ;;  %v6382_v22 = vperm.slane %v6380_v43, 0 }
 0xca6   :  { %8500 = vtanh.f32 %v6317_v7 }
 0xca7   :  { %8502 = vrcp.f32 %v8785_v17 }
 0xcac   :  { %v8501_v19 = vpop.eup %8500 }
 0xcad   :  { %v6320_v16 = vmul.f32 %v8501_v19, %v6319_v46  ;;  %v8503_v61 = vpop.eup %8502 }
 0xcae   :  { %v6352_v49 = vmul.f32 256.0, %v8503_v61 }
 0xcaf   :  { %v6322_v59 = vadd.f32 %v6321_v42, %v6320_v16 }
 0xcb0   :  { %v6353_v21 = vsub.f32 1.0, %v6352_v49 }
 0xcb1   :  { %v6324_v48 = vperm.slane %v6322_v59, 0  ;;  %v6339_v28 = vperm.slane %v6322_v59, 1 }
 0xcb2   :  { %v6354_v55 = vmul.f32 %v8503_v61, %v6353_v21 }
 0xcb3   :  { %v6338_v11 = vsel %vm6337_vm3, %v14796_v57, %v6324_v48  ;;  %v6341_v20 = vsel %vm2205_vm0, %v6339_v28, %v14797_v25 }
 0xcb4   :  { %v6342_v44 = vsel %vm6327_vm10, %v6341_v20, %v14799_v35  ;;  %v6355_v0 = vadd.f32 %v8503_v61, %v6354_v55 }
 0xcb5   :  { %v6343_v10 = vsel %vm6329_vm4, %v6342_v44, %v14801_v15  ;;  %vm6356_vm4 = vweird.f32 %v8503_v61 }
 0xcb6   :  { %v6344_v27 = vsel %vm6331_vm14, %v6343_v10, %v14803_v36  ;;  %v6357_v18 = vsel %vm6356_vm4, %v8503_v61, %v6355_v0 }
 0xcb7   :  { %v6345_v37 = vsel %vm6333_vm9, %v6344_v27, %v14805_v54 }
 0xcb8   :  { %v6346_v40 = vsel %vm6335_vm6, %v6345_v37, %v14807_v3 }
 0xcb9   :  { %v6347_v23 = vsel %vm6337_vm3, %v6346_v40, %v14809_v47 }
 0xcba   :  { %v6348_v33 = vadd.f32 %v6347_v23, %v6338_v11 }
 0xcbc   :  { %6349 = vadd.xlane.f32.xlu0 %v6348_v33 }
 0xd2f   :  { %v6350_v52 = vpop.xlane.xlu0 %6349 }
 0xd30   :  { %v6358_v56 = vmul.f32 %v6357_v18, %v6350_v52 }
 0xd32   :  { %v6359_v2 = vsub.f32 %v6338_v11, %v6358_v56  ;;  %v6360_v30 = vsub.f32 %v6347_v23, %v6358_v56 }
 0xd34   :  { %v6361_v9 = vmul.f32 %v6359_v2, %v6359_v2  ;;  %v6362_v4 = vmul.f32 %v6360_v30, %v6360_v30 }
 0xd36   :  { %v6363_v6 = vadd.f32 %v6362_v4, %v6361_v9 }
 0xd38   :  { %6364 = vadd.xlane.f32.xlu0 %v6363_v6 }
 0xdab   :  { %v6365_v14 = vpop.xlane.xlu0 %6364 }
 0xdac   :  { %v6366_v45 = vmul.f32 %v6365_v14, %v6357_v18 }
 0xdae   :  { %v6367_v12 = vadd.f32 1e-05, %v6366_v45 }
 0xdb0   :  { %8504 = vrsqrt.f32 %v6367_v12  ;;  %vm6374_vm9 = vweird.f32 %v6367_v12 }
 0xdb6   :  { %v8505_v38 = vpop.eup %8504 }
 0xdb7   :  { %v6369_v26 = vmul.f32 %v8505_v38, %v6367_v12  ;;  %vm6375_vm14 = vweird.f32 %v8505_v38 }
 0xdb8   :  { %vm6376_vm5 = vmor %vm6374_vm9, %vm6375_vm14 }
 0xdb9   :  { %v6370_v62 = vmul.f32 %v8505_v38, %v6369_v26 }
 0xdbb   :  { %v6371_v63 = vmul.f32 0.5, %v6370_v62 }
 0xdbd   :  { %v6372_v24 = vsub.f32 1.5, %v6371_v63 }
 0xdbf   :  { %v6373_v58 = vmul.f32 %v8505_v38, %v6372_v24 }
 0xdc1   :  { %v6377_v60 = vsel %vm6376_vm5, %v8505_v38, %v6373_v58 }
 0xdc2   :  { %v6378_v7 = vmul.f32 %v6377_v60, %v6359_v2  ;;  %v6379_v13 = vmul.f32 %v6377_v60, %v6360_v30 }
 0xdc4   :  { %v6386_v51 = vmul.f32 %v6382_v22, %v6378_v7  ;;  %v6387_v5 = vmul.f32 %v6383_v31, %v6379_v13 }
 0xdc6   :  { %v12495_v46 = vadd.f32 %v6390_v53, %v6386_v51  ;;  %v12497_v19 = vadd.f32 %v6391_v41, %v6387_v5 }
 0xdc8   :  { %v6396_v16 = vmax.f32 %v12495_v46, 0.0  ;;  %v6397_v42 = vmax.f32 %v12497_v19, 0.0 }
 0xdc9   :  { %8770 = dma.done.wait [#allocation4], 6144 }
 0xdca   :  { %8771 = vsyncadd [#allocation4], 4294961152  ;;  %v8009_v59 = vld [vmem:[#allocation3 + $0xa8] sm:$0xf]  ;;  %v8381_v48 = vld [vmem:[#allocation3 + $0xb0] sm:$0xf0] }
 0xdcb   :  { %v8105_v28 = vld [vmem:[#allocation3 + $0x168] sm:$0xf]  ;;  %v8010_v57 = vor.u32 %v8381_v48, %v8009_v59  ;;  %v8405_v11 = vld [vmem:[#allocation3 + $0x170] sm:$0xf0]  ;;  %v7997_v25 = vld [vmem:[#allocation3 + $0x90] sm:$0xf] }
 0xdcc   :  { %v8378_v20 = vld [vmem:[#allocation3 + $0x98] sm:$0xf0]  ;;  %v8106_v34 = vor.u32 %v8405_v11, %v8105_v28  ;;  %v8093_v35 = vld [vmem:[#allocation3 + $0x150] sm:$0xf]  ;;  %v8380_v8 = vld [vmem:[#allocation3 + $0xac] sm:$0xf] }
 0xdcd   :  { %v8402_v44 = vld [vmem:[#allocation3 + $0x158] sm:$0xf0]  ;;  %6724 = vmatpush.bf16.msrb.mxu2 %v8010_v57  ;;  %v7998_v15 = vor.u32 %v8378_v20, %v7997_v25  ;;  %v8011_v10 = vld [vmem:[#allocation3 + $0xb4] sm:$0xf0]  ;;  %v8404_v1 = vld [vmem:[#allocation3 + $0x16c] sm:$0xf] }
 0xdce   :  { %v8107_v36 = vld [vmem:[#allocation3 + $0x174] sm:$0xf0]  ;;  %6737 = vmatpush.bf16.msrb.mxu3 %v8106_v34  ;;  %v8094_v27 = vor.u32 %v8402_v44, %v8093_v35  ;;  %v8014_v32 = vor.u32 %v8380_v8, %v8011_v10  ;;  %v8375_v39 = vld [vmem:[#allocation3 + $0x80] sm:$0xf0]  ;;  %v8377_v50 = vld [vmem:[#allocation3 + $0x94] sm:$0xf] }
 0xdcf   :  { %v8110_v54 = vor.u32 %v8404_v1, %v8107_v36  ;;  %v7985_v37 = vld [vmem:[#allocation3 + $0x78] sm:$0xf]  ;;  %v8399_v40 = vld [vmem:[#allocation3 + $0x140] sm:$0xf0]  ;;  %v7999_v47 = vld [vmem:[#allocation3 + $0x9c] sm:$0xf0] }
 0xdd0   :  { %v8081_v3 = vld [vmem:[#allocation3 + $0x138] sm:$0xf]  ;;  %6750 = vmatpush.bf16.msra.mxu0 %v8014_v32  ;;  %v8002_v23 = vor.u32 %v8377_v50, %v7999_v47  ;;  %v8401_v33 = vld [vmem:[#allocation3 + $0x154] sm:$0xf]  ;;  %v8095_v17 = vld [vmem:[#allocation3 + $0x15c] sm:$0xf0]  ;;  %v7986_v61 = vor.u32 %v8375_v39, %v7985_v37 }
 0xdd1   :  { %6763 = vmatpush.bf16.msra.mxu1 %v8110_v54  ;;  %6725 = vmatpush.bf16.msrb.mxu2 %v7998_v15  ;;  %v8098_v49 = vor.u32 %v8401_v33, %v8095_v17  ;;  %v7973_v21 = vld [vmem:[#allocation3 + $0x60] sm:$0xf]  ;;  %v8372_v55 = vld [vmem:[#allocation3 + $0x68] sm:$0xf0]  ;;  %v8082_v0 = vor.u32 %v8399_v40, %v8081_v3  ;;  %v8374_v18 = vld [vmem:[#allocation3 + $0x7c] sm:$0xf] }
 0xdd2   :  { %6738 = vmatpush.bf16.msrb.mxu3 %v8094_v27  ;;  %v7987_v52 = vld [vmem:[#allocation3 + $0x84] sm:$0xf0]  ;;  %v8398_v56 = vld [vmem:[#allocation3 + $0x13c] sm:$0xf]  ;;  %v8069_v2 = vld [vmem:[#allocation3 + $0x120] sm:$0xf]  ;;  %v7974_v45 = vor.u32 %v8372_v55, %v7973_v21 }
 0xdd3   :  { %v8396_v30 = vld [vmem:[#allocation3 + $0x128] sm:$0xf0]  ;;  %v8083_v9 = vld [vmem:[#allocation3 + $0x144] sm:$0xf0]  ;;  %v7990_v4 = vor.u32 %v8374_v18, %v7987_v52  ;;  %v8371_v14 = vld [vmem:[#allocation3 + $0x64] sm:$0xf] }
 0xdd4   :  { %6751 = vmatpush.bf16.msra.mxu0 %v8002_v23  ;;  %v8086_v6 = vor.u32 %v8398_v56, %v8083_v9  ;;  %v7975_v12 = vld [vmem:[#allocation3 + $0x6c] sm:$0xf0]  ;;  %v8395_v38 = vld [vmem:[#allocation3 + $0x124] sm:$0xf]  ;;  %v8070_v62 = vor.u32 %v8396_v30, %v8069_v2  ;;  %v7961_v63 = vld [vmem:[#allocation3 + $0x48] sm:$0xf] }
 0xdd5   :  { %6764 = vmatpush.bf16.msra.mxu1 %v8098_v49  ;;  %6726 = vmatpush.bf16.msrb.mxu2 %v7986_v61  ;;  %v8071_v26 = vld [vmem:[#allocation3 + $0x12c] sm:$0xf0]  ;;  %v8369_v43 = vld [vmem:[#allocation3 + $0x50] sm:$0xf0]  ;;  %v8057_v24 = vld [vmem:[#allocation3 + $0x108] sm:$0xf]  ;;  %v7978_v58 = vor.u32 %v8371_v14, %v7975_v12  ;;  %v12504_v12 = vpack.c.bf16 %v6396_v16, %v6396_v16 }
 0xdd6   :  { %6739 = vmatpush.bf16.msrb.mxu3 %v8082_v0  ;;  %v8393_v29 = vld [vmem:[#allocation3 + $0x110] sm:$0xf0]  ;;  %v8074_v22 = vor.u32 %v8395_v38, %v8071_v26  ;;  %v8368_v31 = vld [vmem:[#allocation3 + $0x4c] sm:$0xf]  ;;  %v7962_v60 = vor.u32 %v8369_v43, %v7961_v63  ;;  %v7963_v53 = vld [vmem:[#allocation3 + $0x54] sm:$0xf0]  ;;  %v12509_v63 = vpack.c.bf16 %v6397_v42, %v6397_v42 }
 0xdd7   :  { %v8392_v41 = vld [vmem:[#allocation3 + $0x10c] sm:$0xf]  ;;  %v8059_v7 = vld [vmem:[#allocation3 + $0x114] sm:$0xf0]  ;;  %v8058_v13 = vor.u32 %v8393_v29, %v8057_v24  ;;  %v7949_v51 = vld [vmem:[#allocation3 + $0x30] sm:$0xf]  ;;  %v7966_v28 = vor.u32 %v8368_v31, %v7963_v53 }
 0xdd8   :  { %6752 = vmatpush.bf16.msra.mxu0 %v7990_v4  ;;  %v8366_v5 = vld [vmem:[#allocation3 + $0x38] sm:$0xf0]  ;;  %v8045_v59 = vld [vmem:[#allocation3 + $0xf0] sm:$0xf]  ;;  %v8062_v57 = vor.u32 %v8392_v41, %v8059_v7  ;;  %v8365_v11 = vld [vmem:[#allocation3 + $0x34] sm:$0xf] }
 0xdd9   :  { %6765 = vmatpush.bf16.msra.mxu1 %v8086_v6  ;;  %6727 = vmatpush.bf16.msrb.mxu2 %v7974_v45  ;;  %v8390_v48 = vld [vmem:[#allocation3 + $0xf8] sm:$0xf0]  ;;  %v7950_v25 = vor.u32 %v8366_v5, %v7949_v51  ;;  %v7951_v20 = vld [vmem:[#allocation3 + $0x3c] sm:$0xf0]  ;;  %v8389_v34 = vld [vmem:[#allocation3 + $0xf4] sm:$0xf] }
 0xdda   :  { %6740 = vmatpush.bf16.msrb.mxu3 %v8070_v62  ;;  %v8047_v35 = vld [vmem:[#allocation3 + $0xfc] sm:$0xf0]  ;;  %v8046_v44 = vor.u32 %v8390_v48, %v8045_v59  ;;  %v7937_v8 = vld [vmem:[#allocation3 + $0x18] sm:$0xf]  ;;  %v8363_v15 = vld [vmem:[#allocation3 + $0x20] sm:$0xf0]  ;;  %v7954_v36 = vor.u32 %v8365_v11, %v7951_v20 }
 0xddb   :  { %v8033_v10 = vld [vmem:[#allocation3 + $0xd8] sm:$0xf]  ;;  %v8387_v1 = vld [vmem:[#allocation3 + $0xe0] sm:$0xf0]  ;;  %v8050_v27 = vor.u32 %v8389_v34, %v8047_v35  ;;  %v8362_v32 = vld [vmem:[#allocation3 + $0x1c] sm:$0xf]  ;;  %v7938_v54 = vor.u32 %v8363_v15, %v7937_v8 }
 0xddc   :  { %6753 = vmatpush.bf16.msra.mxu0 %v7978_v58  ;;  %v7939_v37 = vld [vmem:[#allocation3 + $0x24] sm:$0xf0]  ;;  %v8386_v39 = vld [vmem:[#allocation3 + $0xdc] sm:$0xf]  ;;  %v8034_v40 = vor.u32 %v8387_v1, %v8033_v10  ;;  %v7925_v50 = vld [vmem:[#allocation3] sm:$0xf] }
 0xddd   :  { %6766 = vmatpush.bf16.msra.mxu1 %v8074_v22  ;;  %6728 = vmatpush.bf16.msrb.mxu2 %v7962_v60  ;;  %v8035_v3 = vld [vmem:[#allocation3 + $0xe4] sm:$0xf0]  ;;  %v8360_v47 = vld [vmem:[#allocation3 + $0x8] sm:$0xf0]  ;;  %v8021_v23 = vld [vmem:[#allocation3 + $0xc0] sm:$0xf]  ;;  %v7942_v49 = vor.u32 %v8362_v32, %v7939_v37 }
 0xdde   :  { %6741 = vmatpush.bf16.msrb.mxu3 %v8058_v13  ;;  %v8384_v33 = vld [vmem:[#allocation3 + $0xc8] sm:$0xf0]  ;;  %v8017_v17 = vld [vmem:[#allocation3 + $0xb0] sm:$0xf]  ;;  %v8382_v61 = vld [vmem:[#allocation3 + $0xb8] sm:$0xf0]  ;;  %v8038_v21 = vor.u32 %v8386_v39, %v8035_v3  ;;  %v7926_v18 = vor.u32 %v8360_v47, %v7925_v50 }
 0xddf   :  { %v8113_v55 = vld [vmem:[#allocation3 + $0x170] sm:$0xf]  ;;  %v8406_v0 = vld [vmem:[#allocation3 + $0x178] sm:$0xf0]  ;;  %v8359_v52 = vld [vmem:[#allocation3 + $0x4] sm:$0xf]  ;;  %v8022_v2 = vor.u32 %v8384_v33, %v8021_v23  ;;  %v8018_v30 = vor.u32 %v8382_v61, %v8017_v17 }
 0xde0   :  { %6754 = vmatpush.bf16.msra.mxu0 %v7966_v28  ;;  %v7927_v56 = vld [vmem:[#allocation3 + $0xc] sm:$0xf0]  ;;  %v8383_v9 = vld [vmem:[#allocation3 + $0xc4] sm:$0xf]  ;;  %v8114_v6 = vor.u32 %v8406_v0, %v8113_v55  ;;  %v8005_v14 = vld [vmem:[#allocation3 + $0x98] sm:$0xf] }
 0xde1   :  { %6767 = vmatpush.bf16.msra.mxu1 %v8062_v57  ;;  %6729 = vmatpush.bf16.msrb.mxu2 %v7950_v25  ;;  %v8023_v4 = vld [vmem:[#allocation3 + $0xcc] sm:$0xf0]  ;;  %v8379_v45 = vld [vmem:[#allocation3 + $0xa0] sm:$0xf0]  ;;  %v7930_v38 = vor.u32 %v8359_v52, %v7927_v56  ;;  %v8101_v26 = vld [vmem:[#allocation3 + $0x158] sm:$0xf] }
 0xde2   :  { %6742 = vmatpush.bf16.msrb.mxu3 %v8046_v44  ;;  %v8403_v62 = vld [vmem:[#allocation3 + $0x160] sm:$0xf0]  ;;  %v8026_v43 = vor.u32 %v8383_v9, %v8023_v4  ;;  %v8006_v24 = vor.u32 %v8379_v45, %v8005_v14  ;;  %v7993_v58 = vld [vmem:[#allocation3 + $0x80] sm:$0xf]  ;;  %v8376_v46 = vld [vmem:[#allocation3 + $0x88] sm:$0xf0] }
 0xde3   :  { %v8102_v29 = vor.u32 %v8403_v62, %v8101_v26  ;;  %v8089_v16 = vld [vmem:[#allocation3 + $0x140] sm:$0xf]  ;;  %v8400_v22 = vld [vmem:[#allocation3 + $0x148] sm:$0xf0]  ;;  %v7994_v19 = vor.u32 %v8376_v46, %v7993_v58  ;;  %v7981_v31 = vld [vmem:[#allocation3 + $0x68] sm:$0xf] }
 0xde4   :  { %6755 = vmatpush.bf16.msra.mxu0 %v7954_v36  ;;  %v8090_v42 = vor.u32 %v8400_v22, %v8089_v16  ;;  %v8373_v60 = vld [vmem:[#allocation3 + $0x70] sm:$0xf0]  ;;  %v8077_v53 = vld [vmem:[#allocation3 + $0x128] sm:$0xf]  ;;  %v7969_v51 = vld [vmem:[#allocation3 + $0x50] sm:$0xf] }
 0xde5   :  { %6768 = vmatpush.bf16.msra.mxu1 %v8050_v27  ;;  %6730 = vmatpush.bf16.msrb.mxu2 %v7938_v54  ;;  %v8397_v41 = vld [vmem:[#allocation3 + $0x130] sm:$0xf0]  ;;  %v7982_v7 = vor.u32 %v8373_v60, %v7981_v31  ;;  %v8370_v5 = vld [vmem:[#allocation3 + $0x58] sm:$0xf0]  ;;  %v8065_v59 = vld [vmem:[#allocation3 + $0x110] sm:$0xf] }
 0xde6   :  { %6743 = vmatpush.bf16.msrb.mxu3 %v8034_v40  ;;  %v8078_v13 = vor.u32 %v8397_v41, %v8077_v53  ;;  %v8394_v48 = vld [vmem:[#allocation3 + $0x118] sm:$0xf0]  ;;  %v7970_v28 = vor.u32 %v8370_v5, %v7969_v51  ;;  %v7957_v11 = vld [vmem:[#allocation3 + $0x38] sm:$0xf]  ;;  %v8367_v25 = vld [vmem:[#allocation3 + $0x40] sm:$0xf0] }
 0xde7   :  { %v8066_v57 = vor.u32 %v8394_v48, %v8065_v59  ;;  %v8053_v20 = vld [vmem:[#allocation3 + $0xf8] sm:$0xf]  ;;  %v8391_v34 = vld [vmem:[#allocation3 + $0x100] sm:$0xf0]  ;;  %v7958_v35 = vor.u32 %v8367_v25, %v7957_v11  ;;  %v7945_v8 = vld [vmem:[#allocation3 + $0x20] sm:$0xf] }
 0xde8   :  { %6756 = vmatpush.bf16.msra.mxu0 %v7942_v49  ;;  %v8054_v44 = vor.u32 %v8391_v34, %v8053_v20  ;;  %v8364_v15 = vld [vmem:[#allocation3 + $0x28] sm:$0xf0]  ;;  %v8041_v10 = vld [vmem:[#allocation3 + $0xe0] sm:$0xf]  ;;  %v7933_v32 = vld [vmem:[#allocation3 + $0x8] sm:$0xf] }
 0xde9   :  { %6769 = vmatpush.bf16.msra.mxu1 %v8038_v21  ;;  %6731 = vmatpush.bf16.msrb.mxu2 %v7926_v18  ;;  %v8388_v1 = vld [vmem:[#allocation3 + $0xe8] sm:$0xf0]  ;;  %v7946_v36 = vor.u32 %v8364_v15, %v7945_v8  ;;  %v8361_v54 = vld [vmem:[#allocation3 + $0x10] sm:$0xf0]  ;;  %v8029_v37 = vld [vmem:[#allocation3 + $0xc8] sm:$0xf] }
 0xdea   :  { %6744 = vmatpush.bf16.msrb.mxu3 %v8022_v2  ;;  %v8042_v27 = vor.u32 %v8388_v1, %v8041_v10  ;;  %v8385_v39 = vld [vmem:[#allocation3 + $0xd0] sm:$0xf0]  ;;  %v7934_v3 = vor.u32 %v8361_v54, %v7933_v32  ;;  %v6803_v23 = vld [vmem:[#allocation17 + $0x8] sm:$0xff]  ;;  %v8787_v33 = vmov 0.4   ;;  %s6927_s20 = sshll.u32 %s12536_s11, 4  ;;  %s6928_s20 = int_to_ptr.hbm [resolvable:$true] %s6927_s20 }
 0xdeb   :  { %v8030_v40 = vor.u32 %v8385_v39, %v8029_v37  ;;  %8506 = vrcp.f32 %v8787_v33  ;;  %v6802_v55 = vld [vmem:[#allocation17] sm:$0xff] }
 0xdec   :  { %6732 = vmatmul.bf16.vlgmr.msrb.gmra.mxu2 %v12504_v12  ;;  %6757 = vmatpush.bf16.msra.mxu0 %v7930_v38 }
 0xded   :  { %6776 = vmatpush.bf16.msra.mxu2 %v8018_v30  ;;  %6745 = vmatmul.bf16.vlgmr.msrb.gmra.mxu3 %v12509_v63 }
 0xdee   :  { %6789 = vmatpush.bf16.msra.mxu3 %v8114_v6  ;;  %6770 = vmatpush.bf16.msra.mxu1 %v8026_v43  ;;  %v6826_v43 = vld [vmem:[%s12534_s9] sm:$0x7]  ;;  %s8788_s9 = smov [#allocation19]  }
 0xdef   :  { %6758 = vmatmul.bf16.vlgmr.msra.gmra.mxu0 %v12504_v12  ;;  %v6829_v46 = vperm.slane %v6826_v43, 1  ;;  %v6828_v31 = vperm.slane %v6826_v43, 0  ;;  %v6830_v32 = vperm.slane %v6826_v43, 2  ;;  %s6925_s18 = sshll.u32 %s8788_s9, 4  ;;  %s6926_s18 = int_to_ptr.vmem [resolvable:$true] %s6925_s18 }
 0xdf1   :  { %6777 = vmatpush.bf16.msra.mxu2 %v8006_v24  ;;  %6771 = vmatmul.bf16.vlgmr.msra.gmra.mxu1 %v12509_v63  ;;  %v8507_v52 = vpop.eup %8506 }
 0xdf2   :  { %6790 = vmatpush.bf16.msra.mxu3 %v8102_v29  ;;  %v6841_v14 = vmul.f32 0.4, %v8507_v52  ;;  %vm6845_vm6 = vweird.f32 %v8507_v52 }
 0xdf4   :  { %v6842_v24 = vsub.f32 1.0, %v6841_v14 }
 0xdf5   :  { %6778 = vmatpush.bf16.msra.mxu2 %v7994_v19 }
 0xdf6   :  { %6791 = vmatpush.bf16.msra.mxu3 %v8090_v42  ;;  %v6843_v22 = vmul.f32 %v8507_v52, %v6842_v24 }
 0xdf8   :  { %v6844_v60 = vadd.f32 %v8507_v52, %v6843_v22 }
 0xdf9   :  { %6779 = vmatpush.bf16.msra.mxu2 %v7982_v7 }
 0xdfa   :  { %6792 = vmatpush.bf16.msra.mxu3 %v8078_v13  ;;  %v6846_v7 = vsel %vm6845_vm6, %v8507_v52, %v6844_v60 }
 0xdfd   :  { %6780 = vmatpush.bf16.msra.mxu2 %v7970_v28 }
 0xdfe   :  { %6793 = vmatpush.bf16.msra.mxu3 %v8066_v57  ;;  %v6804_v57 = vld [vmem:[#allocation17 + $0x10] sm:$0xff] }
 0xe01   :  { %6781 = vmatpush.bf16.msra.mxu2 %v7958_v35 }
 0xe02   :  { %6794 = vmatpush.bf16.msra.mxu3 %v8054_v44 }
 0xe05   :  { %6782 = vmatpush.bf16.msra.mxu2 %v7946_v36 }
 0xe06   :  { %6795 = vmatpush.bf16.msra.mxu3 %v8042_v27 }
 0xe09   :  { %6783 = vmatpush.bf16.msra.mxu2 %v7934_v3 }
 0xe0a   :  { %6796 = vmatpush.bf16.msra.mxu3 %v8030_v40 }
 0xe0c   :  { %6784 = vmatmul.bf16.vlgmr.msra.gmra.mxu2 %v12504_v12 }
 0xe0d   :  { %6797 = vmatmul.bf16.vlgmr.msra.gmra.mxu3 %v12509_v63 }
 0xe6c   :  { %v6759_v50 = vpop.f32.mrf.mxu0 }
 0xe6e   :  { %v6772_v47 = vpop.f32.mrf.mxu1 }
 0xe6f   :  { %v6773_v17 = vadd.f32 %v6772_v47, %v6759_v50  ;;  %v6733_v61 = vpop.f32.mrf.mxu2 }
 0xe70   :  { %v6746_v21 = vpop.f32.mrf.mxu3 }
 0xe71   :  { %v6806_v49 = vmul.f32 %v6803_v23, %v6773_v17  ;;  %v6747_v0 = vadd.f32 %v6746_v21, %v6733_v61 }
 0xe73   :  { %v6814_v18 = vrot.slane %v6806_v49, 4  ;;  %v6805_v56 = vmul.f32 %v6802_v55, %v6747_v0 }
 0xe74   :  { %v6761_v30 = vpop.f32.mrf.mxu0 }
 0xe75   :  { %v6815_v2 = vadd.f32 %v6814_v18, %v6806_v49  ;;  %v6808_v9 = vrot.slane %v6805_v56, 4 }
 0xe76   :  { %v6774_v4 = vpop.f32.mrf.mxu1 }
 0xe77   :  { %v6816_v6 = vrot.slane %v6815_v2, 2  ;;  %v6809_v45 = vadd.f32 %v6808_v9, %v6805_v56  ;;  %v6735_v12 = vpop.f32.mrf.mxu2 }
 0xe78   :  { %v6748_v26 = vpop.f32.mrf.mxu3 }
 0xe79   :  { %v6817_v38 = vadd.f32 %v6816_v6, %v6815_v2  ;;  %v6810_v62 = vrot.slane %v6809_v45, 2 }
 0xe7b   :  { %v6818_v63 = vrot.slane %v6817_v38, 1  ;;  %v6811_v29 = vadd.f32 %v6810_v62, %v6809_v45 }
 0xe7d   :  { %v6819_v58 = vadd.f32 %v6818_v63, %v6817_v38  ;;  %v6812_v16 = vrot.slane %v6811_v29, 1 }
 0xe7f   :  { %v6835_v19 = vadd.f32 %v6829_v46, %v6819_v58  ;;  %v6813_v42 = vadd.f32 %v6812_v16, %v6811_v29  ;;  %v6915_v16 = vlaneseq }
 0xe81   :  { %v6838_v53 = vadd.f32 3.0, %v6835_v19  ;;  %v6834_v41 = vadd.f32 %v6828_v31, %v6813_v42  ;;  %vm6917_vm5 = vcmp.lt.s32.totalorder %v6915_v16, 384 }
 0xe83   :  { %v6848_v13 = vmul.f32 %v6846_v7, %v6838_v53  ;;  %v6837_v51 = vadd.f32 3.0, %v6834_v41 }
 0xe85   :  { %v8116_v59 = vmul.f32 -1.442695, %v6848_v13  ;;  %v6847_v48 = vmul.f32 %v6846_v7, %v6837_v51 }
 0xe87   :  { %8508 = vpow2.f32 %v8116_v59  ;;  %v8115_v20 = vmul.f32 -1.442695, %v6847_v48 }
 0xe89   :  { %8510 = vpow2.f32 %v8115_v20 }
 0xe8d   :  { %v8509_v10 = vpop.eup %8508 }
 0xe8e   :  { %v6860_v36 = vadd.f32 1.0, %v8509_v10 }
 0xe8f   :  { %v6785_v5 = vpop.f32.mrf.mxu2  ;;  %v8511_v54 = vpop.eup %8510 }
 0xe90   :  { %v6798_v28 = vpop.f32.mrf.mxu3  ;;  %8512 = vrcp.f32 %v6860_v36  ;;  %v6859_v39 = vadd.f32 1.0, %v8511_v54  ;;  %vm6882_vm7 = vweird.f32 %v6860_v36  ;;  %v6886_v52 = vand.u32 2147483647, %v6860_v36 }
 0xe91   :  { %v6799_v11 = vadd.f32 %v6798_v28, %v6785_v5  ;;  %v6888_v56 = vand.u32 2147483648, %v6860_v36 }
 0xe92   :  { %8514 = vrcp.f32 %v6859_v39  ;;  %vm6887_vm12 = vcmp.eq.f32.partialorder %v6886_v52, 8.507059e+37  ;;  %vm6867_vm13 = vweird.f32 %v6859_v39  ;;  %v6873_v12 = vand.u32 2147483648, %v6859_v39 }
 0xe93   :  { %v6807_v25 = vmul.f32 %v6804_v57, %v6799_v11  ;;  %v6889_v4 = vor.u32 1.1754944e-38, %v6888_v56  ;;  %v6871_v26 = vand.u32 2147483647, %v6859_v39 }
 0xe94   :  { %v6874_v58 = vor.u32 1.1754944e-38, %v6873_v12 }
 0xe95   :  { %v6820_v34 = vrot.slane %v6807_v25, 4  ;;  %vm6872_vm4 = vcmp.eq.f32.partialorder %v6871_v26, 8.507059e+37 }
 0xe96   :  { %v8513_v47 = vpop.eup %8512 }
 0xe97   :  { %v6821_v35 = vadd.f32 %v6820_v34, %v6807_v25  ;;  %v6787_v44 = vpop.f32.mrf.mxu2  ;;  %v6878_v33 = vmul.f32 %v8513_v47, %v6860_v36  ;;  %vm6883_vm8 = vweird.f32 %v8513_v47 }
 0xe98   :  { %v6800_v8 = vpop.f32.mrf.mxu3  ;;  %v8515_v17 = vpop.eup %8514  ;;  %vm6884_vm11 = vmor %vm6882_vm7, %vm6883_vm8 }
 0xe99   :  { %v6822_v15 = vrot.slane %v6821_v35, 2  ;;  %v6863_v61 = vmul.f32 %v8515_v17, %v6859_v39  ;;  %v6879_v49 = vsub.f32 1.0, %v6878_v33  ;;  %vm6868_vm15 = vweird.f32 %v8515_v17 }
 0xe9a   :  { %vm6869_vm1 = vmor %vm6867_vm13, %vm6868_vm15 }
 0xe9b   :  { %v6823_v1 = vadd.f32 %v6822_v15, %v6821_v35  ;;  %v6864_v0 = vsub.f32 1.0, %v6863_v61  ;;  %v6880_v18 = vmul.f32 %v8513_v47, %v6879_v49 }
 0xe9d   :  { %v6824_v27 = vrot.slane %v6823_v1, 1  ;;  %v6865_v2 = vmul.f32 %v8515_v17, %v6864_v0  ;;  %v6881_v30 = vadd.f32 %v8513_v47, %v6880_v18 }
 0xe9f   :  { %v6825_v37 = vadd.f32 %v6824_v27, %v6823_v1  ;;  %v6866_v14 = vadd.f32 %v8515_v17, %v6865_v2  ;;  %v6885_v45 = vsel %vm6884_vm11, %v8513_v47, %v6881_v30 }
 0xea0   :  { %v6890_v63 = vsel %vm6887_vm12, %v6889_v4, %v6885_v45 }
 0xea1   :  { %v6836_v3 = vadd.f32 %v6830_v32, %v6825_v37  ;;  %v6870_v29 = vsel %vm6869_vm1, %v8515_v17, %v6866_v14  ;;  %v6910_v19 = vrot.slane %v6890_v63, 7 }
 0xea2   :  { %v6875_v42 = vsel %vm6872_vm4, %v6874_v58, %v6870_v29 }
 0xea3   :  { %v6839_v40 = vadd.f32 3.0, %v6836_v3  ;;  %v6912_v41 = vsel %vm2205_vm0, %v6875_v42, %v6910_v19 }
 0xea5   :  { %v6849_v50 = vmul.f32 %v6846_v7, %v6839_v40 }
 0xea7   :  { %v8117_v23 = vmul.f32 -1.442695, %v6849_v50 }
 0xea9   :  { %8516 = vpow2.f32 %v8117_v23 }
 0xeaf   :  { %v8517_v21 = vpop.eup %8516 }
 0xeb0   :  { %v6861_v55 = vadd.f32 1.0, %v8517_v21 }
 0xeb2   :  { %8518 = vrcp.f32 %v6861_v55  ;;  %v6903_v62 = vand.u32 2147483648, %v6861_v55  ;;  %v6901_v24 = vand.u32 2147483647, %v6861_v55  ;;  %vm6897_vm3 = vweird.f32 %v6861_v55 }
 0xeb4   :  { %v6904_v22 = vor.u32 1.1754944e-38, %v6903_v62  ;;  %vm6902_vm9 = vcmp.eq.f32.partialorder %v6901_v24, 8.507059e+37 }
 0xeb8   :  { %v8519_v9 = vpop.eup %8518 }
 0xeb9   :  { %v6893_v6 = vmul.f32 %v8519_v9, %v6861_v55  ;;  %vm6898_vm2 = vweird.f32 %v8519_v9 }
 0xeba   :  { %vm6899_vm14 = vmor %vm6897_vm3, %vm6898_vm2 }
 0xebb   :  { %v6894_v38 = vsub.f32 1.0, %v6893_v6 }
 0xebd   :  { %v6895_v43 = vmul.f32 %v8519_v9, %v6894_v38 }
 0xebf   :  { %v6896_v46 = vadd.f32 %v8519_v9, %v6895_v43 }
 0xec1   :  { %v6900_v31 = vsel %vm6899_vm14, %v8519_v9, %v6896_v46 }
 0xec2   :  { %v6905_v60 = vsel %vm6902_vm9, %v6904_v22, %v6900_v31 }
 0xec3   :  { %v6911_v53 = vrot.slane %v6905_v60, 6 }
 0xec5   :  { %v6913_v7 = vsel %vm6327_vm10, %v6912_v41, %v6911_v53 }
 0xec6   :  { %6919 = vst.msk [vmem:[#allocation19] sm:$0x7] %vm6917_vm5, %v6913_v7 }
 0xec7   :  { %6930 = dma.vmem_to_hbm [thread:$0]  %s6926_s18, 48, %s6928_s20, [#allocation7]  }
 0xec8   :  { %8772 = dma.done.wait [#allocation7], 48  }
 0xec9   :  { %8773 = vsyncadd [#allocation7], 4294967248 }
 0xeca   :  { %6935 = vsyncpa [#allocation6], 1 }
 0xecb   :  { %6936 = vsyncpa [#allocation9], 1 }
 0xecc   :  { %6937 = vsyncpa [#allocation12], 1 }
 0xecd   :  { %6938 = vsyncpa [#allocation15], 1 }
 0xece   :  { %6939 = vsyncpa [#allocation18], 1 }
 0xecf   :  { %6940 = vsyncpa [#allocation7], 1 }
 0xed0   :  { %6941 = vsyncmov [#allocation4] }
 0xed3   :  { %s6942_s11 = vpop.sfrf %6941 }
 0xed4   :  { %p8118_p0 = scmp.ne.s32.totalorder %s6942_s11, 0 }
 0xed6   :  { %6946 = shalt.err (%p8118_p0)  }

</bundles_post_ra>
